<compile_context>
chip_gen: v7x
topology: tpu7x:2x2x1
jax: 0.10.0
libtpu: 0.0.40
codegen_flags: <defaults>
</compile_context>

<pallas_src>
import jax
import jax.numpy as jnp
from jax.experimental import pallas as pl
from jax.experimental.pallas import tpu as pltpu


def _round_up(x, m):
    return (x + m - 1) // m * m


# ----------------------------------------------------------------------------
# Pallas kernel: fused  upsample -> concat -> conv3x3+ReLU -> conv3x3+ReLU
# ----------------------------------------------------------------------------
def _unet_up_kernel(x1_ref, x2_ref, mup_ref, w1_ref, b1_ref, w2_ref, b2_ref,
                    o_ref, xp1_ref, xp2_ref):
    """One batch element per grid step.

    x1_ref : (1, H, W, C1)        bf16   high-res branch (inputs1)
    x2_ref : (1, H2, W2, C2)      bf16   low-res branch (inputs2), H=2*H2, W=2*W2
    mup_ref: (H*W, H2*W2)         bf16   bilinear (align_corners) resampling matrix
    w1_ref : (9*Cin_p, Cout_p)    bf16   conv1 weights, im2col layout, zero padded
    b1_ref : (1, Cout_p)          f32
    w2_ref : (9*Cout_p, Cout_p)   bf16   conv2 weights
    b2_ref : (1, Cout_p)          f32
    o_ref  : (1, H, W, Cout_p)    f32    lane-dense (Cout padded to 128) output
    xp1_ref: (H+2, W+2, Cin_p)    bf16   VMEM scratch: halo-padded conv1 input
    xp2_ref: (H+2, W+2, Cout_p)   bf16   VMEM scratch: halo-padded conv2 input
    """
    _, H, W, C1 = x1_ref.shape
    _, H2, W2, C2 = x2_ref.shape
    cin_p = xp1_ref.shape[-1]
    cout_p = o_ref.shape[-1]

    # ---- bilinear 2x upsample (align_corners=True) as a single matmul -------
    x2 = x2_ref[0].reshape(H2 * W2, C2)                                 # bf16
    up = jnp.dot(mup_ref[...], x2, preferred_element_type=jnp.float32)  # (H*W, C2)
    up = up.reshape(H, W, C2).astype(jnp.bfloat16)

    # ---- channel concat into a zero-initialised halo-padded VMEM scratch ----
    pieces = [x1_ref[0], up]
    if cin_p > C1 + C2:
        pieces.append(jnp.zeros((H, W, cin_p - C1 - C2), jnp.bfloat16))
    cat = jnp.concatenate(pieces, axis=-1)                              # (H, W, cin_p)
    xp1_ref[...] = jnp.zeros(xp1_ref.shape, xp1_ref.dtype)
    xp1_ref[1:H + 1, 1:W + 1, :] = cat

    def conv3x3_relu(xp_ref, w_ref, b_ref, cin):
        # im2col: 9 shifted full-channel slices -> one deep-K MXU matmul.
        cols = [xp_ref[ky:ky + H, kx:kx + W, :]
                for ky in range(3) for kx in range(3)]
        col = jnp.concatenate(cols, axis=-1).reshape(H * W, 9 * cin)    # bf16
        acc = jnp.dot(col, w_ref[...], preferred_element_type=jnp.float32)
        return jnp.maximum(acc + b_ref[...], 0.0)                       # (H*W, cout_p) f32

    y1 = conv3x3_relu(xp1_ref, w1_ref, b1_ref, cin_p)

    xp2_ref[...] = jnp.zeros(xp2_ref.shape, xp2_ref.dtype)
    xp2_ref[1:H + 1, 1:W + 1, :] = y1.reshape(H, W, cout_p).astype(jnp.bfloat16)

    y2 = conv3x3_relu(xp2_ref, w2_ref, b2_ref, cout_p)
    o_ref[0] = y2.reshape(H, W, cout_p).astype(o_ref.dtype)


# ----------------------------------------------------------------------------
# Host-side helpers
# ----------------------------------------------------------------------------
def _bilinear_matrix(n_in, n_out):
    """Resampling matrix matching nn.UpsamplingBilinear2d (align_corners=True)."""
    if n_in == 1:
        return jnp.ones((n_out, 1), jnp.float32)
    src = jnp.arange(n_out, dtype=jnp.float32) * (n_in - 1) / (n_out - 1)
    lo = jnp.clip(jnp.floor(src).astype(jnp.int32), 0, n_in - 1)
    hi = jnp.clip(lo + 1, 0, n_in - 1)
    frac = src - lo.astype(jnp.float32)
    oh_lo = jax.nn.one_hot(lo, n_in, dtype=jnp.float32)
    oh_hi = jax.nn.one_hot(hi, n_in, dtype=jnp.float32)
    return oh_lo * (1.0 - frac)[:, None] + oh_hi * frac[:, None]


def _pack_conv3x3(w, cin_p, cout_p):
    """PyTorch OIHW (Cout,Cin,3,3) -> im2col matmul matrix (9*cin_p, cout_p), bf16."""
    cout, cin, kh, kw = w.shape
    wt = jnp.transpose(w, (2, 3, 1, 0))                 # (KH, KW, Cin, Cout)
    wt = jnp.pad(wt, ((0, 0), (0, 0), (0, cin_p - cin), (0, cout_p - cout)))
    return wt.reshape(kh * kw * cin_p, cout_p).astype(jnp.bfloat16)


def unet_up(inputs1, inputs2, w1, b1, w2, b2):
    """Fused unetUp forward.  inputs1: (B,H,W,C1) NHWC, inputs2: (B,H/2,W/2,C2)."""
    B, H, W, C1 = inputs1.shape
    B2, H2, W2, C2 = inputs2.shape
    assert B2 == B and H == 2 * H2 and W == 2 * W2
    Cout, Cin_w, _, _ = w1.shape
    assert Cin_w == C1 + C2 and w2.shape == (Cout, Cout, 3, 3)

    cin_p = _round_up(C1 + C2, 128)
    cout_p = _round_up(Cout, 128)

    # Combined (H2*W2 -> H*W) bilinear operator = kron(Mh, Mw).
    mup = jnp.kron(_bilinear_matrix(H2, H), _bilinear_matrix(W2, W)).astype(jnp.bfloat16)

    w1m = _pack_conv3x3(w1, cin_p, cout_p)
    w2m = _pack_conv3x3(w2, cout_p, cout_p)
    b1r = jnp.pad(b1, (0, cout_p - Cout)).reshape(1, cout_p).astype(jnp.float32)
    b2r = jnp.pad(b2, (0, cout_p - Cout)).reshape(1, cout_p).astype(jnp.float32)

    out = pl.pallas_call(
        _unet_up_kernel,
        out_shape=jax.ShapeDtypeStruct((B, H, W, cout_p), jnp.float32),
        grid=(B,),
        in_specs=[
            pl.BlockSpec((1, H, W, C1), lambda b: (b, 0, 0, 0)),
            pl.BlockSpec((1, H2, W2, C2), lambda b: (b, 0, 0, 0)),
            pl.BlockSpec((H * W, H2 * W2), lambda b: (0, 0)),
            pl.BlockSpec((9 * cin_p, cout_p), lambda b: (0, 0)),
            pl.BlockSpec((1, cout_p), lambda b: (0, 0)),
            pl.BlockSpec((9 * cout_p, cout_p), lambda b: (0, 0)),
            pl.BlockSpec((1, cout_p), lambda b: (0, 0)),
        ],
        out_specs=pl.BlockSpec((1, H, W, cout_p), lambda b: (b, 0, 0, 0)),
        scratch_shapes=[
            pltpu.VMEM((H + 2, W + 2, cin_p), jnp.bfloat16),
            pltpu.VMEM((H + 2, W + 2, cout_p), jnp.bfloat16),
        ],
        compiler_params=pltpu.CompilerParams(
            dimension_semantics=("parallel",),
        ),
    )(
        inputs1.astype(jnp.bfloat16),
        inputs2.astype(jnp.bfloat16),
        mup, w1m, b1r, w2m, b2r,
    )
    return out[..., :Cout]


# ----------------------------------------------------------------------------
# Pure-JAX f32 reference (mirrors the PyTorch module, NHWC)
# ----------------------------------------------------------------------------
def unet_up_reference(inputs1, inputs2, w1, b1, w2, b2):
    _, H2, W2, _ = inputs2.shape
    mh = _bilinear_matrix(H2, 2 * H2)
    mw = _bilinear_matrix(W2, 2 * W2)
    up = jnp.einsum("ah,bw,nhwc->nabc", mh, mw, inputs2)
    x = jnp.concatenate([inputs1, up], axis=-1)

    def conv(x, w, b):
        y = jax.lax.conv_general_dilated(
            x, jnp.transpose(w, (2, 3, 1, 0)),      # OIHW -> HWIO
            window_strides=(1, 1), padding="SAME",
            dimension_numbers=("NHWC", "HWIO", "NHWC"))
        return jnp.maximum(y + b, 0.0)

    return conv(conv(x, w1, b1), w2, b2)


# ----------------------------------------------------------------------------
if __name__ == "__main__":
    B, H, W = 2, 16, 16
    C1, C2 = 64, 32                   # in_size = 96
    Cout = 64                         # out_size = 64 (exercises lane padding)

    key = jax.random.PRNGKey(0)
    k1, k2, kw1, kb1, kw2, kb2 = jax.random.split(key, 6)
    inputs1 = jax.random.normal(k1, (B, H, W, C1), jnp.float32)
    inputs2 = jax.random.normal(k2, (B, H // 2, W // 2, C2), jnp.float32)
    w1 = jax.random.normal(kw1, (Cout, C1 + C2, 3, 3), jnp.float32) * 0.05
    b1 = jax.random.normal(kb1, (Cout,), jnp.float32) * 0.05
    w2 = jax.random.normal(kw2, (Cout, Cout, 3, 3), jnp.float32) * 0.05
    b2 = jax.random.normal(kb2, (Cout,), jnp.float32) * 0.05

    out = jax.jit(unet_up)(inputs1, inputs2, w1, b1, w2, b2)
    out = jax.block_until_ready(out)

    assert out.shape == (B, H, W, Cout), out.shape
    assert bool(jnp.all(jnp.isfinite(out)))

    # Loose check vs f32 reference (kernel uses bf16 MXU inputs, f32 accumulate).
    ref = unet_up_reference(inputs1, inputs2, w1, b1, w2, b2)
    max_err = float(jnp.max(jnp.abs(out - ref)))
    scale = max(1.0, float(jnp.max(jnp.abs(ref))))
    assert max_err <= 0.05 * scale, (max_err, scale)

    print("KERNEL_OK")
</pallas_src>

<mosaic_0001>
module attributes {stable_mosaic.version = 11 : i64} {
  func.func @_unet_up_kernel(%arg0: i32, %arg1: memref<1x16x16x64xbf16, #tpu.memory_space<vmem>>, %arg2: memref<1x8x8x32xbf16, #tpu.memory_space<vmem>>, %arg3: memref<256x64xbf16, #tpu.memory_space<vmem>>, %arg4: memref<1152x128xbf16, #tpu.memory_space<vmem>>, %arg5: memref<1x128xf32, #tpu.memory_space<vmem>>, %arg6: memref<1152x128xbf16, #tpu.memory_space<vmem>>, %arg7: memref<1x128xf32, #tpu.memory_space<vmem>>, %arg8: memref<1x16x16x128xf32, #tpu.memory_space<vmem>>, %arg9: memref<18x18x128xbf16, #tpu.memory_space<vmem>>, %arg10: memref<18x18x128xbf16, #tpu.memory_space<vmem>>) attributes {dimension_semantics = [#tpu.dimension_semantics<parallel>], iteration_bounds = array<i64: 2>, scalar_prefetch = 0 : i64, scratch_operands = 2 : i64, tpu.core_type = #tpu.core_type<tc>, window_params = [{transform_indices = @transform_0, window_bounds = array<i64: 1, 16, 16, 64>}, {transform_indices = @transform_1, window_bounds = array<i64: 1, 8, 8, 32>}, {pipeline_mode = #tpu.pipeline_mode<synchronous>, transform_indices = @transform_2, window_bounds = array<i64: 256, 64>}, {pipeline_mode = #tpu.pipeline_mode<synchronous>, transform_indices = @transform_3, window_bounds = array<i64: 1152, 128>}, {pipeline_mode = #tpu.pipeline_mode<synchronous>, transform_indices = @transform_4, window_bounds = array<i64: 1, 128>}, {pipeline_mode = #tpu.pipeline_mode<synchronous>, transform_indices = @transform_5, window_bounds = array<i64: 1152, 128>}, {pipeline_mode = #tpu.pipeline_mode<synchronous>, transform_indices = @transform_6, window_bounds = array<i64: 1, 128>}, {transform_indices = @transform_7, window_bounds = array<i64: 1, 16, 16, 128>}]} {
    %c0 = arith.constant 0 : index
    %c0_0 = arith.constant 0 : index
    %c0_1 = arith.constant 0 : index
    %c0_2 = arith.constant 0 : index
    %0 = vector.load %arg2[%c0, %c0_0, %c0_1, %c0_2] : memref<1x8x8x32xbf16, #tpu.memory_space<vmem>>, vector<1x8x8x32xbf16>
    %1 = vector.shape_cast %0 : vector<1x8x8x32xbf16> to vector<8x8x32xbf16>
    %2 = vector.shape_cast %1 : vector<8x8x32xbf16> to vector<64x32xbf16>
    %c0_3 = arith.constant 0 : index
    %c0_4 = arith.constant 0 : index
    %3 = vector.load %arg3[%c0_3, %c0_4] : memref<256x64xbf16, #tpu.memory_space<vmem>>, vector<256x64xbf16>
    %cst = arith.constant dense<0.000000e+00> : vector<256x32xf32>
    %4 = tpu.matmul %3, %2, %cst {dimension_numbers = #tpu.dot_dimension_numbers<[1], [0], [0], [1], [0, 0, 1, 1], [], []>} : vector<256x64xbf16>, vector<64x32xbf16>, vector<256x32xf32> -> vector<256x32xf32>
    %5 = vector.shape_cast %4 : vector<256x32xf32> to vector<16x16x32xf32>
    %6 = arith.truncf %5 : vector<16x16x32xf32> to vector<16x16x32xbf16>
    %c0_5 = arith.constant 0 : index
    %c0_6 = arith.constant 0 : index
    %c0_7 = arith.constant 0 : index
    %c0_8 = arith.constant 0 : index
    %7 = vector.load %arg1[%c0_5, %c0_6, %c0_7, %c0_8] : memref<1x16x16x64xbf16, #tpu.memory_space<vmem>>, vector<1x16x16x64xbf16>
    %8 = vector.shape_cast %7 : vector<1x16x16x64xbf16> to vector<16x16x64xbf16>
    %cst_9 = arith.constant 0.000000e+00 : bf16
    %9 = vector.broadcast %cst_9 : bf16 to vector<16x16x32xbf16>
    %10 = tpu.concatenate %8, %6, %9 in 2 : vector<16x16x64xbf16>, vector<16x16x32xbf16>, vector<16x16x32xbf16> -> vector<16x16x128xbf16>
    %cst_10 = arith.constant 0.000000e+00 : bf16
    %11 = vector.broadcast %cst_10 : bf16 to vector<18x18x128xbf16>
    %c0_11 = arith.constant 0 : index
    %c0_12 = arith.constant 0 : index
    %c0_13 = arith.constant 0 : index
    %12 = vector.load %arg9[%c0_11, %c0_12, %c0_13] : memref<18x18x128xbf16, #tpu.memory_space<vmem>>, vector<18x18x128xbf16>
    tpu.vector_store %arg9[%c0_11, %c0_12, %c0_13], %11 {strides = array<i32>} : memref<18x18x128xbf16, #tpu.memory_space<vmem>>, vector<18x18x128xbf16>,
    %c1 = arith.constant 1 : index
    %c1_14 = arith.constant 1 : index
    %c0_15 = arith.constant 0 : index
    %13 = vector.load %arg9[%c1, %c1_14, %c0_15] : memref<18x18x128xbf16, #tpu.memory_space<vmem>>, vector<16x16x128xbf16>
    tpu.vector_store %arg9[%c1, %c1_14, %c0_15], %10 {strides = array<i32>} : memref<18x18x128xbf16, #tpu.memory_space<vmem>>, vector<16x16x128xbf16>,
    %c0_16 = arith.constant 0 : index
    %c0_17 = arith.constant 0 : index
    %c0_18 = arith.constant 0 : index
    %14 = vector.load %arg9[%c0_16, %c0_17, %c0_18] : memref<18x18x128xbf16, #tpu.memory_space<vmem>>, vector<16x16x128xbf16>
    %c0_19 = arith.constant 0 : index
    %c1_20 = arith.constant 1 : index
    %c0_21 = arith.constant 0 : index
    %15 = vector.load %arg9[%c0_19, %c1_20, %c0_21] : memref<18x18x128xbf16, #tpu.memory_space<vmem>>, vector<16x16x128xbf16>
    %c0_22 = arith.constant 0 : index
    %c2 = arith.constant 2 : index
    %c0_23 = arith.constant 0 : index
    %16 = vector.load %arg9[%c0_22, %c2, %c0_23] : memref<18x18x128xbf16, #tpu.memory_space<vmem>>, vector<16x16x128xbf16>
    %c1_24 = arith.constant 1 : index
    %c0_25 = arith.constant 0 : index
    %c0_26 = arith.constant 0 : index
    %17 = vector.load %arg9[%c1_24, %c0_25, %c0_26] : memref<18x18x128xbf16, #tpu.memory_space<vmem>>, vector<16x16x128xbf16>
    %c1_27 = arith.constant 1 : index
    %c1_28 = arith.constant 1 : index
    %c0_29 = arith.constant 0 : index
    %18 = vector.load %arg9[%c1_27, %c1_28, %c0_29] : memref<18x18x128xbf16, #tpu.memory_space<vmem>>, vector<16x16x128xbf16>
    %c1_30 = arith.constant 1 : index
    %c2_31 = arith.constant 2 : index
    %c0_32 = arith.constant 0 : index
    %19 = vector.load %arg9[%c1_30, %c2_31, %c0_32] : memref<18x18x128xbf16, #tpu.memory_space<vmem>>, vector<16x16x128xbf16>
    %c2_33 = arith.constant 2 : index
    %c0_34 = arith.constant 0 : index
    %c0_35 = arith.constant 0 : index
    %20 = vector.load %arg9[%c2_33, %c0_34, %c0_35] : memref<18x18x128xbf16, #tpu.memory_space<vmem>>, vector<16x16x128xbf16>
    %c2_36 = arith.constant 2 : index
    %c1_37 = arith.constant 1 : index
    %c0_38 = arith.constant 0 : index
    %21 = vector.load %arg9[%c2_36, %c1_37, %c0_38] : memref<18x18x128xbf16, #tpu.memory_space<vmem>>, vector<16x16x128xbf16>
    %c2_39 = arith.constant 2 : index
    %c2_40 = arith.constant 2 : index
    %c0_41 = arith.constant 0 : index
    %22 = vector.load %arg9[%c2_39, %c2_40, %c0_41] : memref<18x18x128xbf16, #tpu.memory_space<vmem>>, vector<16x16x128xbf16>
    %23 = tpu.concatenate %14, %15, %16, %17, %18, %19, %20, %21, %22 in 2 : vector<16x16x128xbf16>, vector<16x16x128xbf16>, vector<16x16x128xbf16>, vector<16x16x128xbf16>, vector<16x16x128xbf16>, vector<16x16x128xbf16>, vector<16x16x128xbf16>, vector<16x16x128xbf16>, vector<16x16x128xbf16> -> vector<16x16x1152xbf16>
    %24 = vector.shape_cast %23 : vector<16x16x1152xbf16> to vector<256x1152xbf16>
    %c0_42 = arith.constant 0 : index
    %c0_43 = arith.constant 0 : index
    %25 = vector.load %arg4[%c0_42, %c0_43] : memref<1152x128xbf16, #tpu.memory_space<vmem>>, vector<1152x128xbf16>
    %cst_44 = arith.constant dense<0.000000e+00> : vector<256x128xf32>
    %26 = tpu.matmul %24, %25, %cst_44 {dimension_numbers = #tpu.dot_dimension_numbers<[1], [0], [0], [1], [0, 0, 1, 1], [], []>} : vector<256x1152xbf16>, vector<1152x128xbf16>, vector<256x128xf32> -> vector<256x128xf32>
    %c0_45 = arith.constant 0 : index
    %c0_46 = arith.constant 0 : index
    %27 = vector.load %arg5[%c0_45, %c0_46] : memref<1x128xf32, #tpu.memory_space<vmem>>, vector<1x128xf32>
    %28 = vector.broadcast %27 : vector<1x128xf32> to vector<256x128xf32>
    %29 = arith.addf %26, %28 : vector<256x128xf32>
    %cst_47 = arith.constant 0.000000e+00 : f32
    %30 = vector.broadcast %cst_47 : f32 to vector<256x128xf32>
    %31 = arith.maximumf %29, %30 : vector<256x128xf32>
    %cst_48 = arith.constant 0.000000e+00 : bf16
    %32 = vector.broadcast %cst_48 : bf16 to vector<18x18x128xbf16>
    %c0_49 = arith.constant 0 : index
    %c0_50 = arith.constant 0 : index
    %c0_51 = arith.constant 0 : index
    %33 = vector.load %arg10[%c0_49, %c0_50, %c0_51] : memref<18x18x128xbf16, #tpu.memory_space<vmem>>, vector<18x18x128xbf16>
    tpu.vector_store %arg10[%c0_49, %c0_50, %c0_51], %32 {strides = array<i32>} : memref<18x18x128xbf16, #tpu.memory_space<vmem>>, vector<18x18x128xbf16>,
    %34 = vector.shape_cast %31 : vector<256x128xf32> to vector<16x16x128xf32>
    %35 = arith.truncf %34 : vector<16x16x128xf32> to vector<16x16x128xbf16>
    %c1_52 = arith.constant 1 : index
    %c1_53 = arith.constant 1 : index
    %c0_54 = arith.constant 0 : index
    %36 = vector.load %arg10[%c1_52, %c1_53, %c0_54] : memref<18x18x128xbf16, #tpu.memory_space<vmem>>, vector<16x16x128xbf16>
    tpu.vector_store %arg10[%c1_52, %c1_53, %c0_54], %35 {strides = array<i32>} : memref<18x18x128xbf16, #tpu.memory_space<vmem>>, vector<16x16x128xbf16>,
    %c0_55 = arith.constant 0 : index
    %c0_56 = arith.constant 0 : index
    %c0_57 = arith.constant 0 : index
    %37 = vector.load %arg10[%c0_55, %c0_56, %c0_57] : memref<18x18x128xbf16, #tpu.memory_space<vmem>>, vector<16x16x128xbf16>
    %c0_58 = arith.constant 0 : index
    %c1_59 = arith.constant 1 : index
    %c0_60 = arith.constant 0 : index
    %38 = vector.load %arg10[%c0_58, %c1_59, %c0_60] : memref<18x18x128xbf16, #tpu.memory_space<vmem>>, vector<16x16x128xbf16>
    %c0_61 = arith.constant 0 : index
    %c2_62 = arith.constant 2 : index
    %c0_63 = arith.constant 0 : index
    %39 = vector.load %arg10[%c0_61, %c2_62, %c0_63] : memref<18x18x128xbf16, #tpu.memory_space<vmem>>, vector<16x16x128xbf16>
    %c1_64 = arith.constant 1 : index
    %c0_65 = arith.constant 0 : index
    %c0_66 = arith.constant 0 : index
    %40 = vector.load %arg10[%c1_64, %c0_65, %c0_66] : memref<18x18x128xbf16, #tpu.memory_space<vmem>>, vector<16x16x128xbf16>
    %c1_67 = arith.constant 1 : index
    %c1_68 = arith.constant 1 : index
    %c0_69 = arith.constant 0 : index
    %41 = vector.load %arg10[%c1_67, %c1_68, %c0_69] : memref<18x18x128xbf16, #tpu.memory_space<vmem>>, vector<16x16x128xbf16>
    %c1_70 = arith.constant 1 : index
    %c2_71 = arith.constant 2 : index
    %c0_72 = arith.constant 0 : index
    %42 = vector.load %arg10[%c1_70, %c2_71, %c0_72] : memref<18x18x128xbf16, #tpu.memory_space<vmem>>, vector<16x16x128xbf16>
    %c2_73 = arith.constant 2 : index
    %c0_74 = arith.constant 0 : index
    %c0_75 = arith.constant 0 : index
    %43 = vector.load %arg10[%c2_73, %c0_74, %c0_75] : memref<18x18x128xbf16, #tpu.memory_space<vmem>>, vector<16x16x128xbf16>
    %c2_76 = arith.constant 2 : index
    %c1_77 = arith.constant 1 : index
    %c0_78 = arith.constant 0 : index
    %44 = vector.load %arg10[%c2_76, %c1_77, %c0_78] : memref<18x18x128xbf16, #tpu.memory_space<vmem>>, vector<16x16x128xbf16>
    %c2_79 = arith.constant 2 : index
    %c2_80 = arith.constant 2 : index
    %c0_81 = arith.constant 0 : index
    %45 = vector.load %arg10[%c2_79, %c2_80, %c0_81] : memref<18x18x128xbf16, #tpu.memory_space<vmem>>, vector<16x16x128xbf16>
    %46 = tpu.concatenate %37, %38, %39, %40, %41, %42, %43, %44, %45 in 2 : vector<16x16x128xbf16>, vector<16x16x128xbf16>, vector<16x16x128xbf16>, vector<16x16x128xbf16>, vector<16x16x128xbf16>, vector<16x16x128xbf16>, vector<16x16x128xbf16>, vector<16x16x128xbf16>, vector<16x16x128xbf16> -> vector<16x16x1152xbf16>
    %47 = vector.shape_cast %46 : vector<16x16x1152xbf16> to vector<256x1152xbf16>
    %c0_82 = arith.constant 0 : index
    %c0_83 = arith.constant 0 : index
    %48 = vector.load %arg6[%c0_82, %c0_83] : memref<1152x128xbf16, #tpu.memory_space<vmem>>, vector<1152x128xbf16>
    %cst_84 = arith.constant dense<0.000000e+00> : vector<256x128xf32>
    %49 = tpu.matmul %47, %48, %cst_84 {dimension_numbers = #tpu.dot_dimension_numbers<[1], [0], [0], [1], [0, 0, 1, 1], [], []>} : vector<256x1152xbf16>, vector<1152x128xbf16>, vector<256x128xf32> -> vector<256x128xf32>
    %c0_85 = arith.constant 0 : index
    %c0_86 = arith.constant 0 : index
    %50 = vector.load %arg7[%c0_85, %c0_86] : memref<1x128xf32, #tpu.memory_space<vmem>>, vector<1x128xf32>
    %51 = vector.broadcast %50 : vector<1x128xf32> to vector<256x128xf32>
    %52 = arith.addf %49, %51 : vector<256x128xf32>
    %cst_87 = arith.constant 0.000000e+00 : f32
    %53 = vector.broadcast %cst_87 : f32 to vector<256x128xf32>
    %54 = arith.maximumf %52, %53 : vector<256x128xf32>
    %55 = vector.shape_cast %54 : vector<256x128xf32> to vector<16x16x128xf32>
    %c0_88 = arith.constant 0 : index
    %c0_89 = arith.constant 0 : index
    %c0_90 = arith.constant 0 : index
    %c0_91 = arith.constant 0 : index
    %56 = vector.load %arg8[%c0_88, %c0_89, %c0_90, %c0_91] : memref<1x16x16x128xf32, #tpu.memory_space<vmem>>, vector<1x16x16x128xf32>
    %57 = vector.shape_cast %56 : vector<1x16x16x128xf32> to vector<16x16x128xf32>
    %58 = vector.shape_cast %55 : vector<16x16x128xf32> to vector<1x16x16x128xf32>
    tpu.vector_store %arg8[%c0_88, %c0_89, %c0_90, %c0_91], %58 {strides = array<i32>} : memref<1x16x16x128xf32, #tpu.memory_space<vmem>>, vector<1x16x16x128xf32>,
    return
  }
  func.func @transform_0(%arg0: i32) -> (i32, i32, i32, i32) {
    %c0_i32 = arith.constant 0 : i32
    %c0_i32_0 = arith.constant 0 : i32
    %c0_i32_1 = arith.constant 0 : i32
    %c0_i32_2 = arith.constant 0 : i32
    return %arg0, %c0_i32, %c0_i32_0, %c0_i32_1 : i32, i32, i32, i32
  }
  func.func @transform_1(%arg0: i32) -> (i32, i32, i32, i32) {
    %c0_i32 = arith.constant 0 : i32
    %c0_i32_0 = arith.constant 0 : i32
    %c0_i32_1 = arith.constant 0 : i32
    %c0_i32_2 = arith.constant 0 : i32
    return %arg0, %c0_i32, %c0_i32_0, %c0_i32_1 : i32, i32, i32, i32
  }
  func.func @transform_2(%arg0: i32) -> (i32, i32) {
    %c0_i32 = arith.constant 0 : i32
    %c0_i32_0 = arith.constant 0 : i32
    %c0_i32_1 = arith.constant 0 : i32
    return %c0_i32, %c0_i32_0 : i32, i32
  }
  func.func @transform_3(%arg0: i32) -> (i32, i32) {
    %c0_i32 = arith.constant 0 : i32
    %c0_i32_0 = arith.constant 0 : i32
    %c0_i32_1 = arith.constant 0 : i32
    return %c0_i32, %c0_i32_0 : i32, i32
  }
  func.func @transform_4(%arg0: i32) -> (i32, i32) {
    %c0_i32 = arith.constant 0 : i32
    %c0_i32_0 = arith.constant 0 : i32
    %c0_i32_1 = arith.constant 0 : i32
    return %c0_i32, %c0_i32_0 : i32, i32
  }
  func.func @transform_5(%arg0: i32) -> (i32, i32) {
    %c0_i32 = arith.constant 0 : i32
    %c0_i32_0 = arith.constant 0 : i32
    %c0_i32_1 = arith.constant 0 : i32
    return %c0_i32, %c0_i32_0 : i32, i32
  }
  func.func @transform_6(%arg0: i32) -> (i32, i32) {
    %c0_i32 = arith.constant 0 : i32
    %c0_i32_0 = arith.constant 0 : i32
    %c0_i32_1 = arith.constant 0 : i32
    return %c0_i32, %c0_i32_0 : i32, i32
  }
  func.func @transform_7(%arg0: i32) -> (i32, i32, i32, i32) {
    %c0_i32 = arith.constant 0 : i32
    %c0_i32_0 = arith.constant 0 : i32
    %c0_i32_1 = arith.constant 0 : i32
    %c0_i32_2 = arith.constant 0 : i32
    return %arg0, %c0_i32, %c0_i32_0, %c0_i32_1 : i32, i32, i32, i32
  }
}

</mosaic_0001>

<bundles_post_ra>
// kernel: unet_up.1
= control target key start
LH: loop header
LB: loop body
LE: loop exit
PB: predicated region body
PF: predicated region fallthrough
CT: control target
= control target key end

     0   :  { %12 = vsyncpa [#allocation5], 0  ;;  %s13494_s0 = inlined_call_operand.vmem [shape: bf16[2,16,16,64], index: 0, kind: input, shape index: {}]   ;;  %s13495_s1 = inlined_call_operand.vmem [shape: bf16[2,8,8,32], index: 1, kind: input, shape index: {}]   ;;  %s13496_s2 = inlined_call_operand.vmem [shape: bf16[256,64], index: 2, kind: input, shape index: {}]   ;;  %s13497_s3 = inlined_call_operand.vmem [shape: bf16[1152,128], index: 3, kind: input, shape index: {}]   ;;  %s13498_s4 = inlined_call_operand.vmem [shape: f32[1,128], index: 4, kind: input, shape index: {}]   ;;  %s13499_s5 = inlined_call_operand.vmem [shape: bf16[1152,128], index: 5, kind: input, shape index: {}]   ;;  %s13500_s6 = inlined_call_operand.vmem [shape: f32[1,128], index: 6, kind: input, shape index: {}]   ;;  %s13501_s7 = inlined_call_operand.hbm [shape: f32[2,16,16,128], index: 7, kind: output, shape index: {}]  }
   0x1   :  { %14 = vsyncpa [#allocation5 + $0x1], 0  ;;  %s10547_s24 = smov 0   ;;  %s10549_s25 = smov 0  }
   0x2   :  { %s10551_s26 = smov 0   ;;  %s10553_s27 = smov 0  }
   0x3 LB: > { %s10568_s28 = sadd.s32 4294967295, %s10500_s27   ;;  %s8184_s29 = sadd.s32 4294967294, %s10500_s27   ;;  %s10500_s27 = sphi %s10553_s27, %s13549_s27   ;;  %s10496_s26 = sphi %s10551_s26, %s13548_s26   ;;  %s10492_s25 = sphi %s10549_s25, %s13547_s25   ;;  %s10488_s24 = sphi %s10547_s24, %s13546_s24  }
   0x4   : > { %s10572_s30 = sadd.s32 1, %s10500_s27   ;;  %s184_s8 = sadd.s32 1, %s10496_s26 }
   0x5   : > { %s181_s9 = ssub.s32 %s10500_s27, %s10572_s30  ;;  %p194_p0 = scmp.ne.s32.totalorder %s10496_s26, %s10492_s25 }
   0x6   : > { %p182_p1 = scmp.eq.s32.totalorder %s181_s9, 0  ;;  %p195_p2 = scmp.eq.s32.totalorder %s10568_s28, 1 }
   0x7   : > { %p200_p3 = scmp.ne.s32.totalorder %s10492_s25, %s10488_s24  ;;  %p201_p4 = scmp.eq.s32.totalorder %s8184_s29, 1 }
   0x8   : > { %s10583_s10 = scalar_select %p182_p1, %s10496_s26, %s184_s8  }
   0x9   : > { %p10585_p5 = por %p195_p2, %p194_p0  ;;  %p10589_p6 = por %p201_p4, %p200_p3 }
   0xa   : > { %p8187_p7 = scmp.ge.s32.totalorder %s10500_s27, 1  ;;  %p250_p8 = scmp.lt.s32.totalorder %s10500_s27, 3 }
   0xc   : > { %p251_p9 = pnand %p8187_p7, %p250_p8 }
   0xe   : > { %254 = sbr.rel (%p251_p9) target bundleno = 1480 (0x5c8), region = 48 }
  0x15   : > { %p287_p10 = scmp.lt.s32.totalorder %s10568_s28, 1  ;;  %v9938_v0 = vld [vmem:[%s13496_s2] sm:$0xff]   ;;  %vm442_vm0 = vcmask 523264   ;;  %v9939_v6 = vld [vmem:[%s13496_s2 + $0x8] sm:$0xff]   ;;  %v9940_v7 = vld [vmem:[%s13496_s2 + $0x10] sm:$0xff]   ;;  %v10502_v28 = vmov 0  }
  0x16   : > { %9755 = vmatprep.mubr.msk.bf16.mxu0 %vm442_vm0, %v9938_v0  ;;  %v9946_v4 = vld [vmem:[%s13496_s2 + $0x40] sm:$0xff]   ;;  %v9947_v8 = vld [vmem:[%s13496_s2 + $0x48] sm:$0xff]   ;;  %v9948_v9 = vld [vmem:[%s13496_s2 + $0x50] sm:$0xff]   ;;  %897 = vst [vmem:[#allocation2 + $0xc] sm:$0xf] %v10502_v28  ;;  %s10503_s9 = smov 64  }
  0x17   : > { %s10600_s15 = scalar_select %p287_p10, %s10568_s28, 1  ;;  %9771 = vmatprep.mubr.msk.bf16.mxu1 %vm442_vm0, %v9946_v4  ;;  %v9941_v10 = vld [vmem:[%s13496_s2 + $0x18] sm:$0xff]   ;;  %v9942_v12 = vld [vmem:[%s13496_s2 + $0x20] sm:$0xff]   ;;  %v9943_v14 = vld [vmem:[%s13496_s2 + $0x28] sm:$0xff]   ;;  %898 = vst [vmem:[#allocation2 + $0x10] sm:$0xf] %v10502_v28 }
  0x18   : > { %v9949_v11 = vld [vmem:[%s13496_s2 + $0x58] sm:$0xff]   ;;  %v9950_v13 = vld [vmem:[%s13496_s2 + $0x60] sm:$0xff]   ;;  %v9951_v15 = vld [vmem:[%s13496_s2 + $0x68] sm:$0xff]   ;;  %899 = vst [vmem:[#allocation2 + $0x14] sm:$0x1] %v10502_v28  ;;  %vm2063_vm2 = vcmask 1046528  }
  0x19   : > { %s8749_s16 = sshll.u32 %s10600_s15, 5  ;;  %s8748_s14 = sshll.u32 %s10600_s15, 7  ;;  %v9944_v16 = vld [vmem:[%s13496_s2 + $0x30] sm:$0xff]   ;;  %v9945_v18 = vld [vmem:[%s13496_s2 + $0x38] sm:$0xff]   ;;  %v9954_v20 = vld [vmem:[%s13497_s3 + $0x40] sm:$0xff]   ;;  %vm876_vm3 = vcmask 785408  }
  0x1a   : > { %s296_s19 = scalar_lea.vmem %s13495_s1, %s8749_s16  ;;  %s10643_s13 = scalar_lea.vmem %s13494_s0, %s8748_s14  ;;  %v9952_v17 = vld [vmem:[%s13496_s2 + $0x70] sm:$0xff]   ;;  %v9953_v19 = vld [vmem:[%s13496_s2 + $0x78] sm:$0xff]   ;;  %v9955_v21 = vld [vmem:[%s13497_s3] sm:$0xff]   ;;  %894 = vst [vmem:[#allocation2] sm:$0xf] %v10502_v28  ;;  %vm1352_vm6 = vcmask 1043456  }
  0x1b   : > { %v9934_v1 = vld [vmem:[%s296_s19] sm:$0xff]   ;;  %v9935_v2 = vld [vmem:[%s296_s19 + $0x8] sm:$0xff]   ;;  %v9936_v3 = vld [vmem:[%s296_s19 + $0x10] sm:$0xff]   ;;  %895 = vst [vmem:[#allocation2 + $0x4] sm:$0xf] %v10502_v28  ;;  %vm1359_vm8 = vcmask 1040384  }
  0x1c   : > { %9747 = vmatprep.subr.bf16.mxu0 %v9934_v1  ;;  %9883 = vmatprep.subr.bf16.mxu1 %v9934_v1  ;;  %v9937_v5 = vld [vmem:[%s296_s19 + $0x18] sm:$0xff]   ;;  %v9956_v22 = vld [vmem:[%s13497_s3 + $0x48] sm:$0xff]   ;;  %v9957_v23 = vld [vmem:[%s13497_s3 + $0xc0] sm:$0xff]   ;;  %896 = vst [vmem:[#allocation2 + $0x8] sm:$0x1] %v10502_v28  ;;  %s284_s29 = sand.u32 1, %s10492_s25  }
  0x1d   : > { %9748 = vmatpush3.bf16.msra.mxu0 %v9934_v1  ;;  %9887 = vmatpush3.bf16.msra.mxu1 %v9934_v1  ;;  %v10688_v24 = vld [vmem:[%s13497_s3 + $0x8] sm:$0xff]   ;;  %v10693_v25 = vld [vmem:[%s13497_s3 + $0x80] sm:$0xff]   ;;  %v10698_v26 = vld [vmem:[%s13497_s3 + $0x50] sm:$0xff]   ;;  %900 = vst [vmem:[#allocation2 + $0x18] sm:$0xf] %v10502_v28  ;;  %s8188_s8 = sshll.u32 %s284_s29, 8 }
  0x1e   : > { %9749 = vmatprep.subr.bf16.mxu0 %v9935_v2  ;;  %9884 = vmatprep.subr.bf16.mxu1 %v9935_v2  ;;  %v10703_v27 = vld [vmem:[%s13497_s3 + $0xc8] sm:$0xff]   ;;  %901 = vst [vmem:[#allocation2 + $0x1c] sm:$0xf] %v10502_v28  ;;  %902 = vst [vmem:[#allocation2 + $0x20] sm:$0x1] %v10502_v28  ;;  %v9962_v30 = vld [vmem:[%s13497_s3 + $0x10] sm:$0xff]  }
  0x1f   : > { %903 = vst [vmem:[#allocation2 + $0x24] sm:$0xf] %v10502_v28  ;;  %904 = vst [vmem:[#allocation2 + $0x28] sm:$0xf] %v10502_v28  ;;  %v9963_v29 = vld [vmem:[%s13497_s3 + $0x88] sm:$0xff]   ;;  %v9965_v31 = vld [vmem:[%s13497_s3 + $0xd0] sm:$0xff]  }
  0x20   : > { %905 = vst [vmem:[#allocation2 + $0x2c] sm:$0x1] %v10502_v28  ;;  %906 = vst [vmem:[#allocation2 + $0x30] sm:$0xf] %v10502_v28  ;;  %v9964_v32 = vld [vmem:[%s13497_s3 + $0x58] sm:$0xff]   ;;  %v9967_v33 = vld [vmem:[%s13497_s3 + $0x90] sm:$0xff]  }
  0x21   : > { %9750 = vmatpush3.bf16.msra.mxu0 %v9935_v2  ;;  %9888 = vmatpush3.bf16.msra.mxu1 %v9935_v2  ;;  %907 = vst [vmem:[#allocation2 + $0x34] sm:$0xf] %v10502_v28  ;;  %908 = vst [vmem:[#allocation2 + $0x38] sm:$0x1] %v10502_v28  ;;  %v9966_v34 = vld [vmem:[%s13497_s3 + $0x18] sm:$0xff]   ;;  %v9969_v35 = vld [vmem:[%s13497_s3 + $0x60] sm:$0xff]  }
  0x22   : > { %9751 = vmatprep.subr.bf16.mxu0 %v9936_v3  ;;  %9885 = vmatprep.subr.bf16.mxu1 %v9936_v3  ;;  %909 = vst [vmem:[#allocation2 + $0x3c] sm:$0xf] %v10502_v28  ;;  %910 = vst [vmem:[#allocation2 + $0x40] sm:$0xf] %v10502_v28  ;;  %v9970_v36 = vld [vmem:[%s13497_s3 + $0xd8] sm:$0xff]   ;;  %v9971_v37 = vld [vmem:[%s13497_s3 + $0x20] sm:$0xff]  }
  0x23   : > { %911 = vst [vmem:[#allocation2 + $0x44] sm:$0x1] %v10502_v28  ;;  %912 = vst [vmem:[#allocation2 + $0x48] sm:$0xf] %v10502_v28  ;;  %v9972_v38 = vld [vmem:[%s13497_s3 + $0x98] sm:$0xff]   ;;  %v9974_v39 = vld [vmem:[%s13497_s3 + $0x68] sm:$0xff]  }
  0x24   : > { %913 = vst [vmem:[#allocation2 + $0x4c] sm:$0xf] %v10502_v28  ;;  %914 = vst [vmem:[#allocation2 + $0x50] sm:$0x1] %v10502_v28  ;;  %v9975_v40 = vld [vmem:[%s13497_s3 + $0xe0] sm:$0xff]   ;;  %v9976_v41 = vld [vmem:[%s13497_s3 + $0x28] sm:$0xff]  }
  0x25   : > { %9752 = vmatpush3.bf16.msra.mxu0 %v9936_v3  ;;  %9889 = vmatpush3.bf16.msra.mxu1 %v9936_v3  ;;  %915 = vst [vmem:[#allocation2 + $0x54] sm:$0xf] %v10502_v28  ;;  %916 = vst [vmem:[#allocation2 + $0x58] sm:$0xf] %v10502_v28  ;;  %v9977_v42 = vld [vmem:[%s13497_s3 + $0xa0] sm:$0xff]   ;;  %v9979_v49 = vld [vmem:[%s13497_s3 + $0x70] sm:$0xff]  }
  0x26   : > { %9753 = vmatprep.subr.bf16.mxu0 %v9937_v5  ;;  %9886 = vmatprep.subr.bf16.mxu1 %v9937_v5  ;;  %917 = vst [vmem:[#allocation2 + $0x5c] sm:$0x1] %v10502_v28  ;;  %918 = vst [vmem:[#allocation2 + $0x60] sm:$0xf] %v10502_v28  ;;  %v9980_v50 = vld [vmem:[%s13497_s3 + $0xe8] sm:$0xff]   ;;  %v9981_v55 = vld [vmem:[%s13497_s3 + $0x30] sm:$0xff]  }
  0x27   : > { %919 = vst [vmem:[#allocation2 + $0x64] sm:$0xf] %v10502_v28  ;;  %920 = vst [vmem:[#allocation2 + $0x68] sm:$0x1] %v10502_v28  ;;  %v9982_v56 = vld [vmem:[%s13497_s3 + $0xa8] sm:$0xff]   ;;  %v9984_v1 = vld [vmem:[%s13497_s3 + $0x78] sm:$0xff]  }
  0x28   : > { %921 = vst [vmem:[#allocation2 + $0x6c] sm:$0xf] %v10502_v28  ;;  %922 = vst [vmem:[#allocation2 + $0x70] sm:$0xf] %v10502_v28  ;;  %v1469_v57 = vld [vmem:[#allocation2] sm:$0xf] }
  0x29   : > { %9754 = vmatpush3.bf16.msra.mxu0 %v9937_v5  ;;  %9890 = vmatpush3.bf16.msra.mxu1 %v9937_v5  ;;  %923 = vst [vmem:[#allocation2 + $0x74] sm:$0x1] %v10502_v28  ;;  %924 = vst [vmem:[#allocation2 + $0x78] sm:$0xf] %v10502_v28  ;;  %v1470_v60 = vld [vmem:[#allocation2 + $0x4] sm:$0xf] }
  0x2a   : > { %8803 = vmatprep.subr.bf16.mxu1 %v9954_v20  ;;  %8915 = vmatprep.subr.bf16.mxu0 %v9957_v23  ;;  %925 = vst [vmem:[#allocation2 + $0x7c] sm:$0xf] %v10502_v28  ;;  %926 = vst [vmem:[#allocation2 + $0x80] sm:$0x1] %v10502_v28  ;;  %v8277_v61 = vcombine.low %v1469_v57, %v1470_v60  ;;  %v9985_v2 = vld [vmem:[%s13497_s3 + $0xf0] sm:$0xff]   ;;  %v9991_v23 = vld [vmem:[%s13497_s3 + $0xb8] sm:$0xff]  }
  0x2b   : > { %927 = vst [vmem:[#allocation2 + $0x84] sm:$0xf] %v10502_v28  ;;  %928 = vst [vmem:[#allocation2 + $0x88] sm:$0xf] %v10502_v28  ;;  %vm1806_vm1 = vsmask.f32 7424 }
  0x2c   : > { %9756 = vmatmul.mubr.msk.bf16.vlgmr.msra.gmra.mrb[0].mxu0 %vm442_vm0, %v9939_v6  ;;  %9772 = vmatmul.mubr.msk.bf16.vlgmr.msra.gmra.mrb[0].mxu1 %vm442_vm0, %v9947_v8  ;;  %929 = vst [vmem:[#allocation2 + $0x8c] sm:$0x1] %v10502_v28  ;;  %930 = vst [vmem:[#allocation2 + $0x90] sm:$0xf] %v10502_v28  ;;  %v1808_v3 = vshrl.u32 %v8277_v61, 16  ;;  %v1810_v4 = vshll.u32 %v8277_v61, 16 }
  0x2d   : > { %9759 = vmatprep.mubr.msk.bf16.mxu0 %vm442_vm0, %v9940_v7  ;;  %9775 = vmatprep.mubr.msk.bf16.mxu1 %vm442_vm0, %v9948_v9  ;;  %931 = vst [vmem:[#allocation2 + $0x94] sm:$0xf] %v10502_v28  ;;  %932 = vst [vmem:[#allocation2 + $0x98] sm:$0x1] %v10502_v28  ;;  %v9986_v9 = vld [vmem:[%s13497_s3 + $0x38] sm:$0xff]   ;;  %s13380_s16 = scalar_lea.vmem [#allocation4], %s8188_s8 }
  0x2e   : > { %8804 = vmatpush3.bf16.msra.mxu1 %v9955_v21  ;;  %933 = vst [vmem:[#allocation2 + $0x9c] sm:$0xf] %v10502_v28  ;;  %934 = vst [vmem:[#allocation2 + $0xa0] sm:$0xf] %v10502_v28  ;;  %8916 = vmatpush3.bf16.msra.mxu0 %v10693_v25  ;;  %v9990_v21 = vld [vmem:[%s13497_s3 + $0xf8] sm:$0xff]   ;;  %s8782_s17 = sshll.u32 %s10568_s28, 12 }
  0x2f   : > { %8805 = vmatprep.subr.bf16.mxu1 %v9956_v22  ;;  %935 = vst [vmem:[#allocation2 + $0xa4] sm:$0x1] %v10502_v28  ;;  %936 = vst [vmem:[#allocation2 + $0xa8] sm:$0xf] %v10502_v28  ;;  %8917 = vmatprep.subr.bf16.mxu0 %v10703_v27  ;;  %v1517_v22 = vld [vmem:[#allocation2] sm:$0xe] }
  0x30   : > { %937 = vst [vmem:[#allocation2 + $0xac] sm:$0xf] %v10502_v28  ;;  %938 = vst [vmem:[#allocation2 + $0xb0] sm:$0x1] %v10502_v28  ;;  %vm1028_vm4 = vsmask.f32 256 }
  0x31   : > { %939 = vst [vmem:[#allocation2 + $0xb4] sm:$0xf] %v10502_v28  ;;  %940 = vst [vmem:[#allocation2 + $0xb8] sm:$0xf] %v10502_v28  ;;  %vm1029_vm5 = vsmask.f32 4368 }
  0x32   : > { %941 = vst [vmem:[#allocation2 + $0xbc] sm:$0x1] %v10502_v28  ;;  %942 = vst [vmem:[#allocation2 + $0xc0] sm:$0xf] %v10502_v28  ;;  %8806 = vmatpush3.bf16.msra.mxu1 %v10688_v24  ;;  %8918 = vmatpush3.bf16.msra.mxu0 %v9963_v29  ;;  %v8309_v24 = vcombine.low %v1517_v22, %v1470_v60  ;;  %vm1353_vm7 = vsmask.f32 7938 }
  0x33   : > { %943 = vst [vmem:[#allocation2 + $0xc4] sm:$0xf] %v10502_v28  ;;  %944 = vst [vmem:[#allocation2 + $0xc8] sm:$0x1] %v10502_v28  ;;  %8807 = vmatprep.subr.bf16.mxu1 %v10698_v26  ;;  %8919 = vmatprep.subr.bf16.mxu0 %v9965_v31  ;;  %v9978_v22 = vld [vmem:[%s10643_s13 + $0x10] sm:$0xff]   ;;  %s13453_s28 = scalar_lea.sflag [#allocation5], %s284_s29 }
  0x34   : > { %9760 = vmatmul.mubr.msk.bf16.gmra.mrb[4].mxu0 %vm442_vm0, %v9941_v10  ;;  %9776 = vmatmul.mubr.msk.bf16.gmra.mrb[4].mxu1 %vm442_vm0, %v9949_v11  ;;  %945 = vst [vmem:[#allocation2 + $0xcc] sm:$0xf] %v10502_v28  ;;  %946 = vst [vmem:[#allocation2 + $0xd0] sm:$0xf] %v10502_v28  ;;  %v9987_v10 = vld [vmem:[%s13497_s3 + $0xb0] sm:$0xff]   ;;  %v1812_v11 = vrot.slane %v1810_v4, 1 }
  0x35   : > { %9763 = vmatprep.mubr.msk.bf16.mxu0 %vm442_vm0, %v9942_v12  ;;  %9779 = vmatprep.mubr.msk.bf16.mxu1 %vm442_vm0, %v9950_v13  ;;  %947 = vst [vmem:[#allocation2 + $0xd4] sm:$0x1] %v10502_v28  ;;  %4476 = vst [vmem:[#allocation3] sm:$0xf] %v10502_v28  ;;  %v2064_v26 = vrot.slane %v8309_v24, 1  ;;  %v13520_v24 = vmov 0 }
  0x36   : > { %4477 = vst [vmem:[#allocation3 + $0x4] sm:$0xf] %v10502_v28  ;;  %4478 = vst [vmem:[#allocation3 + $0x8] sm:$0x1] %v10502_v28  ;;  %8808 = vmatpush3.bf16.msra.mxu1 %v9962_v30  ;;  %8920 = vmatpush3.bf16.msra.mxu0 %v9967_v33  ;;  %s10504_s15 = smov [#allocation4]  }
  0x37   : > { %4479 = vst [vmem:[#allocation3 + $0xc] sm:$0xf] %v10502_v28  ;;  %4480 = vst [vmem:[#allocation3 + $0x10] sm:$0xf] %v10502_v28  ;;  %8809 = vmatprep.subr.bf16.mxu1 %v9964_v32  ;;  %8921 = vmatprep.subr.bf16.mxu0 %v9970_v36  ;;  %s10442_s14 = sshll.u32 %s10504_s15, 4  ;;  %s10443_s14 = int_to_ptr.vmem [resolvable:$false] %s10442_s14 }
  0x38   : > { %4481 = vst [vmem:[#allocation3 + $0x14] sm:$0x1] %v10502_v28  ;;  %4482 = vst [vmem:[#allocation3 + $0x18] sm:$0xf] %v10502_v28  ;;  %s10444_s21 = scalar_lea.vmem %s10443_s14, 8192 }
  0x39   : > { %4483 = vst [vmem:[#allocation3 + $0x1c] sm:$0xf] %v10502_v28  ;;  %4484 = vst [vmem:[#allocation3 + $0x20] sm:$0x1] %v10502_v28 }
  0x3a   : > { %4485 = vst [vmem:[#allocation3 + $0x24] sm:$0xf] %v10502_v28  ;;  %4486 = vst [vmem:[#allocation3 + $0x28] sm:$0xf] %v10502_v28  ;;  %8810 = vmatpush3.bf16.msra.mxu1 %v9966_v34  ;;  %8922 = vmatpush3.bf16.msra.mxu0 %v9972_v38 }
  0x3b   : > { %4487 = vst [vmem:[#allocation3 + $0x2c] sm:$0x1] %v10502_v28  ;;  %4488 = vst [vmem:[#allocation3 + $0x30] sm:$0xf] %v10502_v28  ;;  %8811 = vmatprep.subr.bf16.mxu1 %v9969_v35  ;;  %8923 = vmatprep.subr.bf16.mxu0 %v9975_v40  ;;  %v9995_v40 = vld [vmem:[%s13497_s3 + $0x100] sm:$0xff]  }
  0x3c   : > { %9764 = vmatmul.mubr.msk.bf16.gmra.mrb[8].mxu0 %vm442_vm0, %v9943_v14  ;;  %9780 = vmatmul.mubr.msk.bf16.gmra.mrb[8].mxu1 %vm442_vm0, %v9951_v15  ;;  %4489 = vst [vmem:[#allocation3 + $0x34] sm:$0xf] %v10502_v28  ;;  %4490 = vst [vmem:[#allocation3 + $0x38] sm:$0x1] %v10502_v28 }
  0x3d   : > { %9767 = vmatprep.mubr.msk.bf16.mxu0 %vm442_vm0, %v9944_v16  ;;  %9783 = vmatprep.mubr.msk.bf16.mxu1 %vm442_vm0, %v9952_v17  ;;  %4491 = vst [vmem:[#allocation3 + $0x3c] sm:$0xf] %v10502_v28  ;;  %4492 = vst [vmem:[#allocation3 + $0x40] sm:$0xf] %v10502_v28 }
  0x3e   : > { %4493 = vst [vmem:[#allocation3 + $0x44] sm:$0x1] %v10502_v28  ;;  %4494 = vst [vmem:[#allocation3 + $0x48] sm:$0xf] %v10502_v28  ;;  %8812 = vmatpush3.bf16.msra.mxu1 %v9971_v37  ;;  %8924 = vmatpush3.bf16.msra.mxu0 %v9977_v42 }
  0x3f   : > { %4495 = vst [vmem:[#allocation3 + $0x4c] sm:$0xf] %v10502_v28  ;;  %4496 = vst [vmem:[#allocation3 + $0x50] sm:$0x1] %v10502_v28  ;;  %8813 = vmatprep.subr.bf16.mxu1 %v9974_v39  ;;  %8925 = vmatprep.subr.bf16.mxu0 %v9980_v50  ;;  %v9992_v39 = vld [vmem:[%s13497_s3 + $0x140] sm:$0xff]  }
  0x40   : > { %4497 = vst [vmem:[#allocation3 + $0x54] sm:$0xf] %v10502_v28  ;;  %4498 = vst [vmem:[#allocation3 + $0x58] sm:$0xf] %v10502_v28 }
  0x41   : > { %4499 = vst [vmem:[#allocation3 + $0x5c] sm:$0x1] %v10502_v28  ;;  %4500 = vst [vmem:[#allocation3 + $0x60] sm:$0xf] %v10502_v28 }
  0x42   : > { %4501 = vst [vmem:[#allocation3 + $0x64] sm:$0xf] %v10502_v28  ;;  %4502 = vst [vmem:[#allocation3 + $0x68] sm:$0x1] %v10502_v28  ;;  %8814 = vmatpush3.bf16.msra.mxu1 %v9976_v41  ;;  %8926 = vmatpush3.bf16.msra.mxu0 %v9982_v56 }
  0x43   : > { %4503 = vst [vmem:[#allocation3 + $0x6c] sm:$0xf] %v10502_v28  ;;  %4504 = vst [vmem:[#allocation3 + $0x70] sm:$0xf] %v10502_v28  ;;  %8815 = vmatprep.subr.bf16.mxu1 %v9979_v49  ;;  %8927 = vmatprep.subr.bf16.mxu0 %v9985_v2  ;;  %v9968_v2 = vld [vmem:[%s10643_s13] sm:$0xff]  }
  0x44   : > { %9768 = vmatmul.mubr.msk.bf16.gmra.mrb[12].mxu0 %vm442_vm0, %v9945_v18  ;;  %9784 = vmatmul.mubr.msk.bf16.gmra.mrb[12].mxu1 %vm442_vm0, %v9953_v19  ;;  %4505 = vst [vmem:[#allocation3 + $0x74] sm:$0x1] %v10502_v28  ;;  %4506 = vst [vmem:[#allocation3 + $0x78] sm:$0xf] %v10502_v28  ;;  %v1813_v19 = vor.u32 %v1812_v11, %v1808_v3 }
  0x45   : > { %4507 = vst [vmem:[#allocation3 + $0x7c] sm:$0xf] %v10502_v28  ;;  %4508 = vst [vmem:[#allocation3 + $0x80] sm:$0x1] %v10502_v28 }
  0x46   : > { %4509 = vst [vmem:[#allocation3 + $0x84] sm:$0xf] %v10502_v28  ;;  %4510 = vst [vmem:[#allocation3 + $0x88] sm:$0xf] %v10502_v28  ;;  %8816 = vmatpush3.bf16.msra.mxu1 %v9981_v55  ;;  %8928 = vmatpush3.bf16.msra.mxu0 %v9987_v10 }
  0x47   : > { %4511 = vst [vmem:[#allocation3 + $0x8c] sm:$0x1] %v10502_v28  ;;  %4512 = vst [vmem:[#allocation3 + $0x90] sm:$0xf] %v10502_v28  ;;  %8817 = vmatprep.subr.bf16.mxu1 %v9984_v1  ;;  %8929 = vmatprep.subr.bf16.mxu0 %v9990_v21  ;;  %v10078_v1 = vld [vmem:[%s13497_s3 + $0x170] sm:$0xff]  }
  0x48   : > { %4513 = vst [vmem:[#allocation3 + $0x94] sm:$0xf] %v10502_v28  ;;  %4514 = vst [vmem:[#allocation3 + $0x98] sm:$0x1] %v10502_v28 }
  0x49   : > { %4515 = vst [vmem:[#allocation3 + $0x9c] sm:$0xf] %v10502_v28  ;;  %4516 = vst [vmem:[#allocation3 + $0xa0] sm:$0xf] %v10502_v28 }
  0x4a   : > { %4517 = vst [vmem:[#allocation3 + $0xa4] sm:$0x1] %v10502_v28  ;;  %4518 = vst [vmem:[#allocation3 + $0xa8] sm:$0xf] %v10502_v28  ;;  %8818 = vmatpush3.bf16.msra.mxu1 %v9986_v9  ;;  %8930 = vmatpush3.bf16.msra.mxu0 %v9991_v23  ;;  %v1355_v23 = vld [vmem:[#allocation2 + $0xc] sm:$0xf] }
  0x4b   : > { %4519 = vst [vmem:[#allocation3 + $0xac] sm:$0xf] %v10502_v28  ;;  %4520 = vst [vmem:[#allocation3 + $0xb0] sm:$0x1] %v10502_v28  ;;  %9027 = vmatprep.subr.bf16.mxu1 %v9992_v39 }
  0x4c   : > { %4521 = vst [vmem:[#allocation3 + $0xb4] sm:$0xf] %v10502_v28  ;;  %4522 = vst [vmem:[#allocation3 + $0xb8] sm:$0xf] %v10502_v28 }
  0x4d   : > { %4523 = vst [vmem:[#allocation3 + $0xbc] sm:$0x1] %v10502_v28  ;;  %4524 = vst [vmem:[#allocation3 + $0xc0] sm:$0xf] %v10502_v28 }
  0x4e   : > { %4525 = vst [vmem:[#allocation3 + $0xc4] sm:$0xf] %v10502_v28  ;;  %4526 = vst [vmem:[#allocation3 + $0xc8] sm:$0x1] %v10502_v28 }
  0x4f   : > { %4527 = vst [vmem:[#allocation3 + $0xcc] sm:$0xf] %v10502_v28  ;;  %4528 = vst [vmem:[#allocation3 + $0xd0] sm:$0xf] %v10502_v28 }
  0x50   : > { %4529 = vst [vmem:[#allocation3 + $0xd4] sm:$0x1] %v10502_v28  ;;  %v9989_v62 = vld [vmem:[#allocation2 + $0x8] ss:$0 sps:$4 sm:$0x11]   ;;  %vm10986_vm9 = vmor %vm1028_vm4, %vm1029_vm5 }
  0x51   : > { %v1815_v12 = vshll.u32 %v9989_v62, 16  ;;  %v2065_v27 = vrot.slane %v9989_v62, 1  ;;  %v10051_v62 = vld [vmem:[%s13497_s3 + $0x120] sm:$0xff]   ;;  %vm10991_vm10 = vmand %vm1352_vm6, %vm1353_vm7 }
  0x52   : > { %vm10998_vm11 = vmand %vm1359_vm8, %vm1028_vm4 }
  0x53   : > { %v1817_v20 = vrot.slane %v1815_v12, 1  ;;  %v10915_v32 = vsel %vm2063_vm2, %v2064_v26, %v2065_v27  ;;  %v13521_v24 = vsel %vm10998_vm11, 4294967295, %v13520_v24 }
  0x54   : > { %13522 = vst [vmem:[#allocation7_spill] sm:$0xff] %v13521_v24 }
  0x55   : > { %v1818_v25 = vsel %vm1806_vm1, %v1813_v19, %v1817_v20 }
  0x56   : > { %3671 = vmatprep.mubr.bf16.mxu1 %v1818_v25  ;;  %v1361_v25 = vld [vmem:[#allocation2 + $0x14] sm:$0x1] }
  0x57   : > { %3672 = vmatmul.mubr.bf16.vlgmr.msra.gmra.mrb[16].mxu1 %v8277_v61  ;;  %v10008_v61 = vld [vmem:[%s13497_s3 + $0x148] sm:$0xff]  }
  0x58   : > { %9028 = vmatpush3.bf16.msra.mxu1 %v9995_v40 }
  0x59   : > { %9029 = vmatprep.subr.bf16.mxu1 %v10008_v61 }
  0xff   : > { %v9757_v43 = vpop.f32.mrb[0].mxu0  ;;  %v10859_v44 = vpop.f32.mrb[0].mxu1 }
 0x100   : > { %v525_v45 = vpop.f32.mrb[1].mxu0  ;;  %v10861_v46 = vpop.f32.mrb[1].mxu1 }
 0x101   : > { %v9758_v47 = vpop.f32.mrb[2].mxu0  ;;  %v10863_v48 = vpop.f32.mrb[2].mxu1 }
 0x102   : > { %v653_v51 = vpack.c.bf16 %v9758_v47, %v9757_v43  ;;  %v528_v52 = vpop.f32.mrb[3].mxu0  ;;  %v661_v53 = vpack.c.bf16 %v10863_v48, %v10859_v44  ;;  %v10873_v54 = vpop.f32.mrb[3].mxu1  ;;  %v10009_v44 = vld [vmem:[%s13497_s3 + $0x108] sm:$0xff]   ;;  %v10023_v48 = vld [vmem:[%s13497_s3 + $0x110] sm:$0xff]  }
 0x103   : > { %v652_v58 = vpack.c.bf16 %v528_v52, %v525_v45  ;;  %v660_v59 = vpack.c.bf16 %v10873_v54, %v10861_v46  ;;  %9030 = vmatpush3.bf16.msra.mxu1 %v10009_v44  ;;  %v10022_v46 = vld [vmem:[%s13497_s3 + $0x150] sm:$0xff]   ;;  %v10037_v54 = vld [vmem:[%s13497_s3 + $0x118] sm:$0xff]  }
 0x104   : > { %9031 = vmatprep.subr.bf16.mxu1 %v10022_v46  ;;  %v9997_v46 = vld [vmem:[%s10643_s13 + $0x28] sm:$0xff]  }
 0x105   : > { %796 = vrot.lane.b32.xlu0 %v652_v58, %s10503_s9 }
 0x107   : > { %v9761_v63 = vpop.f32.mrb[4].mxu0  ;;  %v10884_v0 = vpop.f32.mrb[4].mxu1  ;;  %9032 = vmatpush3.bf16.msra.mxu1 %v10023_v48 }
 0x108   : > { %v541_v5 = vpop.f32.mrb[5].mxu0  ;;  %v10892_v6 = vpop.f32.mrb[5].mxu1 }
 0x109   : > { %798 = vrot.lane.b32.xlu0 %v653_v51, %s10503_s9  ;;  %v9762_v7 = vpop.f32.mrb[6].mxu0  ;;  %v10895_v8 = vpop.f32.mrb[6].mxu1 }
 0x10a   : > { %v655_v13 = vpack.c.bf16 %v9762_v7, %v9761_v63  ;;  %v544_v14 = vpop.f32.mrb[7].mxu0  ;;  %v663_v15 = vpack.c.bf16 %v10895_v8, %v10884_v0  ;;  %v608_v16 = vpop.f32.mrb[7].mxu1  ;;  %v10064_v63 = vld [vmem:[%s13497_s3 + $0x168] sm:$0xff]   ;;  %v10083_v8 = vld [vmem:[%s13497_s3 + $0x1c0] sm:$0xff]  }
 0x10b   : > { %v654_v17 = vpack.c.bf16 %v544_v14, %v541_v5  ;;  %v662_v18 = vpack.c.bf16 %v608_v16, %v10892_v6  ;;  %v10065_v0 = vld [vmem:[%s13497_s3 + $0x128] sm:$0xff]   ;;  %v10079_v5 = vld [vmem:[%s13497_s3 + $0x130] sm:$0xff]   ;;  %9139 = vmatprep.subr.bf16.mxu0 %v10083_v8  ;;  %v1371_v8 = vld [vmem:[#allocation2 + $0x24] sm:$0xf] }
 0x10c   : > { %v9973_v7 = vld [vmem:[%s10643_s13 + $0x8] sm:$0xff]  }
 0x10d   : > { %800 = vrot.lane.b32.xlu1 %v654_v17, %s10503_s9 }
 0x10f   : > { %v9765_v28 = vpop.f32.mrb[8].mxu0  ;;  %v9781_v29 = vpop.f32.mrb[8].mxu1 }
 0x110   : > { %v557_v30 = vpop.f32.mrb[9].mxu0  ;;  %v621_v31 = vpop.f32.mrb[9].mxu1 }
 0x111   : > { %802 = vrot.lane.b32.xlu1 %v655_v13, %s10503_s9  ;;  %v9766_v33 = vpop.f32.mrb[10].mxu0  ;;  %v9782_v34 = vpop.f32.mrb[10].mxu1 }
 0x112   : > { %v657_v35 = vpack.c.bf16 %v9766_v33, %v9765_v28  ;;  %v560_v36 = vpop.f32.mrb[11].mxu0  ;;  %v665_v37 = vpack.c.bf16 %v9782_v34, %v9781_v29  ;;  %v624_v38 = vpop.f32.mrb[11].mxu1  ;;  %v9983_v34 = vld [vmem:[%s10643_s13 + $0x18] sm:$0xff]  }
 0x113   : > { %v656_v41 = vpack.c.bf16 %v560_v36, %v557_v30  ;;  %v664_v42 = vpack.c.bf16 %v624_v38, %v621_v31 }
 0x115   : > { %806 = vrot.lane.b32.xlu1 %v657_v35, %s10503_s9  ;;  %804 = vrot.lane.b32.xlu0 %v656_v41, %s10503_s9 }
 0x117   : > { %v9769_v43 = vpop.f32.mrb[12].mxu0  ;;  %v9785_v45 = vpop.f32.mrb[12].mxu1 }
 0x118   : > { %v573_v47 = vpop.f32.mrb[13].mxu0  ;;  %v637_v49 = vpop.f32.mrb[13].mxu1 }
 0x119   : > { %v9770_v50 = vpop.f32.mrb[14].mxu0  ;;  %v9786_v51 = vpop.f32.mrb[14].mxu1 }
 0x11a   : > { %v659_v52 = vpack.c.bf16 %v9770_v50, %v9769_v43  ;;  %v576_v55 = vpop.f32.mrb[15].mxu0  ;;  %v667_v56 = vpack.c.bf16 %v9786_v51, %v9785_v45  ;;  %v640_v57 = vpop.f32.mrb[15].mxu1  ;;  %v1364_v51 = vld [vmem:[#allocation2 + $0x18] sm:$0xf] }
 0x11b   : > { %v658_v58 = vpack.c.bf16 %v576_v55, %v573_v47  ;;  %v666_v60 = vpack.c.bf16 %v640_v57, %v637_v49 }
 0x11c   : > { %810 = vrot.lane.b32.xlu1 %v659_v52, %s10503_s9  ;;  %v1368_v52 = vld [vmem:[#allocation2 + $0x20] sm:$0x1] }
 0x11d   : > { %808 = vrot.lane.b32.xlu0 %v658_v58, %s10503_s9 }
 0x120   : > { %814 = vrot.lane.b32.xlu1 %v661_v53, %s10503_s9  ;;  %v10036_v53 = vld [vmem:[%s13497_s3 + $0x158] sm:$0xff]  }
 0x121   : > { %812 = vrot.lane.b32.xlu0 %v660_v59, %s10503_s9  ;;  %9033 = vmatprep.subr.bf16.mxu1 %v10036_v53  ;;  %v10050_v59 = vld [vmem:[%s13497_s3 + $0x160] sm:$0xff]  }
 0x122   : > { %9034 = vmatpush3.bf16.msra.mxu1 %v10037_v54 }
 0x123   : > { %9035 = vmatprep.subr.bf16.mxu1 %v10050_v59 }
 0x124   : > { %818 = vrot.lane.b32.xlu1 %v663_v15, %s10503_s9 }
 0x125   : > { %816 = vrot.lane.b32.xlu0 %v662_v18, %s10503_s9 }
 0x126   : > { %9036 = vmatpush3.bf16.msra.mxu1 %v10051_v62 }
 0x127   : > { %9037 = vmatprep.subr.bf16.mxu1 %v10064_v63 }
 0x128   : > { %822 = vrot.lane.b32.xlu1 %v665_v37, %s10503_s9 }
 0x129   : > { %820 = vrot.lane.b32.xlu0 %v664_v42, %s10503_s9  ;;  %v10098_v42 = vld [vmem:[%s13497_s3 + $0x178] sm:$0xff]  }
 0x12a   : > { %9038 = vmatpush3.bf16.msra.mxu1 %v10065_v0 }
 0x12b   : > { %9039 = vmatprep.subr.bf16.mxu1 %v10078_v1 }
 0x12c   : > { %826 = vrot.lane.b32.xlu1 %v667_v56, %s10503_s9 }
 0x12d   : > { %824 = vrot.lane.b32.xlu0 %v666_v60, %s10503_s9  ;;  %s13444_s9 = scalar_lea.hbm %s13501_s7, %s8782_s17 }
 0x12e   : > { %9040 = vmatpush3.bf16.msra.mxu1 %v10079_v5 }
 0x12f   : > { %9041 = vmatprep.subr.bf16.mxu1 %v10098_v42 }
 0x177   : > { %v797_v3 = vpop.permute.xlu0 %796 }
 0x178   : > { %v830_v4 = vsel %vm442_vm0, %v9968_v2, %v797_v3 }
 0x179   : > { %v878_v6 = vsel %vm876_vm3, %v830_v4, 0 }
 0x17a   : > { %v8245_v9 = vcombine.low %v878_v6, %v878_v6  ;;  %v8246_v10 = vcombine.high %v878_v6, %v878_v6 }
 0x17b   : > { %v799_v11 = vpop.permute.xlu0 %798 }
 0x17c   : > { %v1032_v12 = vshrl.u32 %v8245_v9, 16  ;;  %v1040_v13 = vshrl.u32 %v8246_v10, 16  ;;  %v1035_v15 = vshll.u32 %v8245_v9, 16  ;;  %v833_v16 = vsel %vm442_vm0, %v9973_v7, %v799_v11  ;;  %v10099_v7 = vld [vmem:[%s13497_s3 + $0x138] sm:$0xff]   ;;  %v1375_v9 = vld [vmem:[#allocation2 + $0x2c] sm:$0x1] }
 0x17d   : > { %v1043_v20 = vshll.u32 %v8246_v10, 16  ;;  %v879_v21 = vsel %vm876_vm3, %v833_v16, 0  ;;  %v9998_v11 = vld [vmem:[%s10643_s13 + $0x20] sm:$0xff]   ;;  %9042 = vmatpush3.bf16.msra.mxu1 %v10099_v7 }
 0x17e   : > { %v1034_v18 = vrot.slane %v1032_v12, 7  ;;  %v1042_v19 = vrot.slane %v1040_v13, 7  ;;  %v8247_v26 = vcombine.low %v879_v21, %v879_v21  ;;  %v8248_v27 = vcombine.high %v879_v21, %v879_v21 }
 0x17f   : > { %v801_v28 = vpop.permute.xlu1 %800 }
 0x180   : > { %v1037_v29 = vor.u32 %v1035_v15, %v1034_v18  ;;  %v1038_v30 = vrot.slane %v1034_v18, 4  ;;  %v1045_v31 = vor.u32 %v1043_v20, %v1042_v19  ;;  %v1047_v33 = vrot.slane %v1042_v19, 4 }
 0x181   : > { %v1049_v35 = vshrl.u32 %v8247_v26, 16  ;;  %v1052_v36 = vshll.u32 %v8247_v26, 16  ;;  %v1057_v37 = vshrl.u32 %v8248_v27, 16  ;;  %v836_v41 = vsel %vm442_vm0, %v9978_v22, %v801_v28 }
 0x182   : > { %v1046_v38 = vsel %vm10986_vm9, %v1038_v30, %v1045_v31  ;;  %v1356_v39 = vsel %vm10991_vm10, %v1037_v29, %v1355_v23  ;;  %v1362_v40 = vsel %vm10998_vm11, %v1047_v33, %v1361_v25  ;;  %v1060_v47 = vshll.u32 %v8248_v27, 16  ;;  %v10086_v30 = vld [vmem:[%s13497_s3 + $0x180] sm:$0xff]  }
 0x183   : > { %1357 = vst [vmem:[#allocation2 + $0xc] sm:$0xf] %v1356_v39  ;;  %1358 = vst [vmem:[#allocation2 + $0x10] sm:$0xf] %v1046_v38  ;;  %v1051_v43 = vrot.slane %v1049_v35, 7  ;;  %v1059_v45 = vrot.slane %v1057_v37, 7  ;;  %v803_v50 = vpop.permute.xlu1 %802 }
 0x184   : > { %1363 = vst [vmem:[#allocation2 + $0x14] sm:$0x1] %v1362_v40  ;;  %v880_v49 = vsel %vm876_vm3, %v836_v41, 0  ;;  %v839_v57 = vsel %vm442_vm0, %v9983_v34, %v803_v50  ;;  %v10087_v35 = vld [vmem:[%s13497_s3 + $0x1c8] sm:$0xff]   ;;  %v1382_v37 = vld [vmem:[#allocation2 + $0x38] sm:$0x1] }
 0x185   : > { %v8249_v55 = vcombine.low %v880_v49, %v880_v49  ;;  %v8250_v56 = vcombine.high %v880_v49, %v880_v49  ;;  %v1054_v58 = vor.u32 %v1052_v36, %v1051_v43  ;;  %v1055_v60 = vrot.slane %v1051_v43, 4  ;;  %v1378_v36 = vld [vmem:[#allocation2 + $0x30] sm:$0xf] }
 0x186   : > { %v1062_v61 = vor.u32 %v1060_v47, %v1059_v45  ;;  %v1064_v44 = vrot.slane %v1059_v45, 4  ;;  %v881_v1 = vsel %vm876_vm3, %v839_v57, 0  ;;  %v10088_v57 = vld [vmem:[%s13497_s3 + $0x188] sm:$0xff]  }
 0x187   : > { %v1066_v48 = vshrl.u32 %v8249_v55, 16  ;;  %v1069_v53 = vshll.u32 %v8249_v55, 16  ;;  %v1074_v54 = vshrl.u32 %v8250_v56, 16  ;;  %v1077_v59 = vshll.u32 %v8250_v56, 16  ;;  %v807_v2 = vpop.permute.xlu1 %806  ;;  %v805_v25 = vpop.permute.xlu0 %804 }
 0x188   : > { %v1063_v62 = vsel %vm10986_vm9, %v1055_v60, %v1062_v61  ;;  %v1365_v63 = vsel %vm10991_vm10, %v1054_v58, %v1364_v51  ;;  %v1369_v0 = vsel %vm10998_vm11, %v1064_v44, %v1368_v52  ;;  %v8251_v5 = vcombine.low %v881_v1, %v881_v1  ;;  %v1392_v61 = vld [vmem:[#allocation2 + $0x48] sm:$0xf]  ;;  %v1396_v44 = vld [vmem:[#allocation2 + $0x50] sm:$0x1] }
 0x189   : > { %1366 = vst [vmem:[#allocation2 + $0x18] sm:$0xf] %v1365_v63  ;;  %1367 = vst [vmem:[#allocation2 + $0x1c] sm:$0xf] %v1063_v62  ;;  %v1068_v3 = vrot.slane %v1066_v48, 7  ;;  %v1076_v4 = vrot.slane %v1074_v54, 7  ;;  %v8252_v6 = vcombine.high %v881_v1, %v881_v1  ;;  %v845_v10 = vsel %vm442_vm0, %v9997_v46, %v807_v2 }
 0x18a   : > { %1370 = vst [vmem:[#allocation2 + $0x20] sm:$0x1] %v1369_v0  ;;  %v1533_v18 = vld [vmem:[#allocation2 + $0xc] sm:$0xf]  ;;  %v1534_v19 = vld [vmem:[#allocation2 + $0x10] sm:$0xf]  ;;  %v842_v40 = vsel %vm442_vm0, %v9998_v11, %v805_v25 }
 0x18b   : > { %v1071_v12 = vor.u32 %v1069_v53, %v1068_v3  ;;  %v1072_v13 = vrot.slane %v1068_v3, 4  ;;  %v1079_v15 = vor.u32 %v1077_v59, %v1076_v4  ;;  %v1081_v16 = vrot.slane %v1076_v4, 4  ;;  %v1471_v41 = vld [vmem:[#allocation2 + $0xc] sm:$0xf]  ;;  %v11046_v56 = vld [vmem:[#allocation2 + $0x10] sm:$0xf] }
 0x18c   : > { %v1083_v20 = vshrl.u32 %v8251_v5, 16  ;;  %v1086_v21 = vshll.u32 %v8251_v5, 16  ;;  %v1091_v22 = vshrl.u32 %v8252_v6, 16  ;;  %v1094_v23 = vshll.u32 %v8252_v6, 16  ;;  %v10092_v48 = vld [vmem:[%s13497_s3 + $0x1d0] sm:$0xff]   ;;  %v10096_v4 = vld [vmem:[%s13497_s3 + $0x1d8] sm:$0xff]  }
 0x18d   : > { %v1080_v26 = vsel %vm10986_vm9, %v1072_v13, %v1079_v15  ;;  %v1372_v27 = vsel %vm10991_vm10, %v1071_v12, %v1371_v8  ;;  %v1376_v28 = vsel %vm10998_vm11, %v1081_v16, %v1375_v9  ;;  %v11034_v29 = vcombine.low %v1533_v18, %v1534_v19  ;;  %v11066_v2 = vld [vmem:[#allocation2 + $0x14] ss:$0 sps:$4 sm:$0x11]   ;;  %v1518_v9 = vld [vmem:[#allocation2 + $0xc] sm:$0xe] }
 0x18e   : > { %1373 = vst [vmem:[#allocation2 + $0x24] sm:$0xf] %v1372_v27  ;;  %1374 = vst [vmem:[#allocation2 + $0x28] sm:$0xf] %v1080_v26  ;;  %v1085_v31 = vrot.slane %v1083_v20, 7  ;;  %v1093_v33 = vrot.slane %v1091_v22, 7  ;;  %v11064_v1 = vcombine.low %v1471_v41, %v11046_v56 }
 0x18f   : > { %1377 = vst [vmem:[#allocation2 + $0x2c] sm:$0x1] %v1376_v28  ;;  %v883_v34 = vsel %vm876_vm3, %v845_v10, 0  ;;  %3832 = vmatprep.mubr.bf16.mxu0 %v11034_v29  ;;  %v882_v59 = vsel %vm876_vm3, %v842_v40, 0  ;;  %v10093_v3 = vld [vmem:[%s13497_s3 + $0x190] sm:$0xff]  }
 0x190   : > { %v8255_v38 = vcombine.low %v883_v34, %v883_v34  ;;  %v8256_v39 = vcombine.high %v883_v34, %v883_v34  ;;  %v1088_v42 = vor.u32 %v1086_v21, %v1085_v31  ;;  %v1089_v43 = vrot.slane %v1085_v31, 4  ;;  %3833 = vmatmul.mubr.bf16.vlgmr.msra.gmra.mrb[16].mxu0 %v10915_v32  ;;  %v1535_v49 = vld [vmem:[#allocation2 + $0x18] sm:$0xf]  ;;  %v1536_v50 = vld [vmem:[#allocation2 + $0x1c] sm:$0xf] }
 0x191   : > { %v1096_v45 = vor.u32 %v1094_v23, %v1093_v33  ;;  %v1098_v47 = vrot.slane %v1093_v33, 4  ;;  %9140 = vmatpush3.bf16.msra.mxu0 %v10086_v30  ;;  %v11061_v62 = vcombine.low %v1535_v49, %v1536_v50  ;;  %v8253_v63 = vcombine.low %v882_v59, %v882_v59  ;;  %v1473_v10 = vld [vmem:[#allocation2 + $0x18] sm:$0xf]  ;;  %v11075_v16 = vld [vmem:[#allocation2 + $0x1c] sm:$0xf] }
 0x192   : > { %v1117_v51 = vshrl.u32 %v8255_v38, 16  ;;  %v1120_v52 = vshll.u32 %v8255_v38, 16  ;;  %v1125_v55 = vshrl.u32 %v8256_v39, 16  ;;  %v1379_v60 = vsel %vm10991_vm10, %v1088_v42, %v1378_v36  ;;  %9141 = vmatprep.subr.bf16.mxu0 %v10087_v35  ;;  %v1385_v21 = vld [vmem:[#allocation2 + $0x3c] sm:$0xf]  ;;  %v10117_v38 = vld [vmem:[%s13497_s3 + $0x200] sm:$0xff]  }
 0x193   : > { %v1097_v58 = vsel %vm10986_vm9, %v1089_v43, %v1096_v45  ;;  %v1383_v32 = vsel %vm10998_vm11, %v1098_v47, %v1382_v37  ;;  %v1128_v46 = vshll.u32 %v8256_v39, 16  ;;  %1380 = vst [vmem:[#allocation2 + $0x30] sm:$0xf] %v1379_v60  ;;  %v8254_v0 = vcombine.high %v882_v59, %v882_v59  ;;  %3840 = vmatprep.mubr.bf16.mxu0 %v11061_v62  ;;  %v1389_v22 = vld [vmem:[#allocation2 + $0x44] sm:$0x1]  ;;  %v10097_v37 = vld [vmem:[%s13497_s3 + $0x198] sm:$0xff]  }
 0x194   : > { %1381 = vst [vmem:[#allocation2 + $0x34] sm:$0xf] %v1097_v58  ;;  %1384 = vst [vmem:[#allocation2 + $0x38] sm:$0x1] %v1383_v32  ;;  %v1119_v53 = vrot.slane %v1117_v51, 7  ;;  %v1127_v54 = vrot.slane %v1125_v55, 7  ;;  %v8310_v33 = vcombine.low %v1518_v9, %v11046_v56  ;;  %v11090_v35 = vcombine.low %v1473_v10, %v11075_v16  ;;  %9787 = vmatprep.subr.bf16.mxu1 %v10117_v38  ;;  %v809_v9 = vpop.permute.xlu0 %808 }
 0x195   : > { %9142 = vmatpush3.bf16.msra.mxu0 %v10088_v57  ;;  %v1100_v11 = vshrl.u32 %v8253_v63, 16  ;;  %v1103_v12 = vshll.u32 %v8253_v63, 16  ;;  %v1108_v13 = vshrl.u32 %v8254_v0, 16  ;;  %v1111_v15 = vshll.u32 %v8254_v0, 16  ;;  %v1537_v28 = vld [vmem:[#allocation2 + $0x24] sm:$0xf] }
 0x196   : > { %v1122_v5 = vor.u32 %v1120_v52, %v1119_v53  ;;  %v1123_v6 = vrot.slane %v1119_v53, 4  ;;  %v1130_v7 = vor.u32 %v1128_v46, %v1127_v54  ;;  %v1132_v8 = vrot.slane %v1127_v54, 4  ;;  %9143 = vmatprep.subr.bf16.mxu0 %v10092_v48  ;;  %v11083_v23 = vld [vmem:[#allocation2 + $0x20] ss:$0 sps:$4 sm:$0x11]   ;;  %v10015_v0 = vld [vmem:[%s10643_s13 + $0x38] sm:$0xff]  }
 0x197   : > { %v1102_v25 = vrot.slane %v1100_v11, 7  ;;  %v1110_v26 = vrot.slane %v1108_v13, 7  ;;  %v1822_v27 = vshll.u32 %v11064_v1, 16  ;;  %v1538_v30 = vld [vmem:[#allocation2 + $0x28] sm:$0xf]  ;;  %v1827_v31 = vshll.u32 %v11066_v2, 16 }
 0x198   : > { %v1131_v18 = vsel %vm10986_vm9, %v1123_v6, %v1130_v7  ;;  %v1393_v19 = vsel %vm10991_vm10, %v1122_v5, %v1392_v61  ;;  %v1397_v20 = vsel %vm10998_vm11, %v1132_v8, %v1396_v44  ;;  %v2068_v34 = vrot.slane %v11066_v2, 1  ;;  %v1475_v36 = vld [vmem:[#allocation2 + $0x24] sm:$0xf]  ;;  %v11098_v43 = vld [vmem:[#allocation2 + $0x2c] ss:$0 sps:$4 sm:$0x11]   ;;  %v811_v8 = vpop.permute.xlu1 %810 }
 0x199   : > { %1394 = vst [vmem:[#allocation2 + $0x48] sm:$0xf] %v1393_v19  ;;  %1395 = vst [vmem:[#allocation2 + $0x4c] sm:$0xf] %v1131_v18  ;;  %9144 = vmatpush3.bf16.msra.mxu0 %v10093_v3  ;;  %v1105_v39 = vor.u32 %v1103_v12, %v1102_v25  ;;  %v1106_v40 = vrot.slane %v1102_v25, 4  ;;  %v1113_v41 = vor.u32 %v1111_v15, %v1110_v26  ;;  %v1115_v42 = vrot.slane %v1110_v26, 4 }
 0x19a   : > { %1398 = vst [vmem:[#allocation2 + $0x50] sm:$0x1] %v1397_v20  ;;  %9145 = vmatprep.subr.bf16.mxu0 %v10096_v4  ;;  %v10103_v45 = vld [vmem:[%s13497_s3 + $0x1e0] sm:$0xff]   ;;  %v1820_v47 = vshrl.u32 %v11064_v1, 16  ;;  %v1824_v49 = vrot.slane %v1822_v27, 1  ;;  %v1829_v50 = vrot.slane %v1827_v31, 1  ;;  %v11115_v46 = vcombine.low %v1537_v28, %v1538_v30 }
 0x19b   : > { %v2067_v51 = vrot.slane %v8310_v33, 1  ;;  %v11104_v52 = vld [vmem:[#allocation2 + $0x28] sm:$0xf]  ;;  %v1114_v55 = vsel %vm10986_vm9, %v1106_v40, %v1113_v41  ;;  %v1386_v56 = vsel %vm10991_vm10, %v1105_v39, %v1385_v21  ;;  %v1390_v57 = vsel %vm10998_vm11, %v1115_v42, %v1389_v22  ;;  %v1519_v60 = vld [vmem:[#allocation2 + $0x18] sm:$0xe]  ;;  %v10106_v48 = vld [vmem:[%s13497_s3 + $0x1a0] sm:$0xff]  }
 0x19c   : > { %v1834_v58 = vshll.u32 %v11090_v35, 16  ;;  %1387 = vst [vmem:[#allocation2 + $0x3c] sm:$0xf] %v1386_v56  ;;  %1388 = vst [vmem:[#allocation2 + $0x40] sm:$0xf] %v1114_v55  ;;  %v1825_v32 = vor.u32 %v1824_v49, %v1820_v47  ;;  %v1839_v44 = vshll.u32 %v11083_v23, 16  ;;  %v11122_v59 = vcombine.low %v1475_v36, %v11104_v52 }
 0x19d   : > { %1391 = vst [vmem:[#allocation2 + $0x44] sm:$0x1] %v1390_v57  ;;  %v2069_v61 = vsel %vm2063_vm2, %v2067_v51, %v2068_v34  ;;  %9146 = vmatpush3.bf16.msra.mxu0 %v10097_v37  ;;  %v1832_v53 = vshrl.u32 %v11090_v35, 16  ;;  %v1851_v63 = vshll.u32 %v11098_v43, 16  ;;  %v10016_v2 = vld [vmem:[%s10643_s13 + $0x30] sm:$0xff]   ;;  %v10107_v3 = vld [vmem:[%s13497_s3 + $0x1e8] sm:$0xff]   ;;  %v8311_v5 = vcombine.low %v1519_v60, %v11075_v16 }
 0x19e   : > { %3841 = vmatmul.mubr.bf16.gmra.mrb[20].mxu0 %v2069_v61  ;;  %v1836_v54 = vrot.slane %v1834_v58, 1  ;;  %9147 = vmatprep.subr.bf16.mxu0 %v10103_v45  ;;  %v1830_v4 = vsel %vm1806_vm1, %v1825_v32, %v1829_v50  ;;  %v1539_v6 = vld [vmem:[#allocation2 + $0x30] sm:$0xf]  ;;  %v1540_v7 = vld [vmem:[#allocation2 + $0x34] sm:$0xf]  ;;  %v1841_v11 = vrot.slane %v1839_v44, 1  ;;  %v851_v26 = vsel %vm442_vm0, %v10015_v0, %v811_v8 }
 0x19f   : > { %3848 = vmatprep.mubr.bf16.mxu0 %v11115_v46  ;;  %3679 = vmatprep.mubr.bf16.mxu1 %v1830_v4  ;;  %v1844_v12 = vshrl.u32 %v11122_v59, 16  ;;  %v1846_v13 = vshll.u32 %v11122_v59, 16  ;;  %v1477_v15 = vld [vmem:[#allocation2 + $0x30] sm:$0xf]  ;;  %v10108_v18 = vld [vmem:[%s13497_s3 + $0x1a8] sm:$0xff]   ;;  %v1853_v19 = vrot.slane %v1851_v63, 1  ;;  %v848_v27 = vsel %vm442_vm0, %v10016_v2, %v809_v9 }
 0x1a0   : > { %v1837_v10 = vor.u32 %v1836_v54, %v1832_v53  ;;  %3680 = vmatmul.mubr.bf16.gmra.mrb[20].mxu1 %v11064_v1  ;;  %v2070_v16 = vrot.slane %v8311_v5, 1  ;;  %v2071_v20 = vrot.slane %v11083_v23, 1  ;;  %v11140_v21 = vld [vmem:[#allocation2 + $0x38] ss:$0 sps:$4 sm:$0x11]   ;;  %v10111_v1 = vld [vmem:[%s13497_s3 + $0x1f0] sm:$0xff]   ;;  %v11150_v30 = vcombine.low %v1539_v6, %v1540_v7 }
 0x1a1   : > { %9148 = vmatpush3.bf16.msra.mxu0 %v10106_v48  ;;  %v1848_v25 = vrot.slane %v1846_v13, 1  ;;  %v11145_v28 = vld [vmem:[#allocation2 + $0x34] sm:$0xf]  ;;  %v885_v23 = vsel %vm876_vm3, %v851_v26, 0  ;;  %v884_v31 = vsel %vm876_vm3, %v848_v27, 0  ;;  %v1863_v41 = vshll.u32 %v11140_v21, 16 }
 0x1a2   : > { %v1842_v22 = vsel %vm1806_vm1, %v1837_v10, %v1841_v11  ;;  %9149 = vmatprep.subr.bf16.mxu0 %v10107_v3  ;;  %v8259_v34 = vcombine.low %v885_v23, %v885_v23  ;;  %v8260_v36 = vcombine.high %v885_v23, %v885_v23  ;;  %v8257_v37 = vcombine.low %v884_v31, %v884_v31  ;;  %v1520_v42 = vld [vmem:[#allocation2 + $0x24] sm:$0xe]  ;;  %v10112_v45 = vld [vmem:[%s13497_s3 + $0x1b0] sm:$0xff]   ;;  %v10115_v55 = vld [vmem:[%s13497_s3 + $0x1f8] sm:$0xff]  }
 0x1a3   : > { %3687 = vmatprep.mubr.bf16.mxu1 %v1842_v22  ;;  %v1849_v33 = vor.u32 %v1848_v25, %v1844_v12  ;;  %v2072_v38 = vsel %vm2063_vm2, %v2070_v16, %v2071_v20  ;;  %v8258_v39 = vcombine.high %v884_v31, %v884_v31  ;;  %v11156_v40 = vcombine.low %v1477_v15, %v11145_v28  ;;  %v1406_v56 = vld [vmem:[#allocation2 + $0x60] sm:$0xf]  ;;  %v1410_v57 = vld [vmem:[#allocation2 + $0x68] sm:$0x1]  ;;  %v1399_v53 = vld [vmem:[#allocation2 + $0x54] sm:$0xf] }
 0x1a4   : > { %v1151_v49 = vshrl.u32 %v8259_v34, 16  ;;  %v1154_v50 = vshll.u32 %v8259_v34, 16  ;;  %v1159_v51 = vshrl.u32 %v8260_v36, 16  ;;  %v1162_v58 = vshll.u32 %v8260_v36, 16  ;;  %v1403_v54 = vld [vmem:[#allocation2 + $0x5c] sm:$0x1] }
 0x1a5   : > { %9150 = vmatpush3.bf16.msra.mxu0 %v10108_v18  ;;  %v1854_v47 = vsel %vm1806_vm1, %v1849_v33, %v1853_v19  ;;  %v1134_v60 = vshrl.u32 %v8257_v37, 16  ;;  %v1137_v32 = vshll.u32 %v8257_v37, 16  ;;  %v1142_v61 = vshrl.u32 %v8258_v39, 16  ;;  %v10116_v6 = vld [vmem:[%s13497_s3 + $0x1b8] sm:$0xff]   ;;  %v11182_v26 = vld [vmem:[#allocation2 + $0x40] sm:$0xf] }
 0x1a6   : > { %3849 = vmatmul.mubr.bf16.gmra.mrb[24].mxu0 %v2072_v38  ;;  %9151 = vmatprep.subr.bf16.mxu0 %v10111_v1  ;;  %v1153_v44 = vrot.slane %v1151_v49, 7  ;;  %v1161_v48 = vrot.slane %v1159_v51, 7  ;;  %v1145_v63 = vshll.u32 %v8258_v39, 16  ;;  %v8312_v0 = vcombine.low %v1520_v42, %v11104_v52  ;;  %v1479_v11 = vld [vmem:[#allocation2 + $0x3c] sm:$0xf]  ;;  %v10029_v39 = vld [vmem:[%s10643_s13 + $0x48] sm:$0xff]  }
 0x1a7   : > { %3856 = vmatprep.mubr.bf16.mxu0 %v11150_v30  ;;  %v1136_v2 = vrot.slane %v1134_v60, 7  ;;  %v1144_v3 = vrot.slane %v1142_v61, 7  ;;  %v1856_v4 = vshrl.u32 %v11156_v40, 16  ;;  %v1858_v5 = vshll.u32 %v11156_v40, 16  ;;  %v1521_v52 = vld [vmem:[#allocation2 + $0x30] sm:$0xe] }
 0x1a8   : > { %3688 = vmatmul.mubr.bf16.gmra.mrb[24].mxu1 %v11090_v35  ;;  %v1156_v7 = vor.u32 %v1154_v50, %v1153_v44  ;;  %v1157_v8 = vrot.slane %v1153_v44, 4  ;;  %v1164_v9 = vor.u32 %v1162_v58, %v1161_v48  ;;  %v1166_v10 = vrot.slane %v1161_v48, 4  ;;  %v1541_v18 = vld [vmem:[#allocation2 + $0x3c] sm:$0xf]  ;;  %v1542_v33 = vld [vmem:[#allocation2 + $0x40] sm:$0xf] }
 0x1a9   : > { %9152 = vmatpush3.bf16.msra.mxu0 %v10112_v45  ;;  %3695 = vmatprep.mubr.bf16.mxu1 %v1854_v47  ;;  %v1139_v35 = vor.u32 %v1137_v32, %v1136_v2  ;;  %v1140_v12 = vrot.slane %v1136_v2, 4  ;;  %v1147_v13 = vor.u32 %v1145_v63, %v1144_v3  ;;  %v1149_v15 = vrot.slane %v1144_v3, 4  ;;  %v11174_v19 = vld [vmem:[#allocation2 + $0x44] ss:$0 sps:$4 sm:$0x11]  }
 0x1aa   : > { %9153 = vmatprep.subr.bf16.mxu0 %v10115_v55  ;;  %v1165_v16 = vsel %vm10986_vm9, %v1157_v8, %v1164_v9  ;;  %v1407_v20 = vsel %vm10991_vm10, %v1156_v7, %v1406_v56  ;;  %v1411_v22 = vsel %vm10998_vm11, %v1166_v10, %v1410_v57  ;;  %v1860_v25 = vrot.slane %v1858_v5, 1  ;;  %v1543_v38 = vld [vmem:[#allocation2 + $0x48] sm:$0xf]  ;;  %v10030_v42 = vld [vmem:[%s10643_s13 + $0x40] sm:$0xff]   ;;  %v1544_v51 = vld [vmem:[#allocation2 + $0x4c] sm:$0xf]  ;;  %v815_v55 = vpop.permute.xlu1 %814  ;;  %v813_v56 = vpop.permute.xlu0 %812 }
 0x1ab   : > { %1408 = vst [vmem:[#allocation2 + $0x60] sm:$0xf] %v1407_v20  ;;  %1409 = vst [vmem:[#allocation2 + $0x64] sm:$0xf] %v1165_v16  ;;  %v1148_v27 = vsel %vm10986_vm9, %v1140_v12, %v1147_v13  ;;  %v1400_v1 = vsel %vm10991_vm10, %v1139_v35, %v1399_v53  ;;  %v1404_v23 = vsel %vm10998_vm11, %v1149_v15, %v1403_v54  ;;  %v2073_v31 = vrot.slane %v8312_v0, 1 }
 0x1ac   : > { %1412 = vst [vmem:[#allocation2 + $0x68] sm:$0x1] %v1411_v22  ;;  %1401 = vst [vmem:[#allocation2 + $0x54] sm:$0xf] %v1400_v1  ;;  %v1861_v34 = vor.u32 %v1860_v25, %v1856_v4  ;;  %v1865_v36 = vrot.slane %v1863_v41, 1  ;;  %v2074_v37 = vrot.slane %v11098_v43, 1  ;;  %v11196_v45 = vcombine.low %v1479_v11, %v11182_v26 }
 0x1ad   : > { %9154 = vmatpush3.bf16.msra.mxu0 %v10116_v6  ;;  %1402 = vst [vmem:[#allocation2 + $0x58] sm:$0xf] %v1148_v27  ;;  %1405 = vst [vmem:[#allocation2 + $0x5c] sm:$0x1] %v1404_v23  ;;  %v1875_v47 = vshll.u32 %v11174_v19, 16  ;;  %v8313_v49 = vcombine.low %v1521_v52, %v11145_v28  ;;  %v2077_v50 = vrot.slane %v11140_v21, 1  ;;  %v11202_v41 = vcombine.low %v1541_v18, %v1542_v33 }
 0x1ae   : > { %v2075_v57 = vsel %vm2063_vm2, %v2073_v31, %v2074_v37  ;;  %v1481_v43 = vld [vmem:[#allocation2 + $0x48] sm:$0xf]  ;;  %v1866_v58 = vsel %vm1806_vm1, %v1861_v34, %v1865_v36  ;;  %v1868_v60 = vshrl.u32 %v11196_v45, 16  ;;  %v1870_v32 = vshll.u32 %v11196_v45, 16  ;;  %v11215_v53 = vld [vmem:[#allocation2 + $0x4c] sm:$0xf] }
 0x1af   : > { %3857 = vmatmul.mubr.bf16.gmra.mrb[28].mxu0 %v2075_v57  ;;  %v2076_v28 = vrot.slane %v8313_v49, 1  ;;  %v11208_v61 = vld [vmem:[#allocation2 + $0x50] ss:$0 sps:$4 sm:$0x11]   ;;  %v1877_v21 = vrot.slane %v1875_v47, 1  ;;  %v11211_v44 = vcombine.low %v1543_v38, %v1544_v51  ;;  %v857_v48 = vsel %vm442_vm0, %v10029_v39, %v815_v55 }
 0x1b0   : > { %3696 = vmatmul.mubr.bf16.gmra.mrb[28].mxu1 %v11122_v59  ;;  %3864 = vmatprep.mubr.bf16.mxu0 %v11202_v41  ;;  %v854_v59 = vsel %vm442_vm0, %v10030_v42, %v813_v56  ;;  %v1522_v54 = vld [vmem:[#allocation2 + $0x3c] sm:$0xe]  ;;  %v1872_v63 = vrot.slane %v1870_v32, 1  ;;  %v887_v2 = vsel %vm876_vm3, %v857_v48, 0  ;;  %v11221_v9 = vcombine.low %v1481_v43, %v11215_v53  ;;  %v1420_v18 = vld [vmem:[#allocation2 + $0x78] sm:$0xf] }
 0x1b1   : > { %3703 = vmatprep.mubr.bf16.mxu1 %v1866_v58  ;;  %v2078_v0 = vsel %vm2063_vm2, %v2076_v28, %v2077_v50  ;;  %v886_v3 = vsel %vm876_vm3, %v854_v59, 0  ;;  %v8263_v4 = vcombine.low %v887_v2, %v887_v2  ;;  %v8264_v5 = vcombine.high %v887_v2, %v887_v2  ;;  %v1424_v16 = vld [vmem:[#allocation2 + $0x80] sm:$0x1]  ;;  %v1413_v23 = vld [vmem:[#allocation2 + $0x6c] sm:$0xf] }
 0x1b2   : > { %v8261_v6 = vcombine.low %v886_v3, %v886_v3  ;;  %v8262_v7 = vcombine.high %v886_v3, %v886_v3  ;;  %v1873_v8 = vor.u32 %v1872_v63, %v1868_v60  ;;  %v1887_v10 = vshll.u32 %v11208_v61, 16  ;;  %v1417_v31 = vld [vmem:[#allocation2 + $0x74] sm:$0x1]  ;;  %v1523_v51 = vld [vmem:[#allocation2 + $0x48] sm:$0xe] }
 0x1b3   : > { %v8314_v11 = vcombine.low %v1522_v54, %v11182_v26  ;;  %v1185_v52 = vshrl.u32 %v8263_v4, 16  ;;  %v1188_v35 = vshll.u32 %v8263_v4, 16  ;;  %v1193_v12 = vshrl.u32 %v8264_v5, 16  ;;  %v1483_v50 = vld [vmem:[#allocation2 + $0x54] sm:$0xf] }
 0x1b4   : > { %v1196_v13 = vshll.u32 %v8264_v5, 16  ;;  %v1878_v15 = vsel %vm1806_vm1, %v1873_v8, %v1877_v21  ;;  %v1168_v20 = vshrl.u32 %v8261_v6, 16  ;;  %v1171_v22 = vshll.u32 %v8261_v6, 16  ;;  %v11238_v21 = vld [vmem:[#allocation2 + $0x58] sm:$0xf]  ;;  %v10044_v6 = vld [vmem:[%s10643_s13 + $0x50] sm:$0xff]  }
 0x1b5   : > { %v1176_v25 = vshrl.u32 %v8262_v7, 16  ;;  %v1187_v27 = vrot.slane %v1185_v52, 7  ;;  %v1195_v1 = vrot.slane %v1193_v12, 7  ;;  %v1179_v33 = vshll.u32 %v8262_v7, 16  ;;  %v1546_v2 = vld [vmem:[#allocation2 + $0x58] sm:$0xf]  ;;  %v819_v12 = vpop.permute.xlu1 %818 }
 0x1b6   : > { %v1880_v34 = vshrl.u32 %v11221_v9, 16  ;;  %v1170_v26 = vrot.slane %v1168_v20, 7  ;;  %v1882_v37 = vshll.u32 %v11221_v9, 16  ;;  %v1889_v38 = vrot.slane %v1887_v10, 1  ;;  %v10043_v5 = vld [vmem:[%s10643_s13 + $0x58] sm:$0xff]  }
 0x1b7   : > { %3865 = vmatmul.mubr.bf16.gmra.mrb[32].mxu0 %v2078_v0  ;;  %v1178_v36 = vrot.slane %v1176_v25, 7  ;;  %v1190_v39 = vor.u32 %v1188_v35, %v1187_v27  ;;  %v1191_v42 = vrot.slane %v1187_v27, 4  ;;  %v1198_v47 = vor.u32 %v1196_v13, %v1195_v1  ;;  %v1545_v0 = vld [vmem:[#allocation2 + $0x54] sm:$0xf]  ;;  %v1548_v35 = vld [vmem:[#allocation2 + $0x64] sm:$0xf]  ;;  %v817_v13 = vpop.permute.xlu0 %816 }
 0x1b8   : > { %3704 = vmatmul.mubr.bf16.gmra.mrb[32].mxu1 %v11156_v40  ;;  %3872 = vmatprep.mubr.bf16.mxu0 %v11211_v44  ;;  %v1200_v49 = vrot.slane %v1195_v1, 4  ;;  %v1173_v55 = vor.u32 %v1171_v22, %v1170_v26  ;;  %v1174_v56 = vrot.slane %v1170_v26, 4  ;;  %v11230_v40 = vld [vmem:[#allocation2 + $0x5c] ss:$0 sps:$4 sm:$0x11]   ;;  %v1884_v28 = vrot.slane %v1882_v37, 1 }
 0x1b9   : > { %3711 = vmatprep.mubr.bf16.mxu1 %v1878_v15  ;;  %v1181_v57 = vor.u32 %v1179_v33, %v1178_v36  ;;  %v1183_v43 = vrot.slane %v1178_v36, 4  ;;  %v1199_v58 = vsel %vm10986_vm9, %v1191_v42, %v1198_v47  ;;  %v1421_v60 = vsel %vm10991_vm10, %v1190_v39, %v1420_v18  ;;  %v11260_v20 = vld [vmem:[#allocation2 + $0x68] ss:$0 sps:$4 sm:$0x11]   ;;  %v1524_v33 = vld [vmem:[#allocation2 + $0x54] sm:$0xe] }
 0x1ba   : > { %v1425_v32 = vsel %vm10998_vm11, %v1200_v49, %v1424_v16  ;;  %1422 = vst [vmem:[#allocation2 + $0x78] sm:$0xf] %v1421_v60  ;;  %1423 = vst [vmem:[#allocation2 + $0x7c] sm:$0xf] %v1199_v58  ;;  %v1414_v59 = vsel %vm10991_vm10, %v1173_v55, %v1413_v23  ;;  %v2079_v63 = vrot.slane %v8314_v11, 1  ;;  %v1885_v3 = vor.u32 %v1884_v28, %v1880_v34 }
 0x1bb   : > { %1426 = vst [vmem:[#allocation2 + $0x80] sm:$0x1] %v1425_v32  ;;  %v1182_v48 = vsel %vm10986_vm9, %v1174_v56, %v1181_v57  ;;  %v1418_v54 = vsel %vm10998_vm11, %v1183_v43, %v1417_v31  ;;  %1415 = vst [vmem:[#allocation2 + $0x6c] sm:$0xf] %v1414_v59  ;;  %v2080_v4 = vrot.slane %v11174_v19, 1  ;;  %v11250_v7 = vcombine.low %v1483_v50, %v11238_v21 }
 0x1bc   : > { %1416 = vst [vmem:[#allocation2 + $0x70] sm:$0xf] %v1182_v48  ;;  %1419 = vst [vmem:[#allocation2 + $0x74] sm:$0x1] %v1418_v54  ;;  %v1899_v8 = vshll.u32 %v11230_v40, 16  ;;  %v8315_v10 = vcombine.low %v1523_v51, %v11215_v53  ;;  %v2083_v52 = vrot.slane %v11208_v61, 1  ;;  %v11256_v18 = vcombine.low %v1545_v0, %v1546_v2 }
 0x1bd   : > { %v1547_v11 = vld [vmem:[#allocation2 + $0x60] sm:$0xf]  ;;  %v2081_v15 = vsel %vm2063_vm2, %v2079_v63, %v2080_v4  ;;  %v11258_v16 = vld [vmem:[#allocation2 + $0x64] sm:$0xf]  ;;  %v1890_v22 = vsel %vm1806_vm1, %v1885_v3, %v1889_v38  ;;  %v1892_v61 = vshrl.u32 %v11250_v7, 16  ;;  %v1894_v53 = vshll.u32 %v11250_v7, 16 }
 0x1be   : > { %v1485_v19 = vld [vmem:[#allocation2 + $0x60] sm:$0xf]  ;;  %v2082_v25 = vrot.slane %v8315_v10, 1  ;;  %v1901_v27 = vrot.slane %v1899_v8, 1  ;;  %v11267_v1 = vcombine.low %v1547_v11, %v1548_v35  ;;  %v863_v23 = vsel %vm442_vm0, %v10043_v5, %v819_v12  ;;  %v1434_v60 = vld [vmem:[#allocation2 + $0x90] sm:$0xf] }
 0x1bf   : > { %3873 = vmatmul.mubr.bf16.gmra.mrb[36].mxu0 %v2081_v15  ;;  %v860_v31 = vsel %vm442_vm0, %v10044_v6, %v817_v13  ;;  %v889_v26 = vsel %vm876_vm3, %v863_v23, 0  ;;  %v11275_v49 = vcombine.low %v1485_v19, %v11258_v16  ;;  %v1911_v50 = vshll.u32 %v11260_v20, 16  ;;  %v1438_v32 = vld [vmem:[#allocation2 + $0x98] sm:$0x1]  ;;  %v1427_v0 = vld [vmem:[#allocation2 + $0x84] sm:$0xf] }
 0x1c0   : > { %3712 = vmatmul.mubr.bf16.gmra.mrb[36].mxu1 %v11196_v45  ;;  %3880 = vmatprep.mubr.bf16.mxu0 %v11256_v18  ;;  %v1896_v45 = vrot.slane %v1894_v53, 1  ;;  %v2084_v34 = vsel %vm2063_vm2, %v2082_v25, %v2083_v52  ;;  %v888_v36 = vsel %vm876_vm3, %v860_v31, 0  ;;  %v8267_v37 = vcombine.low %v889_v26, %v889_v26  ;;  %v1431_v2 = vld [vmem:[#allocation2 + $0x8c] sm:$0x1]  ;;  %v1525_v13 = vld [vmem:[#allocation2 + $0x60] sm:$0xe] }
 0x1c1   : > { %3719 = vmatprep.mubr.bf16.mxu1 %v1890_v22  ;;  %v8268_v38 = vcombine.high %v889_v26, %v889_v26  ;;  %v8265_v39 = vcombine.low %v888_v36, %v888_v36  ;;  %v8266_v42 = vcombine.high %v888_v36, %v888_v36  ;;  %v8316_v51 = vcombine.low %v1524_v33, %v11238_v21 }
 0x1c2   : > { %v1897_v47 = vor.u32 %v1896_v45, %v1892_v61  ;;  %v1219_v55 = vshrl.u32 %v8267_v37, 16  ;;  %v1222_v56 = vshll.u32 %v8267_v37, 16  ;;  %v1904_v4 = vshrl.u32 %v11275_v49, 16  ;;  %v1487_v12 = vld [vmem:[#allocation2 + $0x6c] sm:$0xf] }
 0x1c3   : > { %v1227_v57 = vshrl.u32 %v8268_v38, 16  ;;  %v1230_v43 = vshll.u32 %v8268_v38, 16  ;;  %v1202_v28 = vshrl.u32 %v8265_v39, 16  ;;  %v1205_v48 = vshll.u32 %v8265_v39, 16  ;;  %v11292_v31 = vld [vmem:[#allocation2 + $0x70] sm:$0xf] }
 0x1c4   : > { %v1902_v58 = vsel %vm1806_vm1, %v1897_v47, %v1901_v27  ;;  %v1210_v59 = vshrl.u32 %v8266_v42, 16  ;;  %v1221_v54 = vrot.slane %v1219_v55, 7  ;;  %v1213_v3 = vshll.u32 %v8266_v42, 16  ;;  %v1549_v36 = vld [vmem:[#allocation2 + $0x6c] sm:$0xf]  ;;  %v10058_v55 = vld [vmem:[%s10643_s13 + $0x60] sm:$0xff]  }
 0x1c5   : > { %v1229_v63 = vrot.slane %v1227_v57, 7  ;;  %v1204_v21 = vrot.slane %v1202_v28, 7  ;;  %v1906_v6 = vshll.u32 %v11275_v49, 16  ;;  %v1913_v8 = vrot.slane %v1911_v50, 1  ;;  %v1550_v37 = vld [vmem:[#allocation2 + $0x70] sm:$0xf] }
 0x1c6   : > { %v1212_v5 = vrot.slane %v1210_v59, 7  ;;  %v1224_v10 = vor.u32 %v1222_v56, %v1221_v54  ;;  %v1225_v52 = vrot.slane %v1221_v54, 4  ;;  %v2085_v26 = vrot.slane %v8316_v51, 1  ;;  %v10057_v38 = vld [vmem:[%s10643_s13 + $0x68] sm:$0xff]   ;;  %v1551_v47 = vld [vmem:[#allocation2 + $0x78] sm:$0xf] }
 0x1c7   : > { %3881 = vmatmul.mubr.bf16.gmra.mrb[40].mxu0 %v2084_v34  ;;  %v1232_v11 = vor.u32 %v1230_v43, %v1229_v63  ;;  %v1234_v35 = vrot.slane %v1229_v63, 4  ;;  %v1207_v15 = vor.u32 %v1205_v48, %v1204_v21  ;;  %v1208_v19 = vrot.slane %v1204_v21, 4  ;;  %v1552_v50 = vld [vmem:[#allocation2 + $0x7c] sm:$0xf]  ;;  %v1489_v48 = vld [vmem:[#allocation2 + $0x78] sm:$0xf] }
 0x1c8   : > { %3720 = vmatmul.mubr.bf16.gmra.mrb[40].mxu1 %v11221_v9  ;;  %3888 = vmatprep.mubr.bf16.mxu0 %v11267_v1  ;;  %v1215_v22 = vor.u32 %v1213_v3, %v1212_v5  ;;  %v1217_v61 = vrot.slane %v1212_v5, 4  ;;  %v11284_v9 = vld [vmem:[#allocation2 + $0x74] ss:$0 sps:$4 sm:$0x11]   ;;  %v1435_v25 = vsel %vm10991_vm10, %v1224_v10, %v1434_v60  ;;  %v1908_v23 = vrot.slane %v1906_v6, 1  ;;  %v821_v60 = vpop.permute.xlu0 %820 }
 0x1c9   : > { %3727 = vmatprep.mubr.bf16.mxu1 %v1902_v58  ;;  %v1233_v53 = vsel %vm10986_vm9, %v1225_v52, %v1232_v11  ;;  %v1439_v27 = vsel %vm10998_vm11, %v1234_v35, %v1438_v32  ;;  %1436 = vst [vmem:[#allocation2 + $0x90] sm:$0xf] %v1435_v25  ;;  %v1428_v45 = vsel %vm10991_vm10, %v1207_v15, %v1427_v0  ;;  %v2086_v42 = vrot.slane %v11230_v40, 1  ;;  %v823_v58 = vpop.permute.xlu1 %822  ;;  %v11312_v40 = vld [vmem:[#allocation2 + $0x7c] sm:$0xf] }
 0x1ca   : > { %1437 = vst [vmem:[#allocation2 + $0x94] sm:$0xf] %v1233_v53  ;;  %1440 = vst [vmem:[#allocation2 + $0x98] sm:$0x1] %v1439_v27  ;;  %v1216_v33 = vsel %vm10986_vm9, %v1208_v19, %v1215_v22  ;;  %v1432_v34 = vsel %vm10998_vm11, %v1217_v61, %v1431_v2  ;;  %v1909_v39 = vor.u32 %v1908_v23, %v1904_v4  ;;  %v1923_v57 = vshll.u32 %v11284_v9, 16 }
 0x1cb   : > { %1429 = vst [vmem:[#allocation2 + $0x84] sm:$0xf] %v1428_v45  ;;  %1430 = vst [vmem:[#allocation2 + $0x88] sm:$0xf] %v1216_v33  ;;  %v11304_v56 = vcombine.low %v1487_v12, %v11292_v31  ;;  %v8317_v43 = vcombine.low %v1525_v13, %v11258_v16  ;;  %v2089_v51 = vrot.slane %v11260_v20, 1  ;;  %v2087_v32 = vsel %vm2063_vm2, %v2085_v26, %v2086_v42 }
 0x1cc   : > { %1433 = vst [vmem:[#allocation2 + $0x8c] sm:$0x1] %v1432_v34  ;;  %v11310_v28 = vcombine.low %v1549_v36, %v1550_v37  ;;  %v1914_v59 = vsel %vm1806_vm1, %v1909_v39, %v1913_v8  ;;  %v11318_v20 = vld [vmem:[#allocation2 + $0x80] ss:$0 sps:$4 sm:$0x11]   ;;  %v1925_v0 = vrot.slane %v1923_v57, 1  ;;  %v11321_v2 = vcombine.low %v1551_v47, %v1552_v50 }
 0x1cd   : > { %v1916_v54 = vshrl.u32 %v11304_v56, 16  ;;  %v1918_v16 = vshll.u32 %v11304_v56, 16  ;;  %v2088_v63 = vrot.slane %v8317_v43, 1  ;;  %v869_v3 = vsel %vm442_vm0, %v10057_v38, %v823_v58  ;;  %v1526_v4 = vld [vmem:[#allocation2 + $0x6c] sm:$0xe] }
 0x1ce   : > { %v891_v6 = vsel %vm876_vm3, %v869_v3, 0  ;;  %v11329_v13 = vcombine.low %v1489_v48, %v11312_v40  ;;  %v1935_v15 = vshll.u32 %v11318_v20, 16  ;;  %v8318_v19 = vcombine.low %v1526_v4, %v11292_v31  ;;  %v1448_v23 = vld [vmem:[#allocation2 + $0xa8] sm:$0xf]  ;;  %v1452_v33 = vld [vmem:[#allocation2 + $0xb0] sm:$0x1] }
 0x1cf   : > { %3889 = vmatmul.mubr.bf16.gmra.mrb[44].mxu0 %v2087_v32  ;;  %v1920_v21 = vrot.slane %v1918_v16, 1  ;;  %v2090_v5 = vsel %vm2063_vm2, %v2088_v63, %v2089_v51  ;;  %v8271_v10 = vcombine.low %v891_v6, %v891_v6  ;;  %v8272_v52 = vcombine.high %v891_v6, %v891_v6  ;;  %v1441_v38 = vld [vmem:[#allocation2 + $0x9c] sm:$0xf]  ;;  %v1445_v39 = vld [vmem:[#allocation2 + $0xa4] sm:$0x1] }
 0x1d0   : > { %3728 = vmatmul.mubr.bf16.gmra.mrb[44].mxu1 %v11250_v7  ;;  %3896 = vmatprep.mubr.bf16.mxu0 %v11310_v28  ;;  %v866_v7 = vsel %vm442_vm0, %v10058_v55, %v821_v60  ;;  %v1928_v47 = vshrl.u32 %v11329_v13, 16  ;;  %v1930_v55 = vshll.u32 %v11329_v13, 16  ;;  %v1937_v57 = vrot.slane %v1935_v15, 1  ;;  %v1527_v48 = vld [vmem:[#allocation2 + $0x78] sm:$0xe] }
 0x1d1   : > { %3735 = vmatprep.mubr.bf16.mxu1 %v1914_v59  ;;  %v890_v8 = vsel %vm876_vm3, %v866_v7, 0  ;;  %v1921_v12 = vor.u32 %v1920_v21, %v1916_v54  ;;  %v1253_v22 = vshrl.u32 %v8271_v10, 16  ;;  %v1256_v61 = vshll.u32 %v8271_v10, 16  ;;  %v10071_v15 = vld [vmem:[%s10643_s13 + $0x78] sm:$0xff]  }
 0x1d2   : > { %v8269_v11 = vcombine.low %v890_v8, %v890_v8  ;;  %v8270_v35 = vcombine.high %v890_v8, %v890_v8  ;;  %v1261_v53 = vshrl.u32 %v8272_v52, 16  ;;  %v1264_v25 = vshll.u32 %v8272_v52, 16  ;;  %v1491_v32 = vld [vmem:[#allocation2 + $0x84] sm:$0xf]  ;;  %v11346_v21 = vld [vmem:[#allocation2 + $0x88] sm:$0xf] }
 0x1d3   : > { %v1926_v27 = vsel %vm1806_vm1, %v1921_v12, %v1925_v0  ;;  %v1255_v36 = vrot.slane %v1253_v22, 7  ;;  %v1932_v4 = vrot.slane %v1930_v55, 1  ;;  %v2091_v10 = vrot.slane %v8318_v19, 1  ;;  %v1553_v52 = vld [vmem:[#allocation2 + $0x84] sm:$0xf]  ;;  %v10072_v22 = vld [vmem:[%s10643_s13 + $0x70] sm:$0xff]  }
 0x1d4   : > { %v1236_v45 = vshrl.u32 %v8269_v11, 16  ;;  %v1239_v34 = vshll.u32 %v8269_v11, 16  ;;  %v1244_v26 = vshrl.u32 %v8270_v35, 16  ;;  %v1263_v37 = vrot.slane %v1261_v53, 7  ;;  %v1554_v11 = vld [vmem:[#allocation2 + $0x88] sm:$0xf] }
 0x1d5   : > { %v1247_v42 = vshll.u32 %v8270_v35, 16  ;;  %v1258_v43 = vor.u32 %v1256_v61, %v1255_v36  ;;  %v1259_v51 = vrot.slane %v1255_v36, 4  ;;  %v1933_v35 = vor.u32 %v1932_v4, %v1928_v47  ;;  %v1555_v19 = vld [vmem:[#allocation2 + $0x90] sm:$0xf]  ;;  %s8110_s13 = sshll.u32 %s13380_s16, 4  ;;  %s13446_s13 = int_to_ptr.vmem [resolvable:$true] %s8110_s13 }
 0x1d6   : > { %v1238_v31 = vrot.slane %v1236_v45, 7  ;;  %v1246_v50 = vrot.slane %v1244_v26, 7  ;;  %v1266_v58 = vor.u32 %v1264_v25, %v1263_v37  ;;  %v1268_v60 = vrot.slane %v1263_v37, 4  ;;  %v825_v45 = vpop.permute.xlu0 %824  ;;  %v11366_v36 = vld [vmem:[#allocation2 + $0x98] ss:$0 sps:$4 sm:$0x11]   ;;  %p10445_p0 = scmp.lt.s32.totalorder %s13446_s13, %s10443_s14 }
 0x1d7   : > { %3897 = vmatmul.mubr.bf16.gmra.mrb[48].mxu0 %v2090_v5  ;;  %v1449_v3 = vsel %vm10991_vm10, %v1258_v43, %v1448_v23  ;;  %v2092_v12 = vrot.slane %v11284_v9, 1  ;;  %v11358_v61 = vcombine.low %v1491_v32, %v11346_v21  ;;  %v8319_v25 = vcombine.low %v1527_v48, %v11312_v40  ;;  %v1556_v23 = vld [vmem:[#allocation2 + $0x94] sm:$0xf]  ;;  %v1493_v9 = vld [vmem:[#allocation2 + $0x90] sm:$0xf]  ;;  %s10438_s20 = scalar_lea.vmem %s13446_s13, 4096 }
 0x1d8   : > { %3736 = vmatmul.mubr.bf16.gmra.mrb[48].mxu1 %v11275_v49  ;;  %3904 = vmatprep.mubr.bf16.mxu0 %v11321_v2  ;;  %v1241_v59 = vor.u32 %v1239_v34, %v1238_v31  ;;  %v1242_v54 = vrot.slane %v1238_v31, 4  ;;  %v1249_v16 = vor.u32 %v1247_v42, %v1246_v50  ;;  %v1251_v63 = vrot.slane %v1246_v50, 4  ;;  %v11338_v49 = vld [vmem:[#allocation2 + $0x8c] ss:$0 sps:$4 sm:$0x11]   ;;  %p10439_p11 = scmp.ne.s32.totalorder %s13446_s13, %s10438_s20  ;;  %p10446_p1 = scmp.lt.s32.totalorder %s10444_s21, %s10438_s20 }
 0x1d9   : > { %3743 = vmatprep.mubr.bf16.mxu1 %v1926_v27  ;;  %v1267_v0 = vsel %vm10986_vm9, %v1259_v51, %v1266_v58  ;;  %v1453_v7 = vsel %vm10998_vm11, %v1268_v60, %v1452_v33  ;;  %1450 = vst [vmem:[#allocation2 + $0xa8] sm:$0xf] %v1449_v3  ;;  %v1947_v53 = vshll.u32 %v11338_v49, 16  ;;  %v2095_v27 = vrot.slane %v11318_v20, 1  ;;  %v827_v33 = vpop.permute.xlu1 %826  ;;  %v11377_v50 = vld [vmem:[#allocation2 + $0x94] sm:$0xf] }
 0x1da   : > { %1451 = vst [vmem:[#allocation2 + $0xac] sm:$0xf] %v1267_v0  ;;  %1454 = vst [vmem:[#allocation2 + $0xb0] sm:$0x1] %v1453_v7  ;;  %v1250_v5 = vsel %vm10986_vm9, %v1242_v54, %v1249_v16  ;;  %v1442_v6 = vsel %vm10991_vm10, %v1241_v59, %v1441_v38  ;;  %v1446_v8 = vsel %vm10998_vm11, %v1251_v63, %v1445_v39  ;;  %v1940_v40 = vshrl.u32 %v11358_v61, 16  ;;  %v11387_v0 = vpop.f32.mrb[16].mxu1  ;;  %p10440_p12 = pnand %p10439_p11, %p10585_p5  ;;  %p10447_p2 = por %p10446_p1, %p10445_p0 }
 0x1db   : > { %1443 = vst [vmem:[#allocation2 + $0x9c] sm:$0xf] %v1442_v6  ;;  %1444 = vst [vmem:[#allocation2 + $0xa0] sm:$0xf] %v1250_v5  ;;  %v2093_v34 = vsel %vm2063_vm2, %v2091_v10, %v2092_v12  ;;  %v11364_v26 = vcombine.low %v1553_v52, %v1554_v11  ;;  %v1938_v37 = vsel %vm1806_vm1, %v1933_v35, %v1937_v57  ;;  %v1942_v20 = vshll.u32 %v11358_v61, 16 }
 0x1dc   : > { %1447 = vst [vmem:[#allocation2 + $0xa4] sm:$0x1] %v1446_v8  ;;  %v2094_v38 = vrot.slane %v8319_v25, 1  ;;  %v1949_v39 = vrot.slane %v1947_v53, 1  ;;  %v11373_v42 = vcombine.low %v1555_v19, %v1556_v23  ;;  %v875_v47 = vsel %vm442_vm0, %v10071_v15, %v827_v33  ;;  %v1462_v8 = vld [vmem:[#allocation2 + $0xc0] sm:$0xf]  ;;  %p10441_p13 = pneg %p10440_p12 }
 0x1dd   : > { %v872_v31 = vsel %vm442_vm0, %v10072_v22, %v825_v45  ;;  %v1944_v55 = vrot.slane %v1942_v20, 1  ;;  %v893_v43 = vsel %vm876_vm3, %v875_v47, 0  ;;  %v11383_v54 = vcombine.low %v1493_v9, %v11377_v50  ;;  %v1466_v10 = vld [vmem:[#allocation2 + $0xc8] sm:$0x1]  ;;  %v1455_v22 = vld [vmem:[#allocation2 + $0xb4] sm:$0xf] }
 0x1de   : > { %v2096_v57 = vsel %vm2063_vm2, %v2094_v38, %v2095_v27  ;;  %v892_v51 = vsel %vm876_vm3, %v872_v31, 0  ;;  %v8275_v58 = vcombine.low %v893_v43, %v893_v43  ;;  %v8276_v60 = vcombine.high %v893_v43, %v893_v43  ;;  %v1459_v53 = vld [vmem:[#allocation2 + $0xbc] sm:$0x1]  ;;  %v11394_v20 = vpop.f32.mrb[17].mxu1  ;;  %p10448_p3 = pnand %p10447_p2, %p10441_p13 }
 0x1df   : > { %3905 = vmatmul.mubr.bf16.gmra.mrb[52].mxu0 %v2093_v34  ;;  %v8273_v32 = vcombine.low %v892_v51, %v892_v51  ;;  %v8274_v48 = vcombine.high %v892_v51, %v892_v51  ;;  %v1945_v59 = vor.u32 %v1944_v55, %v1940_v40  ;;  %v1959_v16 = vshll.u32 %v11366_v36, 16 }
 0x1e0   : > { %3744 = vmatmul.mubr.bf16.gmra.mrb[52].mxu1 %v11304_v56  ;;  %3912 = vmatprep.mubr.bf16.mxu0 %v11364_v26  ;;  %v1528_v56 = vld [vmem:[#allocation2 + $0x84] sm:$0xe]  ;;  %v1287_v3 = vshrl.u32 %v8275_v58, 16  ;;  %v1290_v7 = vshll.u32 %v8275_v58, 16  ;;  %v1295_v4 = vshrl.u32 %v8276_v60, 16  ;;  %v1298_v5 = vshll.u32 %v8276_v60, 16 }
 0x1e1   : > { %3751 = vmatprep.mubr.bf16.mxu1 %v1938_v37  ;;  %v8320_v63 = vcombine.low %v1528_v56, %v11346_v21  ;;  %v1950_v6 = vsel %vm1806_vm1, %v1945_v59, %v1949_v39  ;;  %v1270_v52 = vshrl.u32 %v8273_v32, 16  ;;  %v1273_v11 = vshll.u32 %v8273_v32, 16  ;;  %v1529_v56 = vld [vmem:[#allocation2 + $0x90] sm:$0xe] }
 0x1e2   : > { %v1278_v35 = vshrl.u32 %v8274_v48, 16  ;;  %v1289_v12 = vrot.slane %v1287_v3, 7  ;;  %v1297_v15 = vrot.slane %v1295_v4, 7  ;;  %v1281_v25 = vshll.u32 %v8274_v48, 16  ;;  %v1495_v40 = vld [vmem:[#allocation2 + $0x9c] sm:$0xf] }
 0x1e3   : > { %v1952_v21 = vshrl.u32 %v11383_v54, 16  ;;  %v1272_v27 = vrot.slane %v1270_v52, 7  ;;  %v1954_v23 = vshll.u32 %v11383_v54, 16  ;;  %v1961_v33 = vrot.slane %v1959_v16, 1  ;;  %v1496_v58 = vld [vmem:[#allocation2 + $0xa0] sm:$0xf] }
 0x1e4   : > { %v1280_v19 = vrot.slane %v1278_v35, 7  ;;  %v1292_v45 = vor.u32 %v1290_v7, %v1289_v12  ;;  %v1293_v34 = vrot.slane %v1289_v12, 4  ;;  %v1300_v9 = vor.u32 %v1298_v5, %v1297_v15  ;;  %v11396_v31 = vld [vmem:[#allocation2 + $0xa4] ss:$0 sps:$4 sm:$0x11]   ;;  %v11410_v7 = vpop.f32.mrb[18].mxu1 }
 0x1e5   : > { %v1302_v37 = vrot.slane %v1297_v15, 4  ;;  %v1275_v38 = vor.u32 %v1273_v11, %v1272_v27  ;;  %v1276_v39 = vrot.slane %v1272_v27, 4  ;;  %v1956_v51 = vrot.slane %v1954_v23, 1  ;;  %v1557_v16 = vld [vmem:[#allocation2 + $0x9c] sm:$0xf] }
 0x1e6   : > { %v1283_v47 = vor.u32 %v1281_v25, %v1280_v19  ;;  %v1301_v55 = vsel %vm10986_vm9, %v1293_v34, %v1300_v9  ;;  %v2097_v59 = vrot.slane %v8320_v63, 1  ;;  %v1558_v3 = vld [vmem:[#allocation2 + $0xa0] sm:$0xf]  ;;  %v2098_v5 = vrot.slane %v11338_v49, 1  ;;  %v1498_v52 = vld [vmem:[#allocation2 + $0xac] sm:$0xf] }
 0x1e7   : > { %3913 = vmatmul.mubr.bf16.gmra.mrb[56].mxu0 %v2096_v57  ;;  %v1463_v57 = vsel %vm10991_vm10, %v1292_v45, %v1462_v8  ;;  %v1467_v43 = vsel %vm10998_vm11, %v1302_v37, %v1466_v10  ;;  %1465 = vst [vmem:[#allocation2 + $0xc4] sm:$0xf] %v1301_v55  ;;  %v1456_v32 = vsel %vm10991_vm10, %v1275_v38, %v1455_v22  ;;  %v1971_v10 = vshll.u32 %v11396_v31, 16  ;;  %v1560_v23 = vld [vmem:[#allocation2 + $0xac] sm:$0xf] }
 0x1e8   : > { %3752 = vmatmul.mubr.bf16.gmra.mrb[56].mxu1 %v11329_v13  ;;  %3920 = vmatprep.mubr.bf16.mxu0 %v11373_v42  ;;  %v1285_v13 = vrot.slane %v1280_v19, 4  ;;  %1464 = vst [vmem:[#allocation2 + $0xc0] sm:$0xf] %v1463_v57  ;;  %1468 = vst [vmem:[#allocation2 + $0xc8] sm:$0x1] %v1467_v43  ;;  %v1284_v60 = vsel %vm10986_vm9, %v1276_v39, %v1283_v47  ;;  %v1957_v4 = vor.u32 %v1956_v51, %v1952_v21 }
 0x1e9   : > { %3759 = vmatprep.mubr.bf16.mxu1 %v1950_v6  ;;  %1457 = vst [vmem:[#allocation2 + $0xb4] sm:$0xf] %v1456_v32  ;;  %1458 = vst [vmem:[#allocation2 + $0xb8] sm:$0xf] %v1284_v60  ;;  %v1497_v6 = vld [vmem:[#allocation2 + $0xa8] sm:$0xf]  ;;  %v8290_v8 = vcombine.low %v1495_v40, %v1496_v58  ;;  %v2099_v11 = vsel %vm2063_vm2, %v2097_v59, %v2098_v5  ;;  %v11415_v35 = vcombine.low %v1557_v16, %v1558_v3 }
 0x1ea   : > { %v1460_v48 = vsel %vm10998_vm11, %v1285_v13, %v1459_v53  ;;  %v8321_v63 = vcombine.low %v1529_v56, %v11377_v50  ;;  %v1962_v12 = vsel %vm1806_vm1, %v1957_v4, %v1961_v33  ;;  %v11421_v49 = vcombine.low %v1497_v6, %v1498_v52  ;;  %v11423_v53 = vpop.f32.mrb[19].mxu1  ;;  %v1559_v50 = vld [vmem:[#allocation2 + $0xa8] sm:$0xf]  ;;  %v10090_v45 = vld [vmem:[#allocation2 + $0xb0] ss:$0 sps:$4 sm:$0x11]  }
 0x1eb   : > { %1461 = vst [vmem:[#allocation2 + $0xbc] sm:$0x1] %v1460_v48  ;;  %v1964_v15 = vshrl.u32 %v8290_v8, 16  ;;  %v1966_v22 = vshll.u32 %v8290_v8, 16  ;;  %v1973_v21 = vrot.slane %v1971_v10, 1  ;;  %v2101_v19 = vrot.slane %v11366_v36, 1 }
 0x1ec   : > { %v2100_v27 = vrot.slane %v8321_v63, 1  ;;  %v1978_v33 = vshll.u32 %v11421_v49, 16  ;;  %v1530_v34 = vld [vmem:[#allocation2 + $0x9c] sm:$0xe]  ;;  %v11431_v39 = vcombine.low %v1559_v50, %v1560_v23  ;;  %v1976_v36 = vshrl.u32 %v11421_v49, 16 }
 0x1ed   : > { %v1968_v25 = vrot.slane %v1966_v22, 1  ;;  %v8322_v47 = vcombine.low %v1530_v34, %v1496_v58  ;;  %v1983_v55 = vshll.u32 %v10090_v45, 16  ;;  %v2104_v58 = vrot.slane %v11396_v31, 1  ;;  %v1531_v60 = vld [vmem:[#allocation2 + $0xa8] sm:$0xe] }
 0x1ee   : > { %v2102_v38 = vsel %vm2063_vm2, %v2100_v27, %v2101_v19  ;;  %v1980_v56 = vrot.slane %v1978_v33, 1  ;;  %v1598_v16 = vld [vmem:[#allocation2 + $0x18] sm:$0xf]  ;;  %v1599_v3 = vld [vmem:[#allocation2 + $0x1c] sm:$0xf]  ;;  %v8323_v63 = vcombine.low %v1531_v60, %v1498_v52 }
 0x1ef   : > { %3921 = vmatmul.mubr.bf16.gmra.mrb[60].mxu0 %v2099_v11  ;;  %v2103_v51 = vrot.slane %v8322_v47, 1  ;;  %v1985_v48 = vrot.slane %v1983_v55, 1  ;;  %v1563_v27 = vld [vmem:[#allocation2 + $0xc0] sm:$0xf]  ;;  %v1564_v19 = vld [vmem:[#allocation2 + $0xc4] sm:$0xf] }
 0x1f0   : > { %3760 = vmatmul.mubr.bf16.gmra.mrb[60].mxu1 %v11358_v61  ;;  %3928 = vmatprep.mubr.bf16.mxu0 %v11415_v35  ;;  %v1969_v61 = vor.u32 %v1968_v25, %v1964_v15  ;;  %v1499_v9 = vld [vmem:[#allocation2 + $0xb4] sm:$0xf]  ;;  %v11428_v40 = vld [vmem:[#allocation2 + $0xb8] sm:$0xf]  ;;  %v1981_v32 = vor.u32 %v1980_v56, %v1976_v36  ;;  %v2106_v25 = vrot.slane %v8323_v63, 1 }
 0x1f1   : > { %3767 = vmatprep.mubr.bf16.mxu1 %v1962_v12  ;;  %v11434_v13 = vcombine.low %v1499_v9, %v11428_v40  ;;  %v1561_v59 = vld [vmem:[#allocation2 + $0xb4] sm:$0xf]  ;;  %v2105_v10 = vsel %vm2063_vm2, %v2103_v51, %v2104_v58  ;;  %v11449_v12 = vcombine.low %v1598_v16, %v1599_v3  ;;  %v10114_v52 = vld [vmem:[#allocation2 + $0x20] ss:$0 sps:$4 sm:$0x11]   ;;  %v2275_v58 = vshll.u32 %v11034_v29, 16 }
 0x1f2   : > { %v1974_v37 = vsel %vm1806_vm1, %v1969_v61, %v1973_v21  ;;  %v11439_v57 = vld [vmem:[#allocation2 + $0xbc] ss:$0 sps:$4 sm:$0x11]   ;;  %v1986_v31 = vsel %vm1806_vm1, %v1981_v32, %v1985_v48  ;;  %v2107_v21 = vrot.slane %v10090_v45, 1  ;;  %v1532_v50 = vld [vmem:[#allocation2 + $0xb4] sm:$0xe] }
 0x1f3   : > { %v1990_v43 = vshll.u32 %v11434_v13, 16  ;;  %v1988_v4 = vshrl.u32 %v11434_v13, 16  ;;  %v1995_v6 = vshll.u32 %v11439_v57, 16  ;;  %v2739_v23 = vshll.u32 %v11449_v12, 16  ;;  %v1581_v61 = vld [vmem:[#allocation2 + $0xc] sm:$0xe] }
 0x1f4   : > { %v1600_v33 = vld [vmem:[#allocation2 + $0x24] sm:$0xf]  ;;  %v1601_v34 = vld [vmem:[#allocation2 + $0x28] sm:$0xf]  ;;  %v2108_v9 = vsel %vm2063_vm2, %v2106_v25, %v2107_v21  ;;  %v10402_v47 = vld [vmem:[#allocation2 + $0x10] sm:$0xf] }
 0x1f5   : > { %v1992_v5 = vrot.slane %v1990_v43, 1  ;;  %v1997_v22 = vrot.slane %v1995_v6, 1  ;;  %v8357_v36 = vcombine.low %v1581_v61, %v10402_v47  ;;  %v10110_v45 = vld [vmem:[#allocation2 + $0x14] ss:$0 sps:$4 sm:$0x11]   ;;  %v2741_v56 = vrot.slane %v2739_v23, 1 }
 0x1f6   : > { %v11460_v55 = vcombine.low %v1600_v33, %v1601_v34  ;;  %v2737_v43 = vshrl.u32 %v11449_v12, 16  ;;  %v2744_v51 = vshll.u32 %v10114_v52, 16  ;;  %v10120_v32 = vld [vmem:[#allocation2 + $0x2c] ss:$0 sps:$4 sm:$0x11]   ;;  %v2277_v6 = vrot.slane %v2275_v58, 1 }
 0x1f7   : > { %3929 = vmatmul.mubr.bf16.gmra.mrb[64].mxu0 %v2102_v38  ;;  %v1993_v15 = vor.u32 %v1992_v5, %v1988_v4  ;;  %v8324_v38 = vcombine.low %v1532_v50, %v11428_v40  ;;  %v2110_v40 = vrot.slane %v11439_v57, 1  ;;  %v1582_v48 = vld [vmem:[#allocation2 + $0x18] sm:$0xe]  ;;  %v1602_v16 = vld [vmem:[#allocation2 + $0x30] sm:$0xf]  ;;  %v2756_v23 = vshll.u32 %v10120_v32, 16 }
 0x1f8   : > { %3768 = vmatmul.mubr.bf16.gmra.mrb[64].mxu1 %v11383_v54  ;;  %3936 = vmatprep.mubr.bf16.mxu0 %v11431_v39  ;;  %v1562_v54 = vld [vmem:[#allocation2 + $0xb8] sm:$0xf]  ;;  %v2751_v3 = vshll.u32 %v11460_v55, 16  ;;  %v11466_v4 = vld [vmem:[#allocation2 + $0x34] sm:$0xf]  ;;  %v2746_v5 = vrot.slane %v2744_v51, 1 }
 0x1f9   : > { %3775 = vmatprep.mubr.bf16.mxu1 %v1974_v37  ;;  %v11446_v11 = vcombine.low %v1561_v59, %v1562_v54  ;;  %v11455_v37 = vcombine.low %v1563_v27, %v1564_v19  ;;  %v2109_v60 = vrot.slane %v8324_v38, 1  ;;  %v2528_v59 = vrot.slane %v8357_v36, 1  ;;  %v10118_v25 = vld [vmem:[#allocation2 + $0x20] ss:$0 sps:$4 sm:$0x11]   ;;  %v10124_v34 = vld [vmem:[%s13497_s3 + $0x208] sm:$0xff]  }
 0x1fa   : > { %v2742_v54 = vor.u32 %v2741_v56, %v2737_v43  ;;  %v11474_v21 = vcombine.low %v1602_v16, %v11466_v4  ;;  %v2280_v27 = vshll.u32 %v10110_v45, 16  ;;  %v2749_v19 = vshrl.u32 %v11460_v55, 16  ;;  %v1583_v61 = vld [vmem:[#allocation2 + $0x24] sm:$0xe]  ;;  %v1604_v36 = vld [vmem:[#allocation2 + $0x3c] sm:$0xf] }
 0x1fb   : > { %v2753_v50 = vrot.slane %v2751_v3, 1  ;;  %v2758_v47 = vrot.slane %v2756_v23, 1  ;;  %v10404_v56 = vld [vmem:[#allocation2 + $0x28] sm:$0xf]  ;;  %v2285_v16 = vshrl.u32 %v11061_v62, 16  ;;  %v2292_v3 = vshll.u32 %v10118_v25, 16 }
 0x1fc   : > { %v2763_v33 = vshll.u32 %v11474_v21, 16  ;;  %v8359_v43 = vcombine.low %v1583_v61, %v10404_v56  ;;  %v10121_v51 = vld [vmem:[#allocation2 + $0x2c] ss:$0 sps:$4 sm:$0x11]   ;;  %v10406_v23 = vld [vmem:[#allocation2 + $0x34] sm:$0xf] }
 0x1fd   : > { %v2754_v38 = vor.u32 %v2753_v50, %v2749_v19  ;;  %v11484_v58 = vld [vmem:[#allocation2 + $0x38] ss:$0 sps:$4 sm:$0x11]   ;;  %v1606_v19 = vld [vmem:[#allocation2 + $0x48] sm:$0xf] }
 0x1fe   : > { %v11506_v50 = vld [vmem:[#allocation2 + $0x4c] sm:$0xf] }
 0x1ff   : > { %3937 = vmatmul.mubr.bf16.gmra.mrb[68].mxu0 %v2105_v10  ;;  %v10403_v10 = vld [vmem:[#allocation2 + $0x1c] sm:$0xf] }
 0x200   : > { %3776 = vmatmul.mubr.bf16.gmra.mrb[68].mxu1 %v8290_v8  ;;  %3944 = vmatprep.mubr.bf16.mxu0 %v11446_v11  ;;  %v1998_v8 = vsel %vm1806_vm1, %v1993_v15, %v1997_v22  ;;  %v8358_v63 = vcombine.low %v1582_v48, %v10403_v10  ;;  %v2273_v15 = vshrl.u32 %v11034_v29, 16  ;;  %v2747_v22 = vsel %vm1806_vm1, %v2742_v54, %v2746_v5 }
 0x201   : > { %3783 = vmatprep.mubr.bf16.mxu1 %v1986_v31  ;;  %v2111_v31 = vsel %vm2063_vm2, %v2109_v60, %v2110_v40  ;;  %v2287_v29 = vshll.u32 %v11061_v62, 16  ;;  %v2765_v48 = vrot.slane %v2763_v33, 1  ;;  %v2759_v54 = vsel %vm1806_vm1, %v2754_v38, %v2758_v47 }
 0x202   : > { %v2531_v52 = vrot.slane %v8358_v63, 1  ;;  %v2534_v5 = vrot.slane %v8359_v43, 1  ;;  %v2768_v10 = vshll.u32 %v11484_v58, 16  ;;  %v10131_v63 = vld [vmem:[%s13497_s3 + $0x210] sm:$0xff]   ;;  %v2304_v38 = vshll.u32 %v10121_v51, 16 }
 0x203   : > { %v2289_v40 = vrot.slane %v2287_v29, 1  ;;  %v11521_v43 = vcombine.low %v1606_v19, %v11506_v50  ;;  %v11541_v19 = vadd.f32 %v11394_v20, %v11387_v0  ;;  %v11552_v20 = vld [vmem:[#allocation2 + $0x5c] ss:$0 sps:$4 sm:$0x11]  }
 0x207   : > { %3945 = vmatmul.mubr.bf16.gmra.mrb[72].mxu0 %v2108_v9  ;;  %v2282_v9 = vrot.slane %v2280_v27, 1  ;;  %v2294_v27 = vrot.slane %v2292_v3, 1 }
 0x208   : > { %3784 = vmatmul.mubr.bf16.gmra.mrb[72].mxu1 %v11421_v49  ;;  %3952 = vmatprep.mubr.bf16.mxu0 %v11455_v37  ;;  %v2529_v49 = vrot.slane %v10110_v45, 1  ;;  %v11482_v45 = vld [vmem:[#allocation2 + $0x40] sm:$0xf] }
 0x209   : > { %3791 = vmatprep.mubr.bf16.mxu1 %v1998_v8  ;;  %v2532_v8 = vrot.slane %v10118_v25, 1 }
 0x20a   : > { %v2530_v57 = vsel %vm2063_vm2, %v2528_v59, %v2529_v49  ;;  %v11490_v59 = vcombine.low %v1604_v36, %v11482_v45  ;;  %v10405_v49 = vld [vmem:[%s13497_s3 + $0x200] sm:$0xff]  }
 0x20b   : > { %v2533_v32 = vsel %vm2063_vm2, %v2531_v52, %v2532_v8  ;;  %v2297_v52 = vshrl.u32 %v11115_v46, 16  ;;  %v11510_v8 = vld [vmem:[#allocation2 + $0x38] ss:$0 sps:$4 sm:$0x11]  }
 0x20c   : > { %v2775_v25 = vshll.u32 %v11490_v59, 16  ;;  %v2316_v0 = vshll.u32 %v11510_v8, 16 }
 0x20e   : > { %v2777_v56 = vrot.slane %v2775_v25, 1 }
 0x20f   : > { %3953 = vmatmul.mubr.bf16.gmra.mrb[76].mxu0 %v2111_v31  ;;  %v2299_v31 = vshll.u32 %v11115_v46, 16  ;;  %v2773_v46 = vshrl.u32 %v11490_v59, 16 }
 0x210   : > { %3792 = vmatmul.mubr.bf16.gmra.mrb[76].mxu1 %v11434_v13  ;;  %4154 = vmatprep.mubr.bf16.mxu0 %v2747_v22  ;;  %v2278_v13 = vor.u32 %v2277_v6, %v2273_v15  ;;  %v2535_v6 = vrot.slane %v10121_v51, 1  ;;  %v1584_v15 = vld [vmem:[#allocation2 + $0x30] sm:$0xe]  ;;  %v11503_v22 = vld [vmem:[#allocation2 + $0x44] ss:$0 sps:$4 sm:$0x11]  }
 0x211   : > { %3993 = vmatprep.mubr.bf16.mxu1 %v2530_v57  ;;  %v2290_v57 = vor.u32 %v2289_v40, %v2285_v16  ;;  %v8360_v29 = vcombine.low %v1584_v15, %v10406_v23  ;;  %v2780_v47 = vshll.u32 %v11503_v22, 16  ;;  %v2311_v51 = vshll.u32 %v11150_v30, 16  ;;  %v1585_v40 = vld [vmem:[#allocation2 + $0x3c] sm:$0xe]  ;;  %v1586_v15 = vld [vmem:[#allocation2 + $0x48] sm:$0xe] }
 0x212   : > { %v2283_v60 = vsel %vm1806_vm1, %v2278_v13, %v2282_v9  ;;  %v2536_v61 = vsel %vm2063_vm2, %v2534_v5, %v2535_v6  ;;  %v2770_v13 = vrot.slane %v2768_v10, 1  ;;  %v2301_v9 = vrot.slane %v2299_v31, 1  ;;  %v1608_v6 = vld [vmem:[#allocation2 + $0x54] sm:$0xf]  ;;  %v10407_v10 = vld [vmem:[#allocation2 + $0x40] sm:$0xf] }
 0x213   : > { %v2295_v33 = vsel %vm1806_vm1, %v2290_v57, %v2294_v27  ;;  %v2778_v16 = vor.u32 %v2777_v56, %v2773_v46  ;;  %v2782_v3 = vrot.slane %v2780_v47, 1  ;;  %v2787_v5 = vshll.u32 %v11521_v43, 16  ;;  %v10152_v27 = vld [vmem:[%s13497_s3 + $0x228] sm:$0xff]   ;;  %v1610_v46 = vld [vmem:[#allocation2 + $0x60] sm:$0xf] }
 0x214   : > { %v2313_v31 = vrot.slane %v2311_v51, 1  ;;  %v11558_v56 = vld [vmem:[#allocation2 + $0x64] sm:$0xf] }
 0x215   : > { %v2783_v23 = vsel %vm1806_vm1, %v2778_v16, %v2782_v3  ;;  %v1587_v16 = vld [vmem:[#allocation2 + $0x54] sm:$0xe]  ;;  %v2347_v3 = vshll.u32 %v11256_v18, 16 }
 0x217   : > { %4155 = vmatmul.mubr.bf16.vlgmr.msra.gmra.mrb[80].mxu0 %v11449_v12  ;;  %v2761_v12 = vshrl.u32 %v11474_v21, 16 }
 0x218   : > { %3994 = vmatmul.mubr.bf16.vlgmr.msra.gmra.mrb[80].mxu1 %v2283_v60  ;;  %4162 = vmatprep.mubr.bf16.mxu0 %v2759_v54  ;;  %v11524_v60 = vld [vmem:[#allocation2 + $0x50] ss:$0 sps:$4 sm:$0x11]   ;;  %v10145_v54 = vld [vmem:[%s13497_s3 + $0x220] sm:$0xff]  }
 0x219   : > { %9788 = vmatpush3.bf16.msra.mxu1 %v10405_v49  ;;  %4001 = vmatprep.mubr.bf16.mxu1 %v2533_v32  ;;  %v2766_v62 = vor.u32 %v2765_v48, %v2761_v12  ;;  %v2302_v32 = vor.u32 %v2301_v9, %v2297_v52  ;;  %v2306_v48 = vrot.slane %v2304_v38, 1  ;;  %v2537_v49 = vrot.slane %v8360_v29, 1  ;;  %v11531_v12 = vld [vmem:[#allocation2 + $0x58] sm:$0xf]  ;;  %v10408_v38 = vld [vmem:[#allocation2 + $0x4c] sm:$0xf] }
 0x21a   : > { %9789 = vmatprep.subr.bf16.mxu1 %v10124_v34  ;;  %v2792_v25 = vshll.u32 %v11524_v60, 16  ;;  %v10128_v29 = vld [vmem:[#allocation2 + $0x44] ss:$0 sps:$4 sm:$0x11]   ;;  %v11547_v52 = vcombine.low %v1608_v6, %v11531_v12  ;;  %v2309_v9 = vshrl.u32 %v11150_v30, 16  ;;  %v8362_v47 = vcombine.low %v1586_v15, %v10408_v38  ;;  %v10159_v30 = vld [vmem:[%s13497_s3 + $0x230] sm:$0xff]  }
 0x21b   : > { %v2771_v36 = vsel %vm1806_vm1, %v2766_v62, %v2770_v13  ;;  %v2307_v57 = vsel %vm1806_vm1, %v2302_v32, %v2306_v48  ;;  %v2789_v13 = vrot.slane %v2787_v5, 1  ;;  %v10132_v32 = vld [vmem:[#allocation2 + $0x50] ss:$0 sps:$4 sm:$0x11]   ;;  %v1588_v5 = vld [vmem:[#allocation2 + $0x60] sm:$0xe]  ;;  %v11568_v6 = vcombine.low %v1610_v46, %v11558_v56 }
 0x21c   : > { %v2799_v48 = vshll.u32 %v11547_v52, 16  ;;  %v11572_v15 = vld [vmem:[#allocation2 + $0x70] sm:$0xf] }
 0x21d   : > { %9790 = vmatpush3.bf16.msra.mxu1 %v10124_v34  ;;  %v10138_v34 = vld [vmem:[%s13497_s3 + $0x218] sm:$0xff]  }
 0x21e   : > { %9791 = vmatprep.subr.bf16.mxu1 %v10131_v63 }
 0x21f   : > { %4163 = vmatmul.mubr.bf16.gmra.mrb[84].mxu0 %v11460_v55  ;;  %v2538_v55 = vrot.slane %v11510_v8, 1  ;;  %v2541_v8 = vrot.slane %v10128_v29, 1 }
 0x220   : > { %4002 = vmatmul.mubr.bf16.gmra.mrb[84].mxu1 %v2295_v33  ;;  %4170 = vmatprep.mubr.bf16.mxu0 %v2771_v36  ;;  %v2323_v33 = vshll.u32 %v11202_v41, 16 }
 0x221   : > { %4009 = vmatprep.mubr.bf16.mxu1 %v2536_v61  ;;  %9792 = vmatpush3.bf16.msra.mxu1 %v10131_v63  ;;  %v8361_v63 = vcombine.low %v1585_v40, %v10407_v10  ;;  %v2539_v62 = vsel %vm2063_vm2, %v2537_v49, %v2538_v55  ;;  %v2785_v61 = vshrl.u32 %v11521_v43, 16  ;;  %v2794_v40 = vrot.slane %v2792_v25, 1 }
 0x222   : > { %9793 = vmatprep.subr.bf16.mxu1 %v10138_v34  ;;  %v2325_v49 = vrot.slane %v2323_v33, 1  ;;  %v2328_v55 = vshll.u32 %v10128_v29, 16  ;;  %v2797_v25 = vshrl.u32 %v11547_v52, 16  ;;  %v2544_v33 = vrot.slane %v10132_v32, 1 }
 0x223   : > { %v2540_v36 = vrot.slane %v8361_v63, 1  ;;  %v2790_v51 = vor.u32 %v2789_v13, %v2785_v61  ;;  %v2804_v63 = vshll.u32 %v11552_v20, 16  ;;  %v2543_v13 = vrot.slane %v8362_v47, 1  ;;  %v1614_v47 = vld [vmem:[#allocation2 + $0x78] sm:$0xf] }
 0x224   : > { %v2330_v61 = vrot.slane %v2328_v55, 1  ;;  %v2349_v55 = vrot.slane %v2347_v3, 1 }
 0x225   : > { %9794 = vmatpush3.bf16.msra.mxu1 %v10138_v34  ;;  %v2314_v34 = vor.u32 %v2313_v31, %v2309_v9  ;;  %v1612_v31 = vld [vmem:[#allocation2 + $0x6c] sm:$0xf]  ;;  %v11583_v9 = vld [vmem:[#allocation2 + $0x5c] ss:$0 sps:$4 sm:$0x11]  }
 0x226   : > { %9795 = vmatprep.subr.bf16.mxu1 %v10145_v54 }
 0x227   : > { %4171 = vmatmul.mubr.bf16.gmra.mrb[88].mxu0 %v11474_v21  ;;  %v11556_v21 = vadd.f32 %v11423_v53, %v11410_v7  ;;  %v2318_v7 = vrot.slane %v2316_v0, 1  ;;  %v2321_v53 = vshrl.u32 %v11202_v41, 16  ;;  %v10166_v41 = vld [vmem:[%s13497_s3 + $0x238] sm:$0xff]   ;;  %v2333_v0 = vshrl.u32 %v11211_v44, 16 }
 0x228   : > { %4010 = vmatmul.mubr.bf16.gmra.mrb[88].mxu1 %v2307_v57  ;;  %4178 = vmatprep.mubr.bf16.mxu0 %v2783_v23  ;;  %v2542_v57 = vsel %vm2063_vm2, %v2540_v36, %v2541_v8  ;;  %v11581_v23 = vld [vmem:[#allocation2 + $0x68] ss:$0 sps:$4 sm:$0x11]   ;;  %v10409_v36 = vld [vmem:[#allocation2 + $0x58] sm:$0xf] }
 0x229   : > { %4017 = vmatprep.mubr.bf16.mxu1 %v2539_v62  ;;  %9796 = vmatpush3.bf16.msra.mxu1 %v10145_v54  ;;  %v2335_v54 = vshll.u32 %v11211_v44, 16  ;;  %v2319_v10 = vsel %vm1806_vm1, %v2314_v34, %v2318_v7  ;;  %v2795_v62 = vsel %vm1806_vm1, %v2790_v51, %v2794_v40  ;;  %v2326_v29 = vor.u32 %v2325_v49, %v2321_v53  ;;  %v10410_v8 = vld [vmem:[#allocation2 + $0x64] sm:$0xf]  ;;  %v11590_v7 = vld [vmem:[#allocation2 + $0x68] ss:$0 sps:$4 sm:$0x11]  }
 0x22a   : > { %9797 = vmatprep.subr.bf16.mxu1 %v10152_v27  ;;  %v11588_v34 = vcombine.low %v1612_v31, %v11572_v15  ;;  %v8363_v46 = vcombine.low %v1587_v16, %v10409_v36  ;;  %v8364_v51 = vcombine.low %v1588_v5, %v10410_v8  ;;  %v2806_v40 = vrot.slane %v2804_v63, 1 }
 0x22b   : > { %v2337_v38 = vrot.slane %v2335_v54, 1  ;;  %v2816_v44 = vshll.u32 %v11581_v23, 16  ;;  %v2345_v49 = vshrl.u32 %v11256_v18, 16  ;;  %v11594_v54 = vld [vmem:[#allocation2 + $0x7c] sm:$0xf]  ;;  %v2331_v16 = vsel %vm1806_vm1, %v2326_v29, %v2330_v61 }
 0x22c   : > { %v2545_v5 = vsel %vm2063_vm2, %v2543_v13, %v2544_v33  ;;  %v2809_v31 = vshrl.u32 %v11568_v6, 16  ;;  %v1589_v18 = vld [vmem:[#allocation2 + $0x6c] sm:$0xe]  ;;  %v11606_v29 = vcombine.low %v1614_v47, %v11594_v54  ;;  %v10411_v47 = vld [vmem:[#allocation2 + $0x70] sm:$0xf] }
 0x22d   : > { %9798 = vmatpush3.bf16.msra.mxu1 %v10152_v27  ;;  %v2801_v27 = vrot.slane %v2799_v48, 1  ;;  %v2340_v48 = vshll.u32 %v10132_v32, 16  ;;  %v2352_v32 = vshll.u32 %v11583_v9, 16  ;;  %v2338_v63 = vor.u32 %v2337_v38, %v2333_v0  ;;  %v11610_v38 = vld [vmem:[#allocation2 + $0x80] ss:$0 sps:$4 sm:$0x11]  }
 0x22e   : > { %9799 = vmatprep.subr.bf16.mxu1 %v10159_v30  ;;  %v2818_v13 = vrot.slane %v2816_v44, 1  ;;  %v2350_v33 = vor.u32 %v2349_v55, %v2345_v49  ;;  %v2549_v0 = vrot.slane %v8364_v51, 1  ;;  %v8365_v51 = vcombine.low %v1589_v18, %v10411_v47  ;;  %v11622_v55 = vld [vmem:[#allocation2 + $0x7c] sm:$0xf] }
 0x22f   : > { %4179 = vmatmul.mubr.bf16.gmra.mrb[92].mxu0 %v11490_v59  ;;  %v2811_v59 = vshll.u32 %v11568_v6, 16  ;;  %v2802_v53 = vor.u32 %v2801_v27, %v2797_v25  ;;  %v2342_v3 = vrot.slane %v2340_v48, 1  ;;  %v2546_v25 = vrot.slane %v8363_v46, 1  ;;  %v1649_v47 = vld [vmem:[#allocation2 + $0x3c] sm:$0xe] }
 0x230   : > { %4018 = vmatmul.mubr.bf16.gmra.mrb[92].mxu1 %v2319_v10  ;;  %4186 = vmatprep.mubr.bf16.mxu0 %v2795_v62  ;;  %v11600_v10 = vld [vmem:[#allocation2 + $0x74] ss:$0 sps:$4 sm:$0x11]   ;;  %v2823_v62 = vshll.u32 %v11588_v34, 16  ;;  %v2547_v27 = vrot.slane %v11583_v9, 1  ;;  %v2550_v9 = vrot.slane %v11590_v7, 1 }
 0x231   : > { %4025 = vmatprep.mubr.bf16.mxu1 %v2542_v57  ;;  %9800 = vmatpush3.bf16.msra.mxu1 %v10159_v30  ;;  %v2359_v30 = vshll.u32 %v11267_v1, 16  ;;  %v2813_v57 = vrot.slane %v2811_v59, 1  ;;  %v2807_v61 = vsel %vm1806_vm1, %v2802_v53, %v2806_v40  ;;  %v11612_v59 = vld [vmem:[#allocation2 + $0x78] sm:$0xe]  ;;  %v2828_v36 = vshll.u32 %v11600_v10, 16 }
 0x232   : > { %9801 = vmatprep.subr.bf16.mxu1 %v10166_v41  ;;  %v2357_v46 = vshrl.u32 %v11267_v1, 16  ;;  %v2825_v40 = vrot.slane %v2823_v62, 1  ;;  %v11618_v53 = vld [vmem:[#allocation2 + $0x74] ss:$0 sps:$4 sm:$0x11]   ;;  %v2835_v44 = vshll.u32 %v11606_v29, 16  ;;  %v2343_v1 = vsel %vm1806_vm1, %v2338_v63, %v2342_v3 }
 0x233   : > { %v2814_v8 = vor.u32 %v2813_v57, %v2809_v31  ;;  %v2361_v48 = vrot.slane %v2359_v30, 1  ;;  %v11628_v31 = vld [vmem:[#allocation2 + $0x88] sm:$0xf]  ;;  %v11634_v57 = vsel %vm2063_vm2, %v2549_v0, %v2550_v9  ;;  %v2364_v62 = vshll.u32 %v11590_v7, 16 }
 0x234   : > { %v2840_v18 = vshll.u32 %v11610_v38, 16  ;;  %v2830_v3 = vrot.slane %v2828_v36, 1  ;;  %v11641_v49 = vrot.slane %v8365_v51, 1  ;;  %v2833_v0 = vshrl.u32 %v11606_v29, 16  ;;  %v1652_v51 = vld [vmem:[#allocation2 + $0x60] sm:$0xe] }
 0x235   : > { %9802 = vmatpush3.bf16.msra.mxu1 %v10166_v41  ;;  %v2354_v41 = vrot.slane %v2352_v32, 1  ;;  %v1616_v32 = vld [vmem:[#allocation2 + $0x84] sm:$0xf]  ;;  %v2999_v9 = vrot.slane %v11484_v58, 1  ;;  %v8408_v36 = vcombine.low %v1649_v47, %v11482_v45 }
 0x236   : > { %v11647_v7 = vcombine.low %v1616_v32, %v11628_v31  ;;  %v11666_v32 = vld [vmem:[#allocation2 + $0xa4] ss:$0 sps:$4 sm:$0x11]   ;;  %v11671_v47 = vld [vmem:[#allocation2 + $0xb0] ss:$0 sps:$4 sm:$0x11]  }
 0x237   : > { %4187 = vmatmul.mubr.bf16.gmra.mrb[96].mxu0 %v11521_v43  ;;  %v2821_v43 = vshrl.u32 %v11588_v34, 16  ;;  %v11631_v30 = vsel %vm1806_vm1, %v2350_v33, %v2354_v41  ;;  %v2553_v33 = vrot.slane %v11618_v53, 1  ;;  %v2837_v41 = vrot.slane %v2835_v44, 1  ;;  %v11661_v44 = vld [vmem:[#allocation2 + $0x98] ss:$0 sps:$4 sm:$0x11]  }
 0x238   : > { %4026 = vmatmul.mubr.bf16.gmra.mrb[96].mxu1 %v2331_v16  ;;  %4194 = vmatprep.mubr.bf16.mxu0 %v2807_v61  ;;  %v1648_v61 = vld [vmem:[#allocation2 + $0x30] sm:$0xe]  ;;  %v2819_v16 = vsel %vm1806_vm1, %v2814_v8, %v2818_v13  ;;  %v11652_v8 = vrot.slane %v2364_v62, 1  ;;  %v3001_v45 = vrot.slane %v8408_v36, 1 }
 0x239   : > { %4033 = vmatprep.mubr.bf16.mxu1 %v2545_v5  ;;  %v2548_v5 = vsel %vm2063_vm2, %v2546_v25, %v2547_v27  ;;  %v2826_v63 = vor.u32 %v2825_v40, %v2821_v43  ;;  %v11639_v25 = vor.u32 %v2361_v48, %v2357_v46  ;;  %v1650_v27 = vld [vmem:[#allocation2 + $0x48] sm:$0xe]  ;;  %v8407_v13 = vcombine.low %v1648_v61, %v11466_v4  ;;  %v1651_v46 = vld [vmem:[#allocation2 + $0x54] sm:$0xe]  ;;  %v1656_v36 = vld [vmem:[#allocation2 + $0x90] sm:$0xe] }
 0x23a   : > { %v11654_v43 = vrot.slane %v2840_v18, 1  ;;  %v11656_v40 = vld [vmem:[#allocation2 + $0x8c] ss:$0 sps:$4 sm:$0x11]   ;;  %v8409_v48 = vcombine.low %v1650_v27, %v11506_v50  ;;  %v8410_v18 = vcombine.low %v1651_v46, %v11531_v12  ;;  %v1654_v50 = vld [vmem:[#allocation2 + $0x78] sm:$0xe] }
 0x23b   : > { %v2831_v4 = vsel %vm1806_vm1, %v2826_v63, %v2830_v3  ;;  %v2998_v58 = vrot.slane %v8407_v13, 1  ;;  %v8411_v3 = vcombine.low %v1652_v51, %v11558_v56  ;;  %v1655_v27 = vld [vmem:[#allocation2 + $0x84] sm:$0xe]  ;;  %v11687_v46 = vld [vmem:[#allocation2 + $0xc8] ss:$0 sps:$4 sm:$0x11]  }
 0x23c   : > { %v3004_v62 = vrot.slane %v8409_v48, 1  ;;  %v8413_v48 = vcombine.low %v1654_v50, %v11594_v54  ;;  %v3017_v56 = vrot.slane %v11610_v38, 1  ;;  %v1657_v51 = vld [vmem:[#allocation2 + $0x9c] sm:$0xe]  ;;  %v2845_v61 = vshrl.u32 %v11647_v7, 16 }
 0x23d   : > { %v11674_v63 = vsel %vm2063_vm2, %v2998_v58, %v2999_v9  ;;  %v3010_v9 = vrot.slane %v8411_v3, 1  ;;  %v1619_v58 = vld [vmem:[#allocation2 + $0x94] sm:$0xf]  ;;  %v3026_v3 = vrot.slane %v11666_v32, 1 }
 0x23e   : > { %v3016_v38 = vrot.slane %v8413_v48, 1 }
 0x23f   : > { %4195 = vmatmul.mubr.bf16.gmra.mrb[100].mxu0 %v11547_v52  ;;  %v3002_v52 = vrot.slane %v11503_v22, 1  ;;  %v3008_v22 = vrot.slane %v11552_v20, 1  ;;  %v3007_v20 = vrot.slane %v8410_v18, 1  ;;  %v3023_v18 = vrot.slane %v11661_v44, 1 }
 0x240   : > { %4034 = vmatmul.mubr.bf16.gmra.mrb[100].mxu1 %v2343_v1  ;;  %4202 = vmatprep.mubr.bf16.mxu0 %v2819_v16  ;;  %v3005_v1 = vrot.slane %v11524_v60, 1  ;;  %v1653_v16 = vld [vmem:[#allocation2 + $0x6c] sm:$0xe] }
 0x241   : > { %4041 = vmatprep.mubr.bf16.mxu1 %v2548_v5  ;;  %v11664_v5 = vor.u32 %v2837_v41, %v2833_v0  ;;  %v11677_v60 = vsel %vm2063_vm2, %v3001_v45, %v3002_v52  ;;  %v11680_v0 = vld [vmem:[#allocation2 + $0xbc] ss:$0 sps:$4 sm:$0x11]   ;;  %v3011_v41 = vrot.slane %v11581_v23, 1  ;;  %v8412_v13 = vcombine.low %v1653_v16, %v11572_v15  ;;  %v1658_v16 = vld [vmem:[#allocation2 + $0xa8] sm:$0xe] }
 0x242   : > { %v11683_v12 = vsel %vm2063_vm2, %v3004_v62, %v3005_v1  ;;  %v3014_v52 = vrot.slane %v11600_v10, 1  ;;  %v11693_v45 = vsel %vm2063_vm2, %v3007_v20, %v3008_v22  ;;  %v8414_v23 = vcombine.low %v1655_v27, %v11628_v31  ;;  %v11699_v10 = vld [vmem:[#allocation2 + $0xa0] sm:$0xf]  ;;  %v1659_v22 = vld [vmem:[#allocation2 + $0xb4] sm:$0xe] }
 0x243   : > { %v3013_v1 = vrot.slane %v8412_v13, 1  ;;  %v3020_v15 = vrot.slane %v11656_v40, 1  ;;  %v11702_v54 = vsel %vm2063_vm2, %v3010_v9, %v3011_v41  ;;  %v8415_v62 = vcombine.low %v1656_v36, %v1619_v58  ;;  %v11706_v31 = vld [vmem:[#allocation2 + $0xac] sm:$0xf]  ;;  %v1660_v27 = vld [vmem:[#allocation2 + $0xc0] sm:$0xe] }
 0x244   : > { %v11713_v20 = vld [vmem:[#allocation2 + $0xb8] sm:$0xf]  ;;  %v11716_v41 = vsel %vm2063_vm2, %v3016_v38, %v3017_v56  ;;  %v11720_v36 = vld [vmem:[#allocation2 + $0xc4] sm:$0xf]  ;;  %v2554_v38 = vsel %vm2063_vm2, %v11641_v49, %v2553_v33  ;;  %v2367_v49 = vsel %vm1806_vm1, %v11639_v25, %v11652_v8 }
 0x245   : > { %v11709_v50 = vsel %vm2063_vm2, %v3013_v1, %v3014_v52  ;;  %v3022_v13 = vrot.slane %v8415_v62, 1  ;;  %v8418_v48 = vcombine.low %v1659_v22, %v11713_v20  ;;  %v1618_v62 = vld [vmem:[#allocation2 + $0x90] sm:$0xf]  ;;  %v10146_v33 = vld [vmem:[#allocation2 + $0x80] ss:$0 sps:$4 sm:$0x11]  }
 0x246   : > { %v1591_v8 = vld [vmem:[#allocation2 + $0x84] sm:$0xe] }
 0x247   : > { %4203 = vmatmul.mubr.bf16.gmra.mrb[104].mxu0 %v11568_v6  ;;  %v8416_v6 = vcombine.low %v1657_v51, %v11699_v10  ;;  %v3032_v51 = vrot.slane %v11680_v0, 1  ;;  %v11728_v1 = vsel %vm2063_vm2, %v3022_v13, %v3023_v18  ;;  %v13523_v18 = vshll.u32 %v11310_v28, 16 }
 0x248   : > { %4042 = vmatmul.mubr.bf16.gmra.mrb[104].mxu1 %v11631_v30  ;;  %4210 = vmatprep.mubr.bf16.mxu0 %v2831_v4  ;;  %v3019_v30 = vrot.slane %v8414_v23, 1  ;;  %v3029_v4 = vrot.slane %v11671_v47, 1  ;;  %v8419_v23 = vcombine.low %v1660_v27, %v11720_v36  ;;  %v2376_v13 = vshll.u32 %v11618_v53, 16 }
 0x249   : > { %4049 = vmatprep.mubr.bf16.mxu1 %v11634_v57  ;;  %v8417_v57 = vcombine.low %v1658_v16, %v11706_v31  ;;  %v3025_v52 = vrot.slane %v8416_v6, 1  ;;  %v3035_v16 = vrot.slane %v11687_v46, 1  ;;  %v2373_v6 = vrot.slane %v13523_v18, 1 }
 0x24a   : > { %v11723_v9 = vsel %vm2063_vm2, %v3019_v30, %v3020_v15  ;;  %v2369_v15 = vshrl.u32 %v11310_v28, 16  ;;  %v3031_v30 = vrot.slane %v8418_v48, 1  ;;  %v2843_v28 = vsel %vm1806_vm1, %v11664_v5, %v11654_v43 }
 0x24b   : > { %v3028_v56 = vrot.slane %v8417_v57, 1  ;;  %v11738_v22 = vsel %vm2063_vm2, %v3025_v52, %v3026_v3  ;;  %v3034_v57 = vrot.slane %v8419_v23, 1  ;;  %v2852_v3 = vshll.u32 %v11656_v40, 16 }
 0x24c   : > { %v11752_v52 = vsel %vm2063_vm2, %v3031_v30, %v3032_v51  ;;  %v13524_v53 = vshll.u32 %v11647_v7, 16  ;;  %v11760_v48 = vcombine.low %v1618_v62, %v1619_v58  ;;  %v2383_v40 = vshll.u32 %v11321_v2, 16  ;;  %v1661_v30 = vld [vmem:[#allocation2 + $0xcc] sm:$0xe] }
 0x24d   : > { %v11744_v27 = vsel %vm2063_vm2, %v3028_v56, %v3029_v4  ;;  %v11763_v25 = vsel %vm2063_vm2, %v3034_v57, %v3035_v16  ;;  %v2374_v51 = vor.u32 %v2373_v6, %v2369_v15  ;;  %v11766_v56 = vld [vmem:[#allocation2 + $0xd0] sm:$0xf]  ;;  %v2378_v23 = vrot.slane %v2376_v13, 1  ;;  %v10413_v15 = vld [vmem:[#allocation2 + $0x88] sm:$0xf] }
 0x24e   : > { %v2849_v4 = vrot.slane %v13524_v53, 1  ;;  %v13525_v43 = vcombine.low %v11612_v59, %v11622_v55  ;;  %v2556_v58 = vrot.slane %v10146_v33, 1  ;;  %v2854_v62 = vrot.slane %v2852_v3, 1  ;;  %v10149_v3 = vld [vmem:[#allocation2 + $0x8c] ss:$0 sps:$4 sm:$0x11]  }
 0x24f   : > { %4211 = vmatmul.mubr.bf16.gmra.mrb[108].mxu0 %v11588_v34  ;;  %v11768_v34 = vld [vmem:[#allocation2 + $0xd4] ss:$0 sps:$4 sm:$0x11]   ;;  %v2859_v18 = vshll.u32 %v11760_v48, 16  ;;  %v8367_v6 = vcombine.low %v1591_v8, %v10413_v15  ;;  %v2385_v13 = vrot.slane %v2383_v40, 1  ;;  %v2388_v53 = vshll.u32 %v10146_v33, 16 }
 0x250   : > { %4050 = vmatmul.mubr.bf16.gmra.mrb[108].mxu1 %v2367_v49  ;;  %4218 = vmatprep.mubr.bf16.mxu0 %v2843_v28  ;;  %v2555_v5 = vrot.slane %v13525_v43, 1  ;;  %v2850_v16 = vor.u32 %v2849_v4, %v2845_v61  ;;  %v3038_v57 = vrot.slane %v11768_v34, 1  ;;  %v1620_v49 = vld [vmem:[#allocation2 + $0x9c] sm:$0xf]  ;;  %v2381_v28 = vshrl.u32 %v11321_v2, 16 }
 0x251   : > { %4057 = vmatprep.mubr.bf16.mxu1 %v2554_v38  ;;  %v8420_v38 = vcombine.low %v1661_v30, %v11766_v56  ;;  %v2379_v59 = vsel %vm1806_vm1, %v2374_v51, %v2378_v23  ;;  %v2857_v61 = vshrl.u32 %v11760_v48, 16  ;;  %v2864_v4 = vshll.u32 %v11661_v44, 16 }
 0x252   : > { %v2557_v55 = vsel %vm2063_vm2, %v2555_v5, %v2556_v58  ;;  %v2855_v8 = vsel %vm1806_vm1, %v2850_v16, %v2854_v62  ;;  %v2861_v43 = vrot.slane %v2859_v18, 1  ;;  %v11784_v2 = vcombine.low %v1620_v49, %v11699_v10  ;;  %v1592_v5 = vld [vmem:[#allocation2 + $0x90] sm:$0xe]  ;;  %v1622_v16 = vld [vmem:[#allocation2 + $0xa8] sm:$0xf] }
 0x253   : > { %v3037_v24 = vrot.slane %v8420_v38, 1  ;;  %v2386_v40 = vor.u32 %v2385_v13, %v2381_v28  ;;  %v2390_v51 = vrot.slane %v2388_v53, 1  ;;  %v2395_v23 = vshll.u32 %v11364_v26, 16  ;;  %v10414_v18 = vld [vmem:[#allocation2 + $0x94] sm:$0xf] }
 0x254   : > { %v2558_v44 = vrot.slane %v8367_v6, 1  ;;  %v2559_v58 = vrot.slane %v10149_v3, 1  ;;  %v2862_v30 = vor.u32 %v2861_v43, %v2857_v61  ;;  %v2871_v62 = vshll.u32 %v11784_v2, 16  ;;  %v10153_v28 = vld [vmem:[#allocation2 + $0x98] ss:$0 sps:$4 sm:$0x11]  }
 0x255   : > { %v11787_v33 = vsel %vm2063_vm2, %v3037_v24, %v3038_v57  ;;  %v8368_v10 = vcombine.low %v1592_v5, %v10414_v18  ;;  %v2391_v38 = vsel %vm1806_vm1, %v2386_v40, %v2390_v51  ;;  %v2393_v24 = vshrl.u32 %v11364_v26, 16  ;;  %v1593_v61 = vld [vmem:[#allocation2 + $0x9c] sm:$0xe] }
 0x256   : > { %v2560_v57 = vsel %vm2063_vm2, %v2558_v44, %v2559_v58  ;;  %v2397_v15 = vrot.slane %v2395_v23, 1  ;;  %v2400_v49 = vshll.u32 %v10149_v3, 16  ;;  %v2876_v13 = vshll.u32 %v11666_v32, 16  ;;  %v10415_v58 = vld [vmem:[#allocation2 + $0xa0] sm:$0xf] }
 0x257   : > { %4219 = vmatmul.mubr.bf16.gmra.mrb[112].mxu0 %v11606_v29  ;;  %v2866_v29 = vrot.slane %v2864_v4, 1  ;;  %v2869_v53 = vshrl.u32 %v11784_v2, 16  ;;  %v2407_v26 = vshll.u32 %v11373_v42, 16  ;;  %v2561_v32 = vrot.slane %v8368_v10, 1 }
 0x258   : > { %4058 = vmatmul.mubr.bf16.gmra.mrb[112].mxu1 %v2379_v59  ;;  %4226 = vmatprep.mubr.bf16.mxu0 %v2855_v8  ;;  %v2873_v59 = vrot.slane %v2871_v62, 1  ;;  %v2398_v4 = vor.u32 %v2397_v15, %v2393_v24  ;;  %v2402_v8 = vrot.slane %v2400_v49, 1  ;;  %v2562_v43 = vrot.slane %v10153_v28, 1  ;;  %v1624_v62 = vld [vmem:[#allocation2 + $0xb4] sm:$0xf] }
 0x259   : > { %4065 = vmatprep.mubr.bf16.mxu1 %v2557_v55  ;;  %v2867_v6 = vsel %vm1806_vm1, %v2862_v30, %v2866_v29  ;;  %v11799_v55 = vcombine.low %v1622_v16, %v11706_v31  ;;  %v2878_v23 = vrot.slane %v2876_v13, 1  ;;  %v8369_v30 = vcombine.low %v1593_v61, %v10415_v58  ;;  %v10156_v24 = vld [vmem:[#allocation2 + $0xa4] ss:$0 sps:$4 sm:$0x11]  }
 0x25a   : > { %v2874_v51 = vor.u32 %v2873_v59, %v2869_v53  ;;  %v2405_v18 = vshrl.u32 %v11373_v42, 16  ;;  %v2409_v10 = vrot.slane %v2407_v26, 1  ;;  %v2563_v49 = vsel %vm2063_vm2, %v2561_v32, %v2562_v43  ;;  %v11829_v58 = vld [vmem:[#allocation2 + $0xb0] ss:$0 sps:$4 sm:$0x11]  }
 0x25b   : > { %v2883_v44 = vshll.u32 %v11799_v55, 16  ;;  %v2888_v13 = vshll.u32 %v11671_v47, 16  ;;  %v2881_v53 = vshrl.u32 %v11799_v55, 16  ;;  %v2565_v61 = vrot.slane %v10156_v24, 1  ;;  %v1594_v47 = vld [vmem:[#allocation2 + $0xa8] sm:$0xe] }
 0x25c   : > { %v2410_v59 = vor.u32 %v2409_v10, %v2405_v18 }
 0x25d   : > { %v2885_v42 = vrot.slane %v2883_v44, 1  ;;  %v2417_v44 = vshrl.u32 %v11415_v35, 16 }
 0x25f   : > { %4227 = vmatmul.mubr.bf16.gmra.mrb[116].mxu0 %v11647_v7  ;;  %v11805_v7 = vld [vmem:[%s13498_s4] ss:$0 sm:$0xff] }
 0x260   : > { %4066 = vmatmul.mubr.bf16.gmra.mrb[116].mxu1 %v2391_v38  ;;  %4234 = vmatprep.mubr.bf16.mxu0 %v2867_v6  ;;  %v2412_v38 = vshll.u32 %v10153_v28, 16  ;;  %v3674_v15 = vadd.f32 %v11541_v19, %v11805_v7  ;;  %v2879_v6 = vsel %vm1806_vm1, %v2874_v51, %v2878_v23  ;;  %v11818_v28 = vcombine.low %v1624_v62, %v11713_v20  ;;  %v1626_v20 = vld [vmem:[#allocation2 + $0xc0] sm:$0xf] }
 0x261   : > { %4073 = vmatprep.mubr.bf16.mxu1 %v2560_v57  ;;  %v2403_v57 = vsel %vm1806_vm1, %v2398_v4, %v2402_v8  ;;  %v2564_v19 = vrot.slane %v8369_v30, 1  ;;  %v2890_v8 = vrot.slane %v2888_v13, 1  ;;  %v3677_v43 = vadd.f32 %v11556_v21, %v11805_v7 }
 0x262   : > { %v2414_v26 = vrot.slane %v2412_v38, 1  ;;  %v2895_v32 = vshll.u32 %v11818_v28, 16  ;;  %v2424_v30 = vshll.u32 %v10156_v24, 16  ;;  %v2893_v10 = vshrl.u32 %v11818_v28, 16 }
 0x263   : > { %v8931_v3 = vpop.f32.mrb[16].mxu0  ;;  %v2431_v24 = vshll.u32 %v11431_v39, 16 }
 0x264   : > { %v8932_v40 = vpop.f32.mrb[17].mxu0  ;;  %v2415_v23 = vsel %vm1806_vm1, %v2410_v59, %v2414_v26  ;;  %v2897_v38 = vrot.slane %v2895_v32, 1  ;;  %v1628_v59 = vld [vmem:[#allocation2 + $0xcc] sm:$0xf] }
 0x265   : > { %v8933_v31 = vadd.f32 %v8932_v40, %v8931_v3  ;;  %v8934_v5 = vpop.f32.mrb[18].mxu0  ;;  %v2419_v3 = vshll.u32 %v11415_v35, 16  ;;  %v10416_v40 = vld [vmem:[#allocation2 + $0xac] sm:$0xf] }
 0x266   : > { %v8935_v29 = vpop.f32.mrb[19].mxu0  ;;  %v8370_v51 = vcombine.low %v1594_v47, %v10416_v40  ;;  %v10417_v47 = vld [vmem:[#allocation2 + $0xb8] sm:$0xf]  ;;  %v2429_v40 = vshrl.u32 %v11431_v39, 16 }
 0x267   : > { %v8936_v16 = vadd.f32 %v8935_v29, %v8934_v5  ;;  %4235 = vmatmul.mubr.bf16.gmra.mrb[120].mxu0 %v11760_v48  ;;  %v11821_v4 = vadd.f32 %v8933_v31, %v3674_v15  ;;  %v2886_v48 = vor.u32 %v2885_v42, %v2881_v53  ;;  %v2566_v5 = vsel %vm2063_vm2, %v2564_v19, %v2565_v61 }
 0x268   : > { %4074 = vmatmul.mubr.bf16.gmra.mrb[120].mxu1 %v2403_v57  ;;  %4242 = vmatprep.mubr.bf16.mxu0 %v2879_v6  ;;  %v2421_v31 = vrot.slane %v2419_v3, 1  ;;  %v2900_v29 = vshll.u32 %v11680_v0, 16  ;;  %v11838_v57 = vcombine.low %v1626_v20, %v11720_v36  ;;  %v1595_v0 = vld [vmem:[#allocation2 + $0xb4] sm:$0xe]  ;;  %v2426_v42 = vrot.slane %v2424_v30, 1 }
 0x269   : > { %4081 = vmatprep.mubr.bf16.mxu1 %v2563_v49  ;;  %v11832_v62 = vadd.f32 %v8936_v16, %v3677_v43  ;;  %v2891_v21 = vsel %vm1806_vm1, %v2886_v48, %v2890_v8  ;;  %v2567_v49 = vrot.slane %v8370_v51, 1  ;;  %v2898_v36 = vor.u32 %v2897_v38, %v2893_v10 }
 0x26a   : > { %v2422_v53 = vor.u32 %v2421_v31, %v2417_v44  ;;  %v2902_v61 = vrot.slane %v2900_v29, 1  ;;  %v2907_v3 = vshll.u32 %v11838_v57, 16  ;;  %v8371_v48 = vcombine.low %v1595_v0, %v10417_v47  ;;  %v10163_v29 = vld [vmem:[#allocation2 + $0xbc] ss:$0 sps:$4 sm:$0x11]  }
 0x26b   : > { %v2433_v51 = vrot.slane %v2431_v24, 1  ;;  %v2436_v30 = vshll.u32 %v11829_v58, 16  ;;  %v2905_v39 = vshrl.u32 %v11838_v57, 16 }
 0x26c   : > { %v2427_v31 = vsel %vm1806_vm1, %v2422_v53, %v2426_v42  ;;  %v2909_v10 = vrot.slane %v2907_v3, 1  ;;  %v2570_v53 = vrot.slane %v8371_v48, 1 }
 0x26f   : > { %4243 = vmatmul.mubr.bf16.gmra.mrb[124].mxu0 %v11784_v2  ;;  %v2568_v2 = vrot.slane %v11829_v58, 1  ;;  %v2443_v58 = vshll.u32 %v11446_v11, 16 }
 0x270   : > { %4082 = vmatmul.mubr.bf16.gmra.mrb[124].mxu1 %v2415_v23  ;;  %4250 = vmatprep.mubr.bf16.mxu0 %v2891_v21  ;;  %v11846_v23 = vcombine.low %v1628_v59, %v11766_v56  ;;  %v2903_v21 = vsel %vm1806_vm1, %v2898_v36, %v2902_v61  ;;  %v2912_v56 = vshll.u32 %v11687_v46, 16  ;;  %v2910_v36 = vor.u32 %v2909_v10, %v2905_v39 }
 0x271   : > { %v8937_v18 = vpop.f32.mrb[20].mxu0  ;;  %4089 = vmatprep.mubr.bf16.mxu1 %v2566_v5  ;;  %v2569_v20 = vsel %vm2063_vm2, %v2567_v49, %v2568_v2  ;;  %v2455_v10 = vshll.u32 %v11455_v37, 16 }
 0x272   : > { %v8938_v35 = vpop.f32.mrb[21].mxu0  ;;  %v2914_v61 = vrot.slane %v2912_v56, 1 }
 0x273   : > { %v8939_v16 = vadd.f32 %v8938_v35, %v8937_v18  ;;  %v8940_v15 = vpop.f32.mrb[22].mxu0  ;;  %v8825_v13 = vpop.f32.mrb[20].mxu1 }
 0x274   : > { %v8941_v6 = vpop.f32.mrb[23].mxu0  ;;  %v8826_v26 = vpop.f32.mrb[21].mxu1 }
 0x275   : > { %v8942_v19 = vadd.f32 %v8941_v6, %v8940_v15  ;;  %v8827_v8 = vadd.f32 %v8826_v26, %v8825_v13  ;;  %v8828_v32 = vpop.f32.mrb[22].mxu1  ;;  %v2434_v13 = vor.u32 %v2433_v51, %v2429_v40  ;;  %v2438_v6 = vrot.slane %v2436_v30, 1 }
 0x276   : > { %v8829_v43 = vpop.f32.mrb[23].mxu1  ;;  %v2571_v26 = vrot.slane %v10163_v29, 1  ;;  %v2924_v40 = vshll.u32 %v11768_v34, 16 }
 0x277   : > { %v3682_v5 = vadd.f32 %v8827_v8, %v11805_v7  ;;  %v8830_v44 = vadd.f32 %v8829_v43, %v8828_v32  ;;  %4251 = vmatmul.mubr.bf16.gmra.mrb[128].mxu0 %v11799_v55  ;;  %v2919_v55 = vshll.u32 %v11846_v23, 16  ;;  %v2441_v8 = vshrl.u32 %v11446_v11, 16 }
 0x278   : > { %4090 = vmatmul.mubr.bf16.gmra.mrb[128].mxu1 %v2427_v31  ;;  %4258 = vmatprep.mubr.bf16.mxu0 %v2903_v21  ;;  %v2445_v43 = vrot.slane %v2443_v58, 1  ;;  %v2439_v51 = vsel %vm1806_vm1, %v2434_v13, %v2438_v6  ;;  %v10418_v31 = vld [vmem:[#allocation2 + $0xc4] sm:$0xf]  ;;  %v2572_v21 = vsel %vm2063_vm2, %v2570_v53, %v2571_v26  ;;  %v2915_v11 = vsel %vm1806_vm1, %v2910_v36, %v2914_v61 }
 0x279   : > { %v8943_v18 = vpop.f32.mrb[24].mxu0  ;;  %v3685_v38 = vadd.f32 %v8830_v44, %v11805_v7  ;;  %4097 = vmatprep.mubr.bf16.mxu1 %v2569_v20  ;;  %v11856_v24 = vadd.f32 %v8939_v16, %v3682_v5  ;;  %v1596_v16 = vld [vmem:[#allocation2 + $0xc0] sm:$0xe]  ;;  %v2917_v20 = vshrl.u32 %v11846_v23, 16  ;;  %v2921_v5 = vrot.slane %v2919_v55, 1 }
 0x27a   : > { %v8944_v35 = vpop.f32.mrb[25].mxu0  ;;  %v2448_v44 = vshll.u32 %v10163_v29, 16  ;;  %v8372_v30 = vcombine.low %v1596_v16, %v10418_v31  ;;  %v2926_v29 = vrot.slane %v2924_v40, 1  ;;  %v2446_v58 = vor.u32 %v2445_v43, %v2441_v8 }
 0x27b   : > { %v8945_v0 = vadd.f32 %v8944_v35, %v8943_v18  ;;  %v8946_v15 = vpop.f32.mrb[26].mxu0  ;;  %v8831_v49 = vpop.f32.mrb[24].mxu1  ;;  %v11860_v42 = vadd.f32 %v8942_v19, %v3685_v38  ;;  %v10167_v18 = vld [vmem:[#allocation2 + $0xc8] ss:$0 sps:$4 sm:$0x11]   ;;  %v2922_v56 = vor.u32 %v2921_v5, %v2917_v20  ;;  %v2453_v16 = vshrl.u32 %v11455_v37, 16 }
 0x27c   : > { %v8947_v2 = vpop.f32.mrb[27].mxu0  ;;  %v8832_v46 = vpop.f32.mrb[25].mxu1  ;;  %v2574_v13 = vrot.slane %v10167_v18, 1  ;;  %v10186_v5 = vld [vmem:[%s13499_s5 + $0x40] sm:$0xff]   ;;  %v10419_v37 = vld [vmem:[#allocation2 + $0x1c] sm:$0xf] }
 0x27d   : > { %v8948_v59 = vadd.f32 %v8947_v2, %v8946_v15  ;;  %v8833_v3 = vadd.f32 %v8832_v46, %v8831_v49  ;;  %v8834_v47 = vpop.f32.mrb[26].mxu1  ;;  %v2450_v15 = vrot.slane %v2448_v44, 1  ;;  %v2573_v2 = vrot.slane %v8372_v30, 1  ;;  %v10187_v44 = vld [vmem:[%s13499_s5] sm:$0xff]   ;;  %9275 = vmatprep.subr.bf16.mxu0 %v10186_v5 }
 0x27e   : > { %v8835_v32 = vpop.f32.mrb[27].mxu1  ;;  %v2927_v8 = vsel %vm1806_vm1, %v2922_v56, %v2926_v29  ;;  %9276 = vmatpush3.bf16.msra.mxu0 %v10187_v44  ;;  %v10420_v56 = vld [vmem:[#allocation2 + $0x20] ss:$0 sps:$4 sm:$0x11]  }
 0x27f   : > { %v3690_v19 = vadd.f32 %v8833_v3, %v11805_v7  ;;  %v8836_v48 = vadd.f32 %v8835_v32, %v8834_v47  ;;  %4259 = vmatmul.mubr.bf16.gmra.mrb[132].mxu0 %v11818_v28  ;;  %v2457_v3 = vrot.slane %v2455_v10, 1  ;;  %v2460_v47 = vshll.u32 %v10167_v18, 16 }
 0x280   : > { %4098 = vmatmul.mubr.bf16.gmra.mrb[132].mxu1 %v2439_v51  ;;  %4266 = vmatprep.mubr.bf16.mxu0 %v2915_v11  ;;  %v2451_v20 = vsel %vm1806_vm1, %v2446_v58, %v2450_v15  ;;  %v2575_v40 = vsel %vm2063_vm2, %v2573_v2, %v2574_v13  ;;  %v2993_v29 = vrot.slane %v10420_v56, 1  ;;  %v10189_v56 = vld [vmem:[%s13499_s5 + $0x8] sm:$0xff]  }
 0x281   : > { %v3693_v39 = vadd.f32 %v8836_v48, %v11805_v7  ;;  %4105 = vmatprep.mubr.bf16.mxu1 %v2572_v21  ;;  %v11871_v34 = vadd.f32 %v8945_v0, %v3690_v19  ;;  %v1646_v0 = vld [vmem:[#allocation2 + $0x18] sm:$0xe]  ;;  %v2458_v31 = vor.u32 %v2457_v3, %v2453_v16  ;;  %v2462_v30 = vrot.slane %v2460_v47, 1 }
 0x282   : > { %v8949_v35 = vpop.f32.mrb[28].mxu0  ;;  %v8405_v19 = vcombine.low %v1646_v0, %v10419_v37 }
 0x283   : > { %v8837_v38 = vpop.f32.mrb[28].mxu1  ;;  %v11874_v55 = vadd.f32 %v8948_v59, %v3693_v39  ;;  %v8950_v49 = vpop.f32.mrb[29].mxu0  ;;  %v2463_v13 = vsel %vm1806_vm1, %v2458_v31, %v2462_v30 }
 0x284   : > { %v8838_v28 = vpop.f32.mrb[29].mxu1  ;;  %v8951_v46 = vadd.f32 %v8950_v49, %v8949_v35  ;;  %v8952_v26 = vpop.f32.mrb[30].mxu0  ;;  %v2992_v10 = vrot.slane %v8405_v19, 1 }
 0x285   : > { %v8839_v6 = vadd.f32 %v8838_v28, %v8837_v38  ;;  %v8840_v53 = vpop.f32.mrb[30].mxu1  ;;  %v8953_v61 = vpop.f32.mrb[31].mxu0  ;;  %v1647_v38 = vld [vmem:[#allocation2 + $0x24] sm:$0xe] }
 0x286   : > { %v8841_v36 = vpop.f32.mrb[31].mxu1  ;;  %v8954_v43 = vadd.f32 %v8953_v61, %v8952_v26  ;;  %v10421_v26 = vld [vmem:[#allocation2 + $0x28] sm:$0xf] }
 0x287   : > { %v3698_v59 = vadd.f32 %v8839_v6, %v11805_v7  ;;  %v8842_v32 = vadd.f32 %v8841_v36, %v8840_v53  ;;  %4267 = vmatmul.mubr.bf16.gmra.mrb[136].mxu0 %v11838_v57  ;;  %v8406_v0 = vcombine.low %v1647_v38, %v10421_v26  ;;  %v2994_v36 = vsel %vm2063_vm2, %v2992_v10, %v2993_v29 }
 0x288   : > { %4106 = vmatmul.mubr.bf16.gmra.mrb[136].mxu1 %v2451_v20  ;;  %4274 = vmatprep.mubr.bf16.mxu0 %v2927_v8 }
 0x289   : > { %v3701_v48 = vadd.f32 %v8842_v32, %v11805_v7  ;;  %4113 = vmatprep.mubr.bf16.mxu1 %v2575_v40  ;;  %v11886_v51 = vadd.f32 %v8951_v46, %v3698_v59  ;;  %v2995_v8 = vrot.slane %v8406_v0, 1  ;;  %v10422_v59 = vld [vmem:[#allocation2 + $0x2c] ss:$0 sps:$4 sm:$0x11]  }
 0x28a   : > { %v8955_v11 = vpop.f32.mrb[32].mxu0  ;;  %v2996_v32 = vrot.slane %v10422_v59, 1 }
 0x28b   : > { %v8843_v21 = vpop.f32.mrb[32].mxu1  ;;  %v11891_v18 = vadd.f32 %v8954_v43, %v3701_v48  ;;  %v8956_v39 = vpop.f32.mrb[33].mxu0 }
 0x28c   : > { %v8844_v57 = vpop.f32.mrb[33].mxu1  ;;  %v8957_v15 = vadd.f32 %v8956_v39, %v8955_v11  ;;  %v8958_v28 = vpop.f32.mrb[34].mxu0  ;;  %v2997_v11 = vsel %vm2063_vm2, %v2995_v8, %v2996_v32 }
 0x28d   : > { %v8845_v35 = vadd.f32 %v8844_v57, %v8843_v21  ;;  %v8846_v58 = vpop.f32.mrb[34].mxu1  ;;  %v8959_v2 = vpop.f32.mrb[35].mxu0  ;;  %v10188_v57 = vld [vmem:[%s13499_s5 + $0x48] sm:$0xff]  }
 0x28e   : > { %v8847_v49 = vpop.f32.mrb[35].mxu1  ;;  %v8960_v46 = vadd.f32 %v8959_v2, %v8958_v28  ;;  %9277 = vmatprep.subr.bf16.mxu0 %v10188_v57 }
 0x28f   : > { %v3706_v6 = vadd.f32 %v8845_v35, %v11805_v7  ;;  %v8848_v53 = vadd.f32 %v8847_v49, %v8846_v58  ;;  %4275 = vmatmul.mubr.bf16.gmra.mrb[140].mxu0 %v11846_v23 }
 0x290   : > { %4114 = vmatmul.mubr.bf16.gmra.mrb[140].mxu1 %v2463_v13  ;;  %9278 = vmatpush3.bf16.msra.mxu0 %v10189_v56 }
 0x291   : > { %v3709_v61 = vadd.f32 %v8848_v53, %v11805_v7  ;;  %9803 = vmatprep.mubr.bf16.mxu1 %v2994_v36  ;;  %v11898_v16 = vadd.f32 %v8957_v15, %v3706_v6 }
 0x292   : > { %v8961_v47 = vpop.f32.mrb[36].mxu0 }
 0x293   : > { %v8849_v3 = vpop.f32.mrb[36].mxu1  ;;  %v11900_v43 = vadd.f32 %v8960_v46, %v3709_v61  ;;  %v8962_v5 = vpop.f32.mrb[37].mxu0 }
 0x294   : > { %v8850_v20 = vpop.f32.mrb[37].mxu1  ;;  %v8963_v19 = vadd.f32 %v8962_v5, %v8961_v47  ;;  %v8964_v48 = vpop.f32.mrb[38].mxu0 }
 0x295   : > { %v8851_v40 = vadd.f32 %v8850_v20, %v8849_v3  ;;  %v8852_v37 = vpop.f32.mrb[38].mxu1  ;;  %v8965_v23 = vpop.f32.mrb[39].mxu0 }
 0x296   : > { %v8853_v44 = vpop.f32.mrb[39].mxu1  ;;  %v8966_v21 = vadd.f32 %v8965_v23, %v8964_v48 }
 0x297   : > { %v3714_v31 = vadd.f32 %v8851_v40, %v11805_v7  ;;  %v8854_v30 = vadd.f32 %v8853_v44, %v8852_v37 }
 0x298   : > { %9804 = vmatmul.mubr.bf16.vlgmr.msra.gmra.mrb[144].mxu1 %v2997_v11 }
 0x299   : > { %v3717_v39 = vadd.f32 %v8854_v30, %v11805_v7  ;;  %9807 = vmatprep.mubr.bf16.mxu1 %v11674_v63  ;;  %v11909_v10 = vadd.f32 %v8963_v19, %v3714_v31  ;;  %v10191_v30 = vld [vmem:[%s13499_s5 + $0x10] sm:$0xff]  }
 0x29a   : > { %v8967_v38 = vpop.f32.mrb[40].mxu0 }
 0x29b   : > { %v8855_v29 = vpop.f32.mrb[40].mxu1  ;;  %v11914_v35 = vadd.f32 %v8966_v21, %v3717_v39  ;;  %v8968_v15 = vpop.f32.mrb[41].mxu0 }
 0x29c   : > { %v8856_v58 = vpop.f32.mrb[41].mxu1  ;;  %v8969_v2 = vadd.f32 %v8968_v15, %v8967_v38  ;;  %v8970_v13 = vpop.f32.mrb[42].mxu0 }
 0x29d   : > { %v8857_v28 = vadd.f32 %v8856_v58, %v8855_v29  ;;  %v8858_v49 = vpop.f32.mrb[42].mxu1  ;;  %v8971_v63 = vpop.f32.mrb[43].mxu0 }
 0x29e   : > { %v8859_v6 = vpop.f32.mrb[43].mxu1  ;;  %v8972_v26 = vadd.f32 %v8971_v63, %v8970_v13 }
 0x29f   : > { %v3722_v53 = vadd.f32 %v8857_v28, %v11805_v7  ;;  %v8860_v46 = vadd.f32 %v8859_v6, %v8858_v49 }
 0x2a0   : > { %9808 = vmatmul.mubr.bf16.gmra.mrb[148].mxu1 %v11677_v60 }
 0x2a1   : > { %v3725_v0 = vadd.f32 %v8860_v46, %v11805_v7  ;;  %9811 = vmatprep.mubr.bf16.mxu1 %v11683_v12  ;;  %v11920_v36 = vadd.f32 %v8969_v2, %v3722_v53  ;;  %v10190_v12 = vld [vmem:[%s13499_s5 + $0x50] sm:$0xff]  }
 0x2a2   : > { %v8973_v3 = vpop.f32.mrb[44].mxu0  ;;  %9279 = vmatprep.subr.bf16.mxu0 %v10190_v12 }
 0x2a3   : > { %v8861_v61 = vpop.f32.mrb[44].mxu1  ;;  %v11922_v47 = vadd.f32 %v8972_v26, %v3725_v0  ;;  %v8974_v59 = vpop.f32.mrb[45].mxu0  ;;  %9280 = vmatpush3.bf16.msra.mxu0 %v10191_v30 }
 0x2a4   : > { %v8862_v8 = vpop.f32.mrb[45].mxu1  ;;  %v8975_v5 = vadd.f32 %v8974_v59, %v8973_v3  ;;  %v8976_v40 = vpop.f32.mrb[46].mxu0 }
 0x2a5   : > { %v8863_v32 = vadd.f32 %v8862_v8, %v8861_v61  ;;  %v8864_v20 = vpop.f32.mrb[46].mxu1  ;;  %v8977_v19 = vpop.f32.mrb[47].mxu0 }
 0x2a6   : > { %v8865_v37 = vpop.f32.mrb[47].mxu1  ;;  %v8978_v44 = vadd.f32 %v8977_v19, %v8976_v40 }
 0x2a7   : > { %v3730_v60 = vadd.f32 %v8863_v32, %v11805_v7  ;;  %v8866_v48 = vadd.f32 %v8865_v37, %v8864_v20 }
 0x2a8   : > { %9812 = vmatmul.mubr.bf16.gmra.mrb[152].mxu1 %v11693_v45 }
 0x2a9   : > { %v3733_v23 = vadd.f32 %v8866_v48, %v11805_v7  ;;  %9815 = vmatprep.mubr.bf16.mxu1 %v11702_v54  ;;  %v11931_v31 = vadd.f32 %v8975_v5, %v3730_v60  ;;  %v10193_v60 = vld [vmem:[%s13499_s5 + $0x18] sm:$0xff]  }
 0x2aa   : > { %v8979_v11 = vpop.f32.mrb[48].mxu0 }
 0x2ab   : > { %v8867_v21 = vpop.f32.mrb[48].mxu1  ;;  %v11936_v57 = vadd.f32 %v8978_v44, %v3733_v23  ;;  %v8980_v56 = vpop.f32.mrb[49].mxu0 }
 0x2ac   : > { %v8868_v39 = vpop.f32.mrb[49].mxu1  ;;  %v8981_v38 = vadd.f32 %v8980_v56, %v8979_v11  ;;  %v8982_v58 = vpop.f32.mrb[50].mxu0 }
 0x2ad   : > { %v8869_v29 = vadd.f32 %v8868_v39, %v8867_v21  ;;  %v8870_v45 = vpop.f32.mrb[50].mxu1  ;;  %v8983_v54 = vpop.f32.mrb[51].mxu0 }
 0x2ae   : > { %v8871_v15 = vpop.f32.mrb[51].mxu1  ;;  %v8984_v2 = vadd.f32 %v8983_v54, %v8982_v58 }
 0x2af   : > { %v3738_v28 = vadd.f32 %v8869_v29, %v11805_v7  ;;  %v8872_v49 = vadd.f32 %v8871_v15, %v8870_v45 }
 0x2b0   : > { %9816 = vmatmul.mubr.bf16.gmra.mrb[156].mxu1 %v11709_v50 }
 0x2b1   : > { %v11940_v13 = vadd.f32 %v8981_v38, %v3738_v28  ;;  %v3741_v6 = vadd.f32 %v8872_v49, %v11805_v7  ;;  %9819 = vmatprep.mubr.bf16.mxu1 %v11716_v41  ;;  %v10192_v41 = vld [vmem:[%s13499_s5 + $0x58] sm:$0xff]  }
 0x2b2   : > { %v8985_v46 = vpop.f32.mrb[52].mxu0  ;;  %9281 = vmatprep.subr.bf16.mxu0 %v10192_v41 }
 0x2b3   : > { %v11944_v63 = vadd.f32 %v8984_v2, %v3741_v6  ;;  %v8873_v53 = vpop.f32.mrb[52].mxu1  ;;  %v8986_v0 = vpop.f32.mrb[53].mxu0  ;;  %9282 = vmatpush3.bf16.msra.mxu0 %v10193_v60 }
 0x2b4   : > { %v8874_v26 = vpop.f32.mrb[53].mxu1  ;;  %v8987_v8 = vadd.f32 %v8986_v0, %v8985_v46  ;;  %v8988_v59 = vpop.f32.mrb[54].mxu0 }
 0x2b5   : > { %v8875_v61 = vadd.f32 %v8874_v26, %v8873_v53  ;;  %v8876_v3 = vpop.f32.mrb[54].mxu1  ;;  %v8989_v20 = vpop.f32.mrb[55].mxu0 }
 0x2b6   : > { %v8877_v32 = vpop.f32.mrb[55].mxu1  ;;  %v8990_v40 = vadd.f32 %v8989_v20, %v8988_v59 }
 0x2b7   : > { %v3746_v50 = vadd.f32 %v8875_v61, %v11805_v7  ;;  %v8878_v5 = vadd.f32 %v8877_v32, %v8876_v3 }
 0x2b8   : > { %9820 = vmatmul.mubr.bf16.gmra.mrb[160].mxu1 %v11723_v9 }
 0x2b9   : > { %v11951_v37 = vadd.f32 %v8987_v8, %v3746_v50  ;;  %v3749_v19 = vadd.f32 %v8878_v5, %v11805_v7  ;;  %9823 = vmatprep.mubr.bf16.mxu1 %v11728_v1  ;;  %v10195_v50 = vld [vmem:[%s13499_s5 + $0x20] sm:$0xff]  }
 0x2ba   : > { %v8991_v12 = vpop.f32.mrb[56].mxu0 }
 0x2bb   : > { %v11958_v48 = vadd.f32 %v8990_v40, %v3749_v19  ;;  %v8879_v44 = vpop.f32.mrb[56].mxu1  ;;  %v8992_v30 = vpop.f32.mrb[57].mxu0 }
 0x2bc   : > { %v8880_v23 = vpop.f32.mrb[57].mxu1  ;;  %v8993_v11 = vadd.f32 %v8992_v30, %v8991_v12  ;;  %v8994_v39 = vpop.f32.mrb[58].mxu0 }
 0x2bd   : > { %v8881_v21 = vadd.f32 %v8880_v23, %v8879_v44  ;;  %v8882_v9 = vpop.f32.mrb[58].mxu1  ;;  %v8995_v29 = vpop.f32.mrb[59].mxu0 }
 0x2be   : > { %v8883_v56 = vpop.f32.mrb[59].mxu1  ;;  %v8996_v38 = vadd.f32 %v8995_v29, %v8994_v39 }
 0x2bf   : > { %v3754_v1 = vadd.f32 %v8881_v21, %v11805_v7  ;;  %v8884_v45 = vadd.f32 %v8883_v56, %v8882_v9 }
 0x2c0   : > { %9824 = vmatmul.mubr.bf16.gmra.mrb[164].mxu1 %v11738_v22 }
 0x2c1   : > { %v11962_v58 = vadd.f32 %v8993_v11, %v3754_v1  ;;  %v3757_v15 = vadd.f32 %v8884_v45, %v11805_v7  ;;  %9827 = vmatprep.mubr.bf16.mxu1 %v11744_v27  ;;  %v10194_v27 = vld [vmem:[%s13499_s5 + $0x60] sm:$0xff]  }
 0x2c2   : > { %v8997_v49 = vpop.f32.mrb[60].mxu0  ;;  %9283 = vmatprep.subr.bf16.mxu0 %v10194_v27 }
 0x2c3   : > { %v11966_v54 = vadd.f32 %v8996_v38, %v3757_v15  ;;  %v8885_v28 = vpop.f32.mrb[60].mxu1  ;;  %v8998_v6 = vpop.f32.mrb[61].mxu0  ;;  %9284 = vmatpush3.bf16.msra.mxu0 %v10195_v50 }
 0x2c4   : > { %v8886_v2 = vpop.f32.mrb[61].mxu1  ;;  %v8999_v26 = vadd.f32 %v8998_v6, %v8997_v49  ;;  %v9000_v0 = vpop.f32.mrb[62].mxu0 }
 0x2c5   : > { %v8887_v53 = vadd.f32 %v8886_v2, %v8885_v28  ;;  %v8888_v46 = vpop.f32.mrb[62].mxu1  ;;  %v9001_v3 = vpop.f32.mrb[63].mxu0 }
 0x2c6   : > { %v8889_v61 = vpop.f32.mrb[63].mxu1  ;;  %v9002_v59 = vadd.f32 %v9001_v3, %v9000_v0 }
 0x2c7   : > { %v3762_v22 = vadd.f32 %v8887_v53, %v11805_v7  ;;  %v8890_v8 = vadd.f32 %v8889_v61, %v8888_v46  ;;  %v10196_v61 = vld [vmem:[%s13499_s5 + $0x68] sm:$0xff]  }
 0x2c8   : > { %9828 = vmatmul.mubr.bf16.gmra.mrb[168].mxu1 %v11752_v52  ;;  %9285 = vmatprep.subr.bf16.mxu0 %v10196_v61 }
 0x2c9   : > { %v11973_v32 = vadd.f32 %v8999_v26, %v3762_v22  ;;  %v3765_v20 = vadd.f32 %v8890_v8, %v11805_v7  ;;  %9831 = vmatprep.mubr.bf16.mxu1 %v11763_v25  ;;  %v10197_v8 = vld [vmem:[%s13499_s5 + $0x28] sm:$0xff]  }
 0x2ca   : > { %v9003_v41 = vpop.f32.mrb[64].mxu0  ;;  %9286 = vmatpush3.bf16.msra.mxu0 %v10197_v8  ;;  %v10199_v8 = vld [vmem:[%s13499_s5 + $0x30] sm:$0xff]  }
 0x2cb   : > { %v11980_v5 = vadd.f32 %v9002_v59, %v3765_v20  ;;  %v8891_v40 = vpop.f32.mrb[64].mxu1  ;;  %v9004_v60 = vpop.f32.mrb[65].mxu0 }
 0x2cc   : > { %v8892_v19 = vpop.f32.mrb[65].mxu1  ;;  %v9005_v12 = vadd.f32 %v9004_v60, %v9003_v41  ;;  %v9006_v23 = vpop.f32.mrb[66].mxu0 }
 0x2cd   : > { %v8893_v44 = vadd.f32 %v8892_v19, %v8891_v40  ;;  %v8894_v52 = vpop.f32.mrb[66].mxu1  ;;  %v9007_v21 = vpop.f32.mrb[67].mxu0 }
 0x2ce   : > { %v8895_v30 = vpop.f32.mrb[67].mxu1  ;;  %v9008_v11 = vadd.f32 %v9007_v21, %v9006_v23 }
 0x2cf   : > { %v3770_v25 = vadd.f32 %v8893_v44, %v11805_v7  ;;  %v8896_v9 = vadd.f32 %v8895_v30, %v8894_v52 }
 0x2d0   : > { %9832 = vmatmul.mubr.bf16.gmra.mrb[172].mxu1 %v11787_v33 }
 0x2d1   : > { %v11984_v39 = vadd.f32 %v9005_v12, %v3770_v25  ;;  %v3773_v56 = vadd.f32 %v8896_v9, %v11805_v7 }
 0x2d2   : > { %v9009_v45 = vpop.f32.mrb[68].mxu0 }
 0x2d3   : > { %v11987_v29 = vadd.f32 %v9008_v11, %v3773_v56  ;;  %v8897_v1 = vpop.f32.mrb[68].mxu1  ;;  %v9010_v15 = vpop.f32.mrb[69].mxu0 }
 0x2d4   : > { %v8898_v38 = vpop.f32.mrb[69].mxu1  ;;  %v9011_v2 = vadd.f32 %v9010_v15, %v9009_v45  ;;  %v9012_v6 = vpop.f32.mrb[70].mxu0 }
 0x2d5   : > { %v8899_v28 = vadd.f32 %v8898_v38, %v8897_v1  ;;  %v8900_v49 = vpop.f32.mrb[70].mxu1  ;;  %v9013_v46 = vpop.f32.mrb[71].mxu0 }
 0x2d6   : > { %v8901_v53 = vpop.f32.mrb[71].mxu1  ;;  %v9014_v33 = vadd.f32 %v9013_v46, %v9012_v6 }
 0x2d7   : > { %v3778_v26 = vadd.f32 %v8899_v28, %v11805_v7  ;;  %v8902_v0 = vadd.f32 %v8901_v53, %v8900_v49 }
 0x2d9   : > { %v11993_v3 = vadd.f32 %v9011_v2, %v3778_v26  ;;  %v3781_v22 = vadd.f32 %v8902_v0, %v11805_v7 }
 0x2da   : > { %v9015_v20 = vpop.f32.mrb[72].mxu0 }
 0x2db   : > { %v11999_v59 = vadd.f32 %v9014_v33, %v3781_v22  ;;  %v8903_v27 = vpop.f32.mrb[72].mxu1  ;;  %v9016_v40 = vpop.f32.mrb[73].mxu0  ;;  %v10198_v33 = vld [vmem:[%s13499_s5 + $0x70] sm:$0xff]  }
 0x2dc   : > { %v8904_v50 = vpop.f32.mrb[73].mxu1  ;;  %v9017_v60 = vadd.f32 %v9016_v40, %v9015_v20  ;;  %v9018_v44 = vpop.f32.mrb[74].mxu0  ;;  %9287 = vmatprep.subr.bf16.mxu0 %v10198_v33  ;;  %v10201_v20 = vld [vmem:[%s13499_s5 + $0x80] sm:$0xff]  }
 0x2dd   : > { %v8905_v41 = vadd.f32 %v8904_v50, %v8903_v27  ;;  %v8906_v19 = vpop.f32.mrb[74].mxu1  ;;  %v9019_v12 = vpop.f32.mrb[75].mxu0  ;;  %v10200_v27 = vld [vmem:[%s13499_s5 + $0xc0] sm:$0xff]   ;;  %9288 = vmatpush3.bf16.msra.mxu0 %v10199_v8 }
 0x2de   : > { %v8907_v52 = vpop.f32.mrb[75].mxu1  ;;  %v9020_v21 = vadd.f32 %v9019_v12, %v9018_v44  ;;  %9387 = vmatprep.subr.bf16.mxu1 %v10200_v27 }
 0x2df   : > { %v3786_v23 = vadd.f32 %v8905_v41, %v11805_v7  ;;  %v8908_v30 = vadd.f32 %v8907_v52, %v8906_v19  ;;  %9388 = vmatpush3.bf16.msra.mxu1 %v10201_v20  ;;  %v10203_v20 = vld [vmem:[%s13499_s5 + $0x88] sm:$0xff]  }
 0x2e1   : > { %v12002_v25 = vadd.f32 %v9017_v60, %v3786_v23  ;;  %v3789_v9 = vadd.f32 %v8908_v30, %v11805_v7 }
 0x2e2   : > { %v9021_v1 = vpop.f32.mrb[76].mxu0 }
 0x2e3   : > { %v12005_v11 = vadd.f32 %v9020_v21, %v3789_v9  ;;  %v8909_v56 = vpop.f32.mrb[76].mxu1  ;;  %v9022_v38 = vpop.f32.mrb[77].mxu0 }
 0x2e4   : > { %v8910_v45 = vpop.f32.mrb[77].mxu1  ;;  %v9023_v49 = vadd.f32 %v9022_v38, %v9021_v1  ;;  %v9024_v2 = vpop.f32.mrb[78].mxu0 }
 0x2e5   : > { %v8911_v15 = vadd.f32 %v8910_v45, %v8909_v56  ;;  %v8912_v28 = vpop.f32.mrb[78].mxu1  ;;  %v9025_v53 = vpop.f32.mrb[79].mxu0 }
 0x2e6   : > { %v8913_v6 = vpop.f32.mrb[79].mxu1  ;;  %v9026_v0 = vadd.f32 %v9025_v53, %v9024_v2 }
 0x2e7   : > { %v3794_v46 = vadd.f32 %v8911_v15, %v11805_v7  ;;  %v8914_v26 = vadd.f32 %v8913_v6, %v8912_v28 }
 0x2e9   : > { %v12011_v61 = vadd.f32 %v9023_v49, %v3794_v46  ;;  %v3797_v22 = vadd.f32 %v8914_v26, %v11805_v7 }
 0x2ea   : > { %v9155_v41 = vpop.f32.mrb[80].mxu0 }
 0x2eb   : > { %v12023_v50 = vadd.f32 %v9026_v0, %v3797_v22  ;;  %v9043_v40 = vpop.f32.mrb[80].mxu1  ;;  %v9156_v19 = vpop.f32.mrb[81].mxu0 }
 0x2ec   : > { %v9044_v7 = vpop.f32.mrb[81].mxu1  ;;  %v9157_v52 = vadd.f32 %v9156_v19, %v9155_v41  ;;  %v9158_v12 = vpop.f32.mrb[82].mxu0 }
 0x2ed   : > { %v9045_v60 = vadd.f32 %v9044_v7, %v9043_v40  ;;  %v9046_v44 = vpop.f32.mrb[82].mxu1  ;;  %v9159_v30 = vpop.f32.mrb[83].mxu0 }
 0x2ee   : > { %v9047_v23 = vpop.f32.mrb[83].mxu1  ;;  %v9160_v56 = vadd.f32 %v9159_v30, %v9158_v12 }
 0x2ef   : > { %v3996_v21 = vadd.f32 %v9045_v60, %v11821_v4  ;;  %v9048_v9 = vadd.f32 %v9047_v23, %v9046_v44  ;;  %v10204_v60 = vld [vmem:[%s13499_s5 + $0xd0] sm:$0xff]  }
 0x2f0   : > { %v10205_v44 = vld [vmem:[%s13499_s5 + $0x90] sm:$0xff]  }
 0x2f1   : > { %v3999_v1 = vadd.f32 %v9048_v9, %v11832_v62  ;;  %v10202_v62 = vld [vmem:[%s13499_s5 + $0xc8] sm:$0xff]   ;;  %v12034_v27 = vadd.f32 %v9157_v52, %v3996_v21 }
 0x2f2   : > { %v9161_v38 = vpop.f32.mrb[84].mxu0  ;;  %9389 = vmatprep.subr.bf16.mxu1 %v10202_v62 }
 0x2f3   : > { %v9049_v45 = vpop.f32.mrb[84].mxu1  ;;  %v9162_v28 = vpop.f32.mrb[85].mxu0  ;;  %v12041_v7 = vadd.f32 %v9160_v56, %v3999_v1  ;;  %9390 = vmatpush3.bf16.msra.mxu1 %v10203_v20 }
 0x2f4   : > { %v9050_v15 = vpop.f32.mrb[85].mxu1  ;;  %v9163_v6 = vadd.f32 %v9162_v28, %v9161_v38  ;;  %v9164_v53 = vpop.f32.mrb[86].mxu0  ;;  %9391 = vmatprep.subr.bf16.mxu1 %v10204_v60  ;;  %v10209_v60 = vld [vmem:[%s13499_s5 + $0x38] sm:$0xff]  }
 0x2f5   : > { %v9051_v49 = vadd.f32 %v9050_v15, %v9049_v45  ;;  %v9052_v2 = vpop.f32.mrb[86].mxu1  ;;  %v9165_v26 = vpop.f32.mrb[87].mxu0  ;;  %v10206_v15 = vld [vmem:[%s13499_s5 + $0xd8] sm:$0xff]  }
 0x2f6   : > { %v9053_v46 = vpop.f32.mrb[87].mxu1  ;;  %v9166_v22 = vadd.f32 %v9165_v26, %v9164_v53 }
 0x2f7   : > { %v4004_v0 = vadd.f32 %v9051_v49, %v11856_v24  ;;  %v9054_v33 = vadd.f32 %v9053_v46, %v9052_v2  ;;  %9392 = vmatpush3.bf16.msra.mxu1 %v10205_v44  ;;  %v10207_v49 = vld [vmem:[%s13499_s5 + $0x98] sm:$0xff]  }
 0x2f8   : > { %9393 = vmatprep.subr.bf16.mxu1 %v10206_v15 }
 0x2f9   : > { %v4007_v4 = vadd.f32 %v9054_v33, %v11860_v42  ;;  %v12029_v8 = vadd.f32 %v9163_v6, %v4004_v0 }
 0x2fa   : > { %v9167_v41 = vpop.f32.mrb[88].mxu0 }
 0x2fb   : > { %v9055_v40 = vpop.f32.mrb[88].mxu1  ;;  %v12039_v24 = vadd.f32 %v9166_v22, %v4007_v4  ;;  %v9168_v19 = vpop.f32.mrb[89].mxu0  ;;  %9394 = vmatpush3.bf16.msra.mxu1 %v10207_v49 }
 0x2fc   : > { %v9056_v42 = vpop.f32.mrb[89].mxu1  ;;  %v9169_v23 = vadd.f32 %v9168_v19, %v9167_v41  ;;  %v9170_v30 = vpop.f32.mrb[90].mxu0 }
 0x2fd   : > { %v9057_v52 = vadd.f32 %v9056_v42, %v9055_v40  ;;  %v9058_v12 = vpop.f32.mrb[90].mxu1  ;;  %v9171_v9 = vpop.f32.mrb[91].mxu0  ;;  %v10208_v42 = vld [vmem:[%s13499_s5 + $0x78] sm:$0xff]  }
 0x2fe   : > { %v9059_v21 = vpop.f32.mrb[91].mxu1  ;;  %v9172_v45 = vadd.f32 %v9171_v9, %v9170_v30  ;;  %9289 = vmatprep.subr.bf16.mxu0 %v10208_v42 }
 0x2ff   : > { %v4012_v56 = vadd.f32 %v9057_v52, %v11871_v34  ;;  %v9060_v1 = vadd.f32 %v9059_v21, %v9058_v12  ;;  %9290 = vmatpush3.bf16.msra.mxu0 %v10209_v60 }
 0x301   : > { %v4015_v38 = vadd.f32 %v9060_v1, %v11874_v55  ;;  %v12054_v28 = vadd.f32 %v9169_v23, %v4012_v56  ;;  %v10212_v23 = vld [vmem:[%s13499_s5 + $0xe8] sm:$0xff]  }
 0x302   : > { %v9173_v6 = vpop.f32.mrb[92].mxu0 }
 0x303   : > { %v9061_v2 = vpop.f32.mrb[92].mxu1  ;;  %v9174_v34 = vpop.f32.mrb[93].mxu0  ;;  %v12066_v19 = vadd.f32 %v9172_v45, %v4015_v38  ;;  %v10213_v38 = vld [vmem:[%s13499_s5 + $0xa8] sm:$0xff]  }
 0x304   : > { %v9062_v53 = vpop.f32.mrb[93].mxu1  ;;  %v9175_v0 = vadd.f32 %v9174_v34, %v9173_v6  ;;  %v9176_v55 = vpop.f32.mrb[94].mxu0 }
 0x305   : > { %v9063_v46 = vadd.f32 %v9062_v53, %v9061_v2  ;;  %v9064_v26 = vpop.f32.mrb[94].mxu1  ;;  %v9177_v22 = vpop.f32.mrb[95].mxu0 }
 0x306   : > { %v9065_v33 = vpop.f32.mrb[95].mxu1  ;;  %v9178_v20 = vadd.f32 %v9177_v22, %v9176_v55  ;;  %v10215_v22 = vld [vmem:[%s13499_s5 + $0xb0] sm:$0xff]  }
 0x307   : > { %v4020_v4 = vadd.f32 %v9063_v46, %v11886_v51  ;;  %v9066_v62 = vadd.f32 %v9065_v33, %v9064_v26  ;;  %v10210_v51 = vld [vmem:[%s13499_s5 + $0xe0] sm:$0xff]   ;;  %v10214_v26 = vld [vmem:[%s13499_s5 + $0xf0] sm:$0xff]  }
 0x308   : > { %9395 = vmatprep.subr.bf16.mxu1 %v10210_v51 }
 0x309   : > { %v4023_v40 = vadd.f32 %v9066_v62, %v11891_v18  ;;  %v12061_v41 = vadd.f32 %v9175_v0, %v4020_v4  ;;  %v10211_v18 = vld [vmem:[%s13499_s5 + $0xa0] sm:$0xff]  }
 0x30a   : > { %v9179_v52 = vpop.f32.mrb[96].mxu0  ;;  %9396 = vmatpush3.bf16.msra.mxu1 %v10211_v18  ;;  %v10217_v18 = vld [vmem:[#allocation3 + $0x8] ss:$0 sps:$4 sm:$0x11]  }
 0x30b   : > { %v9067_v44 = vpop.f32.mrb[96].mxu1  ;;  %v12077_v12 = vadd.f32 %v9178_v20, %v4023_v40  ;;  %v9180_v21 = vpop.f32.mrb[97].mxu0  ;;  %9397 = vmatprep.subr.bf16.mxu1 %v10212_v23 }
 0x30c   : > { %v9068_v30 = vpop.f32.mrb[97].mxu1  ;;  %v9181_v1 = vadd.f32 %v9180_v21, %v9179_v52  ;;  %v9182_v45 = vpop.f32.mrb[98].mxu0 }
 0x30d   : > { %v9069_v9 = vadd.f32 %v9068_v30, %v9067_v44  ;;  %v9070_v56 = vpop.f32.mrb[98].mxu1  ;;  %v9183_v49 = vpop.f32.mrb[99].mxu0  ;;  %v10218_v44 = vld [vmem:[%s13499_s5 + $0xf8] sm:$0xff]  }
 0x30e   : > { %v9071_v15 = vpop.f32.mrb[99].mxu1  ;;  %v9184_v53 = vadd.f32 %v9183_v49, %v9182_v45  ;;  %9398 = vmatpush3.bf16.msra.mxu1 %v10213_v38  ;;  %v10219_v30 = vld [vmem:[%s13499_s5 + $0xb8] sm:$0xff]   ;;  %v5404_v38 = vshll.u32 %v10217_v18, 16 }
 0x30f   : > { %v4028_v2 = vadd.f32 %v9069_v9, %v11898_v16  ;;  %v9072_v6 = vadd.f32 %v9071_v15, %v9070_v56  ;;  %v5059_v16 = vld [vmem:[#allocation3] sm:$0xf]  ;;  %9399 = vmatprep.subr.bf16.mxu1 %v10214_v26 }
 0x311   : > { %v4031_v34 = vadd.f32 %v9072_v6, %v11900_v43  ;;  %v12087_v46 = vadd.f32 %v9181_v1, %v4028_v2  ;;  %v5060_v43 = vld [vmem:[#allocation3 + $0x4] sm:$0xf]  ;;  %v5406_v6 = vrot.slane %v5404_v38, 1 }
 0x312   : > { %v9185_v55 = vpop.f32.mrb[100].mxu0  ;;  %9400 = vmatpush3.bf16.msra.mxu1 %v10215_v22  ;;  %v8526_v51 = vcombine.low %v5059_v16, %v5060_v43 }
 0x313   : > { %v9073_v0 = vpop.f32.mrb[100].mxu1  ;;  %v12092_v33 = vadd.f32 %v9184_v53, %v4031_v34  ;;  %v9186_v62 = vpop.f32.mrb[101].mxu0  ;;  %9401 = vmatprep.subr.bf16.mxu1 %v10218_v44  ;;  %v10220_v53 = vld [vmem:[%s13499_s5 + $0x140] sm:$0xff]  }
 0x314   : > { %v9074_v4 = vpop.f32.mrb[101].mxu1  ;;  %v9187_v42 = vadd.f32 %v9186_v62, %v9185_v55  ;;  %v9188_v60 = vpop.f32.mrb[102].mxu0  ;;  %v5397_v1 = vshrl.u32 %v8526_v51, 16  ;;  %v5399_v45 = vshll.u32 %v8526_v51, 16  ;;  %9499 = vmatprep.subr.bf16.mxu0 %v10220_v53 }
 0x315   : > { %v9075_v20 = vadd.f32 %v9074_v4, %v9073_v0  ;;  %v9076_v40 = vpop.f32.mrb[102].mxu1  ;;  %v9189_v23 = vpop.f32.mrb[103].mxu0  ;;  %v5107_v0 = vld [vmem:[#allocation3] sm:$0xe] }
 0x316   : > { %v9077_v52 = vpop.f32.mrb[103].mxu1  ;;  %v9190_v56 = vadd.f32 %v9189_v23, %v9188_v60  ;;  %9402 = vmatpush3.bf16.msra.mxu1 %v10219_v30  ;;  %v5401_v2 = vrot.slane %v5399_v45, 1  ;;  %v8558_v4 = vcombine.low %v5107_v0, %v5060_v43  ;;  %v10223_v60 = vld [vmem:[%s13499_s5 + $0x100] sm:$0xff]  }
 0x317   : > { %v4036_v21 = vadd.f32 %v9075_v20, %v11909_v10  ;;  %v9078_v9 = vadd.f32 %v9077_v52, %v9076_v40 }
 0x318   : > { %v5402_v16 = vor.u32 %v5401_v2, %v5397_v1  ;;  %v5652_v30 = vrot.slane %v8558_v4, 1 }
 0x319   : > { %v4039_v15 = vadd.f32 %v9078_v9, %v11914_v35  ;;  %v12105_v49 = vadd.f32 %v9187_v42, %v4036_v21  ;;  %v5653_v35 = vrot.slane %v10217_v18, 1 }
 0x31a   : > { %v9191_v26 = vpop.f32.mrb[104].mxu0  ;;  %v5407_v23 = vsel %vm1806_vm1, %v5402_v16, %v5406_v6 }
 0x31b   : > { %v9079_v34 = vpop.f32.mrb[104].mxu1  ;;  %v12110_v10 = vadd.f32 %v9190_v56, %v4039_v15  ;;  %v9192_v22 = vpop.f32.mrb[105].mxu0  ;;  %7259 = vmatprep.mubr.bf16.mxu0 %v5407_v23  ;;  %v12118_v43 = vsel %vm2063_vm2, %v5652_v30, %v5653_v35 }
 0x31c   : > { %v9080_v55 = vpop.f32.mrb[105].mxu1  ;;  %v9193_v40 = vadd.f32 %v9192_v22, %v9191_v26  ;;  %v9194_v42 = vpop.f32.mrb[106].mxu0  ;;  %7260 = vmatmul.mubr.bf16.vlgmr.msra.gmra.mrb[144].mxu0 %v8526_v51 }
 0x31d   : > { %v9081_v62 = vadd.f32 %v9080_v55, %v9079_v34  ;;  %v9082_v20 = vpop.f32.mrb[106].mxu1  ;;  %v9195_v52 = vpop.f32.mrb[107].mxu0  ;;  %9500 = vmatpush3.bf16.msra.mxu0 %v10223_v60 }
 0x31e   : > { %v9083_v44 = vpop.f32.mrb[107].mxu1  ;;  %v9196_v56 = vadd.f32 %v9195_v52, %v9194_v42 }
 0x31f   : > { %v4044_v21 = vadd.f32 %v9081_v62, %v11920_v36  ;;  %v9084_v9 = vadd.f32 %v9083_v44, %v9082_v20 }
 0x321   : > { %v4047_v18 = vadd.f32 %v9084_v9, %v11922_v47  ;;  %v12121_v1 = vadd.f32 %v9193_v40, %v4044_v21 }
 0x322   : > { %v9197_v38 = vpop.f32.mrb[108].mxu0 }
 0x323   : > { %v9085_v45 = vpop.f32.mrb[108].mxu1  ;;  %v12123_v15 = vadd.f32 %v9196_v56, %v4047_v18  ;;  %v9198_v6 = vpop.f32.mrb[109].mxu0 }
 0x324   : > { %v9086_v2 = vpop.f32.mrb[109].mxu1  ;;  %v9199_v34 = vadd.f32 %v9198_v6, %v9197_v38  ;;  %v9200_v26 = vpop.f32.mrb[110].mxu0  ;;  %v10234_v6 = vld [vmem:[%s13499_s5 + $0x148] sm:$0xff]  }
 0x325   : > { %v9087_v53 = vadd.f32 %v9086_v2, %v9085_v45  ;;  %v9088_v36 = vpop.f32.mrb[110].mxu1  ;;  %v9201_v51 = vpop.f32.mrb[111].mxu0  ;;  %9501 = vmatprep.subr.bf16.mxu0 %v10234_v6 }
 0x326   : > { %v9089_v0 = vpop.f32.mrb[111].mxu1  ;;  %v9202_v16 = vadd.f32 %v9201_v51, %v9200_v26 }
 0x327   : > { %v4052_v55 = vadd.f32 %v9087_v53, %v11931_v31  ;;  %v9090_v22 = vadd.f32 %v9089_v0, %v9088_v36 }
 0x329   : > { %v4055_v47 = vadd.f32 %v9090_v22, %v11936_v57  ;;  %v12127_v4 = vadd.f32 %v9199_v34, %v4052_v55 }
 0x32a   : > { %v9203_v62 = vpop.f32.mrb[112].mxu0 }
 0x32b   : > { %v9091_v35 = vpop.f32.mrb[112].mxu1  ;;  %v12129_v20 = vadd.f32 %v9202_v16, %v4055_v47  ;;  %v9204_v42 = vpop.f32.mrb[113].mxu0 }
 0x32c   : > { %v9092_v40 = vpop.f32.mrb[113].mxu1  ;;  %v9205_v52 = vadd.f32 %v9204_v42, %v9203_v62  ;;  %v9206_v23 = vpop.f32.mrb[114].mxu0 }
 0x32d   : > { %v9093_v60 = vadd.f32 %v9092_v40, %v9091_v35  ;;  %v9094_v44 = vpop.f32.mrb[114].mxu1  ;;  %v9207_v21 = vpop.f32.mrb[115].mxu0 }
 0x32e   : > { %v9095_v30 = vpop.f32.mrb[115].mxu1  ;;  %v9208_v56 = vadd.f32 %v9207_v21, %v9206_v23 }
 0x32f   : > { %v4060_v31 = vadd.f32 %v9093_v60, %v11940_v13  ;;  %v9096_v9 = vadd.f32 %v9095_v30, %v9094_v44 }
 0x331   : > { %v4063_v57 = vadd.f32 %v9096_v9, %v11944_v63  ;;  %v12133_v18 = vadd.f32 %v9205_v52, %v4060_v31  ;;  %v10235_v63 = vld [vmem:[%s13499_s5 + $0x108] sm:$0xff]  }
 0x332   : > { %v9209_v38 = vpop.f32.mrb[116].mxu0  ;;  %9502 = vmatpush3.bf16.msra.mxu0 %v10235_v63 }
 0x333   : > { %v9097_v45 = vpop.f32.mrb[116].mxu1  ;;  %v12135_v2 = vadd.f32 %v9208_v56, %v4063_v57  ;;  %v9210_v36 = vpop.f32.mrb[117].mxu0 }
 0x334   : > { %v9098_v53 = vpop.f32.mrb[117].mxu1  ;;  %v9211_v0 = vadd.f32 %v9210_v36, %v9209_v38  ;;  %v9212_v13 = vpop.f32.mrb[118].mxu0 }
 0x335   : > { %v9099_v34 = vadd.f32 %v9098_v53, %v9097_v45  ;;  %v9100_v26 = vpop.f32.mrb[118].mxu1  ;;  %v9213_v55 = vpop.f32.mrb[119].mxu0 }
 0x336   : > { %v9101_v51 = vpop.f32.mrb[119].mxu1  ;;  %v9214_v47 = vadd.f32 %v9213_v55, %v9212_v13 }
 0x337   : > { %v4068_v22 = vadd.f32 %v9099_v34, %v11951_v37  ;;  %v9102_v16 = vadd.f32 %v9101_v51, %v9100_v26 }
 0x339   : > { %v4071_v35 = vadd.f32 %v9102_v16, %v11958_v48  ;;  %v12145_v62 = vadd.f32 %v9211_v0, %v4068_v22 }
 0x33a   : > { %v9215_v42 = vpop.f32.mrb[120].mxu0 }
 0x33b   : > { %v9103_v40 = vpop.f32.mrb[120].mxu1  ;;  %v12147_v60 = vadd.f32 %v9214_v47, %v4071_v35  ;;  %v9216_v52 = vpop.f32.mrb[121].mxu0 }
 0x33c   : > { %v9104_v44 = vpop.f32.mrb[121].mxu1  ;;  %v9217_v21 = vadd.f32 %v9216_v52, %v9215_v42  ;;  %v9218_v31 = vpop.f32.mrb[122].mxu0 }
 0x33d   : > { %v9105_v23 = vadd.f32 %v9104_v44, %v9103_v40  ;;  %v9106_v30 = vpop.f32.mrb[122].mxu1  ;;  %v9219_v56 = vpop.f32.mrb[123].mxu0 }
 0x33e   : > { %v9107_v9 = vpop.f32.mrb[123].mxu1  ;;  %v9220_v45 = vadd.f32 %v9219_v56, %v9218_v31 }
 0x33f   : > { %v4076_v37 = vadd.f32 %v9105_v23, %v11962_v58  ;;  %v9108_v57 = vadd.f32 %v9107_v9, %v9106_v30 }
 0x341   : > { %v4079_v48 = vadd.f32 %v9108_v57, %v11966_v54  ;;  %v12151_v38 = vadd.f32 %v9217_v21, %v4076_v37 }
 0x342   : > { %v9221_v53 = vpop.f32.mrb[124].mxu0 }
 0x343   : > { %v9109_v6 = vpop.f32.mrb[124].mxu1  ;;  %v12153_v36 = vadd.f32 %v9220_v45, %v4079_v48  ;;  %v9222_v26 = vpop.f32.mrb[125].mxu0 }
 0x344   : > { %v9110_v34 = vpop.f32.mrb[125].mxu1  ;;  %v9223_v51 = vadd.f32 %v9222_v26, %v9221_v53  ;;  %v9224_v55 = vpop.f32.mrb[126].mxu0  ;;  %v10247_v53 = vld [vmem:[%s13499_s5 + $0x110] sm:$0xff]  }
 0x345   : > { %v9111_v0 = vadd.f32 %v9110_v34, %v9109_v6  ;;  %v9112_v13 = vpop.f32.mrb[126].mxu1  ;;  %v9225_v22 = vpop.f32.mrb[127].mxu0 }
 0x346   : > { %v9113_v63 = vpop.f32.mrb[127].mxu1  ;;  %v9226_v47 = vadd.f32 %v9225_v22, %v9224_v55 }
 0x347   : > { %v4084_v58 = vadd.f32 %v9111_v0, %v11973_v32  ;;  %v9114_v16 = vadd.f32 %v9113_v63, %v9112_v13 }
 0x349   : > { %v4087_v54 = vadd.f32 %v9114_v16, %v11980_v5  ;;  %v12157_v35 = vadd.f32 %v9223_v51, %v4084_v58  ;;  %v10246_v5 = vld [vmem:[%s13499_s5 + $0x150] sm:$0xff]  }
 0x34a   : > { %v9227_v42 = vpop.f32.mrb[128].mxu0  ;;  %9503 = vmatprep.subr.bf16.mxu0 %v10246_v5 }
 0x34b   : > { %v9115_v40 = vpop.f32.mrb[128].mxu1  ;;  %v12159_v44 = vadd.f32 %v9226_v47, %v4087_v54  ;;  %v9228_v23 = vpop.f32.mrb[129].mxu0  ;;  %9504 = vmatpush3.bf16.msra.mxu0 %v10247_v53 }
 0x34c   : > { %v9116_v52 = vpop.f32.mrb[129].mxu1  ;;  %v9229_v31 = vadd.f32 %v9228_v23, %v9227_v42  ;;  %v9230_v9 = vpop.f32.mrb[130].mxu0  ;;  %v10259_v42 = vld [vmem:[%s13499_s5 + $0x118] sm:$0xff]  }
 0x34d   : > { %v9117_v30 = vadd.f32 %v9116_v52, %v9115_v40  ;;  %v9118_v21 = vpop.f32.mrb[130].mxu1  ;;  %v9231_v37 = vpop.f32.mrb[131].mxu0  ;;  %v10258_v40 = vld [vmem:[%s13499_s5 + $0x158] sm:$0xff]  }
 0x34e   : > { %v9119_v56 = vpop.f32.mrb[131].mxu1  ;;  %v9232_v45 = vadd.f32 %v9231_v37, %v9230_v9  ;;  %9505 = vmatprep.subr.bf16.mxu0 %v10258_v40 }
 0x34f   : > { %v4092_v32 = vadd.f32 %v9117_v30, %v11984_v39  ;;  %v9120_v57 = vadd.f32 %v9119_v56, %v9118_v21  ;;  %9506 = vmatpush3.bf16.msra.mxu0 %v10259_v42 }
 0x351   : > { %v4095_v48 = vadd.f32 %v9120_v57, %v11987_v29  ;;  %v12166_v6 = vadd.f32 %v9229_v31, %v4092_v32 }
 0x352   : > { %v9233_v26 = vpop.f32.mrb[132].mxu0 }
 0x353   : > { %v9121_v34 = vpop.f32.mrb[132].mxu1  ;;  %v12171_v0 = vadd.f32 %v9232_v45, %v4095_v48  ;;  %v9234_v13 = vpop.f32.mrb[133].mxu0 }
 0x354   : > { %v9122_v39 = vpop.f32.mrb[133].mxu1  ;;  %v9235_v63 = vadd.f32 %v9234_v13, %v9233_v26  ;;  %v9236_v22 = vpop.f32.mrb[134].mxu0 }
 0x355   : > { %v9123_v51 = vadd.f32 %v9122_v39, %v9121_v34  ;;  %v9124_v55 = vpop.f32.mrb[134].mxu1  ;;  %v9237_v29 = vpop.f32.mrb[135].mxu0 }
 0x356   : > { %v9125_v58 = vpop.f32.mrb[135].mxu1  ;;  %v9238_v54 = vadd.f32 %v9237_v29, %v9236_v22 }
 0x357   : > { %v4100_v16 = vadd.f32 %v9123_v51, %v11993_v3  ;;  %v9126_v47 = vadd.f32 %v9125_v58, %v9124_v55 }
 0x359   : > { %v4103_v52 = vadd.f32 %v9126_v47, %v11999_v59  ;;  %v12181_v23 = vadd.f32 %v9235_v63, %v4100_v16 }
 0x35a   : > { %v9239_v21 = vpop.f32.mrb[136].mxu0 }
 0x35b   : > { %v9127_v30 = vpop.f32.mrb[136].mxu1  ;;  %v12183_v31 = vadd.f32 %v9238_v54, %v4103_v52  ;;  %v9240_v9 = vpop.f32.mrb[137].mxu0 }
 0x35c   : > { %v9128_v3 = vpop.f32.mrb[137].mxu1  ;;  %v9241_v32 = vadd.f32 %v9240_v9, %v9239_v21  ;;  %v9242_v57 = vpop.f32.mrb[138].mxu0 }
 0x35d   : > { %v9129_v56 = vadd.f32 %v9128_v3, %v9127_v30  ;;  %v9130_v37 = vpop.f32.mrb[138].mxu1  ;;  %v9243_v5 = vpop.f32.mrb[139].mxu0  ;;  %v10273_v30 = vld [vmem:[%s13499_s5 + $0x120] sm:$0xff]  }
 0x35e   : > { %v9131_v45 = vpop.f32.mrb[139].mxu1  ;;  %v9244_v59 = vadd.f32 %v9243_v5, %v9242_v57 }
 0x35f   : > { %v4108_v48 = vadd.f32 %v9129_v56, %v12002_v25  ;;  %v9132_v53 = vadd.f32 %v9131_v45, %v9130_v37  ;;  %v10270_v25 = vld [vmem:[%s13499_s5 + $0x1c0] sm:$0xff]  }
 0x360   : > { %9611 = vmatprep.subr.bf16.mxu1 %v10270_v25 }
 0x361   : > { %v4111_v34 = vadd.f32 %v9132_v53, %v12005_v11  ;;  %v12187_v26 = vadd.f32 %v9241_v32, %v4108_v48  ;;  %v10272_v11 = vld [vmem:[%s13499_s5 + $0x160] sm:$0xff]  }
 0x362   : > { %v9245_v13 = vpop.f32.mrb[140].mxu0  ;;  %9507 = vmatprep.subr.bf16.mxu0 %v10272_v11  ;;  %v4954_v11 = vld [vmem:[#allocation3 + $0x18] sm:$0xf] }
 0x363   : > { %v9133_v39 = vpop.f32.mrb[140].mxu1  ;;  %v12189_v51 = vadd.f32 %v9244_v59, %v4111_v34  ;;  %v9246_v63 = vpop.f32.mrb[141].mxu0  ;;  %9508 = vmatpush3.bf16.msra.mxu0 %v10273_v30 }
 0x364   : > { %v9134_v55 = vpop.f32.mrb[141].mxu1  ;;  %v9247_v29 = vadd.f32 %v9246_v63, %v9245_v13  ;;  %v9248_v16 = vpop.f32.mrb[142].mxu0 }
 0x365   : > { %v9135_v22 = vadd.f32 %v9134_v55, %v9133_v39  ;;  %v9136_v58 = vpop.f32.mrb[142].mxu1  ;;  %v9249_v54 = vpop.f32.mrb[143].mxu0 }
 0x366   : > { %v9137_v47 = vpop.f32.mrb[143].mxu1  ;;  %v9250_v52 = vadd.f32 %v9249_v54, %v9248_v16 }
 0x367   : > { %v4116_v40 = vadd.f32 %v9135_v22, %v12011_v61  ;;  %v9138_v42 = vadd.f32 %v9137_v47, %v9136_v58 }
 0x369   : > { %v4119_v21 = vadd.f32 %v9138_v42, %v12023_v50  ;;  %v12202_v3 = vadd.f32 %v9247_v29, %v4116_v40 }
 0x36b   : > { %v9805_v9 = vpop.f32.mrb[144].mxu1  ;;  %v12204_v56 = vadd.f32 %v9250_v52, %v4119_v21 }
 0x36c   : > { %v4326_v37 = vadd.f32 %v9805_v9, %v12029_v8  ;;  %v4317_v32 = vpop.f32.mrb[145].mxu1 }
 0x36d   : > { %v4318_v61 = vadd.f32 %v4317_v32, %v12034_v27  ;;  %v9806_v57 = vpop.f32.mrb[146].mxu1 }
 0x36e   : > { %v4446_v45 = vmax.f32 %v4326_v37, 0.0  ;;  %v4329_v5 = vadd.f32 %v9806_v57, %v12039_v24  ;;  %v4320_v48 = vpop.f32.mrb[147].mxu1  ;;  %v4947_v37 = vld [vmem:[#allocation3 + $0xc] sm:$0xf] }
 0x36f   : > { %v4444_v53 = vmax.f32 %v4318_v61, 0.0  ;;  %v4321_v59 = vadd.f32 %v4320_v48, %v12041_v7  ;;  %v4958_v48 = vld [vmem:[#allocation3 + $0x20] sm:$0x1] }
 0x370   : > { %v8752_v50 = vpack.c.bf16 %v4446_v45, %v4446_v45  ;;  %v4447_v34 = vmax.f32 %v4329_v5, 0.0 }
 0x371   : > { %v8750_v39 = vpack.c.bf16 %v4444_v53, %v4444_v53  ;;  %v4445_v13 = vmax.f32 %v4321_v59, 0.0 }
 0x372   : > { %v4644_v55 = vshrl.u32 %v8752_v50, 16  ;;  %v8753_v63 = vpack.c.bf16 %v4447_v34, %v4447_v34  ;;  %v4647_v22 = vshll.u32 %v8752_v50, 16 }
 0x373   : > { %v4627_v58 = vshrl.u32 %v8750_v39, 16  ;;  %v4630_v8 = vshll.u32 %v8750_v39, 16  ;;  %v8751_v29 = vpack.c.bf16 %v4445_v13, %v4445_v13  ;;  %v9809_v16 = vpop.f32.mrb[148].mxu1  ;;  %v4951_v39 = vld [vmem:[#allocation3 + $0x14] sm:$0x1] }
 0x374   : > { %v4646_v27 = vrot.slane %v4644_v55, 7  ;;  %v4652_v47 = vshrl.u32 %v8753_v63, 16  ;;  %v4655_v54 = vshll.u32 %v8753_v63, 16  ;;  %v4342_v24 = vadd.f32 %v9809_v16, %v12061_v41  ;;  %v4333_v25 = vpop.f32.mrb[149].mxu1  ;;  %v10286_v41 = vld [vmem:[%s13499_s5 + $0x168] sm:$0xff]  }
 0x375   : > { %v4629_v40 = vrot.slane %v4627_v58, 7  ;;  %v4635_v7 = vshrl.u32 %v8751_v29, 16  ;;  %v4638_v42 = vshll.u32 %v8751_v29, 16  ;;  %v4334_v52 = vadd.f32 %v4333_v25, %v12054_v28  ;;  %v9810_v30 = vpop.f32.mrb[150].mxu1  ;;  %v10287_v55 = vld [vmem:[%s13499_s5 + $0x128] sm:$0xff]   ;;  %9509 = vmatprep.subr.bf16.mxu0 %v10286_v41 }
 0x376   : > { %v4649_v21 = vor.u32 %v4647_v22, %v4646_v27  ;;  %v4650_v9 = vrot.slane %v4646_v27, 4  ;;  %v4654_v32 = vrot.slane %v4652_v47, 7  ;;  %v4450_v61 = vmax.f32 %v4342_v24, 0.0  ;;  %v4336_v57 = vpop.f32.mrb[151].mxu1  ;;  %9510 = vmatpush3.bf16.msra.mxu0 %v10287_v55 }
 0x377   : > { %v4632_v45 = vor.u32 %v4630_v8, %v4629_v40  ;;  %v4633_v5 = vrot.slane %v4629_v40, 4  ;;  %v4637_v53 = vrot.slane %v4635_v7, 7  ;;  %v4448_v59 = vmax.f32 %v4334_v52, 0.0 }
 0x378   : > { %v4955_v50 = vsel %vm10991_vm10, %v4649_v21, %v4954_v11  ;;  %v4657_v28 = vor.u32 %v4655_v54, %v4654_v32  ;;  %v4659_v34 = vrot.slane %v4654_v32, 4  ;;  %v8756_v13 = vpack.c.bf16 %v4450_v61, %v4450_v61 }
 0x379   : > { %4956 = vst [vmem:[#allocation3 + $0x18] sm:$0xf] %v4955_v50  ;;  %v4948_v63 = vsel %vm10991_vm10, %v4632_v45, %v4947_v37  ;;  %v4640_v22 = vor.u32 %v4638_v42, %v4637_v53  ;;  %v4642_v58 = vrot.slane %v4637_v53, 4  ;;  %v8754_v8 = vpack.c.bf16 %v4448_v59, %v4448_v59  ;;  %v4968_v37 = vld [vmem:[#allocation3 + $0x30] sm:$0xf] }
 0x37a   : > { %4949 = vst [vmem:[#allocation3 + $0xc] sm:$0xf] %v4948_v63  ;;  %v4658_v29 = vsel %vm10986_vm9, %v4650_v9, %v4657_v28  ;;  %v4959_v27 = vsel %vm10998_vm11, %v4659_v34, %v4958_v48  ;;  %v4678_v47 = vshrl.u32 %v8756_v13, 16  ;;  %v4681_v25 = vshll.u32 %v8756_v13, 16  ;;  %v4961_v59 = vld [vmem:[#allocation3 + $0x24] sm:$0xf] }
 0x37b   : > { %4957 = vst [vmem:[#allocation3 + $0x1c] sm:$0xf] %v4658_v29  ;;  %4960 = vst [vmem:[#allocation3 + $0x20] sm:$0x1] %v4959_v27  ;;  %v4641_v54 = vsel %vm10986_vm9, %v4633_v5, %v4640_v22  ;;  %v4952_v24 = vsel %vm10998_vm11, %v4642_v58, %v4951_v39  ;;  %v4661_v11 = vshrl.u32 %v8754_v8, 16  ;;  %v9813_v40 = vpop.f32.mrb[152].mxu1  ;;  %v4345_v42 = vadd.f32 %v9810_v30, %v12077_v12 }
 0x37c   : > { %4950 = vst [vmem:[#allocation3 + $0x10] sm:$0xf] %v4641_v54  ;;  %4953 = vst [vmem:[#allocation3 + $0x14] sm:$0x1] %v4952_v24  ;;  %v12230_v7 = vrot.slane %v4678_v47, 7  ;;  %v4337_v52 = vadd.f32 %v4336_v57, %v12066_v19  ;;  %v4358_v21 = vadd.f32 %v9813_v40, %v12105_v49  ;;  %v4349_v9 = vpop.f32.mrb[153].mxu1 }
 0x37d   : > { %v4663_v32 = vrot.slane %v4661_v11, 7  ;;  %v4664_v61 = vshll.u32 %v8754_v8, 16  ;;  %v4350_v45 = vadd.f32 %v4349_v9, %v12087_v46  ;;  %v9814_v5 = vpop.f32.mrb[154].mxu1  ;;  %v4451_v41 = vmax.f32 %v4345_v42, 0.0  ;;  %v4972_v47 = vld [vmem:[#allocation3 + $0x38] sm:$0x1] }
 0x37e   : > { %v4683_v48 = vor.u32 %v4681_v25, %v12230_v7  ;;  %v4684_v53 = vrot.slane %v12230_v7, 4  ;;  %v4449_v50 = vmax.f32 %v4337_v52, 0.0  ;;  %v4352_v28 = vpop.f32.mrb[155].mxu1  ;;  %v4454_v19 = vmax.f32 %v4358_v21, 0.0  ;;  %v4965_v54 = vld [vmem:[#allocation3 + $0x2c] sm:$0x1] }
 0x37f   : > { %v4666_v12 = vor.u32 %v4664_v61, %v4663_v32  ;;  %v4667_v30 = vrot.slane %v4663_v32, 4  ;;  %v4452_v57 = vmax.f32 %v4350_v45, 0.0  ;;  %v8757_v34 = vpack.c.bf16 %v4451_v41, %v4451_v41 }
 0x380   : > { %v4969_v49 = vsel %vm10991_vm10, %v4683_v48, %v4968_v37  ;;  %v8755_v39 = vpack.c.bf16 %v4449_v50, %v4449_v50  ;;  %v4361_v46 = vadd.f32 %v9814_v5, %v12110_v10  ;;  %v8760_v55 = vpack.c.bf16 %v4454_v19, %v4454_v19 }
 0x381   : > { %4970 = vst [vmem:[#allocation3 + $0x30] sm:$0xf] %v4969_v49  ;;  %v4962_v13 = vsel %vm10991_vm10, %v4666_v12, %v4961_v59  ;;  %v8758_v63 = vpack.c.bf16 %v4452_v57, %v4452_v57  ;;  %v4353_v22 = vadd.f32 %v4352_v28, %v12092_v33  ;;  %v4686_v58 = vshrl.u32 %v8757_v34, 16  ;;  %v4982_v33 = vld [vmem:[#allocation3 + $0x48] sm:$0xf] }
 0x382   : > { %4963 = vst [vmem:[#allocation3 + $0x24] sm:$0xf] %v4962_v13  ;;  %v4689_v8 = vshll.u32 %v8757_v34, 16  ;;  %v4669_v29 = vshrl.u32 %v8755_v39, 16  ;;  %v4672_v27 = vshll.u32 %v8755_v39, 16  ;;  %v4712_v24 = vshrl.u32 %v8760_v55, 16 }
 0x383   : > { %v4715_v25 = vshll.u32 %v8760_v55, 16  ;;  %v4695_v11 = vshrl.u32 %v8758_v63, 16  ;;  %v4698_v40 = vshll.u32 %v8758_v63, 16  ;;  %v9817_v10 = vpop.f32.mrb[156].mxu1  ;;  %v4688_v7 = vrot.slane %v4686_v58, 7  ;;  %v10300_v63 = vld [vmem:[%s13499_s5 + $0x170] sm:$0xff]  }
 0x384   : > { %v4671_v42 = vrot.slane %v4669_v29, 7  ;;  %v4455_v52 = vmax.f32 %v4361_v46, 0.0  ;;  %v4453_v21 = vmax.f32 %v4353_v22, 0.0  ;;  %v4365_v9 = vpop.f32.mrb[157].mxu1  ;;  %v12244_v37 = vrot.slane %v4712_v24, 7  ;;  %9511 = vmatprep.subr.bf16.mxu0 %v10300_v63 }
 0x385   : > { %v12246_v32 = vrot.slane %v4695_v11, 7  ;;  %v4374_v61 = vadd.f32 %v9817_v10, %v12127_v4  ;;  %v4366_v45 = vadd.f32 %v4365_v9, %v12121_v1  ;;  %v9818_v5 = vpop.f32.mrb[158].mxu1  ;;  %v4691_v48 = vor.u32 %v4689_v8, %v4688_v7  ;;  %v4975_v28 = vld [vmem:[#allocation3 + $0x3c] sm:$0xf]  ;;  %v5124_v29 = vld [vmem:[#allocation3 + $0x10] sm:$0xf] }
 0x386   : > { %v4693_v59 = vrot.slane %v4688_v7, 4  ;;  %v4674_v41 = vor.u32 %v4672_v27, %v4671_v42  ;;  %v4676_v50 = vrot.slane %v4671_v42, 4  ;;  %v4368_v12 = vpop.f32.mrb[159].mxu1  ;;  %v4717_v19 = vor.u32 %v4715_v25, %v12244_v37  ;;  %v10301_v11 = vld [vmem:[%s13499_s5 + $0x130] sm:$0xff]   ;;  %v4979_v10 = vld [vmem:[#allocation3 + $0x44] sm:$0x1] }
 0x387   : > { %v4718_v57 = vrot.slane %v12244_v37, 4  ;;  %v4700_v49 = vor.u32 %v4698_v40, %v12246_v32  ;;  %v4692_v34 = vsel %vm10986_vm9, %v4684_v53, %v4691_v48  ;;  %v8761_v53 = vpack.c.bf16 %v4455_v52, %v4455_v52  ;;  %v4986_v40 = vld [vmem:[#allocation3 + $0x50] sm:$0x1]  ;;  %9512 = vmatpush3.bf16.msra.mxu0 %v10301_v11 }
 0x388   : > { %v4973_v4 = vsel %vm10998_vm11, %v4693_v59, %v4972_v47  ;;  %v4675_v1 = vsel %vm10986_vm9, %v4667_v30, %v4674_v41  ;;  %v4966_v39 = vsel %vm10998_vm11, %v4676_v50, %v4965_v54  ;;  %4971 = vst [vmem:[#allocation3 + $0x34] sm:$0xf] %v4692_v34  ;;  %v4983_v46 = vsel %vm10991_vm10, %v4717_v19, %v4982_v33 }
 0x389   : > { %4974 = vst [vmem:[#allocation3 + $0x38] sm:$0x1] %v4973_v4  ;;  %4964 = vst [vmem:[#allocation3 + $0x28] sm:$0xf] %v4675_v1  ;;  %v4976_v13 = vsel %vm10991_vm10, %v4700_v49, %v4975_v28  ;;  %v8759_v55 = vpack.c.bf16 %v4453_v21, %v4453_v21  ;;  %v4458_v30 = vmax.f32 %v4374_v61, 0.0  ;;  %v4456_v22 = vmax.f32 %v4366_v45, 0.0 }
 0x38a   : > { %4967 = vst [vmem:[#allocation3 + $0x2c] sm:$0x1] %v4966_v39  ;;  %4984 = vst [vmem:[#allocation3 + $0x48] sm:$0xf] %v4983_v46  ;;  %v4377_v58 = vadd.f32 %v9818_v5, %v12129_v20  ;;  %v4369_v8 = vadd.f32 %v4368_v12, %v12123_v15  ;;  %v4701_v27 = vrot.slane %v12246_v32, 4  ;;  %v4720_v47 = vshrl.u32 %v8761_v53, 16 }
 0x38b   : > { %4977 = vst [vmem:[#allocation3 + $0x3c] sm:$0xf] %v4976_v13  ;;  %v4723_v54 = vshll.u32 %v8761_v53, 16  ;;  %v4703_v24 = vshrl.u32 %v8759_v55, 16  ;;  %v12271_v25 = vpop.f32.mrb[160].mxu1  ;;  %v8764_v7 = vpack.c.bf16 %v4458_v30, %v4458_v30  ;;  %v8762_v42 = vpack.c.bf16 %v4456_v22, %v4456_v22  ;;  %v10271_v45 = vld [vmem:[%s13499_s5 + $0x180] sm:$0xff]  }
 0x38c   : > { %v4459_v20 = vmax.f32 %v4377_v58, 0.0  ;;  %v4457_v52 = vmax.f32 %v4369_v8, 0.0  ;;  %v5123_v15 = vld [vmem:[#allocation3 + $0xc] sm:$0xf]  ;;  %v12276_v21 = vpop.f32.mrb[161].mxu1  ;;  %v4722_v9 = vrot.slane %v4720_v47, 7 }
 0x38d   : > { %v4705_v37 = vrot.slane %v4703_v24, 7  ;;  %v4706_v33 = vshll.u32 %v8759_v55, 16  ;;  %v12278_v32 = vcombine.low %v5123_v15, %v5124_v29  ;;  %v9822_v61 = vpop.f32.mrb[162].mxu1  ;;  %v4746_v5 = vshrl.u32 %v8764_v7, 16  ;;  %v10284_v28 = vld [vmem:[%s13499_s5 + $0x1c8] sm:$0xff]   ;;  %v10298_v29 = vld [vmem:[%s13499_s5 + $0x1d0] sm:$0xff]  }
 0x38e   : > { %v4749_v48 = vshll.u32 %v8764_v7, 16  ;;  %v4729_v59 = vshrl.u32 %v8762_v42, 16  ;;  %v4732_v41 = vshll.u32 %v8762_v42, 16  ;;  %v12283_v50 = vpop.f32.mrb[163].mxu1  ;;  %v4725_v12 = vor.u32 %v4723_v54, %v4722_v9  ;;  %v4996_v1 = vld [vmem:[#allocation3 + $0x60] sm:$0xf] }
 0x38f   : > { %v4727_v19 = vrot.slane %v4722_v9, 4  ;;  %v4708_v49 = vor.u32 %v4706_v33, %v4705_v37  ;;  %v4710_v34 = vrot.slane %v4705_v37, 4  ;;  %7420 = vmatprep.mubr.bf16.mxu1 %v12278_v32  ;;  %v12289_v4 = vrot.slane %v4746_v5, 7  ;;  %v4989_v22 = vld [vmem:[#allocation3 + $0x54] sm:$0xf]  ;;  %v10299_v15 = vld [vmem:[%s13499_s5 + $0x190] sm:$0xff]  }
 0x390   : > { %v12291_v39 = vrot.slane %v4729_v59, 7  ;;  %v8765_v46 = vpack.c.bf16 %v4459_v20, %v4459_v20  ;;  %v8763_v13 = vpack.c.bf16 %v4457_v52, %v4457_v52  ;;  %7421 = vmatmul.mubr.bf16.vlgmr.msra.gmra.mrb[176].mxu1 %v12118_v43  ;;  %v4726_v53 = vsel %vm10986_vm9, %v4718_v57, %v4725_v12  ;;  %v10285_v58 = vld [vmem:[%s13499_s5 + $0x188] sm:$0xff]   ;;  %v5126_v8 = vld [vmem:[#allocation3 + $0x1c] sm:$0xf]  ;;  %v5000_v7 = vld [vmem:[#allocation3 + $0x68] sm:$0x1] }
 0x391   : > { %v4987_v55 = vsel %vm10998_vm11, %v4727_v19, %v4986_v40  ;;  %v4709_v63 = vsel %vm10986_vm9, %v4701_v27, %v4708_v49  ;;  %v4980_v30 = vsel %vm10998_vm11, %v4710_v34, %v4979_v10  ;;  %9612 = vmatpush3.bf16.msra.mxu1 %v10271_v45  ;;  %4985 = vst [vmem:[#allocation3 + $0x4c] sm:$0xf] %v4726_v53  ;;  %v4752_v24 = vrot.slane %v12289_v4, 4  ;;  %v4993_v42 = vld [vmem:[#allocation3 + $0x5c] sm:$0x1]  ;;  %v10312_v34 = vld [vmem:[%s13499_s5 + $0x1d8] sm:$0xff]  }
 0x392   : > { %4988 = vst [vmem:[#allocation3 + $0x50] sm:$0x1] %v4987_v55  ;;  %4978 = vst [vmem:[#allocation3 + $0x40] sm:$0xf] %v4709_v63  ;;  %v4751_v43 = vor.u32 %v4749_v48, %v12289_v4  ;;  %v4734_v57 = vor.u32 %v4732_v41, %v12291_v39  ;;  %9613 = vmatprep.subr.bf16.mxu1 %v10284_v28  ;;  %v4754_v27 = vshrl.u32 %v8765_v46, 16  ;;  %v4737_v47 = vshrl.u32 %v8763_v13, 16 }
 0x393   : > { %4981 = vst [vmem:[#allocation3 + $0x44] sm:$0x1] %v4980_v30  ;;  %v12310_v54 = vpop.f32.mrb[164].mxu1  ;;  %v4757_v10 = vshll.u32 %v8765_v46, 16  ;;  %v5125_v20 = vld [vmem:[#allocation3 + $0x18] sm:$0xf]  ;;  %v4390_v41 = vadd.f32 %v12271_v25, %v12145_v62  ;;  %v4382_v28 = vadd.f32 %v12276_v21, %v12133_v18  ;;  %v4393_v12 = vadd.f32 %v9822_v61, %v12147_v60 }
 0x394   : > { %v4997_v11 = vsel %vm10991_vm10, %v4751_v43, %v4996_v1  ;;  %v4990_v40 = vsel %vm10991_vm10, %v4734_v57, %v4989_v22  ;;  %v12317_v52 = vpop.f32.mrb[165].mxu1  ;;  %v4756_v9 = vrot.slane %v4754_v27, 7  ;;  %v4739_v37 = vrot.slane %v4737_v47, 7  ;;  %v12324_v5 = vld [vmem:[#allocation3 + $0x10] sm:$0xf] }
 0x395   : > { %4998 = vst [vmem:[#allocation3 + $0x60] sm:$0xf] %v4997_v11  ;;  %4991 = vst [vmem:[#allocation3 + $0x54] sm:$0xf] %v4990_v40  ;;  %v4740_v33 = vshll.u32 %v8763_v13, 16  ;;  %v12322_v45 = vcombine.low %v5125_v20, %v5126_v8  ;;  %v12326_v48 = vpop.f32.mrb[166].mxu1  ;;  %9614 = vmatpush3.bf16.msra.mxu1 %v10285_v58 }
 0x396   : > { %v4735_v59 = vrot.slane %v12291_v39, 4  ;;  %v12334_v19 = vld [vmem:[#allocation3 + $0x1c] sm:$0xf]  ;;  %v12336_v49 = vpop.f32.mrb[167].mxu1  ;;  %9615 = vmatprep.subr.bf16.mxu1 %v10298_v29  ;;  %v4759_v4 = vor.u32 %v4757_v10, %v4756_v9  ;;  %v4761_v1 = vrot.slane %v4756_v9, 4  ;;  %v4744_v46 = vrot.slane %v4739_v37, 4 }
 0x397   : > { %v4742_v39 = vor.u32 %v4740_v33, %v4739_v37  ;;  %7428 = vmatprep.mubr.bf16.mxu1 %v12322_v45  ;;  %v12342_v62 = vld [vmem:[#allocation3 + $0x14] ss:$0 sps:$4 sm:$0x11]   ;;  %v4462_v18 = vmax.f32 %v4390_v41, 0.0  ;;  %v4460_v25 = vmax.f32 %v4382_v28, 0.0  ;;  %v4463_v60 = vmax.f32 %v4393_v12, 0.0 }
 0x398   : > { %v12344_v21 = vld [vmem:[#allocation3 + $0x20] ss:$0 sps:$4 sm:$0x11]   ;;  %v4760_v61 = vsel %vm10986_vm9, %v4752_v24, %v4759_v4  ;;  %v5001_v13 = vsel %vm10998_vm11, %v4761_v1, %v5000_v7  ;;  %v4994_v55 = vsel %vm10998_vm11, %v4744_v46, %v4993_v42  ;;  %v5061_v63 = vld [vmem:[#allocation3 + $0xc] sm:$0xf]  ;;  %v4385_v29 = vadd.f32 %v12283_v50, %v12135_v2 }
 0x399   : > { %v4743_v53 = vsel %vm10986_vm9, %v4735_v59, %v4742_v39  ;;  %9616 = vmatpush3.bf16.msra.mxu1 %v10299_v15  ;;  %4999 = vst [vmem:[#allocation3 + $0x64] sm:$0xf] %v4760_v61  ;;  %5002 = vst [vmem:[#allocation3 + $0x68] sm:$0x1] %v5001_v13  ;;  %v8768_v30 = vpack.c.bf16 %v4462_v18, %v4462_v18  ;;  %v8766_v22 = vpack.c.bf16 %v4460_v25, %v4460_v25  ;;  %v5063_v57 = vld [vmem:[#allocation3 + $0x18] sm:$0xf] }
 0x39a   : > { %4992 = vst [vmem:[#allocation3 + $0x58] sm:$0xf] %v4743_v53  ;;  %4995 = vst [vmem:[#allocation3 + $0x5c] sm:$0x1] %v4994_v55  ;;  %v8769_v58 = vpack.c.bf16 %v4463_v60, %v4463_v60  ;;  %v12355_v43 = vcombine.low %v5061_v63, %v12324_v5  ;;  %9617 = vmatprep.subr.bf16.mxu1 %v10312_v34  ;;  %v10313_v8 = vld [vmem:[%s13499_s5 + $0x198] sm:$0xff]   ;;  %v12363_v27 = vcombine.low %v5063_v57, %v12334_v19  ;;  %v10319_v59 = vld [vmem:[%s13499_s5 + $0x1e0] sm:$0xff]  }
 0x39b   : > { %v12365_v47 = vpop.f32.mrb[168].mxu1  ;;  %v10314_v24 = vld [vmem:[%s13499_s5 + $0x178] sm:$0xff]   ;;  %v4780_v11 = vshrl.u32 %v8768_v30, 16  ;;  %v4763_v40 = vshrl.u32 %v8766_v22, 16  ;;  %v5416_v10 = vshll.u32 %v12342_v62, 16  ;;  %v5428_v7 = vshll.u32 %v12344_v21, 16 }
 0x39c   : > { %v12372_v42 = vpop.f32.mrb[169].mxu1  ;;  %v10315_v2 = vld [vmem:[%s13499_s5 + $0x138] sm:$0xff]   ;;  %v4783_v50 = vshll.u32 %v8768_v30, 16  ;;  %v5010_v20 = vld [vmem:[#allocation3 + $0x78] sm:$0xf]  ;;  %v4766_v15 = vshll.u32 %v8766_v22, 16  ;;  %9513 = vmatprep.subr.bf16.mxu0 %v10314_v24 }
 0x39d   : > { %v4788_v9 = vshrl.u32 %v8769_v58, 16  ;;  %v5411_v37 = vshll.u32 %v12355_v43, 16  ;;  %v12378_v33 = vpop.f32.mrb[170].mxu1  ;;  %9618 = vmatpush3.bf16.msra.mxu1 %v10313_v8  ;;  %v4782_v41 = vrot.slane %v4780_v11, 7  ;;  %v12383_v28 = vrot.slane %v4763_v40, 7  ;;  %9514 = vmatpush3.bf16.msra.mxu0 %v10315_v2  ;;  %v10322_v1 = vld [vmem:[%s13499_s5 + $0x1a0] sm:$0xff]  }
 0x39e   : > { %v4791_v12 = vshll.u32 %v8769_v58, 16  ;;  %v4461_v34 = vmax.f32 %v4385_v29, 0.0  ;;  %v12385_v4 = vpop.f32.mrb[171].mxu1  ;;  %v5003_v39 = vld [vmem:[#allocation3 + $0x6c] sm:$0xf]  ;;  %v5409_v18 = vshrl.u32 %v12355_v43, 16  ;;  %9619 = vmatprep.subr.bf16.mxu1 %v10319_v59 }
 0x39f   : > { %v4790_v46 = vrot.slane %v4788_v9, 7  ;;  %v5413_v25 = vrot.slane %v5411_v37, 1  ;;  %v5423_v60 = vshll.u32 %v12363_v27, 16  ;;  %v4785_v61 = vor.u32 %v4783_v50, %v4782_v41  ;;  %v5014_v55 = vld [vmem:[#allocation3 + $0x80] sm:$0x1]  ;;  %v10323_v8 = vld [vmem:[%s13499_s5 + $0x1e8] sm:$0xff]  }
 0x3a0   : > { %v4786_v13 = vrot.slane %v4782_v41, 4  ;;  %v4768_v53 = vor.u32 %v4766_v15, %v12383_v28  ;;  %v5418_v63 = vrot.slane %v5416_v10, 1  ;;  %v8767_v57 = vpack.c.bf16 %v4461_v34, %v4461_v34  ;;  %v5108_v9 = vld [vmem:[#allocation3 + $0xc] sm:$0xe]  ;;  %v5007_v59 = vld [vmem:[#allocation3 + $0x74] sm:$0x1] }
 0x3a1   : > { %v4793_v30 = vor.u32 %v4791_v12, %v4790_v46  ;;  %v4795_v22 = vrot.slane %v4790_v46, 4  ;;  %v5414_v58 = vor.u32 %v5413_v25, %v5409_v18  ;;  %9620 = vmatpush3.bf16.msra.mxu1 %v10322_v1  ;;  %v5011_v29 = vsel %vm10991_vm10, %v4785_v61, %v5010_v20  ;;  %v10324_v20 = vld [vmem:[%s13499_s5 + $0x1a8] sm:$0xff]   ;;  %v5128_v46 = vld [vmem:[#allocation3 + $0x28] sm:$0xf] }
 0x3a2   : > { %v5004_v24 = vsel %vm10991_vm10, %v4768_v53, %v5003_v39  ;;  %v5421_v11 = vshrl.u32 %v12363_v27, 16  ;;  %v5425_v40 = vrot.slane %v5423_v60, 1  ;;  %5012 = vst [vmem:[#allocation3 + $0x78] sm:$0xf] %v5011_v29  ;;  %v4771_v15 = vshrl.u32 %v8767_v57, 16  ;;  %9621 = vmatprep.subr.bf16.mxu1 %v10323_v8  ;;  %v10328_v8 = vld [vmem:[%s13499_s5 + $0x1b0] sm:$0xff]  }
 0x3a3   : > { %5005 = vst [vmem:[#allocation3 + $0x6c] sm:$0xf] %v5004_v24  ;;  %v4794_v10 = vsel %vm10986_vm9, %v4786_v13, %v4793_v30  ;;  %v5015_v2 = vsel %vm10998_vm11, %v4795_v22, %v5014_v55  ;;  %v5419_v50 = vsel %vm1806_vm1, %v5414_v58, %v5418_v63  ;;  %v12406_v37 = vpop.f32.mrb[172].mxu1  ;;  %v5430_v12 = vrot.slane %v5428_v7, 1  ;;  %v5127_v39 = vld [vmem:[#allocation3 + $0x24] sm:$0xf] }
 0x3a4   : > { %5013 = vst [vmem:[#allocation3 + $0x7c] sm:$0xf] %v4794_v10  ;;  %5016 = vst [vmem:[#allocation3 + $0x80] sm:$0x1] %v5015_v2  ;;  %7267 = vmatprep.mubr.bf16.mxu0 %v5419_v50  ;;  %v5426_v41 = vor.u32 %v5425_v40, %v5421_v11  ;;  %v8559_v34 = vcombine.low %v5108_v9, %v12324_v5  ;;  %v5656_v1 = vrot.slane %v12342_v62, 1  ;;  %v12413_v18 = vpop.f32.mrb[173].mxu1 }
 0x3a5   : > { %v4769_v25 = vrot.slane %v12383_v28, 4  ;;  %v4773_v60 = vrot.slane %v4771_v15, 7  ;;  %v4774_v61 = vshll.u32 %v8767_v57, 16  ;;  %7268 = vmatmul.mubr.bf16.gmra.mrb[148].mxu0 %v12355_v43  ;;  %v4406_v13 = vadd.f32 %v12310_v54, %v12157_v35  ;;  %v12419_v53 = vld [vmem:[#allocation3 + $0x28] sm:$0xf]  ;;  %v12421_v7 = vpop.f32.mrb[174].mxu1  ;;  %9622 = vmatpush3.bf16.msra.mxu1 %v10324_v20 }
 0x3a6   : > { %v5431_v5 = vsel %vm1806_vm1, %v5426_v41, %v5430_v12  ;;  %v5655_v62 = vrot.slane %v8559_v34, 1  ;;  %v4398_v55 = vadd.f32 %v12317_v52, %v12151_v38  ;;  %v4409_v28 = vadd.f32 %v12326_v48, %v12159_v44  ;;  %v12428_v63 = vld [vmem:[#allocation3 + $0x2c] ss:$0 sps:$4 sm:$0x11]   ;;  %v12430_v43 = vpop.f32.mrb[175].mxu1  ;;  %v10327_v58 = vld [vmem:[%s13499_s5 + $0x1f0] sm:$0xff]  }
 0x3a7   : > { %v4776_v30 = vor.u32 %v4774_v61, %v4773_v60  ;;  %v4778_v35 = vrot.slane %v4773_v60, 4  ;;  %7275 = vmatprep.mubr.bf16.mxu0 %v5431_v5  ;;  %v12432_v54 = vcombine.low %v5127_v39, %v5128_v46  ;;  %v4466_v22 = vmax.f32 %v4406_v13, 0.0  ;;  %v5065_v48 = vld [vmem:[#allocation3 + $0x24] sm:$0xf]  ;;  %9623 = vmatprep.subr.bf16.mxu1 %v10327_v58  ;;  %v5109_v13 = vld [vmem:[#allocation3 + $0x18] sm:$0xe] }
 0x3a8   : > { %v5657_v57 = vsel %vm2063_vm2, %v5655_v62, %v5656_v1  ;;  %v4464_v38 = vmax.f32 %v4398_v55, 0.0  ;;  %v4467_v52 = vmax.f32 %v4409_v28, 0.0  ;;  %v4401_v44 = vadd.f32 %v12336_v49, %v12153_v36  ;;  %v5017_v46 = vld [vmem:[#allocation3 + $0x84] sm:$0xf]  ;;  %v5028_v55 = vld [vmem:[#allocation3 + $0x98] sm:$0x1] }
 0x3a9   : > { %v4777_v29 = vsel %vm10986_vm9, %v4769_v25, %v4776_v30  ;;  %v5008_v24 = vsel %vm10998_vm11, %v4778_v35, %v5007_v59  ;;  %7429 = vmatmul.mubr.bf16.gmra.mrb[180].mxu1 %v5657_v57  ;;  %v8772_v11 = vpack.c.bf16 %v4466_v22, %v4466_v22  ;;  %v12448_v40 = vcombine.low %v5065_v48, %v12419_v53  ;;  %v5024_v59 = vld [vmem:[#allocation3 + $0x90] sm:$0xf]  ;;  %v10331_v35 = vld [vmem:[%s13499_s5 + $0x1f8] sm:$0xff]  }
 0x3aa   : > { %5006 = vst [vmem:[#allocation3 + $0x70] sm:$0xf] %v4777_v29  ;;  %5009 = vst [vmem:[#allocation3 + $0x74] sm:$0x1] %v5008_v24  ;;  %7436 = vmatprep.mubr.bf16.mxu1 %v12432_v54  ;;  %v8770_v36 = vpack.c.bf16 %v4464_v38, %v4464_v38  ;;  %v8773_v49 = vpack.c.bf16 %v4467_v52, %v4467_v52  ;;  %v4465_v10 = vmax.f32 %v4401_v44, 0.0  ;;  %v5440_v2 = vshll.u32 %v12428_v63, 16 }
 0x3ab   : > { %v4814_v50 = vshrl.u32 %v8772_v11, 16  ;;  %v4817_v15 = vshll.u32 %v8772_v11, 16  ;;  %v5433_v9 = vshrl.u32 %v12448_v40, 16  ;;  %v5435_v20 = vshll.u32 %v12448_v40, 16  ;;  %9624 = vmatpush3.bf16.msra.mxu1 %v10328_v8  ;;  %v5130_v52 = vld [vmem:[#allocation3 + $0x34] sm:$0xf] }
 0x3ac   : > { %v4797_v41 = vshrl.u32 %v8770_v36, 16  ;;  %v4800_v12 = vshll.u32 %v8770_v36, 16  ;;  %v4822_v34 = vshrl.u32 %v8773_v49, 16  ;;  %v4825_v1 = vshll.u32 %v8773_v49, 16  ;;  %9625 = vmatprep.subr.bf16.mxu1 %v10331_v35  ;;  %v5129_v36 = vld [vmem:[#allocation3 + $0x30] sm:$0xf] }
 0x3ad   : > { %v4816_v39 = vrot.slane %v4814_v50, 7  ;;  %v8771_v25 = vpack.c.bf16 %v4465_v10, %v4465_v10  ;;  %7276 = vmatmul.mubr.bf16.gmra.mrb[152].mxu0 %v12363_v27  ;;  %v5437_v60 = vrot.slane %v5435_v20, 1  ;;  %v5442_v61 = vrot.slane %v5440_v2, 1  ;;  %v10332_v27 = vld [vmem:[%s13499_s5 + $0x1b8] sm:$0xff]   ;;  %v5021_v50 = vld [vmem:[#allocation3 + $0x8c] sm:$0x1] }
 0x3ae   : > { %v4799_v5 = vrot.slane %v4797_v41, 7  ;;  %v4824_v62 = vrot.slane %v4822_v34, 7  ;;  %v8560_v28 = vcombine.low %v5109_v13, %v12334_v19  ;;  %v5659_v30 = vrot.slane %v12344_v21, 1  ;;  %v12480_v34 = vld [vmem:[#allocation3 + $0x34] sm:$0xf] }
 0x3af   : > { %v4819_v22 = vor.u32 %v4817_v15, %v4816_v39  ;;  %v4820_v58 = vrot.slane %v4816_v39, 4  ;;  %v4805_v57 = vshrl.u32 %v8771_v25, 16  ;;  %v4808_v38 = vshll.u32 %v8771_v25, 16  ;;  %9626 = vmatpush3.bf16.msra.mxu1 %v10332_v27  ;;  %v12507_v27 = vld [vmem:[#allocation3 + $0x40] sm:$0xf] }
 0x3b0   : > { %v4802_v44 = vor.u32 %v4800_v12, %v4799_v5  ;;  %v4803_v48 = vrot.slane %v4799_v5, 4  ;;  %v4827_v8 = vor.u32 %v4825_v1, %v4824_v62  ;;  %v4829_v29 = vrot.slane %v4824_v62, 4  ;;  %v12495_v5 = vld [vmem:[#allocation3 + $0x38] ss:$0 sps:$4 sm:$0x11]  }
 0x3b1   : > { %v5025_v19 = vsel %vm10991_vm10, %v4819_v22, %v5024_v59  ;;  %v4807_v21 = vrot.slane %v4805_v57, 7  ;;  %v5438_v24 = vor.u32 %v5437_v60, %v5433_v9  ;;  %v5658_v11 = vrot.slane %v8560_v28, 1  ;;  %v12476_v9 = vld [vmem:[%s13499_s5 + $0x200] sm:$0xff]  }
 0x3b2   : > { %5026 = vst [vmem:[#allocation3 + $0x90] sm:$0xf] %v5025_v19  ;;  %v5018_v49 = vsel %vm10991_vm10, %v4802_v44, %v5017_v46  ;;  %v4828_v10 = vsel %vm10986_vm9, %v4820_v58, %v4827_v8  ;;  %v5029_v2 = vsel %vm10998_vm11, %v4829_v29, %v5028_v55  ;;  %v12471_v15 = vcombine.low %v5129_v36, %v5130_v52  ;;  %v5067_v46 = vld [vmem:[#allocation3 + $0x30] sm:$0xf]  ;;  %v5038_v44 = vld [vmem:[#allocation3 + $0xa8] sm:$0xf] }
 0x3b3   : > { %5019 = vst [vmem:[#allocation3 + $0x84] sm:$0xf] %v5018_v49  ;;  %5027 = vst [vmem:[#allocation3 + $0x94] sm:$0xf] %v4828_v10  ;;  %v4810_v20 = vor.u32 %v4808_v38, %v4807_v21  ;;  %v4812_v59 = vrot.slane %v4807_v21, 4  ;;  %v5443_v41 = vsel %vm1806_vm1, %v5438_v24, %v5442_v61  ;;  %v5660_v12 = vsel %vm2063_vm2, %v5658_v11, %v5659_v30 }
 0x3b4   : > { %5030 = vst [vmem:[#allocation3 + $0x98] sm:$0x1] %v5029_v2  ;;  %7283 = vmatprep.mubr.bf16.mxu0 %v5443_v41  ;;  %7437 = vmatmul.mubr.bf16.gmra.mrb[184].mxu1 %v5660_v12  ;;  %v4422_v1 = vadd.f32 %v12365_v47, %v12181_v23  ;;  %v4414_v39 = vadd.f32 %v12372_v42, %v12166_v6  ;;  %v5110_v42 = vld [vmem:[#allocation3 + $0x24] sm:$0xe]  ;;  %v5662_v28 = vrot.slane %v12428_v63, 1 }
 0x3b5   : > { %v4811_v25 = vsel %vm10986_vm9, %v4803_v48, %v4810_v20  ;;  %v5022_v60 = vsel %vm10998_vm11, %v4812_v59, %v5021_v50  ;;  %7444 = vmatprep.mubr.bf16.mxu1 %v12471_v15  ;;  %v4425_v61 = vadd.f32 %v12378_v33, %v12183_v31  ;;  %v4417_v13 = vadd.f32 %v12385_v4, %v12171_v0  ;;  %v5031_v48 = vld [vmem:[#allocation3 + $0x9c] sm:$0xf]  ;;  %v5042_v10 = vld [vmem:[#allocation3 + $0xb0] sm:$0x1] }
 0x3b6   : > { %5020 = vst [vmem:[#allocation3 + $0x88] sm:$0xf] %v4811_v25  ;;  %5023 = vst [vmem:[#allocation3 + $0x8c] sm:$0x1] %v5022_v60  ;;  %v4470_v6 = vmax.f32 %v4422_v1, 0.0  ;;  %v4468_v23 = vmax.f32 %v4414_v39, 0.0  ;;  %7284 = vmatmul.mubr.bf16.gmra.mrb[156].mxu0 %v12448_v40  ;;  %v12499_v47 = vcombine.low %v5067_v46, %v12480_v34  ;;  %9835 = vmatprep.subr.bf16.mxu0 %v12476_v9 }
 0x3b7   : > { %v4471_v62 = vmax.f32 %v4425_v61, 0.0  ;;  %v4469_v55 = vmax.f32 %v4417_v13, 0.0  ;;  %v8561_v31 = vcombine.low %v5110_v42, %v12419_v53  ;;  %v5452_v40 = vshll.u32 %v12495_v5, 16  ;;  %v5131_v36 = vld [vmem:[#allocation3 + $0x3c] sm:$0xf] }
 0x3b8   : > { %v8776_v33 = vpack.c.bf16 %v4470_v6, %v4470_v6  ;;  %v8774_v0 = vpack.c.bf16 %v4468_v23, %v4468_v23  ;;  %v5447_v4 = vshll.u32 %v12499_v47, 16  ;;  %v5445_v52 = vshrl.u32 %v12499_v47, 16  ;;  %v5035_v39 = vld [vmem:[#allocation3 + $0xa4] sm:$0x1] }
 0x3b9   : > { %v8777_v30 = vpack.c.bf16 %v4471_v62, %v4471_v62  ;;  %v8775_v35 = vpack.c.bf16 %v4469_v55, %v4469_v55  ;;  %v5661_v22 = vrot.slane %v8561_v31, 1  ;;  %v12511_v20 = vcombine.low %v5131_v36, %v12507_v27  ;;  %v12514_v13 = vld [vmem:[#allocation3 + $0x44] ss:$0 sps:$4 sm:$0x11]   ;;  %v12520_v55 = vld [vmem:[#allocation3 + $0x40] sm:$0xf] }
 0x3ba   : > { %v4848_v58 = vshrl.u32 %v8776_v33, 16  ;;  %v4851_v57 = vshll.u32 %v8776_v33, 16  ;;  %v4831_v38 = vshrl.u32 %v8774_v0, 16  ;;  %v4834_v53 = vshll.u32 %v8774_v0, 16 }
 0x3bb   : > { %v4856_v8 = vshrl.u32 %v8777_v30, 16  ;;  %v4859_v29 = vshll.u32 %v8777_v30, 16  ;;  %v4839_v19 = vshrl.u32 %v8775_v35, 16  ;;  %v5449_v24 = vrot.slane %v5447_v4, 1 }
 0x3bc   : > { %v4850_v21 = vrot.slane %v4848_v58, 7  ;;  %v4833_v63 = vrot.slane %v4831_v38, 7  ;;  %v5663_v11 = vsel %vm2063_vm2, %v5661_v22, %v5662_v28  ;;  %v4842_v50 = vshll.u32 %v8775_v35, 16  ;;  %v5069_v22 = vld [vmem:[#allocation3 + $0x3c] sm:$0xf] }
 0x3bd   : > { %v4858_v49 = vrot.slane %v4856_v8, 7  ;;  %v4841_v2 = vrot.slane %v4839_v19, 7  ;;  %7445 = vmatmul.mubr.bf16.gmra.mrb[188].mxu1 %v5663_v11  ;;  %v5450_v42 = vor.u32 %v5449_v24, %v5445_v52  ;;  %v5454_v62 = vrot.slane %v5452_v40, 1  ;;  %v5111_v58 = vld [vmem:[#allocation3 + $0x30] sm:$0xe] }
 0x3be   : > { %v4853_v59 = vor.u32 %v4851_v57, %v4850_v21  ;;  %v4854_v41 = vrot.slane %v4850_v21, 4  ;;  %v4836_v12 = vor.u32 %v4834_v53, %v4833_v63  ;;  %v4837_v1 = vrot.slane %v4833_v63, 4  ;;  %7452 = vmatprep.mubr.bf16.mxu1 %v12511_v20  ;;  %v5133_v63 = vld [vmem:[#allocation3 + $0x48] sm:$0xf] }
 0x3bf   : > { %v4861_v46 = vor.u32 %v4859_v29, %v4858_v49  ;;  %v4863_v25 = vrot.slane %v4858_v49, 4  ;;  %v4844_v60 = vor.u32 %v4842_v50, %v4841_v2  ;;  %v4846_v61 = vrot.slane %v4841_v2, 4  ;;  %v12553_v49 = vld [vmem:[#allocation3 + $0x4c] sm:$0xf]  ;;  %v5045_v2 = vld [vmem:[#allocation3 + $0xb4] sm:$0xf] }
 0x3c0   : > { %v5039_v6 = vsel %vm10991_vm10, %v4853_v59, %v5038_v44  ;;  %v5032_v23 = vsel %vm10991_vm10, %v4836_v12, %v5031_v48  ;;  %v5455_v28 = vsel %vm1806_vm1, %v5450_v42, %v5454_v62  ;;  %v4438_v30 = vadd.f32 %v12406_v37, %v12202_v3  ;;  %v12544_v3 = vld [vmem:[#allocation3 + $0x4c] sm:$0xf]  ;;  %v12557_v62 = vld [vmem:[#allocation3 + $0x50] ss:$0 sps:$4 sm:$0x11]  }
 0x3c1   : > { %5040 = vst [vmem:[#allocation3 + $0xa8] sm:$0xf] %v5039_v6  ;;  %5033 = vst [vmem:[#allocation3 + $0x9c] sm:$0xf] %v5032_v23  ;;  %v4862_v31 = vsel %vm10986_vm9, %v4854_v41, %v4861_v46  ;;  %v5043_v33 = vsel %vm10998_vm11, %v4863_v25, %v5042_v10  ;;  %v4845_v0 = vsel %vm10986_vm9, %v4837_v1, %v4844_v60  ;;  %7291 = vmatprep.mubr.bf16.mxu0 %v5455_v28  ;;  %v5052_v10 = vld [vmem:[#allocation3 + $0xc0] sm:$0xf] }
 0x3c2   : > { %v5036_v4 = vsel %vm10998_vm11, %v4846_v61, %v5035_v39  ;;  %5041 = vst [vmem:[#allocation3 + $0xac] sm:$0xf] %v4862_v31  ;;  %5044 = vst [vmem:[#allocation3 + $0xb0] sm:$0x1] %v5043_v33  ;;  %v4430_v35 = vadd.f32 %v12413_v18, %v12187_v26  ;;  %v4441_v40 = vadd.f32 %v12421_v7, %v12204_v56  ;;  %v5464_v52 = vshll.u32 %v12514_v13, 16 }
 0x3c3   : > { %5034 = vst [vmem:[#allocation3 + $0xa0] sm:$0xf] %v4845_v0  ;;  %5037 = vst [vmem:[#allocation3 + $0xa4] sm:$0x1] %v5036_v4  ;;  %v4433_v57 = vadd.f32 %v12430_v43, %v12189_v51  ;;  %v12540_v38 = vcombine.low %v5069_v22, %v12520_v55  ;;  %v8562_v44 = vcombine.low %v5111_v58, %v12480_v34  ;;  %v4474_v37 = vmax.f32 %v4438_v30, 0.0 }
 0x3c4   : > { %v4472_v26 = vmax.f32 %v4430_v35, 0.0  ;;  %v4475_v18 = vmax.f32 %v4441_v40, 0.0  ;;  %7292 = vmatmul.mubr.bf16.gmra.mrb[160].mxu0 %v12499_v47  ;;  %v5665_v53 = vrot.slane %v12495_v5, 1  ;;  %v5466_v21 = vrot.slane %v5464_v52, 1  ;;  %v5056_v39 = vld [vmem:[#allocation3 + $0xc8] sm:$0x1] }
 0x3c5   : > { %v4473_v56 = vmax.f32 %v4433_v57, 0.0  ;;  %v5459_v7 = vshll.u32 %v12540_v38, 16  ;;  %v8780_v51 = vpack.c.bf16 %v4474_v37, %v4474_v37  ;;  %v5664_v8 = vrot.slane %v8562_v44, 1  ;;  %v5071_v60 = vld [vmem:[#allocation3 + $0x48] sm:$0xf] }
 0x3c6   : > { %v8778_v43 = vpack.c.bf16 %v4472_v26, %v4472_v26  ;;  %v8781_v48 = vpack.c.bf16 %v4475_v18, %v4475_v18  ;;  %v5457_v19 = vshrl.u32 %v12540_v38, 16  ;;  %v12551_v47 = vcombine.low %v5133_v63, %v12544_v3  ;;  %v5049_v28 = vld [vmem:[#allocation3 + $0xbc] sm:$0x1]  ;;  %v5112_v44 = vld [vmem:[#allocation3 + $0x3c] sm:$0xe] }
 0x3c7   : > { %v8779_v29 = vpack.c.bf16 %v4473_v56, %v4473_v56  ;;  %v5461_v34 = vrot.slane %v5459_v7, 1  ;;  %v4882_v24 = vshrl.u32 %v8780_v51, 16  ;;  %v4885_v11 = vshll.u32 %v8780_v51, 16  ;;  %v12565_v37 = vld [vmem:[#allocation3 + $0x58] sm:$0xf] }
 0x3c8   : > { %v4865_v36 = vshrl.u32 %v8778_v43, 16  ;;  %v4868_v5 = vshll.u32 %v8778_v43, 16  ;;  %v4890_v50 = vshrl.u32 %v8781_v48, 16  ;;  %v4893_v59 = vshll.u32 %v8781_v48, 16  ;;  %v12567_v26 = vld [vmem:[#allocation3 + $0x58] sm:$0xf] }
 0x3c9   : > { %v4873_v41 = vshrl.u32 %v8779_v29, 16  ;;  %v4884_v12 = vrot.slane %v4882_v24, 7  ;;  %v5462_v46 = vor.u32 %v5461_v34, %v5457_v19  ;;  %v5666_v25 = vsel %vm2063_vm2, %v5664_v8, %v5665_v53  ;;  %v12577_v53 = vld [vmem:[#allocation3 + $0x5c] ss:$0 sps:$4 sm:$0x11]  }
 0x3ca   : > { %v4867_v1 = vrot.slane %v4865_v36, 7  ;;  %v4892_v61 = vrot.slane %v4890_v50, 7  ;;  %v4876_v23 = vshll.u32 %v8779_v29, 16  ;;  %7453 = vmatmul.mubr.bf16.gmra.mrb[192].mxu1 %v5666_v25  ;;  %v8532_v42 = vcombine.low %v5071_v60, %v12553_v49  ;;  %v5073_v8 = vld [vmem:[#allocation3 + $0x54] sm:$0xf] }
 0x3cb   : > { %v4875_v6 = vrot.slane %v4873_v41, 7  ;;  %v4887_v31 = vor.u32 %v4885_v11, %v4884_v12  ;;  %v4888_v33 = vrot.slane %v4884_v12, 4  ;;  %7460 = vmatprep.mubr.bf16.mxu1 %v12551_v47  ;;  %v5467_v52 = vsel %vm1806_vm1, %v5462_v46, %v5466_v21  ;;  %v5135_v29 = vld [vmem:[#allocation3 + $0x54] sm:$0xf]  ;;  %v12584_v19 = vld [vmem:[#allocation3 + $0x64] sm:$0xf] }
 0x3cc   : > { %v4870_v0 = vor.u32 %v4868_v5, %v4867_v1  ;;  %v4871_v4 = vrot.slane %v4867_v1, 4  ;;  %v4895_v30 = vor.u32 %v4893_v59, %v4892_v61  ;;  %v4897_v35 = vrot.slane %v4892_v61, 4  ;;  %7299 = vmatprep.mubr.bf16.mxu0 %v5467_v52  ;;  %v5113_v36 = vld [vmem:[#allocation3 + $0x48] sm:$0xe] }
 0x3cd   : > { %v4878_v40 = vor.u32 %v4876_v23, %v4875_v6  ;;  %v4880_v22 = vrot.slane %v4875_v6, 4  ;;  %v5053_v58 = vsel %vm10991_vm10, %v4887_v31, %v5052_v10  ;;  %7300 = vmatmul.mubr.bf16.gmra.mrb[164].mxu0 %v12540_v38  ;;  %v5471_v51 = vshll.u32 %v8532_v42, 16  ;;  %v12595_v1 = vld [vmem:[#allocation3 + $0x68] ss:$0 sps:$4 sm:$0x11]  }
 0x3ce   : > { %v5046_v57 = vsel %vm10991_vm10, %v4870_v0, %v5045_v2  ;;  %5054 = vst [vmem:[#allocation3 + $0xc0] sm:$0xf] %v5053_v58  ;;  %v4896_v18 = vsel %vm10986_vm9, %v4888_v33, %v4895_v30  ;;  %v5057_v56 = vsel %vm10998_vm11, %v4897_v35, %v5056_v39  ;;  %v5476_v43 = vshll.u32 %v12557_v62, 16  ;;  %v5075_v2 = vld [vmem:[#allocation3 + $0x60] sm:$0xf] }
 0x3cf   : > { %5047 = vst [vmem:[#allocation3 + $0xb4] sm:$0xf] %v5046_v57  ;;  %v4879_v7 = vsel %vm10986_vm9, %v4871_v4, %v4878_v40  ;;  %v5050_v17 = vsel %vm10998_vm11, %v4880_v22, %v5049_v28  ;;  %5055 = vst [vmem:[#allocation3 + $0xc4] sm:$0xf] %v4896_v18  ;;  %v8563_v48 = vcombine.low %v5112_v44, %v12520_v55  ;;  %v5668_v14 = vrot.slane %v12514_v13, 1 }
 0x3d0   : > { %5058 = vst [vmem:[#allocation3 + $0xc8] sm:$0x1] %v5057_v56  ;;  %5048 = vst [vmem:[#allocation3 + $0xb8] sm:$0xf] %v4879_v7  ;;  %v8533_v16 = vcombine.low %v5073_v8, %v12567_v26  ;;  %v5469_v34 = vshrl.u32 %v8532_v42, 16  ;;  %v5473_v21 = vrot.slane %v5471_v51, 1  ;;  %v12587_v24 = vcombine.low %v5135_v29, %v12565_v37 }
 0x3d1   : > { %5051 = vst [vmem:[#allocation3 + $0xbc] sm:$0x1] %v5050_v17  ;;  %v5667_v63 = vrot.slane %v8563_v48, 1  ;;  %v5488_v11 = vshll.u32 %v12577_v53, 16  ;;  %v5478_v55 = vrot.slane %v5476_v43, 1  ;;  %v8564_v5 = vcombine.low %v5113_v36, %v12553_v49 }
 0x3d2   : > { %v5483_v38 = vshll.u32 %v8533_v16, 16  ;;  %v5474_v10 = vor.u32 %v5473_v21, %v5469_v34  ;;  %v5481_v50 = vshrl.u32 %v8533_v16, 16  ;;  %v8534_v41 = vcombine.low %v5075_v2, %v12584_v19  ;;  %v12597_v39 = vld [vmem:[#allocation3 + $0x70] sm:$0xf]  ;;  %v5077_v6 = vld [vmem:[#allocation3 + $0x6c] sm:$0xf] }
 0x3d3   : > { %v5669_v13 = vsel %vm2063_vm2, %v5667_v63, %v5668_v14  ;;  %v5490_v25 = vrot.slane %v5488_v11, 1  ;;  %v5670_v49 = vrot.slane %v8564_v5, 1  ;;  %v5671_v61 = vrot.slane %v12557_v62, 1  ;;  %v5138_v31 = vld [vmem:[#allocation3 + $0x64] sm:$0xf] }
 0x3d4   : > { %7461 = vmatmul.mubr.bf16.gmra.mrb[196].mxu1 %v5669_v13  ;;  %v5485_v59 = vrot.slane %v5483_v38, 1  ;;  %v5479_v12 = vsel %vm1806_vm1, %v5474_v10, %v5478_v55  ;;  %v5495_v60 = vshll.u32 %v8534_v41, 16  ;;  %v12602_v0 = vcombine.low %v5077_v6, %v12597_v39  ;;  %v5114_v30 = vld [vmem:[#allocation3 + $0x54] sm:$0xe]  ;;  %v5137_v35 = vld [vmem:[#allocation3 + $0x60] sm:$0xf] }
 0x3d5   : > { %7468 = vmatprep.mubr.bf16.mxu1 %v12587_v24  ;;  %7307 = vmatprep.mubr.bf16.mxu0 %v5479_v12  ;;  %v5493_v4 = vshrl.u32 %v8534_v41, 16  ;;  %v5500_v28 = vshll.u32 %v12595_v1, 16  ;;  %v8565_v40 = vcombine.low %v5114_v30, %v12567_v26  ;;  %v12607_v22 = vcombine.low %v5137_v35, %v5138_v31  ;;  %v12610_v57 = vld [vmem:[#allocation3 + $0x7c] sm:$0xf]  ;;  %v5079_v56 = vld [vmem:[#allocation3 + $0x78] sm:$0xf] }
 0x3d6   : > { %v5486_v46 = vor.u32 %v5485_v59, %v5481_v50  ;;  %7308 = vmatmul.mubr.bf16.gmra.mrb[168].mxu0 %v8532_v42  ;;  %v5497_v33 = vrot.slane %v5495_v60, 1  ;;  %v5672_v42 = vsel %vm2063_vm2, %v5670_v49, %v5671_v61  ;;  %v5507_v58 = vshll.u32 %v12602_v0, 16  ;;  %v12613_v44 = vld [vmem:[#allocation3 + $0x74] ss:$0 sps:$4 sm:$0x11]  }
 0x3d7   : > { %v5502_v52 = vrot.slane %v5500_v28, 1  ;;  %v5673_v18 = vrot.slane %v8565_v40, 1  ;;  %v5674_v7 = vrot.slane %v12577_v53, 1  ;;  %v5140_v17 = vld [vmem:[#allocation3 + $0x70] sm:$0xf]  ;;  %v12618_v43 = vcombine.low %v5079_v56, %v12610_v57 }
 0x3d8   : > { %v5491_v23 = vsel %vm1806_vm1, %v5486_v46, %v5490_v25  ;;  %v5498_v62 = vor.u32 %v5497_v33, %v5493_v4  ;;  %v5509_v51 = vrot.slane %v5507_v58, 1  ;;  %v5139_v48 = vld [vmem:[#allocation3 + $0x6c] sm:$0xf]  ;;  %v5505_v14 = vshrl.u32 %v12602_v0, 16  ;;  %v5115_v34 = vld [vmem:[#allocation3 + $0x60] sm:$0xe] }
 0x3d9   : > { %7315 = vmatprep.mubr.bf16.mxu0 %v5491_v23  ;;  %v5512_v8 = vshll.u32 %v12613_v44, 16  ;;  %v12622_v29 = vcombine.low %v5139_v48, %v5140_v17  ;;  %v8566_v63 = vcombine.low %v5115_v34, %v12584_v19  ;;  %v5519_v53 = vshll.u32 %v12618_v43, 16  ;;  %v12627_v38 = vld [vmem:[#allocation3 + $0x88] sm:$0xf]  ;;  %v5081_v55 = vld [vmem:[#allocation3 + $0x84] sm:$0xf] }
 0x3da   : > { %v5503_v26 = vsel %vm1806_vm1, %v5498_v62, %v5502_v52  ;;  %v5510_v21 = vor.u32 %v5509_v51, %v5505_v14  ;;  %v12630_v36 = vld [vmem:[#allocation3 + $0x80] ss:$0 sps:$4 sm:$0x11]   ;;  %v5677_v10 = vrot.slane %v12595_v1, 1  ;;  %v5142_v2 = vld [vmem:[#allocation3 + $0x7c] sm:$0xf]  ;;  %v12635_v19 = vcombine.low %v5081_v55, %v12627_v38 }
 0x3db   : > { %v5514_v11 = vrot.slane %v5512_v8, 1  ;;  %v5676_v5 = vrot.slane %v8566_v63, 1  ;;  %v5521_v50 = vrot.slane %v5519_v53, 1  ;;  %v5141_v59 = vld [vmem:[#allocation3 + $0x78] sm:$0xf]  ;;  %v5517_v12 = vshrl.u32 %v12618_v43, 16 }
 0x3dc   : > { %7469 = vmatmul.mubr.bf16.gmra.mrb[200].mxu1 %v5672_v42  ;;  %v5524_v46 = vshll.u32 %v12630_v36, 16  ;;  %v12639_v25 = vcombine.low %v5141_v59, %v5142_v2  ;;  %v5116_v60 = vld [vmem:[#allocation3 + $0x6c] sm:$0xe]  ;;  %v5531_v61 = vshll.u32 %v12635_v19, 16  ;;  %v12644_v6 = vld [vmem:[#allocation3 + $0x94] sm:$0xf] }
 0x3dd   : > { %7476 = vmatprep.mubr.bf16.mxu1 %v12607_v22  ;;  %v5515_v13 = vsel %vm1806_vm1, %v5510_v21, %v5514_v11  ;;  %v5678_v1 = vsel %vm2063_vm2, %v5676_v5, %v5677_v10  ;;  %v8567_v49 = vcombine.low %v5116_v60, %v12597_v39  ;;  %v12647_v31 = vld [vmem:[#allocation3 + $0x8c] ss:$0 sps:$4 sm:$0x11]   ;;  %v5680_v33 = vrot.slane %v12613_v44, 1  ;;  %v5083_v4 = vld [vmem:[#allocation3 + $0x90] sm:$0xf] }
 0x3de   : > { %7316 = vmatmul.mubr.bf16.gmra.mrb[172].mxu0 %v8533_v16  ;;  %v5675_v16 = vsel %vm2063_vm2, %v5673_v18, %v5674_v7  ;;  %v5526_v23 = vrot.slane %v5524_v46, 1  ;;  %v5533_v35 = vrot.slane %v5531_v61, 1  ;;  %v12653_v39 = vcombine.low %v5083_v4, %v12644_v6  ;;  %v5144_v40 = vld [vmem:[#allocation3 + $0x88] sm:$0xf]  ;;  %v5117_v58 = vld [vmem:[#allocation3 + $0x78] sm:$0xe] }
 0x3df   : > { %7323 = vmatprep.mubr.bf16.mxu0 %v5503_v26  ;;  %v5679_v30 = vrot.slane %v8567_v49, 1  ;;  %v5529_v42 = vshrl.u32 %v12635_v19, 16  ;;  %v5536_v62 = vshll.u32 %v12647_v31, 16  ;;  %v5143_v52 = vld [vmem:[#allocation3 + $0x84] sm:$0xf]  ;;  %v8568_v44 = vcombine.low %v5117_v58, %v12610_v57 }
 0x3e0   : > { %v5543_v26 = vshll.u32 %v12653_v39, 16  ;;  %v12662_v7 = vld [vmem:[#allocation3 + $0xa0] sm:$0xf]  ;;  %v12665_v51 = vld [vmem:[#allocation3 + $0x98] ss:$0 sps:$4 sm:$0x11]  }
 0x3e1   : > { %v5681_v18 = vsel %vm2063_vm2, %v5679_v30, %v5680_v33  ;;  %v5534_v56 = vor.u32 %v5533_v35, %v5529_v42  ;;  %v5538_v17 = vrot.slane %v5536_v62, 1  ;;  %v5682_v48 = vrot.slane %v8568_v44, 1  ;;  %v5085_v14 = vld [vmem:[#allocation3 + $0x9c] sm:$0xf]  ;;  %v5146_v34 = vld [vmem:[#allocation3 + $0x94] sm:$0xf] }
 0x3e2   : > { %v5683_v8 = vrot.slane %v12630_v36, 1  ;;  %v5118_v21 = vld [vmem:[#allocation3 + $0x84] sm:$0xe]  ;;  %v12671_v63 = vcombine.low %v5085_v14, %v12662_v7  ;;  %v12673_v53 = vld [vmem:[#allocation3 + $0x2c] ss:$0 sps:$4 sm:$0x11]  }
 0x3e3   : > { %v5539_v57 = vsel %vm1806_vm1, %v5534_v56, %v5538_v17  ;;  %v5541_v11 = vshrl.u32 %v12653_v39, 16  ;;  %v5548_v10 = vshll.u32 %v12665_v51, 16  ;;  %v12677_v55 = vld [vmem:[#allocation3 + $0x28] sm:$0xf]  ;;  %v5237_v59 = vld [vmem:[#allocation3 + $0x24] sm:$0xe] }
 0x3e4   : > { %7477 = vmatmul.mubr.bf16.gmra.mrb[204].mxu1 %v5675_v16  ;;  %v5545_v16 = vrot.slane %v5543_v26, 1  ;;  %v5684_v36 = vsel %vm2063_vm2, %v5682_v48, %v5683_v8  ;;  %v8655_v46 = vcombine.low %v5237_v59, %v12677_v55  ;;  %v6584_v60 = vrot.slane %v12673_v53, 1  ;;  %v5087_v49 = vld [vmem:[#allocation3 + $0xa8] sm:$0xf]  ;;  %v5148_v30 = vld [vmem:[#allocation3 + $0xa0] sm:$0xf] }
 0x3e5   : > { %7484 = vmatprep.mubr.bf16.mxu1 %v12622_v29  ;;  %v5147_v58 = vld [vmem:[#allocation3 + $0x9c] sm:$0xf]  ;;  %v12715_v14 = vld [vmem:[#allocation3 + $0xb8] sm:$0xf] }
 0x3e6   : > { %7324 = vmatmul.mubr.bf16.gmra.mrb[176].mxu0 %v8534_v41  ;;  %v5522_v41 = vor.u32 %v5521_v50, %v5517_v12  ;;  %v5546_v2 = vor.u32 %v5545_v16, %v5541_v11  ;;  %v5555_v50 = vshll.u32 %v12671_v63, 16  ;;  %v12684_v12 = vld [vmem:[#allocation3 + $0xac] sm:$0xf]  ;;  %v12708_v44 = vcombine.low %v5147_v58, %v5148_v30  ;;  %v10308_v8 = vld [vmem:[#allocation3 + $0xb0] ss:$0 sps:$4 sm:$0x11]  }
 0x3e7   : > { %7331 = vmatprep.mubr.bf16.mxu0 %v5515_v13  ;;  %v8569_v13 = vcombine.low %v5118_v21, %v12627_v38  ;;  %v5550_v38 = vrot.slane %v5548_v10, 1  ;;  %v5089_v16 = vld [vmem:[#allocation3 + $0xb4] sm:$0xf]  ;;  %v5120_v59 = vld [vmem:[#allocation3 + $0x9c] sm:$0xe] }
 0x3e8   : > { %v5527_v28 = vsel %vm1806_vm1, %v5522_v41, %v5526_v23  ;;  %v12691_v41 = vld [vmem:[#allocation3 + $0xa4] ss:$0 sps:$4 sm:$0x11]   ;;  %v6583_v23 = vrot.slane %v8655_v46, 1  ;;  %v5557_v35 = vrot.slane %v5555_v50, 1  ;;  %13528 = vst [vmem:[#allocation8_spill] sm:$0xff] %v12708_v44 }
 0x3e9   : > { %v5685_v61 = vrot.slane %v8569_v13, 1  ;;  %v5551_v4 = vsel %vm1806_vm1, %v5546_v2, %v5550_v38  ;;  %v5149_v13 = vld [vmem:[#allocation3 + $0xa8] sm:$0xf]  ;;  %v5572_v2 = vshll.u32 %v10308_v8, 16  ;;  %v5152_v30 = vld [vmem:[#allocation3 + $0xb8] sm:$0xf] }
 0x3ea   : > { %v12702_v42 = vsel %vm2063_vm2, %v6583_v23, %v6584_v60  ;;  %v5189_v58 = vld [vmem:[#allocation3 + $0x1c] sm:$0xf] }
 0x3eb   : > { %13527 = vst [vmem:[#allocation7_spill] sm:$0xff] %v12702_v42  ;;  %v5574_v38 = vrot.slane %v5572_v2, 1  ;;  %v5863_v2 = vshll.u32 %v12278_v32, 16  ;;  %v12938_v42 = vld [vmem:[#allocation3 + $0x94] sm:$0xf] }
 0x3ec   : > { %7485 = vmatmul.mubr.bf16.gmra.mrb[208].mxu1 %v5678_v1 }
 0x3ed   : > { %7492 = vmatprep.mubr.bf16.mxu1 %v12639_v25 }
 0x3ee   : > { %7332 = vmatmul.mubr.bf16.gmra.mrb[180].mxu0 %v12602_v0  ;;  %v12659_v0 = vcombine.low %v5143_v52, %v5144_v40  ;;  %v12699_v40 = vcombine.low %v5087_v49, %v12684_v12  ;;  %v5553_v52 = vshrl.u32 %v12671_v63, 16  ;;  %v12731_v49 = vld [vmem:[#allocation3 + $0xbc] ss:$0 sps:$4 sm:$0x11]  }
 0x3ef   : > { %7339 = vmatprep.mubr.bf16.mxu0 %v5527_v28  ;;  %v12688_v1 = vpop.f32.mrb[144].mxu0  ;;  %v5686_v28 = vrot.slane %v12647_v31, 1 }
 0x3f0   : > { %v12693_v33 = vpop.f32.mrb[145].mxu0  ;;  %v5558_v56 = vor.u32 %v5557_v35, %v5553_v52  ;;  %v5567_v17 = vshll.u32 %v12699_v40, 16  ;;  %v5584_v35 = vshll.u32 %v12731_v49, 16  ;;  %v5151_v52 = vld [vmem:[#allocation3 + $0xb4] sm:$0xf] }
 0x3f1   : > { %v12704_v62 = vpop.f32.mrb[146].mxu0  ;;  %v5687_v31 = vsel %vm2063_vm2, %v5685_v61, %v5686_v28 }
 0x3f2   : > { %v12713_v48 = vpop.f32.mrb[147].mxu0  ;;  %v5569_v10 = vrot.slane %v5567_v17, 1  ;;  %v5171_v17 = vld [vmem:[#allocation3 + $0xc] sm:$0xe] }
 0x3f4   : > { %7493 = vmatmul.mubr.bf16.gmra.mrb[212].mxu1 %v5681_v18  ;;  %v5119_v18 = vld [vmem:[#allocation3 + $0x90] sm:$0xe] }
 0x3f5   : > { %7500 = vmatprep.mubr.bf16.mxu1 %v12659_v0  ;;  %v8570_v26 = vcombine.low %v5119_v18, %v12644_v6  ;;  %v5150_v6 = vld [vmem:[#allocation3 + $0xac] sm:$0xf] }
 0x3f6   : > { %7340 = vmatmul.mubr.bf16.gmra.mrb[184].mxu0 %v12618_v43  ;;  %v5145_v43 = vld [vmem:[#allocation3 + $0x90] sm:$0xf]  ;;  %v12725_v50 = vcombine.low %v5149_v13, %v5150_v6  ;;  %v5154_v13 = vld [vmem:[#allocation3 + $0xc4] sm:$0xf] }
 0x3f7   : > { %7347 = vmatprep.mubr.bf16.mxu0 %v5539_v57  ;;  %v12681_v5 = vcombine.low %v5145_v43, %v5146_v34  ;;  %v5689_v34 = vrot.slane %v12665_v51, 1  ;;  %v5688_v11 = vrot.slane %v8570_v26, 1  ;;  %v12722_v43 = vcombine.low %v5089_v16, %v12715_v14  ;;  %v5188_v26 = vld [vmem:[#allocation3 + $0x18] sm:$0xf]  ;;  %v10423_v16 = vld [vmem:[#allocation3 + $0x10] sm:$0xf] }
 0x3f8   : > { %13529 = vst [vmem:[#allocation9_spill] sm:$0xff] %v12725_v50 }
 0x3f9   : > { %v5690_v51 = vsel %vm2063_vm2, %v5688_v11, %v5689_v34  ;;  %v5579_v60 = vshll.u32 %v12722_v43, 16  ;;  %v10326_v34 = vld [vmem:[#allocation3 + $0x14] ss:$0 sps:$4 sm:$0x11]  }
 0x3fb   : > { %v5581_v28 = vrot.slane %v5579_v60, 1 }
 0x3fc   : > { %7501 = vmatmul.mubr.bf16.gmra.mrb[216].mxu1 %v5684_v36  ;;  %v5565_v36 = vshrl.u32 %v12699_v40, 16 }
 0x3fd   : > { %7508 = vmatprep.mubr.bf16.mxu1 %v12681_v5 }
 0x3fe   : > { %7348 = vmatmul.mubr.bf16.gmra.mrb[188].mxu0 %v12635_v19  ;;  %v5560_v19 = vshll.u32 %v12691_v41, 16  ;;  %v5570_v46 = vor.u32 %v5569_v10, %v5565_v36  ;;  %v5695_v10 = vrot.slane %v10308_v8, 1  ;;  %v5153_v36 = vld [vmem:[#allocation3 + $0xc0] sm:$0xf] }
 0x3ff   : > { %7355 = vmatprep.mubr.bf16.mxu0 %v5551_v4  ;;  %v5692_v4 = vrot.slane %v12691_v41, 1  ;;  %v12742_v41 = vcombine.low %v5188_v26, %v5189_v58 }
 0x400   : > { %v5562_v57 = vrot.slane %v5560_v19, 1  ;;  %v5575_v61 = vsel %vm1806_vm1, %v5570_v46, %v5574_v38  ;;  %v5121_v19 = vld [vmem:[#allocation3 + $0xa8] sm:$0xe]  ;;  %v10330_v46 = vld [vmem:[#allocation3 + $0x20] ss:$0 sps:$4 sm:$0x11]  }
 0x401   : > { %v6117_v38 = vrot.slane %v10326_v34, 1 }
 0x402   : > { %v5563_v21 = vsel %vm1806_vm1, %v5558_v56, %v5562_v57  ;;  %v8572_v56 = vcombine.low %v5121_v19, %v12684_v12  ;;  %v5586_v57 = vrot.slane %v5584_v35, 1  ;;  %v6327_v12 = vshll.u32 %v12742_v41, 16  ;;  %v10424_v35 = vld [vmem:[#allocation3 + $0x1c] sm:$0xf] }
 0x404   : > { %7509 = vmatmul.mubr.bf16.gmra.mrb[220].mxu1 %v5687_v31  ;;  %v12739_v31 = vcombine.low %v5151_v52, %v5152_v30  ;;  %v5694_v6 = vrot.slane %v8572_v56, 1  ;;  %v6329_v8 = vrot.slane %v6327_v12, 1  ;;  %v6325_v30 = vshrl.u32 %v12742_v41, 16  ;;  %v10341_v12 = vld [vmem:[%s13499_s5 + $0x208] sm:$0xff]  }
 0x405   : > { %7516 = vmatprep.mubr.bf16.mxu1 %v12708_v44  ;;  %v5698_v52 = vrot.slane %v12731_v49, 1 }
 0x406   : > { %7356 = vmatmul.mubr.bf16.gmra.mrb[192].mxu0 %v12653_v39  ;;  %v8571_v39 = vcombine.low %v5120_v59, %v12662_v7  ;;  %v5577_v7 = vshrl.u32 %v12722_v43, 16  ;;  %13530 = vst [vmem:[#allocation10_spill] sm:$0xff] %v12739_v31  ;;  %v12749_v59 = vcombine.low %v5153_v36, %v5154_v13  ;;  %v6330_v56 = vor.u32 %v6329_v8, %v6325_v30  ;;  %v5173_v36 = vld [vmem:[#allocation3 + $0x24] sm:$0xe] }
 0x407   : > { %7363 = vmatprep.mubr.bf16.mxu0 %v5563_v21  ;;  %v8606_v21 = vcombine.low %v5171_v17, %v10423_v16  ;;  %v12763_v17 = vld [vmem:[#allocation3 + $0x34] sm:$0xf]  ;;  %v12778_v8 = vld [vmem:[#allocation3 + $0x2c] ss:$0 sps:$4 sm:$0x11]  }
 0x408   : > { %v5691_v23 = vrot.slane %v8571_v39, 1  ;;  %13531 = vst [vmem:[#allocation11_spill] sm:$0xff] %v12749_v59  ;;  %v5696_v39 = vsel %vm2063_vm2, %v5694_v6, %v5695_v10 }
 0x40a   : > { %v5693_v18 = vsel %vm2063_vm2, %v5691_v23, %v5692_v4  ;;  %v5865_v4 = vrot.slane %v5863_v2, 1 }
 0x40c   : > { %7517 = vmatmul.mubr.bf16.gmra.mrb[224].mxu1 %v5690_v51  ;;  %v5122_v51 = vld [vmem:[#allocation3 + $0xb4] sm:$0xe] }
 0x40d   : > { %7524 = vmatprep.mubr.bf16.mxu1 %v12725_v50  ;;  %v8573_v60 = vcombine.low %v5122_v51, %v12715_v14  ;;  %v5242_v50 = vld [vmem:[#allocation3 + $0x60] sm:$0xe] }
 0x40e   : > { %7364 = vmatmul.mubr.bf16.gmra.mrb[196].mxu0 %v12671_v63  ;;  %v5582_v63 = vor.u32 %v5581_v28, %v5577_v7  ;;  %v5172_v28 = vld [vmem:[#allocation3 + $0x18] sm:$0xe]  ;;  %v6332_v7 = vshll.u32 %v10330_v46, 16  ;;  %v6344_v46 = vshll.u32 %v12673_v53, 16 }
 0x40f   : > { %7371 = vmatprep.mubr.bf16.mxu0 %v5575_v61  ;;  %v5190_v61 = vld [vmem:[#allocation3 + $0x24] sm:$0xf]  ;;  %v8607_v58 = vcombine.low %v5172_v28, %v10424_v35  ;;  %v5697_v14 = vrot.slane %v8573_v60, 1  ;;  %v10425_v60 = vld [vmem:[#allocation3 + $0x28] sm:$0xf] }
 0x410   : > { %v5587_v11 = vsel %vm1806_vm1, %v5582_v63, %v5586_v57  ;;  %v12754_v23 = vcombine.low %v5190_v61, %v12677_v55  ;;  %v5861_v55 = vshrl.u32 %v12278_v32, 16  ;;  %v5868_v63 = vshll.u32 %v10326_v34, 16  ;;  %v12781_v28 = vld [vmem:[#allocation3 + $0x40] sm:$0xf] }
 0x411   : > { %v5875_v57 = vshll.u32 %v12322_v45, 16  ;;  %v6334_v16 = vrot.slane %v6332_v7, 1  ;;  %v6119_v49 = vrot.slane %v8607_v58, 1  ;;  %v5873_v7 = vshrl.u32 %v12322_v45, 16 }
 0x412   : > { %v6339_v26 = vshll.u32 %v12754_v23, 16  ;;  %v5870_v34 = vrot.slane %v5868_v63, 1  ;;  %v6337_v51 = vshrl.u32 %v12754_v23, 16  ;;  %v12785_v35 = vld [vmem:[#allocation3 + $0x38] ss:$0 sps:$4 sm:$0x11]   ;;  %v12789_v58 = vadd.f32 %v12693_v33, %v12688_v1 }
 0x413   : > { %v6335_v32 = vsel %vm1806_vm1, %v6330_v56, %v6334_v16  ;;  %v6346_v45 = vrot.slane %v6344_v46, 1  ;;  %v12796_v56 = vld [vmem:[#allocation3 + $0x38] ss:$0 sps:$4 sm:$0x11]   ;;  %v12801_v1 = vld [vmem:[#allocation3 + $0x4c] sm:$0xf] }
 0x414   : > { %7525 = vmatmul.mubr.bf16.gmra.mrb[228].mxu1 %v5693_v18  ;;  %v10334_v18 = vld [vmem:[#allocation3 + $0x20] ss:$0 sps:$4 sm:$0x11]   ;;  %v6341_v13 = vrot.slane %v6339_v26, 1  ;;  %v5911_v33 = vshll.u32 %v12511_v20, 16  ;;  %v6123_v16 = vrot.slane %v12778_v8, 1 }
 0x415   : > { %7532 = vmatprep.mubr.bf16.mxu1 %v12739_v31  ;;  %v6120_v6 = vrot.slane %v10334_v18, 1  ;;  %v5880_v53 = vshll.u32 %v10334_v18, 16  ;;  %v10357_v46 = vld [vmem:[%s13499_s5 + $0x218] sm:$0xff]  }
 0x416   : > { %7372 = vmatmul.mubr.bf16.gmra.mrb[200].mxu0 %v12699_v40  ;;  %v6116_v40 = vrot.slane %v8606_v21, 1  ;;  %v5866_v21 = vor.u32 %v5865_v4, %v5861_v55  ;;  %v6342_v30 = vor.u32 %v6341_v13, %v6337_v51  ;;  %v10426_v55 = vld [vmem:[#allocation3 + $0x34] sm:$0xf]  ;;  %v12809_v13 = vld [vmem:[#allocation3 + $0x48] sm:$0xe] }
 0x417   : > { %7379 = vmatprep.mubr.bf16.mxu0 %v5587_v11  ;;  %v5699_v11 = vsel %vm2063_vm2, %v5697_v14, %v5698_v52  ;;  %v6121_v61 = vsel %vm2063_vm2, %v6119_v49, %v6120_v6  ;;  %v5887_v14 = vshll.u32 %v12432_v54, 16  ;;  %v5899_v52 = vshll.u32 %v12471_v15, 16  ;;  %v12812_v51 = vld [vmem:[#allocation3 + $0x44] ss:$0 sps:$4 sm:$0x11]  }
 0x418   : > { %v6118_v19 = vsel %vm2063_vm2, %v6116_v40, %v6117_v38  ;;  %v5871_v2 = vsel %vm1806_vm1, %v5866_v21, %v5870_v34  ;;  %v8608_v40 = vcombine.low %v5173_v36, %v10425_v60  ;;  %v5174_v38 = vld [vmem:[#allocation3 + $0x30] sm:$0xe]  ;;  %v6356_v6 = vshll.u32 %v12785_v35, 16  ;;  %v5175_v34 = vld [vmem:[#allocation3 + $0x3c] sm:$0xe] }
 0x419   : > { %v8609_v63 = vcombine.low %v5174_v38, %v10426_v55  ;;  %v5889_v36 = vrot.slane %v5887_v14, 1  ;;  %v6126_v38 = vrot.slane %v12796_v56, 1  ;;  %v5239_v55 = vld [vmem:[#allocation3 + $0x3c] sm:$0xe] }
 0x41a   : > { %v12918_v14 = vld [vmem:[#allocation3 + $0xbc] ss:$0 sps:$4 sm:$0x11]  }
 0x41c   : > { %7533 = vmatmul.mubr.bf16.gmra.mrb[232].mxu1 %v5696_v39  ;;  %v5877_v39 = vrot.slane %v5875_v57, 1  ;;  %v6122_v57 = vrot.slane %v8608_v40, 1  ;;  %v6125_v40 = vrot.slane %v8609_v63, 1  ;;  %v12839_v63 = vld [vmem:[#allocation3 + $0x50] ss:$0 sps:$4 sm:$0x11]  }
 0x41d   : > { %7540 = vmatprep.mubr.bf16.mxu1 %v12749_v59 }
 0x41e   : > { %7380 = vmatmul.mubr.bf16.gmra.mrb[204].mxu0 %v12722_v43  ;;  %v5192_v43 = vld [vmem:[#allocation3 + $0x30] sm:$0xf]  ;;  %v5878_v18 = vor.u32 %v5877_v39, %v5873_v7  ;;  %v12824_v39 = vld [vmem:[#allocation3 + $0x54] sm:$0xe]  ;;  %v5885_v7 = vshrl.u32 %v12432_v54, 16  ;;  %v6368_v54 = vshll.u32 %v12812_v51, 16 }
 0x41f   : > { %7581 = vmatprep.mubr.bf16.mxu0 %v6118_v19  ;;  %v12768_v10 = vcombine.low %v5192_v43, %v12763_v17  ;;  %v5194_v19 = vld [vmem:[#allocation3 + $0x3c] sm:$0xf]  ;;  %v6347_v43 = vsel %vm1806_vm1, %v6342_v30, %v6346_v45 }
 0x420   : > { %v12799_v26 = vcombine.low %v5194_v19, %v12781_v28  ;;  %v6358_v19 = vrot.slane %v6356_v6, 1  ;;  %v5890_v45 = vor.u32 %v5889_v36, %v5885_v7  ;;  %v5897_v6 = vshrl.u32 %v12471_v15, 16  ;;  %v5241_v7 = vld [vmem:[#allocation3 + $0x54] sm:$0xe]  ;;  %v5200_v15 = vld [vmem:[#allocation3 + $0x60] sm:$0xf] }
 0x421   : > { %v6351_v4 = vshll.u32 %v12768_v10, 16  ;;  %v6349_v49 = vshrl.u32 %v12768_v10, 16 }
 0x423   : > { %v6353_v21 = vrot.slane %v6351_v4, 1  ;;  %v6124_v4 = vsel %vm2063_vm2, %v6122_v57, %v6123_v16  ;;  %v12843_v16 = vld [vmem:[#allocation3 + $0x58] sm:$0xf] }
 0x424   : > { %7541 = vmatmul.mubr.bf16.gmra.mrb[236].mxu1 %v5699_v11  ;;  %v5882_v11 = vrot.slane %v5880_v53, 1  ;;  %v12832_v53 = vld [vmem:[#allocation3 + $0x44] ss:$0 sps:$4 sm:$0x11]  }
 0x425   : > { %7742 = vmatprep.mubr.bf16.mxu1 %v6335_v32  ;;  %v5196_v32 = vld [vmem:[#allocation3 + $0x48] sm:$0xf]  ;;  %v6354_v30 = vor.u32 %v6353_v21, %v6349_v49  ;;  %v6361_v49 = vshrl.u32 %v12799_v26, 16  ;;  %v6129_v36 = vrot.slane %v12832_v53, 1 }
 0x426   : > { %7582 = vmatmul.mubr.bf16.vlgmr.msra.gmra.mrb[208].mxu0 %v5871_v2  ;;  %v5892_v2 = vshll.u32 %v12778_v8, 16  ;;  %v5883_v60 = vsel %vm1806_vm1, %v5878_v18, %v5882_v11  ;;  %v5923_v8 = vshll.u32 %v12551_v47, 16  ;;  %v5901_v11 = vrot.slane %v5899_v52, 1 }
 0x427   : > { %9836 = vmatpush3.bf16.msra.mxu0 %v12476_v9  ;;  %7589 = vmatprep.mubr.bf16.mxu0 %v6121_v61  ;;  %v10349_v9 = vld [vmem:[%s13499_s5 + $0x210] sm:$0xff]   ;;  %v6363_v61 = vshll.u32 %v12799_v26, 16 }
 0x428   : > { %9837 = vmatprep.subr.bf16.mxu0 %v10341_v12  ;;  %v5894_v18 = vrot.slane %v5892_v2, 1  ;;  %v6380_v2 = vshll.u32 %v12839_v63, 16 }
 0x429   : > { %v6365_v21 = vrot.slane %v6363_v61, 1 }
 0x42a   : > { %v5895_v52 = vsel %vm1806_vm1, %v5890_v45, %v5894_v18  ;;  %v8659_v45 = vcombine.low %v5241_v7, %v12843_v16  ;;  %v5243_v18 = vld [vmem:[#allocation3 + $0x6c] sm:$0xe] }
 0x42b   : > { %9838 = vmatpush3.bf16.msra.mxu0 %v10341_v12  ;;  %v12822_v12 = vadd.f32 %v12713_v48, %v12704_v62  ;;  %v8610_v62 = vcombine.low %v5175_v34, %v12507_v27  ;;  %v8611_v48 = vcombine.low %v12809_v13, %v12544_v3  ;;  %v10365_v27 = vld [vmem:[%s13499_s5 + $0x220] sm:$0xff]   ;;  %v6127_v3 = vsel %vm2063_vm2, %v6125_v40, %v6126_v38  ;;  %v5198_v34 = vld [vmem:[#allocation3 + $0x54] sm:$0xf]  ;;  %v12866_v40 = vld [vmem:[#allocation3 + $0x5c] ss:$0 sps:$4 sm:$0x11]  }
 0x42c   : > { %7743 = vmatmul.mubr.bf16.vlgmr.msra.gmra.mrb[240].mxu1 %v12742_v41  ;;  %v12815_v41 = vcombine.low %v5196_v32, %v12801_v1  ;;  %9839 = vmatprep.subr.bf16.mxu0 %v10349_v9  ;;  %v5904_v32 = vshll.u32 %v12796_v56, 16  ;;  %v10373_v38 = vld [vmem:[%s13499_s5 + $0x228] sm:$0xff]   ;;  %v6366_v61 = vor.u32 %v6365_v21, %v6361_v49 }
 0x42d   : > { %7750 = vmatprep.mubr.bf16.mxu1 %v6347_v43  ;;  %v8657_v43 = vcombine.low %v5239_v55, %v12781_v28  ;;  %v6128_v13 = vrot.slane %v8610_v62, 1  ;;  %v12860_v28 = vcombine.low %v5198_v34, %v12843_v16  ;;  %v12872_v62 = vld [vmem:[#allocation3 + $0x70] sm:$0xf]  ;;  %v5909_v55 = vshrl.u32 %v12511_v20, 16  ;;  %v12886_v16 = vld [vmem:[#allocation3 + $0xa0] sm:$0xf] }
 0x42e   : > { %7590 = vmatmul.mubr.bf16.gmra.mrb[212].mxu0 %v5883_v60  ;;  %v6375_v57 = vshll.u32 %v12815_v41, 16  ;;  %v12857_v60 = vld [vmem:[#allocation3 + $0x50] ss:$0 sps:$4 sm:$0x11]   ;;  %v6131_v34 = vrot.slane %v8611_v48, 1 }
 0x42f   : > { %7597 = vmatprep.mubr.bf16.mxu0 %v6124_v4  ;;  %9840 = vmatpush3.bf16.msra.mxu0 %v10349_v9  ;;  %v6359_v9 = vsel %vm1806_vm1, %v6354_v30, %v6358_v19  ;;  %v6370_v4 = vrot.slane %v6368_v54, 1  ;;  %v5902_v30 = vor.u32 %v5901_v11, %v5897_v6  ;;  %v12874_v19 = vrot.slane %v8657_v43, 1  ;;  %v5245_v43 = vld [vmem:[#allocation3 + $0x84] sm:$0xe] }
 0x430   : > { %9841 = vmatprep.subr.bf16.mxu0 %v10357_v46  ;;  %v6377_v56 = vrot.slane %v6375_v57, 1  ;;  %v12879_v57 = vld [vmem:[#allocation3 + $0x88] sm:$0xf]  ;;  %v5906_v54 = vrot.slane %v5904_v32, 1  ;;  %v6130_v21 = vsel %vm2063_vm2, %v6128_v13, %v6129_v36  ;;  %v6387_v11 = vshll.u32 %v12860_v28, 16 }
 0x431   : > { %v6132_v20 = vrot.slane %v12857_v60, 1  ;;  %v6371_v32 = vsel %vm1806_vm1, %v6366_v61, %v6370_v4  ;;  %v8663_v7 = vcombine.low %v5245_v43, %v12879_v57  ;;  %v6596_v4 = vrot.slane %v12866_v40, 1  ;;  %v5249_v43 = vld [vmem:[#allocation3 + $0xb4] sm:$0xe] }
 0x432   : > { %v5907_v13 = vsel %vm1806_vm1, %v5902_v30, %v5906_v54  ;;  %v12902_v61 = vrot.slane %v6387_v11, 1  ;;  %v5201_v11 = vld [vmem:[#allocation3 + $0x64] sm:$0xf] }
 0x433   : > { %9842 = vmatpush3.bf16.msra.mxu0 %v10357_v46  ;;  %v5916_v46 = vshll.u32 %v12832_v53, 16  ;;  %v6382_v53 = vrot.slane %v6380_v2, 1  ;;  %v12894_v2 = vld [vmem:[#allocation3 + $0x8c] ss:$0 sps:$4 sm:$0x11]   ;;  %v8660_v44 = vcombine.low %v5242_v50, %v5201_v11 }
 0x434   : > { %7751 = vmatmul.mubr.bf16.gmra.mrb[244].mxu1 %v12754_v23  ;;  %v5913_v23 = vrot.slane %v5911_v33, 1  ;;  %9843 = vmatprep.subr.bf16.mxu0 %v10365_v27  ;;  %v6373_v33 = vshrl.u32 %v12815_v41, 16  ;;  %v6608_v30 = vrot.slane %v12894_v2, 1  ;;  %v12970_v50 = vld [vmem:[#allocation3 + $0xc4] sm:$0xf] }
 0x435   : > { %7758 = vmatprep.mubr.bf16.mxu1 %v6359_v9  ;;  %v12883_v9 = vld [vmem:[#allocation3 + $0x74] ss:$0 sps:$4 sm:$0x11]   ;;  %v5918_v36 = vrot.slane %v5916_v46, 1 }
 0x436   : > { %7598 = vmatmul.mubr.bf16.gmra.mrb[216].mxu0 %v5895_v52  ;;  %v6378_v49 = vor.u32 %v6377_v56, %v6373_v33  ;;  %v5914_v6 = vor.u32 %v5913_v23, %v5909_v55  ;;  %v5247_v52 = vld [vmem:[#allocation3 + $0x9c] sm:$0xe]  ;;  %v6595_v23 = vrot.slane %v8659_v45, 1  ;;  %v12899_v33 = vld [vmem:[#allocation3 + $0xb8] sm:$0xf] }
 0x437   : > { %7605 = vmatprep.mubr.bf16.mxu0 %v6127_v3  ;;  %9844 = vmatpush3.bf16.msra.mxu0 %v10365_v27  ;;  %v10381_v3 = vld [vmem:[%s13499_s5 + $0x230] sm:$0xff]   ;;  %v8661_v27 = vcombine.low %v5243_v18, %v12872_v62  ;;  %13532 = vst [vmem:[#allocation12_spill] sm:$0xff] %v12899_v33  ;;  %v12906_v46 = vld [vmem:[#allocation3 + $0x68] ss:$0 sps:$4 sm:$0x11]   ;;  %v8665_v18 = vcombine.low %v5247_v52, %v12886_v16  ;;  %v6607_v52 = vrot.slane %v8663_v7, 1 }
 0x438   : > { %9845 = vmatprep.subr.bf16.mxu0 %v10373_v38  ;;  %v12908_v55 = vld [vmem:[#allocation3 + $0xa4] ss:$0 sps:$4 sm:$0x11]   ;;  %v6383_v45 = vsel %vm1806_vm1, %v6378_v49, %v6382_v53  ;;  %v12913_v54 = vsel %vm1806_vm1, %v5914_v6, %v5918_v36  ;;  %v6602_v49 = vrot.slane %v12883_v9, 1  ;;  %v12928_v6 = vld [vmem:[#allocation3 + $0x7c] sm:$0xf] }
 0x439   : > { %13533 = vst [vmem:[#allocation13_spill] sm:$0xff] %v12908_v55  ;;  %v6601_v53 = vrot.slane %v8661_v27, 1  ;;  %v5238_v36 = vld [vmem:[#allocation3 + $0x30] sm:$0xe]  ;;  %v5240_v27 = vld [vmem:[#allocation3 + $0x48] sm:$0xe] }
 0x43a   : > { %v12934_v56 = vld [vmem:[#allocation3 + $0x98] ss:$0 sps:$4 sm:$0x11]   ;;  %v8656_v48 = vcombine.low %v5238_v36, %v12763_v17  ;;  %v6613_v59 = vrot.slane %v8665_v18, 1  ;;  %v6614_v31 = vrot.slane %v12908_v55, 1  ;;  %v8658_v17 = vcombine.low %v5240_v27, %v12801_v1 }
 0x43b   : > { %9846 = vmatpush3.bf16.msra.mxu0 %v10373_v38  ;;  %v10389_v38 = vld [vmem:[%s13499_s5 + $0x238] sm:$0xff]   ;;  %v6593_v36 = vrot.slane %v12839_v63, 1  ;;  %v12953_v18 = vsel %vm2063_vm2, %v6595_v23, %v6596_v4  ;;  %v5244_v55 = vld [vmem:[#allocation3 + $0x78] sm:$0xe]  ;;  %v12966_v63 = vsel %vm2063_vm2, %v6601_v53, %v6602_v49  ;;  %v6598_v4 = vrot.slane %v8660_v44, 1 }
 0x43c   : > { %7759 = vmatmul.mubr.bf16.gmra.mrb[248].mxu1 %v12768_v10  ;;  %v12916_v10 = vsel %vm2063_vm2, %v6131_v34, %v6132_v20  ;;  %9847 = vmatprep.subr.bf16.mxu0 %v10381_v3  ;;  %v12930_v34 = vld [vmem:[#allocation3 + $0x80] ss:$0 sps:$4 sm:$0x11]   ;;  %v8667_v20 = vcombine.low %v5249_v43, %v12899_v33  ;;  %v12941_v43 = vld [vmem:[#allocation3 + $0xb0] ss:$0 sps:$4 sm:$0x11]   ;;  %v8662_v23 = vcombine.low %v5244_v55, %v12928_v6 }
 0x43d   : > { %7766 = vmatprep.mubr.bf16.mxu1 %v6371_v32  ;;  %v12925_v32 = vrot.slane %v5923_v8, 1  ;;  %v6587_v8 = vrot.slane %v12785_v35, 1  ;;  %v6620_v35 = vrot.slane %v12918_v14, 1  ;;  %v12960_v1 = vld [vmem:[#allocation3 + $0xc8] ss:$0 sps:$4 sm:$0x11]  }
 0x43e   : > { %7606 = vmatmul.mubr.bf16.gmra.mrb[220].mxu0 %v5907_v13  ;;  %v13534_v13 = vrot.slane %v12812_v51, 1  ;;  %v6619_v33 = vrot.slane %v8667_v20, 1  ;;  %v6599_v51 = vrot.slane %v12906_v46, 1  ;;  %v12977_v20 = vsel %vm2063_vm2, %v6607_v52, %v6608_v30  ;;  %v10354_v52 = vld [vmem:[#allocation3 + $0x5c] ss:$0 sps:$4 sm:$0x11]  }
 0x43f   : > { %7613 = vmatprep.mubr.bf16.mxu0 %v6130_v21  ;;  %9848 = vmatpush3.bf16.msra.mxu0 %v10381_v3  ;;  %v6586_v21 = vrot.slane %v8656_v48, 1  ;;  %v6592_v3 = vrot.slane %v8658_v17, 1  ;;  %v6604_v53 = vrot.slane %v8662_v23, 1  ;;  %v6611_v55 = vrot.slane %v12934_v56, 1 }
 0x440   : > { %v12947_v7 = vsel %vm2063_vm2, %v12874_v19, %v13534_v13  ;;  %9849 = vmatprep.subr.bf16.mxu0 %v10389_v38  ;;  %v12956_v19 = vcombine.low %v5200_v15, %v5201_v11  ;;  %v12958_v13 = vld [vmem:[#allocation3 + $0xac] sm:$0xf]  ;;  %v6605_v11 = vrot.slane %v12930_v34, 1  ;;  %v12985_v27 = vsel %vm2063_vm2, %v6598_v4, %v6599_v51 }
 0x441   : > { %v12963_v48 = vsel %vm2063_vm2, %v6586_v21, %v6587_v8  ;;  %v12973_v15 = vsel %vm2063_vm2, %v6592_v3, %v6593_v36  ;;  %v5246_v8 = vld [vmem:[#allocation3 + $0x90] sm:$0xe]  ;;  %v6617_v17 = vrot.slane %v12941_v43, 1  ;;  %v12990_v30 = vsel %vm2063_vm2, %v6619_v33, %v6620_v35 }
 0x442   : > { %v8664_v49 = vcombine.low %v5246_v8, %v12938_v42  ;;  %v12994_v21 = vsel %vm2063_vm2, %v6604_v53, %v6605_v11  ;;  %v6623_v36 = vrot.slane %v12960_v1, 1  ;;  %v13535_v3 = vshrl.u32 %v12860_v28, 16 }
 0x443   : > { %9850 = vmatpush3.bf16.msra.mxu0 %v10389_v38  ;;  %v5248_v38 = vld [vmem:[#allocation3 + $0xa8] sm:$0xe]  ;;  %v5928_v33 = vshll.u32 %v12857_v60, 16  ;;  %v6399_v35 = vshll.u32 %v12956_v19, 16  ;;  %v5935_v11 = vshll.u32 %v12587_v24, 16  ;;  %v13536_v8 = vshll.u32 %v12866_v40, 16 }
 0x444   : > { %7767 = vmatmul.mubr.bf16.gmra.mrb[252].mxu1 %v12799_v26  ;;  %v12982_v26 = vsel %vm2063_vm2, %v6613_v59, %v6614_v31  ;;  %v8666_v44 = vcombine.low %v5248_v38, %v12958_v13  ;;  %v6610_v31 = vrot.slane %v8664_v49, 1  ;;  %v6390_v51 = vor.u32 %v12902_v61, %v13535_v3 }
 0x445   : > { %7774 = vmatprep.mubr.bf16.mxu1 %v6383_v45  ;;  %v5250_v45 = vld [vmem:[#allocation3 + $0xc0] sm:$0xe]  ;;  %v6394_v53 = vrot.slane %v13536_v8, 1  ;;  %v13538_v60 = vcombine.low %v12824_v39, %v12565_v37  ;;  %v6397_v37 = vshrl.u32 %v12956_v19, 16  ;;  %v6404_v39 = vshll.u32 %v12906_v46, 16 }
 0x446   : > { %7614 = vmatmul.mubr.bf16.gmra.mrb[224].mxu0 %v12913_v54  ;;  %v8668_v59 = vcombine.low %v5250_v45, %v12970_v50  ;;  %v6616_v54 = vrot.slane %v8666_v44, 1  ;;  %v13005_v23 = vsel %vm2063_vm2, %v6610_v31, %v6611_v55  ;;  %v6135_v44 = vrot.slane %v10354_v52, 1  ;;  %v5202_v55 = vld [vmem:[#allocation3 + $0x6c] sm:$0xf] }
 0x447   : > { %7621 = vmatprep.mubr.bf16.mxu0 %v12916_v10  ;;  %v13537_v10 = vshrl.u32 %v12551_v47, 16  ;;  %v6134_v38 = vrot.slane %v13538_v60, 1  ;;  %v6395_v40 = vsel %vm1806_vm1, %v6390_v51, %v6394_v53  ;;  %v5930_v31 = vrot.slane %v5928_v33, 1  ;;  %v10358_v51 = vld [vmem:[#allocation3 + $0x68] ss:$0 sps:$4 sm:$0x11]  }
 0x448   : > { %v6622_v4 = vrot.slane %v8668_v59, 1  ;;  %v13014_v61 = vsel %vm2063_vm2, %v6616_v54, %v6617_v17  ;;  %v6401_v47 = vrot.slane %v6399_v35, 1  ;;  %v5178_v17 = vld [vmem:[#allocation3 + $0x60] sm:$0xe]  ;;  %v5937_v3 = vrot.slane %v5935_v11, 1 }
 0x449   : > { %v5926_v49 = vor.u32 %v12925_v32, %v13537_v10  ;;  %v13025_v32 = vcombine.low %v5202_v55, %v12872_v62  ;;  %v5933_v62 = vshrl.u32 %v12587_v24, 16  ;;  %v5940_v35 = vshll.u32 %v10354_v52, 16  ;;  %v5204_v11 = vld [vmem:[#allocation3 + $0x78] sm:$0xf]  ;;  %v5179_v24 = vld [vmem:[#allocation3 + $0x6c] sm:$0xe] }
 0x44a   : > { %v13020_v45 = vsel %vm2063_vm2, %v6622_v4, %v6623_v36  ;;  %v10427_v36 = vld [vmem:[#allocation3 + $0x64] sm:$0xf]  ;;  %v6402_v33 = vor.u32 %v6401_v47, %v6397_v37  ;;  %v5947_v8 = vshll.u32 %v12607_v22, 16  ;;  %v6406_v53 = vrot.slane %v6404_v39, 1 }
 0x44b   : > { %v5931_v59 = vsel %vm1806_vm1, %v5926_v49, %v5930_v31  ;;  %v8613_v54 = vcombine.low %v5178_v17, %v10427_v36  ;;  %v6411_v4 = vshll.u32 %v13025_v32, 16  ;;  %v5938_v10 = vor.u32 %v5937_v3, %v5933_v62  ;;  %v10428_v17 = vld [vmem:[#allocation3 + $0x70] sm:$0xf]  ;;  %v10362_v37 = vld [vmem:[#allocation3 + $0x74] ss:$0 sps:$4 sm:$0x11]  }
 0x44c   : > { %7775 = vmatmul.mubr.bf16.gmra.mrb[0].mxu1 %v12815_v41  ;;  %v6136_v41 = vsel %vm2063_vm2, %v6134_v38, %v6135_v44  ;;  %v6138_v46 = vrot.slane %v10358_v51, 1  ;;  %v6407_v60 = vsel %vm1806_vm1, %v6402_v33, %v6406_v53  ;;  %v5942_v38 = vrot.slane %v5940_v35, 1  ;;  %v5251_v62 = vld [vmem:[#allocation3 + $0xcc] sm:$0xe] }
 0x44d   : > { %7782 = vmatprep.mubr.bf16.mxu1 %v6395_v40  ;;  %v6137_v49 = vrot.slane %v8613_v54, 1  ;;  %v6413_v44 = vrot.slane %v6411_v4, 1  ;;  %v13037_v55 = vcombine.low %v5204_v11, %v12928_v6  ;;  %v6409_v40 = vshrl.u32 %v13025_v32, 16  ;;  %v5206_v4 = vld [vmem:[#allocation3 + $0x84] sm:$0xf] }
 0x44e   : > { %7622 = vmatmul.mubr.bf16.gmra.mrb[228].mxu0 %v5931_v59  ;;  %v5943_v52 = vsel %vm1806_vm1, %v5938_v10, %v5942_v38  ;;  %v6416_v31 = vshll.u32 %v12883_v9, 16  ;;  %v5949_v47 = vrot.slane %v5947_v8, 1  ;;  %v8614_v59 = vcombine.low %v5179_v24, %v10428_v17  ;;  %v10429_v24 = vld [vmem:[#allocation3 + $0x7c] sm:$0xf] }
 0x44f   : > { %7629 = vmatprep.mubr.bf16.mxu0 %v6136_v41  ;;  %v6414_v39 = vor.u32 %v6413_v44, %v6409_v40  ;;  %v5945_v6 = vshrl.u32 %v12607_v22, 16  ;;  %v5952_v3 = vshll.u32 %v10358_v51, 16  ;;  %v6423_v36 = vshll.u32 %v13037_v55, 16  ;;  %v13051_v22 = vld [vmem:[#allocation3 + $0xd0] sm:$0xf] }
 0x450   : > { %v5959_v54 = vshll.u32 %v12622_v29, 16  ;;  %v6418_v41 = vrot.slane %v6416_v31, 1  ;;  %v6140_v9 = vrot.slane %v8614_v59, 1  ;;  %v6141_v35 = vrot.slane %v10362_v37, 1 }
 0x451   : > { %v5950_v33 = vor.u32 %v5949_v47, %v5945_v6  ;;  %v5954_v53 = vrot.slane %v5952_v3, 1  ;;  %v6425_v10 = vrot.slane %v6423_v36, 1  ;;  %v8669_v11 = vcombine.low %v5251_v62, %v13051_v22  ;;  %v13066_v17 = vld [vmem:[#allocation3 + $0xd4] ss:$0 sps:$4 sm:$0x11]  }
 0x452   : > { %v6419_v8 = vsel %vm1806_vm1, %v6414_v39, %v6418_v41  ;;  %v5961_v51 = vrot.slane %v5959_v54, 1  ;;  %v6428_v44 = vshll.u32 %v12930_v34, 16  ;;  %v6142_v40 = vsel %vm2063_vm2, %v6140_v9, %v6141_v35  ;;  %v5208_v62 = vld [vmem:[#allocation3 + $0x90] sm:$0xf] }
 0x453   : > { %v5955_v38 = vsel %vm1806_vm1, %v5950_v33, %v5954_v53  ;;  %v5957_v31 = vshrl.u32 %v12622_v29, 16  ;;  %v5964_v47 = vshll.u32 %v10362_v37, 16  ;;  %v6625_v39 = vrot.slane %v8669_v11, 1 }
 0x454   : > { %7783 = vmatmul.mubr.bf16.gmra.mrb[4].mxu1 %v12860_v28  ;;  %v6139_v28 = vsel %vm2063_vm2, %v6137_v49, %v6138_v46  ;;  %v13049_v49 = vcombine.low %v5206_v4, %v12879_v57  ;;  %v13053_v46 = vld [vmem:[#allocation3 + $0x80] ss:$0 sps:$4 sm:$0x11]   ;;  %v13062_v57 = vld [vmem:[%s13500_s6] ss:$0 sm:$0xff]  ;;  %v6626_v6 = vrot.slane %v13066_v17, 1 }
 0x455   : > { %7790 = vmatprep.mubr.bf16.mxu1 %v6407_v60  ;;  %v5180_v60 = vld [vmem:[#allocation3 + $0x78] sm:$0xe]  ;;  %v5962_v34 = vor.u32 %v5961_v51, %v5957_v31  ;;  %v5971_v3 = vshll.u32 %v12639_v25, 16  ;;  %v6430_v36 = vrot.slane %v6428_v44, 1  ;;  %v7262_v54 = vadd.f32 %v12789_v58, %v13062_v57 }
 0x456   : > { %7630 = vmatmul.mubr.bf16.gmra.mrb[232].mxu0 %v5943_v52  ;;  %v8615_v52 = vcombine.low %v5180_v60, %v10429_v24  ;;  %v5966_v33 = vrot.slane %v5964_v47, 1  ;;  %v6144_v37 = vrot.slane %v13053_v46, 1  ;;  %v6433_v51 = vshrl.u32 %v13049_v49, 16 }
 0x457   : > { %7637 = vmatprep.mubr.bf16.mxu0 %v6139_v28  ;;  %v6435_v28 = vshll.u32 %v13049_v49, 16  ;;  %v6440_v11 = vshll.u32 %v12894_v2, 16  ;;  %v7265_v44 = vadd.f32 %v12822_v12, %v13062_v57  ;;  %v5969_v47 = vshrl.u32 %v12639_v25, 16  ;;  %v10370_v2 = vld [vmem:[#allocation3 + $0x8c] ss:$0 sps:$4 sm:$0x11]  }
 0x458   : > { %v6143_v29 = vrot.slane %v8615_v52, 1  ;;  %v5967_v58 = vsel %vm1806_vm1, %v5962_v34, %v5966_v33  ;;  %v10430_v52 = vld [vmem:[#allocation3 + $0x88] sm:$0xf]  ;;  %v5983_v12 = vshll.u32 %v12659_v0, 16 }
 0x459   : > { %v6437_v4 = vrot.slane %v6435_v28, 1  ;;  %v5976_v28 = vshll.u32 %v13053_v46, 16  ;;  %v5182_v46 = vld [vmem:[#allocation3 + $0x90] sm:$0xe] }
 0x45a   : > { %v6145_v31 = vsel %vm2063_vm2, %v6143_v29, %v6144_v37 }
 0x45b   : > { %v5978_v33 = vrot.slane %v5976_v28, 1 }
 0x45c   : > { %7791 = vmatmul.mubr.bf16.gmra.mrb[8].mxu1 %v12956_v19  ;;  %v6421_v19 = vshrl.u32 %v13037_v55, 16 }
 0x45d   : > { %7798 = vmatprep.mubr.bf16.mxu1 %v6419_v8  ;;  %v13077_v8 = vcombine.low %v5208_v62, %v12938_v42 }
 0x45e   : > { %7638 = vmatmul.mubr.bf16.gmra.mrb[236].mxu0 %v5955_v38  ;;  %v6426_v59 = vor.u32 %v6425_v10, %v6421_v19  ;;  %v13083_v38 = vsel %vm2063_vm2, %v6625_v39, %v6626_v6  ;;  %v5973_v19 = vrot.slane %v5971_v3, 1  ;;  %v6442_v6 = vrot.slane %v6440_v11, 1 }
 0x45f   : > { %7645 = vmatprep.mubr.bf16.mxu0 %v6142_v40  ;;  %v6447_v34 = vshll.u32 %v13077_v8, 16  ;;  %v5988_v11 = vshll.u32 %v10370_v2, 16 }
 0x460   : > { %v6431_v35 = vsel %vm1806_vm1, %v6426_v59, %v6430_v36  ;;  %v6438_v59 = vor.u32 %v6437_v4, %v6433_v51  ;;  %v5974_v3 = vor.u32 %v5973_v19, %v5969_v47  ;;  %v5985_v4 = vrot.slane %v5983_v12, 1 }
 0x461   : > { %v6449_v29 = vrot.slane %v6447_v34, 1  ;;  %v13539_v34 = vld [vmem:[#allocation13_spill] sm:$0xff] }
 0x462   : > { %v6443_v25 = vsel %vm1806_vm1, %v6438_v59, %v6442_v6  ;;  %v5979_v62 = vsel %vm1806_vm1, %v5974_v3, %v5978_v33  ;;  %v6464_v12 = vshll.u32 %v13539_v34, 16  ;;  %v10432_v3 = vld [vmem:[#allocation3 + $0xa0] sm:$0xf] }
 0x463   : > { %v9403_v41 = vpop.f32.mrb[176].mxu1 }
 0x464   : > { %v9404_v9 = vpop.f32.mrb[177].mxu1  ;;  %7799 = vmatmul.mubr.bf16.gmra.mrb[12].mxu1 %v13025_v32  ;;  %v5181_v32 = vld [vmem:[#allocation3 + $0x84] sm:$0xe] }
 0x465   : > { %v9405_v53 = vadd.f32 %v9404_v9, %v9403_v41  ;;  %v9406_v10 = vpop.f32.mrb[178].mxu1  ;;  %7806 = vmatprep.mubr.bf16.mxu1 %v6431_v35  ;;  %v8616_v40 = vcombine.low %v5181_v32, %v10430_v52  ;;  %v5210_v41 = vld [vmem:[#allocation3 + $0x9c] sm:$0xf]  ;;  %v6445_v9 = vshrl.u32 %v13077_v8, 16  ;;  %v6452_v35 = vshll.u32 %v12934_v56, 16 }
 0x466   : > { %v9407_v60 = vpop.f32.mrb[179].mxu1  ;;  %7646 = vmatmul.mubr.bf16.gmra.mrb[240].mxu0 %v5967_v58  ;;  %v13099_v37 = vcombine.low %v5210_v41, %v12886_v16  ;;  %v10374_v58 = vld [vmem:[#allocation3 + $0x98] ss:$0 sps:$4 sm:$0x11]   ;;  %v5981_v16 = vshrl.u32 %v12659_v0, 16  ;;  %v5995_v32 = vshll.u32 %v12681_v5, 16 }
 0x467   : > { %v13087_v42 = vadd.f32 %v9405_v53, %v7262_v54  ;;  %v9408_v24 = vadd.f32 %v9407_v60, %v9406_v10  ;;  %7653 = vmatprep.mubr.bf16.mxu0 %v6145_v31  ;;  %v6146_v36 = vrot.slane %v8616_v40, 1  ;;  %v6147_v54 = vrot.slane %v10370_v2, 1  ;;  %v10431_v53 = vld [vmem:[#allocation3 + $0x94] sm:$0xf]  ;;  %v5212_v52 = vld [vmem:[#allocation3 + $0xa8] sm:$0xf] }
 0x468   : > { %v8617_v10 = vcombine.low %v5182_v46, %v10431_v53  ;;  %v6450_v51 = vor.u32 %v6449_v29, %v6445_v9  ;;  %v6459_v60 = vshll.u32 %v13099_v37, 16  ;;  %v6454_v19 = vrot.slane %v6452_v35, 1  ;;  %v5183_v0 = vld [vmem:[#allocation3 + $0x9c] sm:$0xe]  ;;  %v13540_v35 = vld [vmem:[#allocation8_spill] sm:$0xff] }
 0x469   : > { %v13093_v39 = vadd.f32 %v9408_v24, %v7265_v44  ;;  %v5986_v44 = vor.u32 %v5985_v4, %v5981_v16  ;;  %v6150_v56 = vrot.slane %v10374_v58, 1  ;;  %v5990_v31 = vrot.slane %v5988_v11, 1 }
 0x46a   : > { %v6149_v24 = vrot.slane %v8617_v10, 1  ;;  %v6455_v40 = vsel %vm1806_vm1, %v6450_v51, %v6454_v19  ;;  %v6461_v47 = vrot.slane %v6459_v60, 1  ;;  %v13111_v59 = vcombine.low %v5212_v52, %v12958_v13  ;;  %v5214_v19 = vld [vmem:[#allocation3 + $0xb4] sm:$0xf] }
 0x46b   : > { %v5991_v2 = vsel %vm1806_vm1, %v5986_v44, %v5990_v31  ;;  %v6457_v28 = vshrl.u32 %v13099_v37, 16  ;;  %v5997_v6 = vrot.slane %v5995_v32, 1  ;;  %v5993_v13 = vshrl.u32 %v12681_v5, 16 }
 0x46c   : > { %7807 = vmatmul.mubr.bf16.gmra.mrb[16].mxu1 %v13037_v55  ;;  %v6148_v55 = vsel %vm2063_vm2, %v6146_v36, %v6147_v54  ;;  %v8618_v36 = vcombine.low %v5183_v0, %v10432_v3  ;;  %v10378_v54 = vld [vmem:[#allocation3 + $0xa4] ss:$0 sps:$4 sm:$0x11]   ;;  %v6000_v33 = vshll.u32 %v10374_v58, 16  ;;  %v6471_v29 = vshll.u32 %v13111_v59, 16 }
 0x46d   : > { %7814 = vmatprep.mubr.bf16.mxu1 %v6443_v25  ;;  %v6462_v25 = vor.u32 %v6461_v47, %v6457_v28  ;;  %v6007_v4 = vshll.u32 %v13540_v35, 16  ;;  %v6466_v53 = vrot.slane %v6464_v12, 1  ;;  %v5998_v10 = vor.u32 %v5997_v6, %v5993_v13  ;;  %v10433_v6 = vld [vmem:[#allocation3 + $0xac] sm:$0xf] }
 0x46e   : > { %7654 = vmatmul.mubr.bf16.gmra.mrb[244].mxu0 %v5979_v62  ;;  %v6152_v51 = vrot.slane %v8618_v36, 1  ;;  %v6153_v16 = vrot.slane %v10378_v54, 1  ;;  %v6002_v58 = vrot.slane %v6000_v33, 1  ;;  %v6473_v44 = vrot.slane %v6471_v29, 1 }
 0x46f   : > { %7661 = vmatprep.mubr.bf16.mxu0 %v6148_v55  ;;  %v6467_v5 = vsel %vm1806_vm1, %v6462_v25, %v6466_v53  ;;  %v6009_v0 = vrot.slane %v6007_v4, 1  ;;  %v6469_v34 = vshrl.u32 %v13111_v59, 16  ;;  %v10382_v25 = vld [vmem:[#allocation3 + $0xb0] ss:$0 sps:$4 sm:$0x11]   ;;  %v6005_v33 = vshrl.u32 %v13540_v35, 16 }
 0x470   : > { %v6003_v28 = vsel %vm1806_vm1, %v5998_v10, %v6002_v58  ;;  %v6154_v36 = vsel %vm2063_vm2, %v6152_v51, %v6153_v16  ;;  %v6012_v29 = vshll.u32 %v10378_v54, 16 }
 0x471   : > { %v6010_v51 = vor.u32 %v6009_v0, %v6005_v33 }
 0x472   : > { %v6014_v35 = vrot.slane %v6012_v29, 1 }
 0x474   : > { %7815 = vmatmul.mubr.bf16.gmra.mrb[20].mxu1 %v13049_v49  ;;  %v6151_v49 = vsel %vm2063_vm2, %v6149_v24, %v6150_v56  ;;  %v13541_v56 = vld [vmem:[#allocation12_spill] sm:$0xff] }
 0x475   : > { %7822 = vmatprep.mubr.bf16.mxu1 %v6455_v40  ;;  %v13124_v52 = vcombine.low %v5214_v19, %v13541_v56  ;;  %v5185_v56 = vld [vmem:[#allocation3 + $0xb4] sm:$0xe] }
 0x476   : > { %7662 = vmatmul.mubr.bf16.gmra.mrb[248].mxu0 %v5991_v2  ;;  %v5184_v2 = vld [vmem:[#allocation3 + $0xa8] sm:$0xe] }
 0x477   : > { %7669 = vmatprep.mubr.bf16.mxu0 %v6151_v49  ;;  %v8619_v3 = vcombine.low %v5184_v2, %v10433_v6 }
 0x478   : > { %v9297_v41 = vpop.f32.mrb[148].mxu0 }
 0x479   : > { %v9298_v46 = vpop.f32.mrb[149].mxu0 }
 0x47a   : > { %v9299_v62 = vadd.f32 %v9298_v46, %v9297_v41  ;;  %v9300_v9 = vpop.f32.mrb[150].mxu0  ;;  %v6474_v46 = vor.u32 %v6473_v44, %v6469_v34  ;;  %v10434_v34 = vld [vmem:[#allocation3 + $0xb8] sm:$0xf] }
 0x47b   : > { %v9301_v55 = vpop.f32.mrb[151].mxu0 }
 0x47c   : > { %v7270_v11 = vadd.f32 %v9299_v62, %v13062_v57  ;;  %v9409_v60 = vpop.f32.mrb[180].mxu1  ;;  %v9302_v32 = vadd.f32 %v9301_v55, %v9300_v9  ;;  %7823 = vmatmul.mubr.bf16.gmra.mrb[24].mxu1 %v13077_v8  ;;  %v6476_v8 = vshll.u32 %v12941_v43, 16  ;;  %v6483_v62 = vshll.u32 %v13124_v52, 16  ;;  %v13542_v43 = vld [vmem:[#allocation9_spill] sm:$0xff] }
 0x47d   : > { %v9410_v24 = vpop.f32.mrb[181].mxu1  ;;  %7830 = vmatprep.mubr.bf16.mxu1 %v6467_v5  ;;  %v6019_v4 = vshll.u32 %v13542_v43, 16  ;;  %v5216_v5 = vld [vmem:[#allocation3 + $0xc0] sm:$0xf] }
 0x47e   : > { %v9411_v40 = vadd.f32 %v9410_v24, %v9409_v60  ;;  %v7273_v31 = vadd.f32 %v9302_v32, %v13062_v57  ;;  %v9412_v47 = vpop.f32.mrb[182].mxu1  ;;  %7670 = vmatmul.mubr.bf16.gmra.mrb[252].mxu0 %v6003_v28  ;;  %v6478_v16 = vrot.slane %v6476_v8, 1  ;;  %v6155_v60 = vrot.slane %v8619_v3, 1  ;;  %v13147_v28 = vld [vmem:[#allocation3 + $0xbc] ss:$0 sps:$4 sm:$0x11]  }
 0x47f   : > { %v9413_v12 = vpop.f32.mrb[183].mxu1  ;;  %7677 = vmatprep.mubr.bf16.mxu0 %v6154_v36  ;;  %v6156_v32 = vrot.slane %v10382_v25, 1  ;;  %v6485_v58 = vrot.slane %v6483_v62, 1  ;;  %v13141_v44 = vcombine.low %v5216_v5, %v12970_v50  ;;  %v6021_v24 = vrot.slane %v6019_v4, 1  ;;  %v5218_v3 = vld [vmem:[#allocation3 + $0xcc] sm:$0xf] }
 0x480   : > { %v13131_v49 = vadd.f32 %v9411_v40, %v7270_v11  ;;  %v9414_v41 = vadd.f32 %v9413_v12, %v9412_v47  ;;  %v9303_v13 = vpop.f32.mrb[152].mxu0  ;;  %v6479_v54 = vsel %vm1806_vm1, %v6474_v46, %v6478_v16  ;;  %v6488_v40 = vshll.u32 %v12918_v14, 16  ;;  %v13543_v62 = vld [vmem:[#allocation10_spill] sm:$0xff] }
 0x481   : > { %v9304_v9 = vpop.f32.mrb[153].mxu0  ;;  %v6481_v47 = vshrl.u32 %v13124_v52, 16  ;;  %v8620_v8 = vcombine.low %v5185_v56, %v10434_v34  ;;  %v6024_v50 = vshll.u32 %v10382_v25, 16  ;;  %v6157_v12 = vsel %vm2063_vm2, %v6155_v60, %v6156_v32 }
 0x482   : > { %v13136_v53 = vadd.f32 %v9414_v41, %v7273_v31  ;;  %v9305_v10 = vadd.f32 %v9304_v9, %v9303_v13  ;;  %v9306_v55 = vpop.f32.mrb[154].mxu0  ;;  %v6015_v31 = vsel %vm1806_vm1, %v6010_v51, %v6014_v35  ;;  %v6495_v33 = vshll.u32 %v13141_v44, 16 }
 0x483   : > { %v9307_v11 = vpop.f32.mrb[155].mxu0  ;;  %v6486_v14 = vor.u32 %v6485_v58, %v6481_v47  ;;  %v6031_v9 = vshll.u32 %v13543_v62, 16  ;;  %v6026_v60 = vrot.slane %v6024_v50, 1  ;;  %v6158_v32 = vrot.slane %v8620_v8, 1 }
 0x484   : > { %v9308_v19 = vadd.f32 %v9307_v11, %v9306_v55  ;;  %7831 = vmatmul.mubr.bf16.gmra.mrb[28].mxu1 %v13099_v37  ;;  %v7278_v0 = vadd.f32 %v9305_v10, %v13062_v57  ;;  %v6017_v37 = vshrl.u32 %v13542_v43, 16  ;;  %v6490_v43 = vrot.slane %v6488_v40, 1  ;;  %v5186_v40 = vld [vmem:[#allocation3 + $0xc0] sm:$0xe] }
 0x485   : > { %7838 = vmatprep.mubr.bf16.mxu1 %v6479_v54  ;;  %v13157_v11 = vcombine.low %v5218_v3, %v13051_v22  ;;  %v6497_v58 = vrot.slane %v6495_v33, 1  ;;  %v6033_v56 = vrot.slane %v6031_v9, 1  ;;  %v6493_v22 = vshrl.u32 %v13141_v44, 16 }
 0x486   : > { %7678 = vmatmul.mubr.bf16.gmra.mrb[0].mxu0 %v6015_v31  ;;  %v7281_v41 = vadd.f32 %v9308_v19, %v13062_v57  ;;  %v6022_v46 = vor.u32 %v6021_v24, %v6017_v37  ;;  %v6159_v19 = vrot.slane %v13147_v28, 1  ;;  %v6491_v35 = vsel %vm1806_vm1, %v6486_v14, %v6490_v43 }
 0x487   : > { %v9415_v2 = vpop.f32.mrb[184].mxu1  ;;  %7685 = vmatprep.mubr.bf16.mxu0 %v6157_v12  ;;  %v6500_v47 = vshll.u32 %v12960_v1, 16  ;;  %v10390_v12 = vld [vmem:[#allocation3 + $0xc8] ss:$0 sps:$4 sm:$0x11]   ;;  %v6498_v3 = vor.u32 %v6497_v58, %v6493_v22  ;;  %v13544_v1 = vld [vmem:[#allocation11_spill] sm:$0xff] }
 0x488   : > { %v9416_v6 = vpop.f32.mrb[185].mxu1  ;;  %v6027_v31 = vsel %vm1806_vm1, %v6022_v46, %v6026_v60  ;;  %v6160_v34 = vsel %vm2063_vm2, %v6158_v32, %v6159_v19  ;;  %v6505_v9 = vshrl.u32 %v13157_v11, 16 }
 0x489   : > { %v9417_v36 = vadd.f32 %v9416_v6, %v9415_v2  ;;  %v9418_v13 = vpop.f32.mrb[186].mxu1  ;;  %v9309_v29 = vpop.f32.mrb[156].mxu0  ;;  %v6029_v2 = vshrl.u32 %v13543_v62, 16  ;;  %v6036_v6 = vshll.u32 %v13147_v28, 16  ;;  %v6502_v46 = vrot.slane %v6500_v47, 1 }
 0x48a   : > { %v9419_v4 = vpop.f32.mrb[187].mxu1  ;;  %v9310_v10 = vpop.f32.mrb[157].mxu0  ;;  %v6048_v47 = vshll.u32 %v10390_v12, 16 }
 0x48b   : > { %v13154_v25 = vadd.f32 %v9417_v36, %v7278_v0  ;;  %v9420_v55 = vadd.f32 %v9419_v4, %v9418_v13  ;;  %v9311_v51 = vadd.f32 %v9310_v10, %v9309_v29  ;;  %v9312_v16 = vpop.f32.mrb[158].mxu0  ;;  %v6507_v0 = vshll.u32 %v13157_v11, 16 }
 0x48c   : > { %v9313_v5 = vpop.f32.mrb[159].mxu0  ;;  %7839 = vmatmul.mubr.bf16.gmra.mrb[32].mxu1 %v13111_v59  ;;  %v10435_v59 = vld [vmem:[#allocation3 + $0xc4] sm:$0xf]  ;;  %v6034_v36 = vor.u32 %v6033_v56, %v6029_v2  ;;  %v6512_v4 = vshll.u32 %v13066_v17, 16  ;;  %v6503_v60 = vsel %vm1806_vm1, %v6498_v3, %v6502_v46  ;;  %v5236_v17 = vld [vmem:[#allocation3 + $0x18] sm:$0xe] }
 0x48d   : > { %v13162_v54 = vadd.f32 %v9420_v55, %v7281_v41  ;;  %v9314_v24 = vadd.f32 %v9313_v5, %v9312_v16  ;;  %7846 = vmatprep.mubr.bf16.mxu1 %v6491_v35  ;;  %v8621_v37 = vcombine.low %v5186_v40, %v10435_v59  ;;  %v7286_v8 = vadd.f32 %v9311_v51, %v13062_v57 }
 0x48e   : > { %7686 = vmatmul.mubr.bf16.gmra.mrb[4].mxu0 %v6027_v31  ;;  %v6043_v41 = vshll.u32 %v13544_v1, 16  ;;  %v6509_v43 = vrot.slane %v6507_v0, 1  ;;  %v6162_v51 = vrot.slane %v10390_v12, 1  ;;  %v6038_v16 = vrot.slane %v6036_v6, 1  ;;  %v10436_v31 = vld [vmem:[#allocation3 + $0x1c] sm:$0xf] }
 0x48f   : > { %7693 = vmatprep.mubr.bf16.mxu0 %v6160_v34  ;;  %v7289_v33 = vadd.f32 %v9314_v24, %v13062_v57  ;;  %v6161_v55 = vrot.slane %v8621_v37, 1  ;;  %v6514_v24 = vrot.slane %v6512_v4, 1  ;;  %v8654_v22 = vcombine.low %v5236_v17, %v10436_v31  ;;  %v10437_v6 = vld [vmem:[#allocation3 + $0x20] ss:$0 sps:$4 sm:$0x11]  }
 0x490   : > { %v9421_v50 = vpop.f32.mrb[188].mxu1  ;;  %v6045_v19 = vrot.slane %v6043_v41, 1  ;;  %v6039_v5 = vsel %vm1806_vm1, %v6034_v36, %v6038_v16  ;;  %v6510_v58 = vor.u32 %v6509_v43, %v6505_v9  ;;  %v6581_v3 = vrot.slane %v10437_v6, 1 }
 0x491   : > { %v9422_v14 = vpop.f32.mrb[189].mxu1  ;;  %v6163_v56 = vsel %vm2063_vm2, %v6161_v55, %v6162_v51 }
 0x492   : > { %v9423_v13 = vadd.f32 %v9422_v14, %v9421_v50  ;;  %v9424_v29 = vpop.f32.mrb[190].mxu1  ;;  %v6580_v50 = vrot.slane %v8654_v22, 1  ;;  %v6050_v14 = vrot.slane %v6048_v47, 1 }
 0x493   : > { %v9425_v62 = vpop.f32.mrb[191].mxu1 }
 0x494   : > { %v13176_v10 = vadd.f32 %v9423_v13, %v7286_v8  ;;  %v9426_v28 = vadd.f32 %v9425_v62, %v9424_v29  ;;  %7847 = vmatmul.mubr.bf16.gmra.mrb[36].mxu1 %v13124_v52  ;;  %v6041_v52 = vshrl.u32 %v13544_v1, 16  ;;  %v6515_v8 = vsel %vm1806_vm1, %v6510_v58, %v6514_v24 }
 0x495   : > { %7854 = vmatprep.mubr.bf16.mxu1 %v6503_v60  ;;  %v6582_v46 = vsel %vm2063_vm2, %v6580_v50, %v6581_v3 }
 0x496   : > { %v13180_v32 = vadd.f32 %v9426_v28, %v7289_v33  ;;  %7694 = vmatmul.mubr.bf16.gmra.mrb[8].mxu0 %v6039_v5  ;;  %v6046_v37 = vor.u32 %v6045_v19, %v6041_v52 }
 0x497   : > { %v9315_v35 = vpop.f32.mrb[160].mxu0  ;;  %7701 = vmatprep.mubr.bf16.mxu0 %v6163_v56 }
 0x498   : > { %v9316_v40 = vpop.f32.mrb[161].mxu0  ;;  %v6051_v12 = vsel %vm1806_vm1, %v6046_v37, %v6050_v14 }
 0x499   : > { %v9317_v0 = vadd.f32 %v9316_v40, %v9315_v35  ;;  %v9318_v2 = vpop.f32.mrb[162].mxu0  ;;  %v13545_v35 = vld [vmem:[#allocation7_spill] sm:$0xff] }
 0x49a   : > { %v9319_v59 = vpop.f32.mrb[163].mxu0 }
 0x49b   : > { %v9320_v34 = vadd.f32 %v9319_v59, %v9318_v2  ;;  %v7294_v36 = vadd.f32 %v9317_v0, %v13062_v57 }
 0x49c   : > { %7855 = vmatmul.mubr.bf16.gmra.mrb[40].mxu1 %v13141_v44 }
 0x49d   : > { %v9427_v41 = vpop.f32.mrb[192].mxu1  ;;  %7862 = vmatprep.mubr.bf16.mxu1 %v6515_v8  ;;  %v7297_v33 = vadd.f32 %v9320_v34, %v13062_v57 }
 0x49e   : > { %v9428_v1 = vpop.f32.mrb[193].mxu1  ;;  %7702 = vmatmul.mubr.bf16.gmra.mrb[12].mxu0 %v6051_v12 }
 0x49f   : > { %v9429_v13 = vadd.f32 %v9428_v1, %v9427_v41  ;;  %v9430_v29 = vpop.f32.mrb[194].mxu1  ;;  %9851 = vmatprep.mubr.bf16.mxu0 %v6582_v46 }
 0x4a0   : > { %v9431_v62 = vpop.f32.mrb[195].mxu1  ;;  %v9321_v44 = vpop.f32.mrb[164].mxu0 }
 0x4a1   : > { %v13191_v9 = vadd.f32 %v9429_v13, %v7294_v36  ;;  %v9432_v43 = vadd.f32 %v9431_v62, %v9430_v29  ;;  %v9322_v28 = vpop.f32.mrb[165].mxu0 }
 0x4a2   : > { %v9323_v55 = vadd.f32 %v9322_v28, %v9321_v44  ;;  %v9324_v51 = vpop.f32.mrb[166].mxu0 }
 0x4a3   : > { %v13193_v4 = vadd.f32 %v9432_v43, %v7297_v33  ;;  %v9325_v16 = vpop.f32.mrb[167].mxu0 }
 0x4a4   : > { %7863 = vmatmul.mubr.bf16.gmra.mrb[44].mxu1 %v13157_v11  ;;  %v9326_v60 = vadd.f32 %v9325_v16, %v9324_v51  ;;  %v7302_v19 = vadd.f32 %v9323_v55, %v13062_v57 }
 0x4a6   : > { %9852 = vmatmul.mubr.bf16.vlgmr.msra.gmra.mrb[16].mxu0 %v13545_v35  ;;  %v7305_v17 = vadd.f32 %v9326_v60, %v13062_v57 }
 0x4a7   : > { %v9433_v5 = vpop.f32.mrb[196].mxu1  ;;  %9855 = vmatprep.mubr.bf16.mxu0 %v12963_v48 }
 0x4a8   : > { %v9434_v58 = vpop.f32.mrb[197].mxu1 }
 0x4a9   : > { %v9435_v24 = vadd.f32 %v9434_v58, %v9433_v5  ;;  %v9436_v56 = vpop.f32.mrb[198].mxu1  ;;  %v9327_v31 = vpop.f32.mrb[168].mxu0 }
 0x4aa   : > { %v9437_v40 = vpop.f32.mrb[199].mxu1  ;;  %v9328_v52 = vpop.f32.mrb[169].mxu0 }
 0x4ab   : > { %v13200_v22 = vadd.f32 %v9435_v24, %v7302_v19  ;;  %v9438_v11 = vadd.f32 %v9437_v40, %v9436_v56  ;;  %v9329_v47 = vadd.f32 %v9328_v52, %v9327_v31  ;;  %v9330_v0 = vpop.f32.mrb[170].mxu0 }
 0x4ac   : > { %v9331_v59 = vpop.f32.mrb[171].mxu0 }
 0x4ad   : > { %v13202_v2 = vadd.f32 %v9438_v11, %v7305_v17  ;;  %v9332_v37 = vadd.f32 %v9331_v59, %v9330_v0  ;;  %v7310_v34 = vadd.f32 %v9329_v47, %v13062_v57 }
 0x4ae   : > { %9856 = vmatmul.mubr.bf16.gmra.mrb[20].mxu0 %v12947_v7 }
 0x4af   : > { %v9439_v8 = vpop.f32.mrb[200].mxu1  ;;  %9859 = vmatprep.mubr.bf16.mxu0 %v12973_v15  ;;  %v7313_v6 = vadd.f32 %v9332_v37, %v13062_v57 }
 0x4b0   : > { %v9440_v48 = vpop.f32.mrb[201].mxu1 }
 0x4b1   : > { %v9441_v50 = vadd.f32 %v9440_v48, %v9439_v8  ;;  %v9442_v3 = vpop.f32.mrb[202].mxu1  ;;  %v9333_v36 = vpop.f32.mrb[172].mxu0 }
 0x4b2   : > { %v9443_v14 = vpop.f32.mrb[203].mxu1  ;;  %v9334_v12 = vpop.f32.mrb[173].mxu0 }
 0x4b3   : > { %v13208_v41 = vadd.f32 %v9441_v50, %v7310_v34  ;;  %v9444_v1 = vadd.f32 %v9443_v14, %v9442_v3  ;;  %v9335_v13 = vadd.f32 %v9334_v12, %v9333_v36  ;;  %v9336_v33 = vpop.f32.mrb[174].mxu0 }
 0x4b4   : > { %v9337_v46 = vpop.f32.mrb[175].mxu0 }
 0x4b5   : > { %v13210_v29 = vadd.f32 %v9444_v1, %v7313_v6  ;;  %v9338_v62 = vadd.f32 %v9337_v46, %v9336_v33  ;;  %v7318_v7 = vadd.f32 %v9335_v13, %v13062_v57 }
 0x4b6   : > { %9860 = vmatmul.mubr.bf16.gmra.mrb[24].mxu0 %v12953_v18 }
 0x4b7   : > { %v9445_v43 = vpop.f32.mrb[204].mxu1  ;;  %9863 = vmatprep.mubr.bf16.mxu0 %v12985_v27  ;;  %v7321_v28 = vadd.f32 %v9338_v62, %v13062_v57 }
 0x4b8   : > { %v9446_v15 = vpop.f32.mrb[205].mxu1 }
 0x4b9   : > { %v9447_v44 = vadd.f32 %v9446_v15, %v9445_v43  ;;  %v9448_v55 = vpop.f32.mrb[206].mxu1  ;;  %v9339_v16 = vpop.f32.mrb[176].mxu0 }
 0x4ba   : > { %v9449_v51 = vpop.f32.mrb[207].mxu1  ;;  %v9340_v5 = vpop.f32.mrb[177].mxu0 }
 0x4bb   : > { %v13216_v60 = vadd.f32 %v9447_v44, %v7318_v7  ;;  %v9450_v19 = vadd.f32 %v9449_v51, %v9448_v55  ;;  %v9341_v35 = vadd.f32 %v9340_v5, %v9339_v16  ;;  %v9342_v58 = vpop.f32.mrb[178].mxu0 }
 0x4bc   : > { %v9343_v17 = vpop.f32.mrb[179].mxu0 }
 0x4bd   : > { %v13218_v24 = vadd.f32 %v9450_v19, %v7321_v28  ;;  %v9344_v56 = vadd.f32 %v9343_v17, %v9342_v58  ;;  %v7326_v18 = vadd.f32 %v9341_v35, %v13062_v57 }
 0x4be   : > { %9864 = vmatmul.mubr.bf16.gmra.mrb[28].mxu0 %v12966_v63 }
 0x4bf   : > { %v9451_v40 = vpop.f32.mrb[208].mxu1  ;;  %9867 = vmatprep.mubr.bf16.mxu0 %v12994_v21  ;;  %v7329_v11 = vadd.f32 %v9344_v56, %v13062_v57 }
 0x4c0   : > { %v9452_v27 = vpop.f32.mrb[209].mxu1 }
 0x4c1   : > { %v9453_v31 = vadd.f32 %v9452_v27, %v9451_v40  ;;  %v9454_v52 = vpop.f32.mrb[210].mxu1  ;;  %v9345_v0 = vpop.f32.mrb[180].mxu0 }
 0x4c2   : > { %v9455_v47 = vpop.f32.mrb[211].mxu1  ;;  %v9346_v34 = vpop.f32.mrb[181].mxu0 }
 0x4c3   : > { %v13224_v59 = vadd.f32 %v9453_v31, %v7326_v18  ;;  %v9456_v37 = vadd.f32 %v9455_v47, %v9454_v52  ;;  %v9347_v8 = vadd.f32 %v9346_v34, %v9345_v0  ;;  %v9348_v48 = vpop.f32.mrb[182].mxu0 }
 0x4c4   : > { %v9349_v6 = vpop.f32.mrb[183].mxu0 }
 0x4c5   : > { %v13226_v50 = vadd.f32 %v9456_v37, %v7329_v11  ;;  %v9350_v3 = vadd.f32 %v9349_v6, %v9348_v48  ;;  %v7334_v63 = vadd.f32 %v9347_v8, %v13062_v57 }
 0x4c6   : > { %9868 = vmatmul.mubr.bf16.gmra.mrb[32].mxu0 %v12977_v20 }
 0x4c7   : > { %v9457_v14 = vpop.f32.mrb[212].mxu1  ;;  %9871 = vmatprep.mubr.bf16.mxu0 %v13005_v23  ;;  %v7337_v1 = vadd.f32 %v9350_v3, %v13062_v57 }
 0x4c8   : > { %v9458_v21 = vpop.f32.mrb[213].mxu1 }
 0x4c9   : > { %v9459_v36 = vadd.f32 %v9458_v21, %v9457_v14  ;;  %v9460_v12 = vpop.f32.mrb[214].mxu1  ;;  %v9351_v33 = vpop.f32.mrb[184].mxu0 }
 0x4ca   : > { %v9461_v13 = vpop.f32.mrb[215].mxu1  ;;  %v9352_v7 = vpop.f32.mrb[185].mxu0 }
 0x4cb   : > { %v13232_v46 = vadd.f32 %v9459_v36, %v7334_v63  ;;  %v9462_v62 = vadd.f32 %v9461_v13, %v9460_v12  ;;  %v9353_v43 = vadd.f32 %v9352_v7, %v9351_v33  ;;  %v9354_v15 = vpop.f32.mrb[186].mxu0 }
 0x4cc   : > { %v9355_v28 = vpop.f32.mrb[187].mxu0 }
 0x4cd   : > { %v13234_v44 = vadd.f32 %v9462_v62, %v7337_v1  ;;  %v9356_v55 = vadd.f32 %v9355_v28, %v9354_v15  ;;  %v7342_v20 = vadd.f32 %v9353_v43, %v13062_v57 }
 0x4ce   : > { %9872 = vmatmul.mubr.bf16.gmra.mrb[36].mxu0 %v12982_v26 }
 0x4cf   : > { %v9463_v51 = vpop.f32.mrb[216].mxu1  ;;  %9875 = vmatprep.mubr.bf16.mxu0 %v13014_v61  ;;  %v7345_v19 = vadd.f32 %v9356_v55, %v13062_v57 }
 0x4d0   : > { %v9464_v23 = vpop.f32.mrb[217].mxu1 }
 0x4d1   : > { %v9465_v16 = vadd.f32 %v9464_v23, %v9463_v51  ;;  %v9466_v5 = vpop.f32.mrb[218].mxu1  ;;  %v9357_v58 = vpop.f32.mrb[188].mxu0 }
 0x4d2   : > { %v9467_v35 = vpop.f32.mrb[219].mxu1  ;;  %v9358_v18 = vpop.f32.mrb[189].mxu0 }
 0x4d3   : > { %v13240_v17 = vadd.f32 %v9465_v16, %v7342_v20  ;;  %v9468_v56 = vadd.f32 %v9467_v35, %v9466_v5  ;;  %v9359_v40 = vadd.f32 %v9358_v18, %v9357_v58  ;;  %v9360_v27 = vpop.f32.mrb[190].mxu0 }
 0x4d4   : > { %v9361_v11 = vpop.f32.mrb[191].mxu0 }
 0x4d5   : > { %v13242_v31 = vadd.f32 %v9468_v56, %v7345_v19  ;;  %v9362_v52 = vadd.f32 %v9361_v11, %v9360_v27  ;;  %v7350_v26 = vadd.f32 %v9359_v40, %v13062_v57 }
 0x4d6   : > { %9876 = vmatmul.mubr.bf16.gmra.mrb[40].mxu0 %v12990_v30 }
 0x4d7   : > { %v9469_v47 = vpop.f32.mrb[220].mxu1  ;;  %9879 = vmatprep.mubr.bf16.mxu0 %v13020_v45  ;;  %v7353_v37 = vadd.f32 %v9362_v52, %v13062_v57 }
 0x4d8   : > { %v9470_v61 = vpop.f32.mrb[221].mxu1 }
 0x4d9   : > { %v9471_v0 = vadd.f32 %v9470_v61, %v9469_v47  ;;  %v9472_v34 = vpop.f32.mrb[222].mxu1  ;;  %v9363_v48 = vpop.f32.mrb[192].mxu0 }
 0x4da   : > { %v9473_v8 = vpop.f32.mrb[223].mxu1  ;;  %v9364_v63 = vpop.f32.mrb[193].mxu0 }
 0x4db   : > { %v13248_v6 = vadd.f32 %v9471_v0, %v7350_v26  ;;  %v9474_v3 = vadd.f32 %v9473_v8, %v9472_v34  ;;  %v9365_v14 = vadd.f32 %v9364_v63, %v9363_v48  ;;  %v9366_v21 = vpop.f32.mrb[194].mxu0 }
 0x4dc   : > { %v9367_v1 = vpop.f32.mrb[195].mxu0 }
 0x4dd   : > { %v13250_v36 = vadd.f32 %v9474_v3, %v7353_v37  ;;  %v9368_v12 = vadd.f32 %v9367_v1, %v9366_v21  ;;  %v7358_v30 = vadd.f32 %v9365_v14, %v13062_v57 }
 0x4de   : > { %9880 = vmatmul.mubr.bf16.gmra.mrb[44].mxu0 %v13083_v38 }
 0x4df   : > { %v9475_v13 = vpop.f32.mrb[224].mxu1  ;;  %v7361_v62 = vadd.f32 %v9368_v12, %v13062_v57 }
 0x4e0   : > { %v9476_v45 = vpop.f32.mrb[225].mxu1 }
 0x4e1   : > { %v9477_v33 = vadd.f32 %v9476_v45, %v9475_v13  ;;  %v9478_v7 = vpop.f32.mrb[226].mxu1  ;;  %v9369_v15 = vpop.f32.mrb[196].mxu0 }
 0x4e2   : > { %v9479_v43 = vpop.f32.mrb[227].mxu1  ;;  %v9370_v20 = vpop.f32.mrb[197].mxu0 }
 0x4e3   : > { %v13255_v28 = vadd.f32 %v9477_v33, %v7358_v30  ;;  %v9480_v55 = vadd.f32 %v9479_v43, %v9478_v7  ;;  %v9371_v51 = vadd.f32 %v9370_v20, %v9369_v15  ;;  %v9372_v23 = vpop.f32.mrb[198].mxu0 }
 0x4e4   : > { %v9373_v19 = vpop.f32.mrb[199].mxu0 }
 0x4e5   : > { %v13257_v16 = vadd.f32 %v9480_v55, %v7361_v62  ;;  %v9374_v5 = vadd.f32 %v9373_v19, %v9372_v23  ;;  %v7366_v35 = vadd.f32 %v9371_v51, %v13062_v57 }
 0x4e7   : > { %v9481_v38 = vpop.f32.mrb[228].mxu1  ;;  %v7369_v18 = vadd.f32 %v9374_v5, %v13062_v57 }
 0x4e8   : > { %v9482_v58 = vpop.f32.mrb[229].mxu1 }
 0x4e9   : > { %v9483_v56 = vadd.f32 %v9482_v58, %v9481_v38  ;;  %v9484_v40 = vpop.f32.mrb[230].mxu1  ;;  %v9375_v11 = vpop.f32.mrb[200].mxu0 }
 0x4ea   : > { %v9485_v27 = vpop.f32.mrb[231].mxu1  ;;  %v9376_v47 = vpop.f32.mrb[201].mxu0 }
 0x4eb   : > { %v13261_v52 = vadd.f32 %v9483_v56, %v7366_v35  ;;  %v9486_v26 = vadd.f32 %v9485_v27, %v9484_v40  ;;  %v9377_v61 = vadd.f32 %v9376_v47, %v9375_v11  ;;  %v9378_v0 = vpop.f32.mrb[202].mxu0 }
 0x4ec   : > { %v9379_v34 = vpop.f32.mrb[203].mxu0 }
 0x4ed   : > { %v13263_v37 = vadd.f32 %v9486_v26, %v7369_v18  ;;  %v9380_v8 = vadd.f32 %v9379_v34, %v9378_v0  ;;  %v7374_v48 = vadd.f32 %v9377_v61, %v13062_v57 }
 0x4ef   : > { %v9487_v3 = vpop.f32.mrb[232].mxu1  ;;  %v7377_v21 = vadd.f32 %v9380_v8, %v13062_v57 }
 0x4f0   : > { %v9488_v63 = vpop.f32.mrb[233].mxu1 }
 0x4f1   : > { %v9489_v14 = vadd.f32 %v9488_v63, %v9487_v3  ;;  %v9490_v1 = vpop.f32.mrb[234].mxu1  ;;  %v9381_v30 = vpop.f32.mrb[204].mxu0 }
 0x4f2   : > { %v9491_v12 = vpop.f32.mrb[235].mxu1  ;;  %v9382_v33 = vpop.f32.mrb[205].mxu0 }
 0x4f3   : > { %v13267_v13 = vadd.f32 %v9489_v14, %v7374_v48  ;;  %v9492_v45 = vadd.f32 %v9491_v12, %v9490_v1  ;;  %v9383_v62 = vadd.f32 %v9382_v33, %v9381_v30  ;;  %v9384_v7 = vpop.f32.mrb[206].mxu0 }
 0x4f4   : > { %v9385_v15 = vpop.f32.mrb[207].mxu0 }
 0x4f5   : > { %v13269_v43 = vadd.f32 %v9492_v45, %v7377_v21  ;;  %v9386_v55 = vadd.f32 %v9385_v15, %v9384_v7  ;;  %v7382_v20 = vadd.f32 %v9383_v62, %v13062_v57 }
 0x4f7   : > { %v9493_v51 = vpop.f32.mrb[236].mxu1  ;;  %v7385_v5 = vadd.f32 %v9386_v55, %v13062_v57 }
 0x4f8   : > { %v9494_v23 = vpop.f32.mrb[237].mxu1 }
 0x4f9   : > { %v9495_v19 = vadd.f32 %v9494_v23, %v9493_v51  ;;  %v9496_v35 = vpop.f32.mrb[238].mxu1  ;;  %v9515_v58 = vpop.f32.mrb[208].mxu0 }
 0x4fa   : > { %v9497_v38 = vpop.f32.mrb[239].mxu1  ;;  %v9516_v40 = vpop.f32.mrb[209].mxu0 }
 0x4fb   : > { %v13273_v56 = vadd.f32 %v9495_v19, %v7382_v20  ;;  %v9498_v18 = vadd.f32 %v9497_v38, %v9496_v35  ;;  %v9517_v27 = vadd.f32 %v9516_v40, %v9515_v58  ;;  %v9518_v11 = vpop.f32.mrb[210].mxu0 }
 0x4fc   : > { %v9519_v47 = vpop.f32.mrb[211].mxu0 }
 0x4fd   : > { %v13275_v26 = vadd.f32 %v9498_v18, %v7385_v5  ;;  %v7584_v61 = vadd.f32 %v9517_v27, %v13087_v42  ;;  %v9520_v0 = vadd.f32 %v9519_v47, %v9518_v11 }
 0x4ff   : > { %v9627_v34 = vpop.f32.mrb[240].mxu1  ;;  %v7587_v48 = vadd.f32 %v9520_v0, %v13093_v39 }
 0x500   : > { %v9628_v8 = vpop.f32.mrb[241].mxu1 }
 0x501   : > { %v9629_v57 = vadd.f32 %v9628_v8, %v9627_v34  ;;  %v9630_v3 = vpop.f32.mrb[242].mxu1  ;;  %v9521_v14 = vpop.f32.mrb[212].mxu0 }
 0x502   : > { %v9631_v63 = vpop.f32.mrb[243].mxu1  ;;  %v9522_v1 = vpop.f32.mrb[213].mxu0 }
 0x503   : > { %v9632_v21 = vadd.f32 %v9631_v63, %v9630_v3  ;;  %v13279_v12 = vadd.f32 %v9629_v57, %v7584_v61  ;;  %v9523_v30 = vadd.f32 %v9522_v1, %v9521_v14  ;;  %v9524_v45 = vpop.f32.mrb[214].mxu0 }
 0x504   : > { %v9525_v33 = vpop.f32.mrb[215].mxu0 }
 0x505   : > { %v13281_v62 = vadd.f32 %v9632_v21, %v7587_v48  ;;  %v7592_v42 = vadd.f32 %v9523_v30, %v13131_v49  ;;  %v9526_v7 = vadd.f32 %v9525_v33, %v9524_v45 }
 0x507   : > { %v9633_v15 = vpop.f32.mrb[244].mxu1  ;;  %v7595_v39 = vadd.f32 %v9526_v7, %v13136_v53 }
 0x508   : > { %v9634_v55 = vpop.f32.mrb[245].mxu1 }
 0x509   : > { %v9635_v20 = vadd.f32 %v9634_v55, %v9633_v15  ;;  %v9636_v51 = vpop.f32.mrb[246].mxu1  ;;  %v9527_v19 = vpop.f32.mrb[216].mxu0 }
 0x50a   : > { %v9637_v23 = vpop.f32.mrb[247].mxu1  ;;  %v9528_v35 = vpop.f32.mrb[217].mxu0 }
 0x50b   : > { %v9638_v5 = vadd.f32 %v9637_v23, %v9636_v51  ;;  %v13285_v38 = vadd.f32 %v9635_v20, %v7592_v42  ;;  %v9529_v58 = vadd.f32 %v9528_v35, %v9527_v19  ;;  %v9530_v18 = vpop.f32.mrb[218].mxu0 }
 0x50c   : > { %v9531_v40 = vpop.f32.mrb[219].mxu0 }
 0x50d   : > { %v13287_v27 = vadd.f32 %v9638_v5, %v7595_v39  ;;  %v7600_v49 = vadd.f32 %v9529_v58, %v13154_v25  ;;  %v9532_v11 = vadd.f32 %v9531_v40, %v9530_v18 }
 0x50f   : > { %v9639_v47 = vpop.f32.mrb[248].mxu1  ;;  %v7603_v53 = vadd.f32 %v9532_v11, %v13162_v54 }
 0x510   : > { %v9640_v61 = vpop.f32.mrb[249].mxu1 }
 0x511   : > { %v9641_v0 = vadd.f32 %v9640_v61, %v9639_v47  ;;  %v9642_v34 = vpop.f32.mrb[250].mxu1  ;;  %v9533_v48 = vpop.f32.mrb[220].mxu0 }
 0x512   : > { %v9643_v8 = vpop.f32.mrb[251].mxu1  ;;  %v9534_v3 = vpop.f32.mrb[221].mxu0 }
 0x513   : > { %v9644_v57 = vadd.f32 %v9643_v8, %v9642_v34  ;;  %v13291_v63 = vadd.f32 %v9641_v0, %v7600_v49  ;;  %v9535_v14 = vadd.f32 %v9534_v3, %v9533_v48  ;;  %v9536_v21 = vpop.f32.mrb[222].mxu0 }
 0x514   : > { %v9537_v1 = vpop.f32.mrb[223].mxu0 }
 0x515   : > { %v13293_v30 = vadd.f32 %v9644_v57, %v7603_v53  ;;  %v7608_v25 = vadd.f32 %v9535_v14, %v13176_v10  ;;  %v9538_v45 = vadd.f32 %v9537_v1, %v9536_v21 }
 0x517   : > { %v9645_v33 = vpop.f32.mrb[252].mxu1  ;;  %v7611_v54 = vadd.f32 %v9538_v45, %v13180_v32 }
 0x518   : > { %v9646_v42 = vpop.f32.mrb[253].mxu1 }
 0x519   : > { %v9647_v7 = vadd.f32 %v9646_v42, %v9645_v33  ;;  %v9648_v15 = vpop.f32.mrb[254].mxu1  ;;  %v9539_v39 = vpop.f32.mrb[224].mxu0 }
 0x51a   : > { %v9649_v55 = vpop.f32.mrb[255].mxu1  ;;  %v9540_v51 = vpop.f32.mrb[225].mxu0 }
 0x51b   : > { %v9650_v20 = vadd.f32 %v9649_v55, %v9648_v15  ;;  %v13297_v23 = vadd.f32 %v9647_v7, %v7608_v25  ;;  %v9541_v19 = vadd.f32 %v9540_v51, %v9539_v39  ;;  %v9542_v5 = vpop.f32.mrb[226].mxu0 }
 0x51c   : > { %v9543_v35 = vpop.f32.mrb[227].mxu0 }
 0x51d   : > { %v13299_v58 = vadd.f32 %v9650_v20, %v7611_v54  ;;  %v7616_v10 = vadd.f32 %v9541_v19, %v13191_v9  ;;  %v9544_v18 = vadd.f32 %v9543_v35, %v9542_v5 }
 0x51f   : > { %v9651_v40 = vpop.f32.mrb[0].mxu1  ;;  %v7619_v32 = vadd.f32 %v9544_v18, %v13193_v4 }
 0x520   : > { %v9652_v49 = vpop.f32.mrb[1].mxu1 }
 0x521   : > { %v9653_v11 = vadd.f32 %v9652_v49, %v9651_v40  ;;  %v9654_v47 = vpop.f32.mrb[2].mxu1  ;;  %v9545_v53 = vpop.f32.mrb[228].mxu0 }
 0x522   : > { %v9655_v61 = vpop.f32.mrb[3].mxu1  ;;  %v9546_v34 = vpop.f32.mrb[229].mxu0 }
 0x523   : > { %v9656_v0 = vadd.f32 %v9655_v61, %v9654_v47  ;;  %v13303_v8 = vadd.f32 %v9653_v11, %v7616_v10  ;;  %v9547_v48 = vadd.f32 %v9546_v34, %v9545_v53  ;;  %v9548_v57 = vpop.f32.mrb[230].mxu0 }
 0x524   : > { %v9549_v3 = vpop.f32.mrb[231].mxu0 }
 0x525   : > { %v13305_v14 = vadd.f32 %v9656_v0, %v7619_v32  ;;  %v7624_v9 = vadd.f32 %v9547_v48, %v13200_v22  ;;  %v9550_v21 = vadd.f32 %v9549_v3, %v9548_v57 }
 0x527   : > { %v9657_v1 = vpop.f32.mrb[4].mxu1  ;;  %v7627_v4 = vadd.f32 %v9550_v21, %v13202_v2 }
 0x528   : > { %v9658_v25 = vpop.f32.mrb[5].mxu1 }
 0x529   : > { %v9659_v45 = vadd.f32 %v9658_v25, %v9657_v1  ;;  %v9660_v33 = vpop.f32.mrb[6].mxu1  ;;  %v9551_v54 = vpop.f32.mrb[232].mxu0 }
 0x52a   : > { %v9661_v42 = vpop.f32.mrb[7].mxu1  ;;  %v9552_v15 = vpop.f32.mrb[233].mxu0 }
 0x52b   : > { %v9662_v7 = vadd.f32 %v9661_v42, %v9660_v33  ;;  %v13309_v55 = vadd.f32 %v9659_v45, %v7624_v9  ;;  %v9553_v39 = vadd.f32 %v9552_v15, %v9551_v54  ;;  %v9554_v20 = vpop.f32.mrb[234].mxu0 }
 0x52c   : > { %v9555_v51 = vpop.f32.mrb[235].mxu0 }
 0x52d   : > { %v13311_v19 = vadd.f32 %v9662_v7, %v7627_v4  ;;  %v7632_v22 = vadd.f32 %v9553_v39, %v13208_v41  ;;  %v9556_v5 = vadd.f32 %v9555_v51, %v9554_v20 }
 0x52f   : > { %v9663_v35 = vpop.f32.mrb[8].mxu1  ;;  %v7635_v2 = vadd.f32 %v9556_v5, %v13210_v29 }
 0x530   : > { %v9664_v10 = vpop.f32.mrb[9].mxu1 }
 0x531   : > { %v9665_v18 = vadd.f32 %v9664_v10, %v9663_v35  ;;  %v9666_v40 = vpop.f32.mrb[10].mxu1  ;;  %v9557_v32 = vpop.f32.mrb[236].mxu0 }
 0x532   : > { %v9667_v49 = vpop.f32.mrb[11].mxu1  ;;  %v9558_v47 = vpop.f32.mrb[237].mxu0 }
 0x533   : > { %v9668_v11 = vadd.f32 %v9667_v49, %v9666_v40  ;;  %v13315_v61 = vadd.f32 %v9665_v18, %v7632_v22  ;;  %v9559_v53 = vadd.f32 %v9558_v47, %v9557_v32  ;;  %v9560_v0 = vpop.f32.mrb[238].mxu0 }
 0x534   : > { %v9561_v34 = vpop.f32.mrb[239].mxu0 }
 0x535   : > { %v13317_v48 = vadd.f32 %v9668_v11, %v7635_v2  ;;  %v7640_v41 = vadd.f32 %v9559_v53, %v13216_v60  ;;  %v9562_v57 = vadd.f32 %v9561_v34, %v9560_v0 }
 0x537   : > { %v9669_v3 = vpop.f32.mrb[12].mxu1  ;;  %v7643_v29 = vadd.f32 %v9562_v57, %v13218_v24 }
 0x538   : > { %v9670_v9 = vpop.f32.mrb[13].mxu1 }
 0x539   : > { %v9671_v21 = vadd.f32 %v9670_v9, %v9669_v3  ;;  %v9672_v1 = vpop.f32.mrb[14].mxu1  ;;  %v9563_v4 = vpop.f32.mrb[240].mxu0 }
 0x53a   : > { %v9673_v25 = vpop.f32.mrb[15].mxu1  ;;  %v9564_v33 = vpop.f32.mrb[241].mxu0 }
 0x53b   : > { %v9674_v45 = vadd.f32 %v9673_v25, %v9672_v1  ;;  %v13321_v42 = vadd.f32 %v9671_v21, %v7640_v41  ;;  %v9565_v54 = vadd.f32 %v9564_v33, %v9563_v4  ;;  %v9566_v7 = vpop.f32.mrb[242].mxu0 }
 0x53c   : > { %v9567_v15 = vpop.f32.mrb[243].mxu0 }
 0x53d   : > { %v13323_v39 = vadd.f32 %v9674_v45, %v7643_v29  ;;  %v7648_v60 = vadd.f32 %v9565_v54, %v13224_v59  ;;  %v9568_v20 = vadd.f32 %v9567_v15, %v9566_v7 }
 0x53f   : > { %v9675_v51 = vpop.f32.mrb[16].mxu1  ;;  %v7651_v24 = vadd.f32 %v9568_v20, %v13226_v50 }
 0x540   : > { %v9676_v22 = vpop.f32.mrb[17].mxu1 }
 0x541   : > { %v9677_v5 = vadd.f32 %v9676_v22, %v9675_v51  ;;  %v9678_v35 = vpop.f32.mrb[18].mxu1  ;;  %v9569_v2 = vpop.f32.mrb[244].mxu0 }
 0x542   : > { %v9679_v10 = vpop.f32.mrb[19].mxu1  ;;  %v9570_v40 = vpop.f32.mrb[245].mxu0 }
 0x543   : > { %v9680_v18 = vadd.f32 %v9679_v10, %v9678_v35  ;;  %v13327_v49 = vadd.f32 %v9677_v5, %v7648_v60  ;;  %v9571_v32 = vadd.f32 %v9570_v40, %v9569_v2  ;;  %v9572_v11 = vpop.f32.mrb[246].mxu0 }
 0x544   : > { %v9573_v47 = vpop.f32.mrb[247].mxu0 }
 0x545   : > { %v13329_v53 = vadd.f32 %v9680_v18, %v7651_v24  ;;  %v7656_v59 = vadd.f32 %v9571_v32, %v13232_v46  ;;  %v9574_v0 = vadd.f32 %v9573_v47, %v9572_v11 }
 0x547   : > { %v9681_v34 = vpop.f32.mrb[20].mxu1  ;;  %v7659_v50 = vadd.f32 %v9574_v0, %v13234_v44 }
 0x548   : > { %v9682_v41 = vpop.f32.mrb[21].mxu1 }
 0x549   : > { %v9683_v57 = vadd.f32 %v9682_v41, %v9681_v34  ;;  %v9684_v3 = vpop.f32.mrb[22].mxu1  ;;  %v9575_v29 = vpop.f32.mrb[248].mxu0 }
 0x54a   : > { %v9685_v9 = vpop.f32.mrb[23].mxu1  ;;  %v9576_v1 = vpop.f32.mrb[249].mxu0 }
 0x54b   : > { %v9686_v21 = vadd.f32 %v9685_v9, %v9684_v3  ;;  %v13333_v25 = vadd.f32 %v9683_v57, %v7656_v59  ;;  %v9577_v4 = vadd.f32 %v9576_v1, %v9575_v29  ;;  %v9578_v45 = vpop.f32.mrb[250].mxu0 }
 0x54c   : > { %v9579_v33 = vpop.f32.mrb[251].mxu0 }
 0x54d   : > { %v13335_v54 = vadd.f32 %v9686_v21, %v7659_v50  ;;  %v7664_v46 = vadd.f32 %v9577_v4, %v13240_v17  ;;  %v9580_v7 = vadd.f32 %v9579_v33, %v9578_v45 }
 0x54f   : > { %v9687_v15 = vpop.f32.mrb[24].mxu1  ;;  %v7667_v44 = vadd.f32 %v9580_v7, %v13242_v31 }
 0x550   : > { %v9688_v60 = vpop.f32.mrb[25].mxu1 }
 0x551   : > { %v9689_v20 = vadd.f32 %v9688_v60, %v9687_v15  ;;  %v9690_v51 = vpop.f32.mrb[26].mxu1  ;;  %v9581_v24 = vpop.f32.mrb[252].mxu0 }
 0x552   : > { %v9691_v22 = vpop.f32.mrb[27].mxu1  ;;  %v9582_v35 = vpop.f32.mrb[253].mxu0 }
 0x553   : > { %v9692_v5 = vadd.f32 %v9691_v22, %v9690_v51  ;;  %v13339_v10 = vadd.f32 %v9689_v20, %v7664_v46  ;;  %v9583_v2 = vadd.f32 %v9582_v35, %v9581_v24  ;;  %v9584_v18 = vpop.f32.mrb[254].mxu0 }
 0x554   : > { %v9585_v40 = vpop.f32.mrb[255].mxu0 }
 0x555   : > { %v13341_v32 = vadd.f32 %v9692_v5, %v7667_v44  ;;  %v7672_v17 = vadd.f32 %v9583_v2, %v13248_v6  ;;  %v9586_v11 = vadd.f32 %v9585_v40, %v9584_v18 }
 0x557   : > { %v9693_v47 = vpop.f32.mrb[28].mxu1  ;;  %v7675_v31 = vadd.f32 %v9586_v11, %v13250_v36 }
 0x558   : > { %v9694_v59 = vpop.f32.mrb[29].mxu1 }
 0x559   : > { %v9695_v0 = vadd.f32 %v9694_v59, %v9693_v47  ;;  %v9696_v34 = vpop.f32.mrb[30].mxu1  ;;  %v9587_v50 = vpop.f32.mrb[0].mxu0 }
 0x55a   : > { %v9697_v41 = vpop.f32.mrb[31].mxu1  ;;  %v9588_v3 = vpop.f32.mrb[1].mxu0 }
 0x55b   : > { %v9698_v57 = vadd.f32 %v9697_v41, %v9696_v34  ;;  %v13345_v9 = vadd.f32 %v9695_v0, %v7672_v17  ;;  %v9589_v29 = vadd.f32 %v9588_v3, %v9587_v50  ;;  %v9590_v21 = vpop.f32.mrb[2].mxu0 }
 0x55c   : > { %v9591_v1 = vpop.f32.mrb[3].mxu0 }
 0x55d   : > { %v13347_v4 = vadd.f32 %v9698_v57, %v7675_v31  ;;  %v7680_v6 = vadd.f32 %v9589_v29, %v13255_v28  ;;  %v9592_v45 = vadd.f32 %v9591_v1, %v9590_v21 }
 0x55f   : > { %v9699_v33 = vpop.f32.mrb[32].mxu1  ;;  %v7683_v36 = vadd.f32 %v9592_v45, %v13257_v16 }
 0x560   : > { %v9700_v46 = vpop.f32.mrb[33].mxu1 }
 0x561   : > { %v9701_v7 = vadd.f32 %v9700_v46, %v9699_v33  ;;  %v9702_v15 = vpop.f32.mrb[34].mxu1  ;;  %v9593_v44 = vpop.f32.mrb[4].mxu0 }
 0x562   : > { %v9703_v60 = vpop.f32.mrb[35].mxu1  ;;  %v9594_v51 = vpop.f32.mrb[5].mxu0 }
 0x563   : > { %v9704_v20 = vadd.f32 %v9703_v60, %v9702_v15  ;;  %v13351_v22 = vadd.f32 %v9701_v7, %v7680_v6  ;;  %v9595_v24 = vadd.f32 %v9594_v51, %v9593_v44  ;;  %v9596_v5 = vpop.f32.mrb[6].mxu0 }
 0x564   : > { %v9597_v35 = vpop.f32.mrb[7].mxu0 }
 0x565   : > { %v13353_v2 = vadd.f32 %v9704_v20, %v7683_v36  ;;  %v7688_v28 = vadd.f32 %v9595_v24, %v13261_v52  ;;  %v9598_v18 = vadd.f32 %v9597_v35, %v9596_v5 }
 0x567   : > { %v9705_v40 = vpop.f32.mrb[36].mxu1  ;;  %v7691_v16 = vadd.f32 %v9598_v18, %v13263_v37 }
 0x568   : > { %v9706_v17 = vpop.f32.mrb[37].mxu1 }
 0x569   : > { %v9707_v11 = vadd.f32 %v9706_v17, %v9705_v40  ;;  %v9708_v47 = vpop.f32.mrb[38].mxu1  ;;  %v9599_v31 = vpop.f32.mrb[8].mxu0 }
 0x56a   : > { %v9709_v59 = vpop.f32.mrb[39].mxu1  ;;  %v9600_v34 = vpop.f32.mrb[9].mxu0 }
 0x56b   : > { %v9710_v0 = vadd.f32 %v9709_v59, %v9708_v47  ;;  %v13357_v41 = vadd.f32 %v9707_v11, %v7688_v28  ;;  %v9601_v50 = vadd.f32 %v9600_v34, %v9599_v31  ;;  %v9602_v57 = vpop.f32.mrb[10].mxu0 }
 0x56c   : > { %v9603_v3 = vpop.f32.mrb[11].mxu0 }
 0x56d   : > { %v13359_v29 = vadd.f32 %v9710_v0, %v7691_v16  ;;  %v7696_v52 = vadd.f32 %v9601_v50, %v13267_v13  ;;  %v9604_v21 = vadd.f32 %v9603_v3, %v9602_v57 }
 0x56f   : > { %v9711_v1 = vpop.f32.mrb[40].mxu1  ;;  %v7699_v37 = vadd.f32 %v9604_v21, %v13269_v43 }
 0x570   : > { %v9712_v6 = vpop.f32.mrb[41].mxu1 }
 0x571   : > { %v9713_v45 = vadd.f32 %v9712_v6, %v9711_v1  ;;  %v9714_v33 = vpop.f32.mrb[42].mxu1  ;;  %v9605_v36 = vpop.f32.mrb[12].mxu0 }
 0x572   : > { %v9715_v46 = vpop.f32.mrb[43].mxu1  ;;  %v9606_v15 = vpop.f32.mrb[13].mxu0 }
 0x573   : > { %v9716_v7 = vadd.f32 %v9715_v46, %v9714_v33  ;;  %v13363_v60 = vadd.f32 %v9713_v45, %v7696_v52  ;;  %v9607_v44 = vadd.f32 %v9606_v15, %v9605_v36  ;;  %v9608_v20 = vpop.f32.mrb[14].mxu0 }
 0x574   : > { %v9609_v51 = vpop.f32.mrb[15].mxu0 }
 0x575   : > { %v13365_v24 = vadd.f32 %v9716_v7, %v7699_v37  ;;  %v7704_v13 = vadd.f32 %v9607_v44, %v13273_v56  ;;  %v9610_v5 = vadd.f32 %v9609_v51, %v9608_v20 }
 0x577   : > { %v9717_v35 = vpop.f32.mrb[44].mxu1  ;;  %v7707_v43 = vadd.f32 %v9610_v5, %v13275_v26 }
 0x578   : > { %v9718_v28 = vpop.f32.mrb[45].mxu1 }
 0x579   : > { %v9719_v18 = vadd.f32 %v9718_v28, %v9717_v35  ;;  %v9720_v40 = vpop.f32.mrb[46].mxu1  ;;  %v9853_v16 = vpop.f32.mrb[16].mxu0 }
 0x57a   : > { %v9721_v17 = vpop.f32.mrb[47].mxu1  ;;  %v7914_v47 = vadd.f32 %v9853_v16, %v13285_v38  ;;  %v7905_v59 = vpop.f32.mrb[17].mxu0 }
 0x57b   : > { %v9722_v11 = vadd.f32 %v9721_v17, %v9720_v40  ;;  %v13373_v31 = vadd.f32 %v9719_v18, %v7704_v13  ;;  %v7906_v56 = vadd.f32 %v7905_v59, %v13279_v12  ;;  %v9854_v0 = vpop.f32.mrb[18].mxu0 }
 0x57c   : > { %v8034_v34 = vmax.f32 %v7914_v47, 0.0  ;;  %v7917_v50 = vadd.f32 %v9854_v0, %v13287_v27  ;;  %v7908_v26 = vpop.f32.mrb[19].mxu0 }
 0x57d   : > { %v13377_v57 = vadd.f32 %v9722_v11, %v7707_v43  ;;  %v8032_v3 = vmax.f32 %v7906_v56, 0.0  ;;  %v7909_v52 = vadd.f32 %v7908_v26, %v13281_v62 }
 0x57e   : > { %8066 = vst [vmem:[%s13380_s16 + $0x10] sm:$0xff] %v8034_v34  ;;  %v8035_v38 = vmax.f32 %v7917_v50, 0.0 }
 0x57f   : > { %8064 = vst [vmem:[%s13380_s16] sm:$0xff] %v8032_v3  ;;  %v8033_v12 = vmax.f32 %v7909_v52, 0.0 }
 0x580   : > { %8067 = vst [vmem:[%s13380_s16 + $0x18] sm:$0xff] %v8035_v38 }
 0x581   : > { %8065 = vst [vmem:[%s13380_s16 + $0x8] sm:$0xff] %v8033_v12  ;;  %v9857_v27 = vpop.f32.mrb[20].mxu0 }
 0x582   : > { %v7930_v21 = vadd.f32 %v9857_v27, %v13297_v23  ;;  %v7921_v62 = vpop.f32.mrb[21].mxu0 }
 0x583   : > { %v7922_v1 = vadd.f32 %v7921_v62, %v13291_v63  ;;  %v9858_v6 = vpop.f32.mrb[22].mxu0 }
 0x584   : > { %v8038_v37 = vmax.f32 %v7930_v21, 0.0  ;;  %v7933_v45 = vadd.f32 %v9858_v6, %v13299_v58  ;;  %v7924_v33 = vpop.f32.mrb[23].mxu0 }
 0x585   : > { %v8036_v46 = vmax.f32 %v7922_v1, 0.0  ;;  %v7925_v36 = vadd.f32 %v7924_v33, %v13293_v30 }
 0x586   : > { %8070 = vst [vmem:[%s13380_s16 + $0x30] sm:$0xff] %v8038_v37  ;;  %v8039_v7 = vmax.f32 %v7933_v45, 0.0 }
 0x587   : > { %8068 = vst [vmem:[%s13380_s16 + $0x20] sm:$0xff] %v8036_v46  ;;  %v8037_v15 = vmax.f32 %v7925_v36, 0.0 }
 0x588   : > { %8071 = vst [vmem:[%s13380_s16 + $0x38] sm:$0xff] %v8039_v7 }
 0x589   : > { %8069 = vst [vmem:[%s13380_s16 + $0x28] sm:$0xff] %v8037_v15  ;;  %v9861_v23 = vpop.f32.mrb[24].mxu0 }
 0x58a   : > { %v7946_v63 = vadd.f32 %v9861_v23, %v13309_v55  ;;  %v7937_v44 = vpop.f32.mrb[25].mxu0 }
 0x58b   : > { %v7938_v58 = vadd.f32 %v7937_v44, %v13303_v8  ;;  %v9862_v20 = vpop.f32.mrb[26].mxu0 }
 0x58c   : > { %v8042_v51 = vmax.f32 %v7946_v63, 0.0  ;;  %v7949_v30 = vadd.f32 %v9862_v20, %v13311_v19  ;;  %v7940_v13 = vpop.f32.mrb[27].mxu0 }
 0x58d   : > { %v8040_v5 = vmax.f32 %v7938_v58, 0.0  ;;  %v7941_v35 = vadd.f32 %v7940_v13, %v13305_v14 }
 0x58e   : > { %8074 = vst [vmem:[%s13380_s16 + $0x50] sm:$0xff] %v8042_v51  ;;  %v8043_v43 = vmax.f32 %v7949_v30, 0.0 }
 0x58f   : > { %8072 = vst [vmem:[%s13380_s16 + $0x40] sm:$0xff] %v8040_v5  ;;  %v8041_v28 = vmax.f32 %v7941_v35, 0.0 }
 0x590   : > { %8075 = vst [vmem:[%s13380_s16 + $0x58] sm:$0xff] %v8043_v43 }
 0x591   : > { %8073 = vst [vmem:[%s13380_s16 + $0x48] sm:$0xff] %v8041_v28  ;;  %v9865_v55 = vpop.f32.mrb[28].mxu0 }
 0x592   : > { %v7962_v8 = vadd.f32 %v9865_v55, %v13321_v42  ;;  %v7953_v18 = vpop.f32.mrb[29].mxu0 }
 0x593   : > { %v7954_v19 = vadd.f32 %v7953_v18, %v13315_v61  ;;  %v9866_v40 = vpop.f32.mrb[30].mxu0 }
 0x594   : > { %v8046_v17 = vmax.f32 %v7962_v8, 0.0  ;;  %v7965_v14 = vadd.f32 %v9866_v40, %v13323_v39  ;;  %v7956_v16 = vpop.f32.mrb[31].mxu0 }
 0x595   : > { %v8044_v11 = vmax.f32 %v7954_v19, 0.0  ;;  %v7957_v47 = vadd.f32 %v7956_v16, %v13317_v48 }
 0x596   : > { %8078 = vst [vmem:[%s13380_s16 + $0x70] sm:$0xff] %v8046_v17  ;;  %v8047_v59 = vmax.f32 %v7965_v14, 0.0 }
 0x597   : > { %8076 = vst [vmem:[%s13380_s16 + $0x60] sm:$0xff] %v8044_v11  ;;  %v8045_v56 = vmax.f32 %v7957_v47, 0.0 }
 0x598   : > { %8079 = vst [vmem:[%s13380_s16 + $0x78] sm:$0xff] %v8047_v59 }
 0x599   : > { %8077 = vst [vmem:[%s13380_s16 + $0x68] sm:$0xff] %v8045_v56  ;;  %v9869_v42 = vpop.f32.mrb[32].mxu0 }
 0x59a   : > { %v7978_v61 = vadd.f32 %v9869_v42, %v13333_v25  ;;  %v7969_v0 = vpop.f32.mrb[33].mxu0 }
 0x59b   : > { %v7970_v39 = vadd.f32 %v7969_v0, %v13327_v49  ;;  %v9870_v34 = vpop.f32.mrb[34].mxu0 }
 0x59c   : > { %v8050_v50 = vmax.f32 %v7978_v61, 0.0  ;;  %v7981_v48 = vadd.f32 %v9870_v34, %v13335_v54  ;;  %v7972_v26 = vpop.f32.mrb[35].mxu0 }
 0x59d   : > { %v8048_v3 = vmax.f32 %v7970_v39, 0.0  ;;  %v7973_v52 = vadd.f32 %v7972_v26, %v13329_v53 }
 0x59e   : > { %8082 = vst [vmem:[%s13380_s16 + $0x90] sm:$0xff] %v8050_v50  ;;  %v8051_v38 = vmax.f32 %v7981_v48, 0.0 }
 0x59f   : > { %8080 = vst [vmem:[%s13380_s16 + $0x80] sm:$0xff] %v8048_v3  ;;  %v8049_v12 = vmax.f32 %v7973_v52, 0.0 }
 0x5a0   : > { %8083 = vst [vmem:[%s13380_s16 + $0x98] sm:$0xff] %v8051_v38 }
 0x5a1   : > { %8081 = vst [vmem:[%s13380_s16 + $0x88] sm:$0xff] %v8049_v12  ;;  %v9873_v25 = vpop.f32.mrb[36].mxu0 }
 0x5a2   : > { %v7994_v49 = vadd.f32 %v9873_v25, %v13345_v9  ;;  %v7985_v27 = vpop.f32.mrb[37].mxu0 }
 0x5a3   : > { %v7986_v54 = vadd.f32 %v7985_v27, %v13339_v10  ;;  %v9874_v21 = vpop.f32.mrb[38].mxu0 }
 0x5a4   : > { %v8054_v62 = vmax.f32 %v7994_v49, 0.0  ;;  %v7997_v53 = vadd.f32 %v9874_v21, %v13347_v4  ;;  %v7988_v1 = vpop.f32.mrb[39].mxu0 }
 0x5a5   : > { %v8052_v6 = vmax.f32 %v7986_v54, 0.0  ;;  %v7989_v37 = vadd.f32 %v7988_v1, %v13341_v32 }
 0x5a6   : > { %8086 = vst [vmem:[%s13380_s16 + $0xb0] sm:$0xff] %v8054_v62  ;;  %v8055_v45 = vmax.f32 %v7997_v53, 0.0 }
 0x5a7   : > { %8084 = vst [vmem:[%s13380_s16 + $0xa0] sm:$0xff] %v8052_v6  ;;  %v8053_v33 = vmax.f32 %v7989_v37, 0.0 }
 0x5a8   : > { %8087 = vst [vmem:[%s13380_s16 + $0xb8] sm:$0xff] %v8055_v45 }
 0x5a9   : > { %8085 = vst [vmem:[%s13380_s16 + $0xa8] sm:$0xff] %v8053_v33  ;;  %v9877_v9 = vpop.f32.mrb[40].mxu0 }
 0x5aa   : > { %v8010_v10 = vadd.f32 %v9877_v9, %v13357_v41  ;;  %v8001_v46 = vpop.f32.mrb[41].mxu0 }
 0x5ab   : > { %v8002_v4 = vadd.f32 %v8001_v46, %v13351_v22  ;;  %v9878_v36 = vpop.f32.mrb[42].mxu0 }
 0x5ac   : > { %v8058_v7 = vmax.f32 %v8010_v10, 0.0  ;;  %v8013_v32 = vadd.f32 %v9878_v36, %v13359_v29  ;;  %v8004_v15 = vpop.f32.mrb[43].mxu0 }
 0x5ad   : > { %v8056_v23 = vmax.f32 %v8002_v4, 0.0  ;;  %v8005_v63 = vadd.f32 %v8004_v15, %v13353_v2 }
 0x5ae   : > { %8090 = vst [vmem:[%s13380_s16 + $0xd0] sm:$0xff] %v8058_v7  ;;  %v8059_v44 = vmax.f32 %v8013_v32, 0.0 }
 0x5af   : > { %8088 = vst [vmem:[%s13380_s16 + $0xc0] sm:$0xff] %v8056_v23  ;;  %v8057_v58 = vmax.f32 %v8005_v63, 0.0 }
 0x5b0   : > { %8091 = vst [vmem:[%s13380_s16 + $0xd8] sm:$0xff] %v8059_v44 }
 0x5b1   : > { %8089 = vst [vmem:[%s13380_s16 + $0xc8] sm:$0xff] %v8057_v58  ;;  %v9881_v41 = vpop.f32.mrb[44].mxu0 }
 0x5b2   : > { %v8026_v22 = vadd.f32 %v9881_v41, %v13373_v31  ;;  %v8017_v20 = vpop.f32.mrb[45].mxu0 }
 0x5b3   : > { %v8018_v29 = vadd.f32 %v8017_v20, %v13363_v60  ;;  %v9882_v51 = vpop.f32.mrb[46].mxu0 }
 0x5b4   : > { %v8062_v2 = vmax.f32 %v8026_v22, 0.0  ;;  %v8029_v30 = vadd.f32 %v9882_v51, %v13377_v57  ;;  %v8020_v13 = vpop.f32.mrb[47].mxu0 }
 0x5b5   : > { %v8060_v5 = vmax.f32 %v8018_v29, 0.0  ;;  %v8021_v35 = vadd.f32 %v8020_v13, %v13365_v24 }
 0x5b6   : > { %8094 = vst [vmem:[%s13380_s16 + $0xf0] sm:$0xff] %v8062_v2  ;;  %v8063_v43 = vmax.f32 %v8029_v30, 0.0 }
 0x5b7   : > { %8092 = vst [vmem:[%s13380_s16 + $0xe0] sm:$0xff] %v8060_v5  ;;  %v8061_v60 = vmax.f32 %v8021_v35, 0.0 }
 0x5b8   : > { %8095 = vst [vmem:[%s13380_s16 + $0xf8] sm:$0xff] %v8063_v43 }
 0x5b9   : > { %8093 = vst [vmem:[%s13380_s16 + $0xe8] sm:$0xff] %v8061_v60 }
 0x5ba   : > { %10451 = shalt.err (!%p10448_p3)
}
 0x5bb   : > { %s10452_s22 = scalar_lea.hbm %s13444_s9, 4096  ;;  %s10456_s8 = scalar_lea.hbm %s13501_s7, 8192 }
 0x5bc   : > { %p10453_p4 = scmp.ne.s32.totalorder %s13444_s9, %s10452_s22  ;;  %p10457_p9 = scmp.lt.u32.totalorder %s13444_s9, %s13501_s7 }
 0x5bd   : > { %p10458_p10 = scmp.lt.u32.totalorder %s10456_s8, %s10452_s22  ;;  %p10460_p12 = scmp.lt.u32.totalorder %s10452_s22, %s13444_s9 }
 0x5be   : > { %p10454_p7 = pnand %p10453_p4, %p10585_p5 }
 0x5bf   : > { %p10459_p11 = por %p10458_p10, %p10457_p9 }
 0x5c0   : > { %p10455_p8 = pneg %p10454_p7 }
 0x5c1   : > { %p10461_p13 = por %p10460_p12, %p10459_p11 }
 0x5c3   : > { %p10462_p0 = pnand %p10461_p13, %p10455_p8 }
 0x5c5   : > { %10465 = shalt.err (!%p10462_p0)
}
 0x5c6   : > { %s10505_s18 = smov 128   ;;  %s10506_s19 = smov 8  }
 0x5c7   : > { %9891 = dma.vmem_to_hbm [thread:$0]  (%p10585_p5), %s13446_s13, 4096, %s13444_s9, %s13453_s28, %s10505_s18, %s10505_s18, %s10506_s19  }
 0x5c8 PF: > { %p9897_p1 = scmp.ge.s32.totalorder %s10500_s27, 2  ;;  %s8125_s20 = sand.u32 1, %s10488_s24  }
 0x5c9   : > { %s8126_s15 = scalar_lea.sflag [#allocation5], %s8125_s20 }
 0x5ca   : > { %p9894_p2 = pnand %p9897_p1, %p10589_p6 }
 0x5cc   : > { %10483 = dma.done.wait (!%p9894_p2), %s8126_s15, 4096  }
 0x5cd   : > { %10485 = vsyncadd (!%p9894_p2), %s8126_s15, 4294963200  ;;  %p17_p3 = scmp.ge.s32.totalorder %s10572_s30, 4   ;;  %s13546_s24 = smov %s10492_s25 }
 0x5ce   : > { %s13547_s25 = smov %s10496_s26  ;;  %s13548_s26 = smov %s10583_s10 }
 0x5cf   : > { %s13549_s27 = smov %s10572_s30  ;;  %19 = sbr.rel (!%p17_p3) target bundleno = 3 (0x3), region = 90 }
 0x5d6   :  { %8131 = vsyncpa [#allocation5], 1 }
 0x5d7   :  { %8133 = vsyncpa [#allocation5 + $0x1], 1 }

</bundles_post_ra>
